<compile_context>
chip_gen: v6e
topology: v6e:2x2x1
jax: 0.10.0
libtpu: 0.0.40
codegen_flags: <defaults>
</compile_context>

<pallas_src>
import jax
import jax.numpy as jnp
from jax.experimental import pallas as pl
from jax.experimental.pallas import tpu as pltpu

LANE = 128  # TPU lane width; channel dim is zero-padded to a multiple of this.


def _make_resnet_block_kernel(H, W, Cp):
    """Whole ResnetBlock for one batch element, fused into a single kernel body."""
    Hp = H + 2          # 1-px zero border top/bottom
    Wpa = W + 16        # sublane-aligned width: [0,8) left pad, [8,8+W) interior,
                        # [8+W, W+16) right pad (border cols are 7 and W+8)
    COL0 = 8            # interior column offset (multiple of 8 -> unmasked stores)
    HW = H * W
    TAPS = [(dy, dx) for dy in range(3) for dx in range(3)]

    def kernel(x_ref, w1_ref, w2_ref, s1_ref, b1_ref, s2_ref, b2_ref,
               out_ref, pad_s, acc_s):
        # x_ref   : (1, H, W, Cp)  f32   lane-dense input block
        # w*_ref  : (9, Cp, Cp)    bf16  per-tap conv weights (dy-major, dx-minor)
        # s*/b*   : (1, Cp)        f32   folded BN scale / bias
        # out_ref : (1, H, W, Cp)  f32
        # pad_s   : (Hp, Wpa, Cp)  bf16  zero-bordered activation scratch (reused)
        # acc_s   : (HW, Cp)       f32   matmul accumulator (reused for both convs)

        # Zero only the 1-px border (aligned 8-wide side blocks + top/bottom
        # rows).  Redone every grid step -> no reliance on scratch persistence
        # or on which TensorCore saw program_id == 0.
        zrow = jnp.zeros((1, Wpa, Cp), jnp.bfloat16)
        zcol = jnp.zeros((H, 8, Cp), jnp.bfloat16)
        pad_s[pl.ds(0, 1), :, :] = zrow
        pad_s[pl.ds(Hp - 1, 1), :, :] = zrow
        pad_s[pl.ds(1, H), pl.ds(0, 8), :] = zcol
        pad_s[pl.ds(1, H), pl.ds(W + COL0, 8), :] = zcol

        def conv3x3(w_ref):
            # 9 accumulating MXU matmuls; LHS is the shifted slice of pad_s read
            # directly (no im2col slab), RHS is the per-tap (Cp, Cp) weight.
            # The slice/relayout of tap t+1 overlaps the matmul of tap t.
            for t, (dy, dx) in enumerate(TAPS):
                lhs = pad_s[pl.ds(dy, H), pl.ds(COL0 - 1 + dx, W), :].reshape(HW, Cp)
                part = jax.lax.dot_general(
                    lhs, w_ref[t],
                    dimension_numbers=(((1,), (0,)), ((), ())),
                    preferred_element_type=jnp.float32)             # (HW, Cp) f32
                if t == 0:
                    acc_s[...] = part       # explicit re-init for this conv
                else:
                    acc_s[...] += part
            return acc_s[...]

        # Write the interior ONCE, cast to bf16 once (MXU operand dtype).
        pad_s[pl.ds(1, H), pl.ds(COL0, W), :] = x_ref[0].astype(jnp.bfloat16)

        # conv1 + folded BN1 + ReLU (epilogue in f32).
        h = conv3x3(w1_ref) * s1_ref[...] + b1_ref[...]
        h = jnp.maximum(h, 0.0)

        # Intermediate activation stays entirely in VMEM (no HBM round trip).
        pad_s[pl.ds(1, H), pl.ds(COL0, W), :] = h.reshape(H, W, Cp).astype(jnp.bfloat16)

        # conv2 + folded BN2 + residual; residual re-reads the resident input
        # block instead of keeping x live across both convs.
        y = conv3x3(w2_ref) * s2_ref[...] + b2_ref[...]
        out_ref[0] = (y.reshape(H, W, Cp) + x_ref[0]).astype(out_ref.dtype)

    return kernel


def _vmem_limit_bytes(H, W, Cp):
    """Advisory scoped-VMEM limit: only raised above the 32 MiB default when the
    buffer set needs it; capped at 56 MiB to keep headroom inside v7x's 64 MiB."""
    Hp, Wpa, HW = H + 2, W + 16, H * W
    act_f32 = H * W * Cp * 4
    est = (
        2 * act_f32                      # input block (double-buffered)
        + 2 * act_f32                    # output block (double-buffered)
        + 2 * 2 * 9 * Cp * Cp * 2        # two bf16 weight blocks (double-buffered)
        + 4 * 2 * Cp * 4                 # scale/bias blocks
        + Hp * Wpa * Cp * 2              # pad_s (bf16)
        + HW * Cp * 4                    # accumulator
    )
    est = int(est * 1.25) + (1 << 20)    # headroom for compiler scratch
    default = 32 * 1024 * 1024
    if est <= default:
        return None                      # default scoped limit is enough
    return min(est, 56 * 1024 * 1024)


def resnet_block_pallas(x_nhwc_p, w1f, w2f, s1, b1, s2, b2):
    """x_nhwc_p: (B, H, W, Cp) f32 with channels already zero-padded to Cp."""
    B, H, W, Cp = x_nhwc_p.shape
    kernel = _make_resnet_block_kernel(H, W, Cp)

    # NOTE: the weight/scale/bias blocks are grid-invariant (index_map -> (0,..));
    # single-buffering them (pl.Buffered(1)) would shave a little more VMEM but
    # is left out to keep the well-trodden default pipelining path.
    return pl.pallas_call(
        kernel,
        out_shape=jax.ShapeDtypeStruct((B, H, W, Cp), jnp.float32),
        grid=(B,),
        in_specs=[
            pl.BlockSpec((1, H, W, Cp), lambda b: (b, 0, 0, 0)),   # activations
            pl.BlockSpec((9, Cp, Cp), lambda b: (0, 0, 0)),        # w1 (grid-invariant)
            pl.BlockSpec((9, Cp, Cp), lambda b: (0, 0, 0)),        # w2
            pl.BlockSpec((1, Cp), lambda b: (0, 0)),               # scale1
            pl.BlockSpec((1, Cp), lambda b: (0, 0)),               # bias1
            pl.BlockSpec((1, Cp), lambda b: (0, 0)),               # scale2
            pl.BlockSpec((1, Cp), lambda b: (0, 0)),               # bias2
        ],
        out_specs=pl.BlockSpec((1, H, W, Cp), lambda b: (b, 0, 0, 0)),
        scratch_shapes=[
            pltpu.VMEM((H + 2, W + 16, Cp), jnp.bfloat16),  # padded activation scratch
            pltpu.VMEM((H * W, Cp), jnp.float32),           # conv accumulator
        ],
        compiler_params=pltpu.CompilerParams(
            dimension_semantics=("parallel",),
            vmem_limit_bytes=_vmem_limit_bytes(H, W, Cp)),
    )(x_nhwc_p, w1f, w2f, s1, b1, s2, b2)


def fold_bn(conv_bias, gamma, beta, running_mean, running_var, eps=1e-5):
    """Fold conv bias + BatchNorm (eval mode) into per-channel scale/bias."""
    scale = gamma / jnp.sqrt(running_var + eps)
    bias = beta + (conv_bias - running_mean) * scale
    return scale, bias


def prepare_params(w1, cb1, bn1, w2, cb2, bn2, eps=1e-5):
    """One-time prep: pad channels to a lane-dense multiple of 128, reshape conv
    weights to per-tap (9, Cp, Cp) bf16, fold conv-bias + BN into per-channel
    scale/bias (zero in the padded channels)."""
    C = w1.shape[-1]
    Cp = ((C + LANE - 1) // LANE) * LANE

    def pad_weight(w):  # (3,3,C,C) HWIO -> (9, Cp, Cp) bf16, tap-major
        wp = jnp.zeros((3, 3, Cp, Cp), jnp.float32).at[:, :, :C, :C].set(w)
        return wp.reshape(9, Cp, Cp).astype(jnp.bfloat16)

    def pad_vec(v):     # (C,) -> (1, Cp) f32
        return jnp.zeros((1, Cp), jnp.float32).at[0, :C].set(v)

    s1, b1 = fold_bn(cb1, *bn1, eps=eps)
    s2, b2 = fold_bn(cb2, *bn2, eps=eps)
    return (pad_weight(w1), pad_weight(w2),
            pad_vec(s1), pad_vec(b1), pad_vec(s2), pad_vec(b2))


@jax.jit
def resnet_block_forward_nhwc(x_nhwc, prepared):
    """Preferred entry point: NHWC in / NHWC out (no layout plumbing)."""
    w1f, w2f, s1, b1, s2, b2 = prepared
    C = x_nhwc.shape[-1]
    Cp = w1f.shape[-1]
    x_p = jnp.pad(x_nhwc, ((0, 0), (0, 0), (0, 0), (0, Cp - C)))
    out = resnet_block_pallas(x_p, w1f, w2f, s1, b1, s2, b2)
    return out[..., :C]


@jax.jit
def resnet_block_forward(x_nchw, prepared):
    """NCHW adapter matching the PyTorch module I/O. The NCHW<->NHWC transposes
    are pure layout plumbing; keep the surrounding model in NHWC and call
    resnet_block_forward_nhwc to avoid them."""
    x = jnp.transpose(x_nchw, (0, 2, 3, 1))
    out = resnet_block_forward_nhwc(x, prepared)
    return jnp.transpose(out, (0, 3, 1, 2))


def resnet_block_reference(x_nchw, raw_params, compute_dtype=jnp.float32):
    """Pure-JAX reference (lax.conv). compute_dtype=bf16 mirrors the kernel's MXU
    operand precision (f32 accumulation / f32 epilogue either way)."""
    w1, cb1, bn1, w2, cb2, bn2 = raw_params
    s1, b1 = fold_bn(cb1, *bn1)
    s2, b2 = fold_bn(cb2, *bn2)
    x = jnp.transpose(x_nchw, (0, 2, 3, 1))
    dn = jax.lax.conv_dimension_numbers(x.shape, w1.shape, ("NHWC", "HWIO", "NHWC"))

    def conv(t, w):
        return jax.lax.conv_general_dilated(
            t.astype(compute_dtype), w.astype(compute_dtype), (1, 1),
            ((1, 1), (1, 1)), dimension_numbers=dn,
            preferred_element_type=jnp.float32)

    h = jnp.maximum(conv(x, w1) * s1 + b1, 0.0)
    out = conv(h, w2) * s2 + b2 + x
    return jnp.transpose(out, (0, 3, 1, 2))


if __name__ == "__main__":
    B, C, H, W = 2, 4, 16, 16
    key = jax.random.PRNGKey(0)
    ks = jax.random.split(key, 11)

    # Conv weights stored HWIO (3, 3, Cin, Cout); equivalent to PyTorch OIHW transposed.
    fan_in = C * 3 * 3
    w1 = jax.random.uniform(ks[0], (3, 3, C, C), jnp.float32, -1.0, 1.0) / jnp.sqrt(fan_in)
    cb1 = jax.random.uniform(ks[1], (C,), jnp.float32, -0.1, 0.1)
    w2 = jax.random.uniform(ks[2], (3, 3, C, C), jnp.float32, -1.0, 1.0) / jnp.sqrt(fan_in)
    cb2 = jax.random.uniform(ks[3], (C,), jnp.float32, -0.1, 0.1)

    # BatchNorm params (eval mode): gamma, beta, running_mean, running_var (>0).
    g1 = 1.0 + 0.1 * jax.random.normal(ks[4], (C,), jnp.float32)
    be1 = 0.05 * jax.random.normal(ks[5], (C,), jnp.float32)
    m1 = 0.1 * jax.random.normal(ks[6], (C,), jnp.float32)
    v1 = 0.9 + 0.1 * jax.random.uniform(ks[7], (C,), jnp.float32)
    g2 = 1.0 + 0.1 * jax.random.normal(ks[8], (C,), jnp.float32)
    be2 = 0.05 * jax.random.normal(ks[9], (C,), jnp.float32)
    m2 = 0.1 * jax.random.normal(ks[10], (C,), jnp.float32)
    v2 = jnp.linspace(0.8, 1.2, C).astype(jnp.float32)

    bn1 = (g1, be1, m1, v1)
    bn2 = (g2, be2, m2, v2)
    prepared = prepare_params(w1, cb1, bn1, w2, cb2, bn2)

    x = jax.random.normal(jax.random.PRNGKey(42), (B, C, H, W), jnp.float32)

    out = jax.block_until_ready(resnet_block_forward(x, prepared))
    assert out.shape == (B, C, H, W)

    raw = (w1, cb1, bn1, w2, cb2, bn2)
    ref_bf16 = resnet_block_reference(x, raw, compute_dtype=jnp.bfloat16)
    ref_f32 = resnet_block_reference(x, raw, compute_dtype=jnp.float32)
    assert jnp.allclose(out, ref_bf16, atol=5e-3, rtol=5e-3), "mismatch vs bf16-matched reference"
    assert jnp.allclose(out, ref_f32, atol=3e-2, rtol=3e-2), "mismatch vs f32 reference"

    print("KERNEL_OK")
</pallas_src>

<mosaic_0001>
module attributes {stable_mosaic.version = 11 : i64} {
  func.func @kernel(%arg0: i32, %arg1: memref<1x16x16x128xf32, #tpu.memory_space<vmem>>, %arg2: memref<9x128x128xbf16, #tpu.memory_space<vmem>>, %arg3: memref<9x128x128xbf16, #tpu.memory_space<vmem>>, %arg4: memref<1x128xf32, #tpu.memory_space<vmem>>, %arg5: memref<1x128xf32, #tpu.memory_space<vmem>>, %arg6: memref<1x128xf32, #tpu.memory_space<vmem>>, %arg7: memref<1x128xf32, #tpu.memory_space<vmem>>, %arg8: memref<1x16x16x128xf32, #tpu.memory_space<vmem>>, %arg9: memref<18x32x128xbf16, #tpu.memory_space<vmem>>, %arg10: memref<256x128xf32, #tpu.memory_space<vmem>>) attributes {dimension_semantics = [#tpu.dimension_semantics<parallel>], iteration_bounds = array<i64: 2>, scalar_prefetch = 0 : i64, scratch_operands = 2 : i64, tpu.core_type = #tpu.core_type<tc>, window_params = [{transform_indices = @transform_0, window_bounds = array<i64: 1, 16, 16, 128>}, {pipeline_mode = #tpu.pipeline_mode<synchronous>, transform_indices = @transform_1, window_bounds = array<i64: 9, 128, 128>}, {pipeline_mode = #tpu.pipeline_mode<synchronous>, transform_indices = @transform_2, window_bounds = array<i64: 9, 128, 128>}, {pipeline_mode = #tpu.pipeline_mode<synchronous>, transform_indices = @transform_3, window_bounds = array<i64: 1, 128>}, {pipeline_mode = #tpu.pipeline_mode<synchronous>, transform_indices = @transform_4, window_bounds = array<i64: 1, 128>}, {pipeline_mode = #tpu.pipeline_mode<synchronous>, transform_indices = @transform_5, window_bounds = array<i64: 1, 128>}, {pipeline_mode = #tpu.pipeline_mode<synchronous>, transform_indices = @transform_6, window_bounds = array<i64: 1, 128>}, {transform_indices = @transform_7, window_bounds = array<i64: 1, 16, 16, 128>}]} {
    %cst = arith.constant 0.000000e+00 : bf16
    %0 = vector.broadcast %cst : bf16 to vector<1x32x128xbf16>
    %cst_0 = arith.constant 0.000000e+00 : bf16
    %1 = vector.broadcast %cst_0 : bf16 to vector<16x8x128xbf16>
    %c0 = arith.constant 0 : index
    %c0_1 = arith.constant 0 : index
    %c0_2 = arith.constant 0 : index
    %2 = vector.load %arg9[%c0, %c0_1, %c0_2] : memref<18x32x128xbf16, #tpu.memory_space<vmem>>, vector<1x32x128xbf16>
    tpu.vector_store %arg9[%c0, %c0_1, %c0_2], %0 {strides = array<i32>} : memref<18x32x128xbf16, #tpu.memory_space<vmem>>, vector<1x32x128xbf16>,
    %c17 = arith.constant 17 : index
    %c0_3 = arith.constant 0 : index
    %c0_4 = arith.constant 0 : index
    %3 = vector.load %arg9[%c17, %c0_3, %c0_4] : memref<18x32x128xbf16, #tpu.memory_space<vmem>>, vector<1x32x128xbf16>
    tpu.vector_store %arg9[%c17, %c0_3, %c0_4], %0 {strides = array<i32>} : memref<18x32x128xbf16, #tpu.memory_space<vmem>>, vector<1x32x128xbf16>,
    %c1 = arith.constant 1 : index
    %c0_5 = arith.constant 0 : index
    %c0_6 = arith.constant 0 : index
    %4 = vector.load %arg9[%c1, %c0_5, %c0_6] : memref<18x32x128xbf16, #tpu.memory_space<vmem>>, vector<16x8x128xbf16>
    tpu.vector_store %arg9[%c1, %c0_5, %c0_6], %1 {strides = array<i32>} : memref<18x32x128xbf16, #tpu.memory_space<vmem>>, vector<16x8x128xbf16>,
    %c1_7 = arith.constant 1 : index
    %c24 = arith.constant 24 : index
    %c0_8 = arith.constant 0 : index
    %5 = vector.load %arg9[%c1_7, %c24, %c0_8] : memref<18x32x128xbf16, #tpu.memory_space<vmem>>, vector<16x8x128xbf16>
    tpu.vector_store %arg9[%c1_7, %c24, %c0_8], %1 {strides = array<i32>} : memref<18x32x128xbf16, #tpu.memory_space<vmem>>, vector<16x8x128xbf16>,
    %c0_9 = arith.constant 0 : index
    %c0_10 = arith.constant 0 : index
    %c0_11 = arith.constant 0 : index
    %c0_12 = arith.constant 0 : index
    %6 = vector.load %arg1[%c0_9, %c0_10, %c0_11, %c0_12] : memref<1x16x16x128xf32, #tpu.memory_space<vmem>>, vector<1x16x16x128xf32>
    %7 = vector.shape_cast %6 : vector<1x16x16x128xf32> to vector<16x16x128xf32>
    %8 = arith.truncf %7 : vector<16x16x128xf32> to vector<16x16x128xbf16>
    %c1_13 = arith.constant 1 : index
    %c8 = arith.constant 8 : index
    %c0_14 = arith.constant 0 : index
    %9 = vector.load %arg9[%c1_13, %c8, %c0_14] : memref<18x32x128xbf16, #tpu.memory_space<vmem>>, vector<16x16x128xbf16>
    tpu.vector_store %arg9[%c1_13, %c8, %c0_14], %8 {strides = array<i32>} : memref<18x32x128xbf16, #tpu.memory_space<vmem>>, vector<16x16x128xbf16>,
    %c0_15 = arith.constant 0 : index
    %c7 = arith.constant 7 : index
    %c0_16 = arith.constant 0 : index
    %10 = vector.load %arg9[%c0_15, %c7, %c0_16] : memref<18x32x128xbf16, #tpu.memory_space<vmem>>, vector<16x16x128xbf16>
    %11 = vector.shape_cast %10 : vector<16x16x128xbf16> to vector<256x128xbf16>
    %c0_17 = arith.constant 0 : index
    %c0_18 = arith.constant 0 : index
    %c0_19 = arith.constant 0 : index
    %12 = vector.load %arg2[%c0_17, %c0_18, %c0_19] : memref<9x128x128xbf16, #tpu.memory_space<vmem>>, vector<1x128x128xbf16>
    %13 = vector.shape_cast %12 : vector<1x128x128xbf16> to vector<128x128xbf16>
    %cst_20 = arith.constant dense<0.000000e+00> : vector<256x128xf32>
    %14 = tpu.matmul %11, %13, %cst_20 {dimension_numbers = #tpu.dot_dimension_numbers<[1], [0], [0], [1], [0, 0, 1, 1], [], []>} : vector<256x128xbf16>, vector<128x128xbf16>, vector<256x128xf32> -> vector<256x128xf32>
    %c0_21 = arith.constant 0 : index
    %c0_22 = arith.constant 0 : index
    %15 = vector.load %arg10[%c0_21, %c0_22] : memref<256x128xf32, #tpu.memory_space<vmem>>, vector<256x128xf32>
    tpu.vector_store %arg10[%c0_21, %c0_22], %14 {strides = array<i32>} : memref<256x128xf32, #tpu.memory_space<vmem>>, vector<256x128xf32>,
    %c0_23 = arith.constant 0 : index
    %c8_24 = arith.constant 8 : index
    %c0_25 = arith.constant 0 : index
    %16 = vector.load %arg9[%c0_23, %c8_24, %c0_25] : memref<18x32x128xbf16, #tpu.memory_space<vmem>>, vector<16x16x128xbf16>
    %17 = vector.shape_cast %16 : vector<16x16x128xbf16> to vector<256x128xbf16>
    %c1_26 = arith.constant 1 : index
    %c0_27 = arith.constant 0 : index
    %c0_28 = arith.constant 0 : index
    %18 = vector.load %arg2[%c1_26, %c0_27, %c0_28] : memref<9x128x128xbf16, #tpu.memory_space<vmem>>, vector<1x128x128xbf16>
    %19 = vector.shape_cast %18 : vector<1x128x128xbf16> to vector<128x128xbf16>
    %cst_29 = arith.constant dense<0.000000e+00> : vector<256x128xf32>
    %20 = tpu.matmul %17, %19, %cst_29 {dimension_numbers = #tpu.dot_dimension_numbers<[1], [0], [0], [1], [0, 0, 1, 1], [], []>} : vector<256x128xbf16>, vector<128x128xbf16>, vector<256x128xf32> -> vector<256x128xf32>
    %c0_30 = arith.constant 0 : index
    %c0_31 = arith.constant 0 : index
    %21 = vector.load %arg10[%c0_30, %c0_31] : memref<256x128xf32, #tpu.memory_space<vmem>>, vector<256x128xf32>
    %22 = arith.addf %21, %20 : vector<256x128xf32>
    %c0_32 = arith.constant 0 : index
    %c0_33 = arith.constant 0 : index
    %23 = vector.load %arg10[%c0_32, %c0_33] : memref<256x128xf32, #tpu.memory_space<vmem>>, vector<256x128xf32>
    tpu.vector_store %arg10[%c0_32, %c0_33], %22 {strides = array<i32>} : memref<256x128xf32, #tpu.memory_space<vmem>>, vector<256x128xf32>,
    %c0_34 = arith.constant 0 : index
    %c9 = arith.constant 9 : index
    %c0_35 = arith.constant 0 : index
    %24 = vector.load %arg9[%c0_34, %c9, %c0_35] : memref<18x32x128xbf16, #tpu.memory_space<vmem>>, vector<16x16x128xbf16>
    %25 = vector.shape_cast %24 : vector<16x16x128xbf16> to vector<256x128xbf16>
    %c2 = arith.constant 2 : index
    %c0_36 = arith.constant 0 : index
    %c0_37 = arith.constant 0 : index
    %26 = vector.load %arg2[%c2, %c0_36, %c0_37] : memref<9x128x128xbf16, #tpu.memory_space<vmem>>, vector<1x128x128xbf16>
    %27 = vector.shape_cast %26 : vector<1x128x128xbf16> to vector<128x128xbf16>
    %cst_38 = arith.constant dense<0.000000e+00> : vector<256x128xf32>
    %28 = tpu.matmul %25, %27, %cst_38 {dimension_numbers = #tpu.dot_dimension_numbers<[1], [0], [0], [1], [0, 0, 1, 1], [], []>} : vector<256x128xbf16>, vector<128x128xbf16>, vector<256x128xf32> -> vector<256x128xf32>
    %c0_39 = arith.constant 0 : index
    %c0_40 = arith.constant 0 : index
    %29 = vector.load %arg10[%c0_39, %c0_40] : memref<256x128xf32, #tpu.memory_space<vmem>>, vector<256x128xf32>
    %30 = arith.addf %29, %28 : vector<256x128xf32>
    %c0_41 = arith.constant 0 : index
    %c0_42 = arith.constant 0 : index
    %31 = vector.load %arg10[%c0_41, %c0_42] : memref<256x128xf32, #tpu.memory_space<vmem>>, vector<256x128xf32>
    tpu.vector_store %arg10[%c0_41, %c0_42], %30 {strides = array<i32>} : memref<256x128xf32, #tpu.memory_space<vmem>>, vector<256x128xf32>,
    %c1_43 = arith.constant 1 : index
    %c7_44 = arith.constant 7 : index
    %c0_45 = arith.constant 0 : index
    %32 = vector.load %arg9[%c1_43, %c7_44, %c0_45] : memref<18x32x128xbf16, #tpu.memory_space<vmem>>, vector<16x16x128xbf16>
    %33 = vector.shape_cast %32 : vector<16x16x128xbf16> to vector<256x128xbf16>
    %c3 = arith.constant 3 : index
    %c0_46 = arith.constant 0 : index
    %c0_47 = arith.constant 0 : index
    %34 = vector.load %arg2[%c3, %c0_46, %c0_47] : memref<9x128x128xbf16, #tpu.memory_space<vmem>>, vector<1x128x128xbf16>
    %35 = vector.shape_cast %34 : vector<1x128x128xbf16> to vector<128x128xbf16>
    %cst_48 = arith.constant dense<0.000000e+00> : vector<256x128xf32>
    %36 = tpu.matmul %33, %35, %cst_48 {dimension_numbers = #tpu.dot_dimension_numbers<[1], [0], [0], [1], [0, 0, 1, 1], [], []>} : vector<256x128xbf16>, vector<128x128xbf16>, vector<256x128xf32> -> vector<256x128xf32>
    %c0_49 = arith.constant 0 : index
    %c0_50 = arith.constant 0 : index
    %37 = vector.load %arg10[%c0_49, %c0_50] : memref<256x128xf32, #tpu.memory_space<vmem>>, vector<256x128xf32>
    %38 = arith.addf %37, %36 : vector<256x128xf32>
    %c0_51 = arith.constant 0 : index
    %c0_52 = arith.constant 0 : index
    %39 = vector.load %arg10[%c0_51, %c0_52] : memref<256x128xf32, #tpu.memory_space<vmem>>, vector<256x128xf32>
    tpu.vector_store %arg10[%c0_51, %c0_52], %38 {strides = array<i32>} : memref<256x128xf32, #tpu.memory_space<vmem>>, vector<256x128xf32>,
    %c1_53 = arith.constant 1 : index
    %c8_54 = arith.constant 8 : index
    %c0_55 = arith.constant 0 : index
    %40 = vector.load %arg9[%c1_53, %c8_54, %c0_55] : memref<18x32x128xbf16, #tpu.memory_space<vmem>>, vector<16x16x128xbf16>
    %41 = vector.shape_cast %40 : vector<16x16x128xbf16> to vector<256x128xbf16>
    %c4 = arith.constant 4 : index
    %c0_56 = arith.constant 0 : index
    %c0_57 = arith.constant 0 : index
    %42 = vector.load %arg2[%c4, %c0_56, %c0_57] : memref<9x128x128xbf16, #tpu.memory_space<vmem>>, vector<1x128x128xbf16>
    %43 = vector.shape_cast %42 : vector<1x128x128xbf16> to vector<128x128xbf16>
    %cst_58 = arith.constant dense<0.000000e+00> : vector<256x128xf32>
    %44 = tpu.matmul %41, %43, %cst_58 {dimension_numbers = #tpu.dot_dimension_numbers<[1], [0], [0], [1], [0, 0, 1, 1], [], []>} : vector<256x128xbf16>, vector<128x128xbf16>, vector<256x128xf32> -> vector<256x128xf32>
    %c0_59 = arith.constant 0 : index
    %c0_60 = arith.constant 0 : index
    %45 = vector.load %arg10[%c0_59, %c0_60] : memref<256x128xf32, #tpu.memory_space<vmem>>, vector<256x128xf32>
    %46 = arith.addf %45, %44 : vector<256x128xf32>
    %c0_61 = arith.constant 0 : index
    %c0_62 = arith.constant 0 : index
    %47 = vector.load %arg10[%c0_61, %c0_62] : memref<256x128xf32, #tpu.memory_space<vmem>>, vector<256x128xf32>
    tpu.vector_store %arg10[%c0_61, %c0_62], %46 {strides = array<i32>} : memref<256x128xf32, #tpu.memory_space<vmem>>, vector<256x128xf32>,
    %c1_63 = arith.constant 1 : index
    %c9_64 = arith.constant 9 : index
    %c0_65 = arith.constant 0 : index
    %48 = vector.load %arg9[%c1_63, %c9_64, %c0_65] : memref<18x32x128xbf16, #tpu.memory_space<vmem>>, vector<16x16x128xbf16>
    %49 = vector.shape_cast %48 : vector<16x16x128xbf16> to vector<256x128xbf16>
    %c5 = arith.constant 5 : index
    %c0_66 = arith.constant 0 : index
    %c0_67 = arith.constant 0 : index
    %50 = vector.load %arg2[%c5, %c0_66, %c0_67] : memref<9x128x128xbf16, #tpu.memory_space<vmem>>, vector<1x128x128xbf16>
    %51 = vector.shape_cast %50 : vector<1x128x128xbf16> to vector<128x128xbf16>
    %cst_68 = arith.constant dense<0.000000e+00> : vector<256x128xf32>
    %52 = tpu.matmul %49, %51, %cst_68 {dimension_numbers = #tpu.dot_dimension_numbers<[1], [0], [0], [1], [0, 0, 1, 1], [], []>} : vector<256x128xbf16>, vector<128x128xbf16>, vector<256x128xf32> -> vector<256x128xf32>
    %c0_69 = arith.constant 0 : index
    %c0_70 = arith.constant 0 : index
    %53 = vector.load %arg10[%c0_69, %c0_70] : memref<256x128xf32, #tpu.memory_space<vmem>>, vector<256x128xf32>
    %54 = arith.addf %53, %52 : vector<256x128xf32>
    %c0_71 = arith.constant 0 : index
    %c0_72 = arith.constant 0 : index
    %55 = vector.load %arg10[%c0_71, %c0_72] : memref<256x128xf32, #tpu.memory_space<vmem>>, vector<256x128xf32>
    tpu.vector_store %arg10[%c0_71, %c0_72], %54 {strides = array<i32>} : memref<256x128xf32, #tpu.memory_space<vmem>>, vector<256x128xf32>,
    %c2_73 = arith.constant 2 : index
    %c7_74 = arith.constant 7 : index
    %c0_75 = arith.constant 0 : index
    %56 = vector.load %arg9[%c2_73, %c7_74, %c0_75] : memref<18x32x128xbf16, #tpu.memory_space<vmem>>, vector<16x16x128xbf16>
    %57 = vector.shape_cast %56 : vector<16x16x128xbf16> to vector<256x128xbf16>
    %c6 = arith.constant 6 : index
    %c0_76 = arith.constant 0 : index
    %c0_77 = arith.constant 0 : index
    %58 = vector.load %arg2[%c6, %c0_76, %c0_77] : memref<9x128x128xbf16, #tpu.memory_space<vmem>>, vector<1x128x128xbf16>
    %59 = vector.shape_cast %58 : vector<1x128x128xbf16> to vector<128x128xbf16>
    %cst_78 = arith.constant dense<0.000000e+00> : vector<256x128xf32>
    %60 = tpu.matmul %57, %59, %cst_78 {dimension_numbers = #tpu.dot_dimension_numbers<[1], [0], [0], [1], [0, 0, 1, 1], [], []>} : vector<256x128xbf16>, vector<128x128xbf16>, vector<256x128xf32> -> vector<256x128xf32>
    %c0_79 = arith.constant 0 : index
    %c0_80 = arith.constant 0 : index
    %61 = vector.load %arg10[%c0_79, %c0_80] : memref<256x128xf32, #tpu.memory_space<vmem>>, vector<256x128xf32>
    %62 = arith.addf %61, %60 : vector<256x128xf32>
    %c0_81 = arith.constant 0 : index
    %c0_82 = arith.constant 0 : index
    %63 = vector.load %arg10[%c0_81, %c0_82] : memref<256x128xf32, #tpu.memory_space<vmem>>, vector<256x128xf32>
    tpu.vector_store %arg10[%c0_81, %c0_82], %62 {strides = array<i32>} : memref<256x128xf32, #tpu.memory_space<vmem>>, vector<256x128xf32>,
    %c2_83 = arith.constant 2 : index
    %c8_84 = arith.constant 8 : index
    %c0_85 = arith.constant 0 : index
    %64 = vector.load %arg9[%c2_83, %c8_84, %c0_85] : memref<18x32x128xbf16, #tpu.memory_space<vmem>>, vector<16x16x128xbf16>
    %65 = vector.shape_cast %64 : vector<16x16x128xbf16> to vector<256x128xbf16>
    %c7_86 = arith.constant 7 : index
    %c0_87 = arith.constant 0 : index
    %c0_88 = arith.constant 0 : index
    %66 = vector.load %arg2[%c7_86, %c0_87, %c0_88] : memref<9x128x128xbf16, #tpu.memory_space<vmem>>, vector<1x128x128xbf16>
    %67 = vector.shape_cast %66 : vector<1x128x128xbf16> to vector<128x128xbf16>
    %cst_89 = arith.constant dense<0.000000e+00> : vector<256x128xf32>
    %68 = tpu.matmul %65, %67, %cst_89 {dimension_numbers = #tpu.dot_dimension_numbers<[1], [0], [0], [1], [0, 0, 1, 1], [], []>} : vector<256x128xbf16>, vector<128x128xbf16>, vector<256x128xf32> -> vector<256x128xf32>
    %c0_90 = arith.constant 0 : index
    %c0_91 = arith.constant 0 : index
    %69 = vector.load %arg10[%c0_90, %c0_91] : memref<256x128xf32, #tpu.memory_space<vmem>>, vector<256x128xf32>
    %70 = arith.addf %69, %68 : vector<256x128xf32>
    %c0_92 = arith.constant 0 : index
    %c0_93 = arith.constant 0 : index
    %71 = vector.load %arg10[%c0_92, %c0_93] : memref<256x128xf32, #tpu.memory_space<vmem>>, vector<256x128xf32>
    tpu.vector_store %arg10[%c0_92, %c0_93], %70 {strides = array<i32>} : memref<256x128xf32, #tpu.memory_space<vmem>>, vector<256x128xf32>,
    %c2_94 = arith.constant 2 : index
    %c9_95 = arith.constant 9 : index
    %c0_96 = arith.constant 0 : index
    %72 = vector.load %arg9[%c2_94, %c9_95, %c0_96] : memref<18x32x128xbf16, #tpu.memory_space<vmem>>, vector<16x16x128xbf16>
    %73 = vector.shape_cast %72 : vector<16x16x128xbf16> to vector<256x128xbf16>
    %c8_97 = arith.constant 8 : index
    %c0_98 = arith.constant 0 : index
    %c0_99 = arith.constant 0 : index
    %74 = vector.load %arg2[%c8_97, %c0_98, %c0_99] : memref<9x128x128xbf16, #tpu.memory_space<vmem>>, vector<1x128x128xbf16>
    %75 = vector.shape_cast %74 : vector<1x128x128xbf16> to vector<128x128xbf16>
    %cst_100 = arith.constant dense<0.000000e+00> : vector<256x128xf32>
    %76 = tpu.matmul %73, %75, %cst_100 {dimension_numbers = #tpu.dot_dimension_numbers<[1], [0], [0], [1], [0, 0, 1, 1], [], []>} : vector<256x128xbf16>, vector<128x128xbf16>, vector<256x128xf32> -> vector<256x128xf32>
    %c0_101 = arith.constant 0 : index
    %c0_102 = arith.constant 0 : index
    %77 = vector.load %arg10[%c0_101, %c0_102] : memref<256x128xf32, #tpu.memory_space<vmem>>, vector<256x128xf32>
    %78 = arith.addf %77, %76 : vector<256x128xf32>
    %c0_103 = arith.constant 0 : index
    %c0_104 = arith.constant 0 : index
    %79 = vector.load %arg10[%c0_103, %c0_104] : memref<256x128xf32, #tpu.memory_space<vmem>>, vector<256x128xf32>
    tpu.vector_store %arg10[%c0_103, %c0_104], %78 {strides = array<i32>} : memref<256x128xf32, #tpu.memory_space<vmem>>, vector<256x128xf32>,
    %c0_105 = arith.constant 0 : index
    %c0_106 = arith.constant 0 : index
    %80 = vector.load %arg10[%c0_105, %c0_106] : memref<256x128xf32, #tpu.memory_space<vmem>>, vector<256x128xf32>
    %c0_107 = arith.constant 0 : index
    %c0_108 = arith.constant 0 : index
    %81 = vector.load %arg4[%c0_107, %c0_108] : memref<1x128xf32, #tpu.memory_space<vmem>>, vector<1x128xf32>
    %82 = vector.broadcast %81 : vector<1x128xf32> to vector<256x128xf32>
    %83 = arith.mulf %80, %82 : vector<256x128xf32>
    %c0_109 = arith.constant 0 : index
    %c0_110 = arith.constant 0 : index
    %84 = vector.load %arg5[%c0_109, %c0_110] : memref<1x128xf32, #tpu.memory_space<vmem>>, vector<1x128xf32>
    %85 = vector.broadcast %84 : vector<1x128xf32> to vector<256x128xf32>
    %86 = arith.addf %83, %85 : vector<256x128xf32>
    %cst_111 = arith.constant 0.000000e+00 : f32
    %87 = vector.broadcast %cst_111 : f32 to vector<256x128xf32>
    %88 = arith.maximumf %86, %87 : vector<256x128xf32>
    %89 = vector.shape_cast %88 : vector<256x128xf32> to vector<16x16x128xf32>
    %90 = arith.truncf %89 : vector<16x16x128xf32> to vector<16x16x128xbf16>
    %c1_112 = arith.constant 1 : index
    %c8_113 = arith.constant 8 : index
    %c0_114 = arith.constant 0 : index
    %91 = vector.load %arg9[%c1_112, %c8_113, %c0_114] : memref<18x32x128xbf16, #tpu.memory_space<vmem>>, vector<16x16x128xbf16>
    tpu.vector_store %arg9[%c1_112, %c8_113, %c0_114], %90 {strides = array<i32>} : memref<18x32x128xbf16, #tpu.memory_space<vmem>>, vector<16x16x128xbf16>,
    %c0_115 = arith.constant 0 : index
    %c7_116 = arith.constant 7 : index
    %c0_117 = arith.constant 0 : index
    %92 = vector.load %arg9[%c0_115, %c7_116, %c0_117] : memref<18x32x128xbf16, #tpu.memory_space<vmem>>, vector<16x16x128xbf16>
    %93 = vector.shape_cast %92 : vector<16x16x128xbf16> to vector<256x128xbf16>
    %c0_118 = arith.constant 0 : index
    %c0_119 = arith.constant 0 : index
    %c0_120 = arith.constant 0 : index
    %94 = vector.load %arg3[%c0_118, %c0_119, %c0_120] : memref<9x128x128xbf16, #tpu.memory_space<vmem>>, vector<1x128x128xbf16>
    %95 = vector.shape_cast %94 : vector<1x128x128xbf16> to vector<128x128xbf16>
    %cst_121 = arith.constant dense<0.000000e+00> : vector<256x128xf32>
    %96 = tpu.matmul %93, %95, %cst_121 {dimension_numbers = #tpu.dot_dimension_numbers<[1], [0], [0], [1], [0, 0, 1, 1], [], []>} : vector<256x128xbf16>, vector<128x128xbf16>, vector<256x128xf32> -> vector<256x128xf32>
    %c0_122 = arith.constant 0 : index
    %c0_123 = arith.constant 0 : index
    %97 = vector.load %arg10[%c0_122, %c0_123] : memref<256x128xf32, #tpu.memory_space<vmem>>, vector<256x128xf32>
    tpu.vector_store %arg10[%c0_122, %c0_123], %96 {strides = array<i32>} : memref<256x128xf32, #tpu.memory_space<vmem>>, vector<256x128xf32>,
    %c0_124 = arith.constant 0 : index
    %c8_125 = arith.constant 8 : index
    %c0_126 = arith.constant 0 : index
    %98 = vector.load %arg9[%c0_124, %c8_125, %c0_126] : memref<18x32x128xbf16, #tpu.memory_space<vmem>>, vector<16x16x128xbf16>
    %99 = vector.shape_cast %98 : vector<16x16x128xbf16> to vector<256x128xbf16>
    %c1_127 = arith.constant 1 : index
    %c0_128 = arith.constant 0 : index
    %c0_129 = arith.constant 0 : index
    %100 = vector.load %arg3[%c1_127, %c0_128, %c0_129] : memref<9x128x128xbf16, #tpu.memory_space<vmem>>, vector<1x128x128xbf16>
    %101 = vector.shape_cast %100 : vector<1x128x128xbf16> to vector<128x128xbf16>
    %cst_130 = arith.constant dense<0.000000e+00> : vector<256x128xf32>
    %102 = tpu.matmul %99, %101, %cst_130 {dimension_numbers = #tpu.dot_dimension_numbers<[1], [0], [0], [1], [0, 0, 1, 1], [], []>} : vector<256x128xbf16>, vector<128x128xbf16>, vector<256x128xf32> -> vector<256x128xf32>
    %c0_131 = arith.constant 0 : index
    %c0_132 = arith.constant 0 : index
    %103 = vector.load %arg10[%c0_131, %c0_132] : memref<256x128xf32, #tpu.memory_space<vmem>>, vector<256x128xf32>
    %104 = arith.addf %103, %102 : vector<256x128xf32>
    %c0_133 = arith.constant 0 : index
    %c0_134 = arith.constant 0 : index
    %105 = vector.load %arg10[%c0_133, %c0_134] : memref<256x128xf32, #tpu.memory_space<vmem>>, vector<256x128xf32>
    tpu.vector_store %arg10[%c0_133, %c0_134], %104 {strides = array<i32>} : memref<256x128xf32, #tpu.memory_space<vmem>>, vector<256x128xf32>,
    %c0_135 = arith.constant 0 : index
    %c9_136 = arith.constant 9 : index
    %c0_137 = arith.constant 0 : index
    %106 = vector.load %arg9[%c0_135, %c9_136, %c0_137] : memref<18x32x128xbf16, #tpu.memory_space<vmem>>, vector<16x16x128xbf16>
    %107 = vector.shape_cast %106 : vector<16x16x128xbf16> to vector<256x128xbf16>
    %c2_138 = arith.constant 2 : index
    %c0_139 = arith.constant 0 : index
    %c0_140 = arith.constant 0 : index
    %108 = vector.load %arg3[%c2_138, %c0_139, %c0_140] : memref<9x128x128xbf16, #tpu.memory_space<vmem>>, vector<1x128x128xbf16>
    %109 = vector.shape_cast %108 : vector<1x128x128xbf16> to vector<128x128xbf16>
    %cst_141 = arith.constant dense<0.000000e+00> : vector<256x128xf32>
    %110 = tpu.matmul %107, %109, %cst_141 {dimension_numbers = #tpu.dot_dimension_numbers<[1], [0], [0], [1], [0, 0, 1, 1], [], []>} : vector<256x128xbf16>, vector<128x128xbf16>, vector<256x128xf32> -> vector<256x128xf32>
    %c0_142 = arith.constant 0 : index
    %c0_143 = arith.constant 0 : index
    %111 = vector.load %arg10[%c0_142, %c0_143] : memref<256x128xf32, #tpu.memory_space<vmem>>, vector<256x128xf32>
    %112 = arith.addf %111, %110 : vector<256x128xf32>
    %c0_144 = arith.constant 0 : index
    %c0_145 = arith.constant 0 : index
    %113 = vector.load %arg10[%c0_144, %c0_145] : memref<256x128xf32, #tpu.memory_space<vmem>>, vector<256x128xf32>
    tpu.vector_store %arg10[%c0_144, %c0_145], %112 {strides = array<i32>} : memref<256x128xf32, #tpu.memory_space<vmem>>, vector<256x128xf32>,
    %c1_146 = arith.constant 1 : index
    %c7_147 = arith.constant 7 : index
    %c0_148 = arith.constant 0 : index
    %114 = vector.load %arg9[%c1_146, %c7_147, %c0_148] : memref<18x32x128xbf16, #tpu.memory_space<vmem>>, vector<16x16x128xbf16>
    %115 = vector.shape_cast %114 : vector<16x16x128xbf16> to vector<256x128xbf16>
    %c3_149 = arith.constant 3 : index
    %c0_150 = arith.constant 0 : index
    %c0_151 = arith.constant 0 : index
    %116 = vector.load %arg3[%c3_149, %c0_150, %c0_151] : memref<9x128x128xbf16, #tpu.memory_space<vmem>>, vector<1x128x128xbf16>
    %117 = vector.shape_cast %116 : vector<1x128x128xbf16> to vector<128x128xbf16>
    %cst_152 = arith.constant dense<0.000000e+00> : vector<256x128xf32>
    %118 = tpu.matmul %115, %117, %cst_152 {dimension_numbers = #tpu.dot_dimension_numbers<[1], [0], [0], [1], [0, 0, 1, 1], [], []>} : vector<256x128xbf16>, vector<128x128xbf16>, vector<256x128xf32> -> vector<256x128xf32>
    %c0_153 = arith.constant 0 : index
    %c0_154 = arith.constant 0 : index
    %119 = vector.load %arg10[%c0_153, %c0_154] : memref<256x128xf32, #tpu.memory_space<vmem>>, vector<256x128xf32>
    %120 = arith.addf %119, %118 : vector<256x128xf32>
    %c0_155 = arith.constant 0 : index
    %c0_156 = arith.constant 0 : index
    %121 = vector.load %arg10[%c0_155, %c0_156] : memref<256x128xf32, #tpu.memory_space<vmem>>, vector<256x128xf32>
    tpu.vector_store %arg10[%c0_155, %c0_156], %120 {strides = array<i32>} : memref<256x128xf32, #tpu.memory_space<vmem>>, vector<256x128xf32>,
    %c1_157 = arith.constant 1 : index
    %c8_158 = arith.constant 8 : index
    %c0_159 = arith.constant 0 : index
    %122 = vector.load %arg9[%c1_157, %c8_158, %c0_159] : memref<18x32x128xbf16, #tpu.memory_space<vmem>>, vector<16x16x128xbf16>
    %123 = vector.shape_cast %122 : vector<16x16x128xbf16> to vector<256x128xbf16>
    %c4_160 = arith.constant 4 : index
    %c0_161 = arith.constant 0 : index
    %c0_162 = arith.constant 0 : index
    %124 = vector.load %arg3[%c4_160, %c0_161, %c0_162] : memref<9x128x128xbf16, #tpu.memory_space<vmem>>, vector<1x128x128xbf16>
    %125 = vector.shape_cast %124 : vector<1x128x128xbf16> to vector<128x128xbf16>
    %cst_163 = arith.constant dense<0.000000e+00> : vector<256x128xf32>
    %126 = tpu.matmul %123, %125, %cst_163 {dimension_numbers = #tpu.dot_dimension_numbers<[1], [0], [0], [1], [0, 0, 1, 1], [], []>} : vector<256x128xbf16>, vector<128x128xbf16>, vector<256x128xf32> -> vector<256x128xf32>
    %c0_164 = arith.constant 0 : index
    %c0_165 = arith.constant 0 : index
    %127 = vector.load %arg10[%c0_164, %c0_165] : memref<256x128xf32, #tpu.memory_space<vmem>>, vector<256x128xf32>
    %128 = arith.addf %127, %126 : vector<256x128xf32>
    %c0_166 = arith.constant 0 : index
    %c0_167 = arith.constant 0 : index
    %129 = vector.load %arg10[%c0_166, %c0_167] : memref<256x128xf32, #tpu.memory_space<vmem>>, vector<256x128xf32>
    tpu.vector_store %arg10[%c0_166, %c0_167], %128 {strides = array<i32>} : memref<256x128xf32, #tpu.memory_space<vmem>>, vector<256x128xf32>,
    %c1_168 = arith.constant 1 : index
    %c9_169 = arith.constant 9 : index
    %c0_170 = arith.constant 0 : index
    %130 = vector.load %arg9[%c1_168, %c9_169, %c0_170] : memref<18x32x128xbf16, #tpu.memory_space<vmem>>, vector<16x16x128xbf16>
    %131 = vector.shape_cast %130 : vector<16x16x128xbf16> to vector<256x128xbf16>
    %c5_171 = arith.constant 5 : index
    %c0_172 = arith.constant 0 : index
    %c0_173 = arith.constant 0 : index
    %132 = vector.load %arg3[%c5_171, %c0_172, %c0_173] : memref<9x128x128xbf16, #tpu.memory_space<vmem>>, vector<1x128x128xbf16>
    %133 = vector.shape_cast %132 : vector<1x128x128xbf16> to vector<128x128xbf16>
    %cst_174 = arith.constant dense<0.000000e+00> : vector<256x128xf32>
    %134 = tpu.matmul %131, %133, %cst_174 {dimension_numbers = #tpu.dot_dimension_numbers<[1], [0], [0], [1], [0, 0, 1, 1], [], []>} : vector<256x128xbf16>, vector<128x128xbf16>, vector<256x128xf32> -> vector<256x128xf32>
    %c0_175 = arith.constant 0 : index
    %c0_176 = arith.constant 0 : index
    %135 = vector.load %arg10[%c0_175, %c0_176] : memref<256x128xf32, #tpu.memory_space<vmem>>, vector<256x128xf32>
    %136 = arith.addf %135, %134 : vector<256x128xf32>
    %c0_177 = arith.constant 0 : index
    %c0_178 = arith.constant 0 : index
    %137 = vector.load %arg10[%c0_177, %c0_178] : memref<256x128xf32, #tpu.memory_space<vmem>>, vector<256x128xf32>
    tpu.vector_store %arg10[%c0_177, %c0_178], %136 {strides = array<i32>} : memref<256x128xf32, #tpu.memory_space<vmem>>, vector<256x128xf32>,
    %c2_179 = arith.constant 2 : index
    %c7_180 = arith.constant 7 : index
    %c0_181 = arith.constant 0 : index
    %138 = vector.load %arg9[%c2_179, %c7_180, %c0_181] : memref<18x32x128xbf16, #tpu.memory_space<vmem>>, vector<16x16x128xbf16>
    %139 = vector.shape_cast %138 : vector<16x16x128xbf16> to vector<256x128xbf16>
    %c6_182 = arith.constant 6 : index
    %c0_183 = arith.constant 0 : index
    %c0_184 = arith.constant 0 : index
    %140 = vector.load %arg3[%c6_182, %c0_183, %c0_184] : memref<9x128x128xbf16, #tpu.memory_space<vmem>>, vector<1x128x128xbf16>
    %141 = vector.shape_cast %140 : vector<1x128x128xbf16> to vector<128x128xbf16>
    %cst_185 = arith.constant dense<0.000000e+00> : vector<256x128xf32>
    %142 = tpu.matmul %139, %141, %cst_185 {dimension_numbers = #tpu.dot_dimension_numbers<[1], [0], [0], [1], [0, 0, 1, 1], [], []>} : vector<256x128xbf16>, vector<128x128xbf16>, vector<256x128xf32> -> vector<256x128xf32>
    %c0_186 = arith.constant 0 : index
    %c0_187 = arith.constant 0 : index
    %143 = vector.load %arg10[%c0_186, %c0_187] : memref<256x128xf32, #tpu.memory_space<vmem>>, vector<256x128xf32>
    %144 = arith.addf %143, %142 : vector<256x128xf32>
    %c0_188 = arith.constant 0 : index
    %c0_189 = arith.constant 0 : index
    %145 = vector.load %arg10[%c0_188, %c0_189] : memref<256x128xf32, #tpu.memory_space<vmem>>, vector<256x128xf32>
    tpu.vector_store %arg10[%c0_188, %c0_189], %144 {strides = array<i32>} : memref<256x128xf32, #tpu.memory_space<vmem>>, vector<256x128xf32>,
    %c2_190 = arith.constant 2 : index
    %c8_191 = arith.constant 8 : index
    %c0_192 = arith.constant 0 : index
    %146 = vector.load %arg9[%c2_190, %c8_191, %c0_192] : memref<18x32x128xbf16, #tpu.memory_space<vmem>>, vector<16x16x128xbf16>
    %147 = vector.shape_cast %146 : vector<16x16x128xbf16> to vector<256x128xbf16>
    %c7_193 = arith.constant 7 : index
    %c0_194 = arith.constant 0 : index
    %c0_195 = arith.constant 0 : index
    %148 = vector.load %arg3[%c7_193, %c0_194, %c0_195] : memref<9x128x128xbf16, #tpu.memory_space<vmem>>, vector<1x128x128xbf16>
    %149 = vector.shape_cast %148 : vector<1x128x128xbf16> to vector<128x128xbf16>
    %cst_196 = arith.constant dense<0.000000e+00> : vector<256x128xf32>
    %150 = tpu.matmul %147, %149, %cst_196 {dimension_numbers = #tpu.dot_dimension_numbers<[1], [0], [0], [1], [0, 0, 1, 1], [], []>} : vector<256x128xbf16>, vector<128x128xbf16>, vector<256x128xf32> -> vector<256x128xf32>
    %c0_197 = arith.constant 0 : index
    %c0_198 = arith.constant 0 : index
    %151 = vector.load %arg10[%c0_197, %c0_198] : memref<256x128xf32, #tpu.memory_space<vmem>>, vector<256x128xf32>
    %152 = arith.addf %151, %150 : vector<256x128xf32>
    %c0_199 = arith.constant 0 : index
    %c0_200 = arith.constant 0 : index
    %153 = vector.load %arg10[%c0_199, %c0_200] : memref<256x128xf32, #tpu.memory_space<vmem>>, vector<256x128xf32>
    tpu.vector_store %arg10[%c0_199, %c0_200], %152 {strides = array<i32>} : memref<256x128xf32, #tpu.memory_space<vmem>>, vector<256x128xf32>,
    %c2_201 = arith.constant 2 : index
    %c9_202 = arith.constant 9 : index
    %c0_203 = arith.constant 0 : index
    %154 = vector.load %arg9[%c2_201, %c9_202, %c0_203] : memref<18x32x128xbf16, #tpu.memory_space<vmem>>, vector<16x16x128xbf16>
    %155 = vector.shape_cast %154 : vector<16x16x128xbf16> to vector<256x128xbf16>
    %c8_204 = arith.constant 8 : index
    %c0_205 = arith.constant 0 : index
    %c0_206 = arith.constant 0 : index
    %156 = vector.load %arg3[%c8_204, %c0_205, %c0_206] : memref<9x128x128xbf16, #tpu.memory_space<vmem>>, vector<1x128x128xbf16>
    %157 = vector.shape_cast %156 : vector<1x128x128xbf16> to vector<128x128xbf16>
    %cst_207 = arith.constant dense<0.000000e+00> : vector<256x128xf32>
    %158 = tpu.matmul %155, %157, %cst_207 {dimension_numbers = #tpu.dot_dimension_numbers<[1], [0], [0], [1], [0, 0, 1, 1], [], []>} : vector<256x128xbf16>, vector<128x128xbf16>, vector<256x128xf32> -> vector<256x128xf32>
    %c0_208 = arith.constant 0 : index
    %c0_209 = arith.constant 0 : index
    %159 = vector.load %arg10[%c0_208, %c0_209] : memref<256x128xf32, #tpu.memory_space<vmem>>, vector<256x128xf32>
    %160 = arith.addf %159, %158 : vector<256x128xf32>
    %c0_210 = arith.constant 0 : index
    %c0_211 = arith.constant 0 : index
    %161 = vector.load %arg10[%c0_210, %c0_211] : memref<256x128xf32, #tpu.memory_space<vmem>>, vector<256x128xf32>
    tpu.vector_store %arg10[%c0_210, %c0_211], %160 {strides = array<i32>} : memref<256x128xf32, #tpu.memory_space<vmem>>, vector<256x128xf32>,
    %c0_212 = arith.constant 0 : index
    %c0_213 = arith.constant 0 : index
    %162 = vector.load %arg10[%c0_212, %c0_213] : memref<256x128xf32, #tpu.memory_space<vmem>>, vector<256x128xf32>
    %c0_214 = arith.constant 0 : index
    %c0_215 = arith.constant 0 : index
    %163 = vector.load %arg6[%c0_214, %c0_215] : memref<1x128xf32, #tpu.memory_space<vmem>>, vector<1x128xf32>
    %164 = vector.broadcast %163 : vector<1x128xf32> to vector<256x128xf32>
    %165 = arith.mulf %162, %164 : vector<256x128xf32>
    %c0_216 = arith.constant 0 : index
    %c0_217 = arith.constant 0 : index
    %166 = vector.load %arg7[%c0_216, %c0_217] : memref<1x128xf32, #tpu.memory_space<vmem>>, vector<1x128xf32>
    %167 = vector.broadcast %166 : vector<1x128xf32> to vector<256x128xf32>
    %168 = arith.addf %165, %167 : vector<256x128xf32>
    %169 = vector.shape_cast %168 : vector<256x128xf32> to vector<16x16x128xf32>
    %c0_218 = arith.constant 0 : index
    %c0_219 = arith.constant 0 : index
    %c0_220 = arith.constant 0 : index
    %c0_221 = arith.constant 0 : index
    %170 = vector.load %arg1[%c0_218, %c0_219, %c0_220, %c0_221] : memref<1x16x16x128xf32, #tpu.memory_space<vmem>>, vector<1x16x16x128xf32>
    %171 = vector.shape_cast %170 : vector<1x16x16x128xf32> to vector<16x16x128xf32>
    %172 = arith.addf %169, %171 : vector<16x16x128xf32>
    %c0_222 = arith.constant 0 : index
    %c0_223 = arith.constant 0 : index
    %c0_224 = arith.constant 0 : index
    %c0_225 = arith.constant 0 : index
    %173 = vector.load %arg8[%c0_222, %c0_223, %c0_224, %c0_225] : memref<1x16x16x128xf32, #tpu.memory_space<vmem>>, vector<1x16x16x128xf32>
    %174 = vector.shape_cast %173 : vector<1x16x16x128xf32> to vector<16x16x128xf32>
    %175 = vector.shape_cast %172 : vector<16x16x128xf32> to vector<1x16x16x128xf32>
    tpu.vector_store %arg8[%c0_222, %c0_223, %c0_224, %c0_225], %175 {strides = array<i32>} : memref<1x16x16x128xf32, #tpu.memory_space<vmem>>, vector<1x16x16x128xf32>,
    return
  }
  func.func @transform_0(%arg0: i32) -> (i32, i32, i32, i32) {
    %c0_i32 = arith.constant 0 : i32
    %c0_i32_0 = arith.constant 0 : i32
    %c0_i32_1 = arith.constant 0 : i32
    %c0_i32_2 = arith.constant 0 : i32
    return %arg0, %c0_i32, %c0_i32_0, %c0_i32_1 : i32, i32, i32, i32
  }
  func.func @transform_1(%arg0: i32) -> (i32, i32, i32) {
    %c0_i32 = arith.constant 0 : i32
    %c0_i32_0 = arith.constant 0 : i32
    %c0_i32_1 = arith.constant 0 : i32
    %c0_i32_2 = arith.constant 0 : i32
    return %c0_i32, %c0_i32_0, %c0_i32_1 : i32, i32, i32
  }
  func.func @transform_2(%arg0: i32) -> (i32, i32, i32) {
    %c0_i32 = arith.constant 0 : i32
    %c0_i32_0 = arith.constant 0 : i32
    %c0_i32_1 = arith.constant 0 : i32
    %c0_i32_2 = arith.constant 0 : i32
    return %c0_i32, %c0_i32_0, %c0_i32_1 : i32, i32, i32
  }
  func.func @transform_3(%arg0: i32) -> (i32, i32) {
    %c0_i32 = arith.constant 0 : i32
    %c0_i32_0 = arith.constant 0 : i32
    %c0_i32_1 = arith.constant 0 : i32
    return %c0_i32, %c0_i32_0 : i32, i32
  }
  func.func @transform_4(%arg0: i32) -> (i32, i32) {
    %c0_i32 = arith.constant 0 : i32
    %c0_i32_0 = arith.constant 0 : i32
    %c0_i32_1 = arith.constant 0 : i32
    return %c0_i32, %c0_i32_0 : i32, i32
  }
  func.func @transform_5(%arg0: i32) -> (i32, i32) {
    %c0_i32 = arith.constant 0 : i32
    %c0_i32_0 = arith.constant 0 : i32
    %c0_i32_1 = arith.constant 0 : i32
    return %c0_i32, %c0_i32_0 : i32, i32
  }
  func.func @transform_6(%arg0: i32) -> (i32, i32) {
    %c0_i32 = arith.constant 0 : i32
    %c0_i32_0 = arith.constant 0 : i32
    %c0_i32_1 = arith.constant 0 : i32
    return %c0_i32, %c0_i32_0 : i32, i32
  }
  func.func @transform_7(%arg0: i32) -> (i32, i32, i32, i32) {
    %c0_i32 = arith.constant 0 : i32
    %c0_i32_0 = arith.constant 0 : i32
    %c0_i32_1 = arith.constant 0 : i32
    %c0_i32_2 = arith.constant 0 : i32
    return %arg0, %c0_i32, %c0_i32_0, %c0_i32_1 : i32, i32, i32, i32
  }
}

</mosaic_0001>

<bundles_post_ra>
// kernel: resnet_block_forward_nhwc.1
= control target key start
LH: loop header
LB: loop body
LE: loop exit
PB: predicated region body
PF: predicated region fallthrough
CT: control target
= control target key end

     0   :  { %s15805_s24 = smov 0   ;;  %s19353_s0 = inlined_call_operand.vmem [shape: f32[2,16,16,128], index: 0, kind: input, shape index: {}]   ;;  %s19354_s1 = inlined_call_operand.vmem [shape: bf16[9,128,128], index: 1, kind: input, shape index: {}]   ;;  %s19355_s2 = inlined_call_operand.vmem [shape: bf16[9,128,128], index: 2, kind: input, shape index: {}]   ;;  %s19356_s3 = inlined_call_operand.vmem [shape: f32[1,128], index: 3, kind: input, shape index: {}]   ;;  %s19357_s4 = inlined_call_operand.vmem [shape: f32[1,128], index: 4, kind: input, shape index: {}]   ;;  %s19358_s5 = inlined_call_operand.vmem [shape: f32[1,128], index: 5, kind: input, shape index: {}]   ;;  %s19359_s6 = inlined_call_operand.vmem [shape: f32[1,128], index: 6, kind: input, shape index: {}]   ;;  %s19360_s7 = inlined_call_operand.vmem [shape: f32[2,16,16,128], index: 7, kind: output, shape index: {}]  }
   0x1 LB: > { %s13278_s25 = sadd.s32 4294967295, %s15762_s24   ;;  %p13282_p0 = scmp.ge.s32.totalorder %s15762_s24, 1  ;;  %s15762_s24 = sphi %s15805_s24, %s17_s24  }
   0x2   : > { %p237_p1 = scmp.lt.s32.totalorder %s15762_s24, 3 }
   0x4   : > { %p238_p2 = pnand %p13282_p0, %p237_p1 }
   0x6   : > { %241 = sbr.rel (%p238_p2) target bundleno = 1195 (0x4ab), region = 48 }
   0xb   : > { %v15512_v0 = vld [vmem:[%s19354_s1 + $0x38] sm:$0xff]   ;;  %v15764_v2 = vmov 0   ;;  %v15514_v3 = vld [vmem:[%s19354_s1 + $0x30] sm:$0xff]   ;;  %v15516_v5 = vld [vmem:[%s19354_s1 + $0x28] sm:$0xff]   ;;  %p269_p3 = scmp.lt.s32.totalorder %s13278_s25, 1  ;;  %v19371_v28 = vmov 0 }
   0xc   : > { %v15513_v1 = vld [vmem:[%s19354_s1 + $0x78] sm:$0xff]   ;;  %280 = vst [vmem:[#allocation2] sm:$0xf] %v15764_v2  ;;  %281 = vst [vmem:[#allocation2 + $0x4] sm:$0xf] %v15764_v2  ;;  %14639 = vmatprep.subr.bf16.mxu0 %v15512_v0  ;;  %v15515_v4 = vld [vmem:[%s19354_s1 + $0x70] sm:$0xff]  }
   0xd   : > { %282 = vst [vmem:[#allocation2 + $0x8] sm:$0xf] %v15764_v2  ;;  %283 = vst [vmem:[#allocation2 + $0xc] sm:$0xf] %v15764_v2  ;;  %14687 = vmatprep.subr.bf16.mxu1 %v15513_v1  ;;  %14640 = vmatpush3.bf16.msra.mxu0 %v15512_v0  ;;  %v15517_v6 = vld [vmem:[%s19354_s1 + $0x68] sm:$0xff]   ;;  %v15518_v7 = vld [vmem:[%s19354_s1 + $0x20] sm:$0xff]  }
   0xe   : > { %285 = vst [vmem:[#allocation2 + $0x110] sm:$0xf] %v15764_v2  ;;  %286 = vst [vmem:[#allocation2 + $0x114] sm:$0xf] %v15764_v2  ;;  %14688 = vmatpush3.bf16.msra.mxu1 %v15513_v1  ;;  %14641 = vmatprep.subr.bf16.mxu0 %v15514_v3  ;;  %v15519_v8 = vld [vmem:[%s19354_s1 + $0x60] sm:$0xff]   ;;  %s19726_s25 = smov (!%p269_p3, %s13278_s25), 1 }
   0xf   : > { %287 = vst [vmem:[#allocation2 + $0x118] sm:$0xf] %v15764_v2  ;;  %288 = vst [vmem:[#allocation2 + $0x11c] sm:$0xf] %v15764_v2  ;;  %14689 = vmatprep.subr.bf16.mxu1 %v15515_v4  ;;  %v15520_v9 = vld [vmem:[%s19354_s1 + $0x18] sm:$0xff]   ;;  %s14141_s23 = sshll.u32 %s19726_s25, 8 }
  0x10   : > { %290 = vst [vmem:[#allocation2 + $0x10] sm:$0xf] %v15764_v2  ;;  %291 = vst [vmem:[#allocation2 + $0x20] sm:$0xf] %v15764_v2  ;;  %v15521_v10 = vld [vmem:[%s19354_s1 + $0x58] sm:$0xff]   ;;  %v15522_v11 = vld [vmem:[%s19354_s1 + $0x10] sm:$0xff]   ;;  %s15861_s9 = scalar_lea.vmem %s19353_s0, %s14141_s23  ;;  %s19157_s27 = scalar_lea.vmem %s19360_s7, %s14141_s23 }
  0x11   : > { %292 = vst [vmem:[#allocation2 + $0x30] sm:$0xf] %v15764_v2  ;;  %293 = vst [vmem:[#allocation2 + $0x40] sm:$0xf] %v15764_v2  ;;  %14642 = vmatpush3.bf16.msra.mxu0 %v15514_v3  ;;  %v15523_v12 = vld [vmem:[%s19354_s1 + $0x50] sm:$0xff]   ;;  %v15524_v18 = vld [vmem:[%s19354_s1 + $0x8] sm:$0xff]  }
  0x12   : > { %294 = vst [vmem:[#allocation2 + $0x50] sm:$0xf] %v15764_v2  ;;  %295 = vst [vmem:[#allocation2 + $0x60] sm:$0xf] %v15764_v2  ;;  %14690 = vmatpush3.bf16.msra.mxu1 %v15515_v4  ;;  %14643 = vmatprep.subr.bf16.mxu0 %v15516_v5  ;;  %vm562_vm0 = vsmask.f32 256 }
  0x13   : > { %296 = vst [vmem:[#allocation2 + $0x70] sm:$0xf] %v15764_v2  ;;  %297 = vst [vmem:[#allocation2 + $0x80] sm:$0xf] %v15764_v2  ;;  %14691 = vmatprep.subr.bf16.mxu1 %v15517_v6  ;;  %v514_v13 = vld [vmem:[#allocation2] sm:$0x8] }
  0x14   : > { %298 = vst [vmem:[#allocation2 + $0x90] sm:$0xf] %v15764_v2  ;;  %299 = vst [vmem:[#allocation2 + $0xa0] sm:$0xf] %v15764_v2  ;;  %v515_v14 = vld [vmem:[#allocation2 + $0x4] sm:$0xf] }
  0x15   : > { %300 = vst [vmem:[#allocation2 + $0xb0] sm:$0xf] %v15764_v2  ;;  %301 = vst [vmem:[#allocation2 + $0xc0] sm:$0xf] %v15764_v2  ;;  %14644 = vmatpush3.bf16.msra.mxu0 %v15516_v5  ;;  %v516_v15 = vld [vmem:[#allocation2 + $0x8] sm:$0xf] }
  0x16   : > { %302 = vst [vmem:[#allocation2 + $0xd0] sm:$0xf] %v15764_v2  ;;  %303 = vst [vmem:[#allocation2 + $0xe0] sm:$0xf] %v15764_v2  ;;  %14692 = vmatpush3.bf16.msra.mxu1 %v15517_v6  ;;  %14645 = vmatprep.subr.bf16.mxu0 %v15518_v7  ;;  %vm563_vm1 = vsmask.f32 4368 }
  0x17   : > { %304 = vst [vmem:[#allocation2 + $0xf0] sm:$0xf] %v15764_v2  ;;  %305 = vst [vmem:[#allocation2 + $0x100] sm:$0xf] %v15764_v2  ;;  %14693 = vmatprep.subr.bf16.mxu1 %v15519_v8  ;;  %v566_v16 = vshrl.u32 %v514_v13, 16  ;;  %v571_v17 = vshrl.u32 %v515_v14, 16 }
  0x18   : > { %306 = vst [vmem:[#allocation2 + $0x1c] sm:$0xf] %v15764_v2  ;;  %307 = vst [vmem:[#allocation2 + $0x2c] sm:$0xf] %v15764_v2  ;;  %v574_v19 = vshll.u32 %v515_v14, 16  ;;  %v580_v20 = vshrl.u32 %v516_v15, 16 }
  0x19   : > { %308 = vst [vmem:[#allocation2 + $0x3c] sm:$0xf] %v15764_v2  ;;  %309 = vst [vmem:[#allocation2 + $0x4c] sm:$0xf] %v15764_v2  ;;  %14646 = vmatpush3.bf16.msra.mxu0 %v15518_v7  ;;  %v583_v21 = vshll.u32 %v516_v15, 16  ;;  %v15528_v22 = vld [vmem:[#allocation2 + $0x4] sm:$0xff]  }
  0x1a   : > { %310 = vst [vmem:[#allocation2 + $0x5c] sm:$0xf] %v15764_v2  ;;  %311 = vst [vmem:[#allocation2 + $0x6c] sm:$0xf] %v15764_v2  ;;  %14694 = vmatpush3.bf16.msra.mxu1 %v15519_v8  ;;  %14647 = vmatprep.subr.bf16.mxu0 %v15520_v9  ;;  %v15525_v23 = vld [vmem:[%s19354_s1 + $0x48] sm:$0xff]   ;;  %v13319_v24 = vrot.slane %v566_v16, 11 }
  0x1b   : > { %312 = vst [vmem:[#allocation2 + $0x7c] sm:$0xf] %v15764_v2  ;;  %313 = vst [vmem:[#allocation2 + $0x8c] sm:$0xf] %v15764_v2  ;;  %14695 = vmatprep.subr.bf16.mxu1 %v15521_v10  ;;  %v573_v25 = vrot.slane %v571_v17, 7  ;;  %v322_v26 = vld [vmem:[%s15861_s9] sm:$0xff]  ;;  %14703 = vmatprep.mubr.bf16.mxu1 %v15528_v22 }
  0x1c   : > { %314 = vst [vmem:[#allocation2 + $0x9c] sm:$0xf] %v15764_v2  ;;  %315 = vst [vmem:[#allocation2 + $0xac] sm:$0xf] %v15764_v2  ;;  %v323_v27 = vld [vmem:[%s15861_s9 + $0x8] sm:$0xff]  ;;  %v582_v29 = vrot.slane %v580_v20, 7  ;;  %v14143_v30 = vpack.c.bf16 %v322_v26, %v322_v26 }
  0x1d   : > { %316 = vst [vmem:[#allocation2 + $0xbc] sm:$0xf] %v15764_v2  ;;  %317 = vst [vmem:[#allocation2 + $0xcc] sm:$0xf] %v15764_v2  ;;  %14648 = vmatpush3.bf16.msra.mxu0 %v15520_v9  ;;  %v14144_v31 = vpack.c.bf16 %v323_v27, %v323_v27  ;;  %v517_v32 = vld [vmem:[#allocation2 + $0x10] sm:$0x8]  ;;  %v576_v33 = vor.u32 %v574_v19, %v573_v25 }
  0x1e   : > { %318 = vst [vmem:[#allocation2 + $0xdc] sm:$0xf] %v15764_v2  ;;  %319 = vst [vmem:[#allocation2 + $0xec] sm:$0xf] %v15764_v2  ;;  %14696 = vmatpush3.bf16.msra.mxu1 %v15521_v10  ;;  %14649 = vmatprep.subr.bf16.mxu0 %v15522_v11  ;;  %v578_v34 = vrot.slane %v573_v25, 4  ;;  %v324_v35 = vld [vmem:[%s15861_s9 + $0x10] sm:$0xff]  ;;  %v585_v37 = vor.u32 %v583_v21, %v582_v29 }
  0x1f   : > { %320 = vst [vmem:[#allocation2 + $0xfc] sm:$0xf] %v15764_v2  ;;  %321 = vst [vmem:[#allocation2 + $0x10c] sm:$0xf] %v15764_v2  ;;  %14697 = vmatprep.subr.bf16.mxu1 %v15523_v12  ;;  %v325_v36 = vld [vmem:[%s15861_s9 + $0x18] sm:$0xff]  ;;  %v588_v38 = vshrl.u32 %v517_v32, 16  ;;  %v14145_v39 = vpack.c.bf16 %v324_v35, %v324_v35 }
  0x20   : > { %vm15873_vm2 = vmor %vm562_vm0, %vm563_vm1  ;;  %482 = vst [vmem:[#allocation2 + $0x14] sm:$0xf] %v14143_v30  ;;  %v14146_v40 = vpack.c.bf16 %v325_v36, %v325_v36  ;;  %v520_v41 = vld [vmem:[#allocation2 + $0x20] sm:$0x8]  ;;  %v327_v43 = vld [vmem:[%s15861_s9 + $0x28] sm:$0xff] }
  0x21   : > { %v19372_v28 = vsel %vm15873_vm2, 4294967295, %v19371_v28  ;;  %483 = vst [vmem:[#allocation2 + $0x18] sm:$0xf] %v14144_v31  ;;  %v326_v42 = vld [vmem:[%s15861_s9 + $0x20] sm:$0xff]  ;;  %14650 = vmatpush3.bf16.msra.mxu0 %v15522_v11  ;;  %v577_v45 = vsel %vm15873_vm2, %v13319_v24, %v576_v33  ;;  %v523_v47 = vld [vmem:[#allocation2 + $0x30] sm:$0x8]  ;;  %v586_v49 = vsel %vm15873_vm2, %v578_v34, %v585_v37  ;;  %v14148_v51 = vpack.c.bf16 %v327_v43, %v327_v43 }
  0x22   : > { %19373 = vst [vmem:[#allocation4_spill] sm:$0xff] %v19372_v28  ;;  %v15526_v44 = vld [vmem:[%s19354_s1] sm:$0xff]   ;;  %v14147_v46 = vpack.c.bf16 %v326_v42, %v326_v42  ;;  %14698 = vmatpush3.bf16.msra.mxu1 %v15523_v12  ;;  %14651 = vmatprep.subr.bf16.mxu0 %v15524_v18  ;;  %484 = vst [vmem:[#allocation2 + $0x24] sm:$0xf] %v14145_v39  ;;  %v610_v50 = vshrl.u32 %v520_v41, 16  ;;  %v632_v52 = vshrl.u32 %v523_v47, 16 }
  0x23   : > { %v15527_v48 = vld [vmem:[%s19354_s1 + $0x40] sm:$0xff]   ;;  %485 = vst [vmem:[#allocation2 + $0x28] sm:$0xf] %v14146_v40  ;;  %v328_v53 = vld [vmem:[%s15861_s9 + $0x30] sm:$0xff]  ;;  %14699 = vmatprep.subr.bf16.mxu1 %v15525_v23  ;;  %v13335_v54 = vcombine.low %v577_v45, %v586_v49  ;;  %v329_v55 = vld [vmem:[%s15861_s9 + $0x38] sm:$0xff]  ;;  %v15894_v59 = vrot.slane %v588_v38, 11 }
  0x24   : > { %486 = vst [vmem:[#allocation2 + $0x34] sm:$0xf] %v14147_v46  ;;  %v14149_v56 = vpack.c.bf16 %v328_v53, %v328_v53  ;;  %v526_v57 = vld [vmem:[#allocation2 + $0x40] sm:$0x8]  ;;  %487 = vst [vmem:[#allocation2 + $0x38] sm:$0xf] %v14148_v51  ;;  %v14150_v60 = vpack.c.bf16 %v329_v55, %v329_v55 }
  0x25   : > { %v330_v58 = vld [vmem:[%s15861_s9 + $0x40] sm:$0xff]  ;;  %v331_v61 = vld [vmem:[%s15861_s9 + $0x48] sm:$0xff]  ;;  %v529_v63 = vld [vmem:[#allocation2 + $0x50] sm:$0x8]  ;;  %14652 = vmatpush3.bf16.msra.mxu0 %v15524_v18  ;;  %14655 = vmatprep.mubr.bf16.mxu0 %v13335_v54  ;;  %v654_v0 = vshrl.u32 %v526_v57, 16  ;;  %v15903_v4 = vrot.slane %v610_v50, 11 }
  0x26   : > { %v14151_v62 = vpack.c.bf16 %v330_v58, %v330_v58  ;;  %488 = vst [vmem:[#allocation2 + $0x44] sm:$0xf] %v14149_v56  ;;  %v14152_v1 = vpack.c.bf16 %v331_v61, %v331_v61  ;;  %v332_v2 = vld [vmem:[%s15861_s9 + $0x50] sm:$0xff]  ;;  %14700 = vmatpush3.bf16.msra.mxu1 %v15525_v23  ;;  %14653 = vmatprep.subr.bf16.mxu0 %v15526_v44  ;;  %v15901_v3 = vld [vmem:[%s19354_s1 + $0xb8] sm:$0xff]   ;;  %v15905_v5 = vrot.slane %v632_v52, 11  ;;  %v676_v6 = vshrl.u32 %v529_v63, 16 }
  0x27   : > { %489 = vst [vmem:[#allocation2 + $0x48] sm:$0xf] %v14150_v60  ;;  %v333_v7 = vld [vmem:[%s15861_s9 + $0x58] sm:$0xff]  ;;  %v14153_v8 = vpack.c.bf16 %v332_v2, %v332_v2  ;;  %v334_v9 = vld [vmem:[%s15861_s9 + $0x60] sm:$0xff]  ;;  %14701 = vmatprep.subr.bf16.mxu1 %v15527_v48  ;;  %v518_v10 = vld [vmem:[#allocation2 + $0x14] sm:$0xf] }
  0x28   : > { %490 = vst [vmem:[#allocation2 + $0x54] sm:$0xf] %v14151_v62  ;;  %v519_v11 = vld [vmem:[#allocation2 + $0x18] sm:$0xf]  ;;  %491 = vst [vmem:[#allocation2 + $0x58] sm:$0xf] %v14152_v1  ;;  %v14154_v12 = vpack.c.bf16 %v333_v7, %v333_v7  ;;  %v14155_v13 = vpack.c.bf16 %v334_v9, %v334_v9 }
  0x29   : > { %v593_v14 = vshrl.u32 %v518_v10, 16  ;;  %v596_v15 = vshll.u32 %v518_v10, 16  ;;  %v602_v16 = vshrl.u32 %v519_v11, 16  ;;  %v605_v17 = vshll.u32 %v519_v11, 16  ;;  %492 = vst [vmem:[#allocation2 + $0x64] sm:$0xf] %v14153_v8  ;;  %14654 = vmatpush3.bf16.msra.mxu0 %v15526_v44 }
  0x2a   : > { %v15529_v18 = vld [vmem:[#allocation2 + $0x14] sm:$0xff]   ;;  %v521_v19 = vld [vmem:[#allocation2 + $0x24] sm:$0xf]  ;;  %v522_v20 = vld [vmem:[#allocation2 + $0x28] sm:$0xf]  ;;  %v15909_v21 = vrot.slane %v654_v0, 11  ;;  %14702 = vmatpush3.bf16.msra.mxu1 %v15527_v48  ;;  %14735 = vmatprep.subr.bf16.mxu0 %v15901_v3 }
  0x2b   : > { %493 = vst [vmem:[#allocation2 + $0x68] sm:$0xf] %v14154_v12  ;;  %494 = vst [vmem:[#allocation2 + $0x74] sm:$0xf] %v14155_v13  ;;  %v595_v22 = vrot.slane %v593_v14, 7  ;;  %v604_v23 = vrot.slane %v602_v16, 7 }
  0x2c   : > { %v615_v24 = vshrl.u32 %v521_v19, 16  ;;  %v618_v25 = vshll.u32 %v521_v19, 16  ;;  %v624_v26 = vshrl.u32 %v522_v20, 16  ;;  %v627_v27 = vshll.u32 %v522_v20, 16  ;;  %v15531_v29 = vld [vmem:[#allocation2 + $0x24] sm:$0xff]   ;;  %v15533_v45 = vld [vmem:[%s19354_s1 + $0xb0] sm:$0xff]  }
  0x2d   : > { %v15912_v30 = vrot.slane %v676_v6, 11  ;;  %v598_v31 = vor.u32 %v596_v15, %v595_v22  ;;  %v600_v32 = vrot.slane %v595_v22, 4  ;;  %v607_v33 = vor.u32 %v605_v17, %v604_v23  ;;  %v524_v35 = vld [vmem:[#allocation2 + $0x34] sm:$0xf]  ;;  %v525_v36 = vld [vmem:[#allocation2 + $0x38] sm:$0xf]  ;;  %14704 = vmatmul.mubr.bf16.vlgmr.msra.gmra.mxu1 %v15529_v18 }
  0x2e   : > { %v617_v34 = vrot.slane %v615_v24, 7  ;;  %v626_v37 = vrot.slane %v624_v26, 7  ;;  %v637_v38 = vshrl.u32 %v524_v35, 16  ;;  %v640_v39 = vshll.u32 %v524_v35, 16  ;;  %14707 = vmatprep.mubr.bf16.mxu1 %v15531_v29  ;;  %v527_v46 = vld [vmem:[#allocation2 + $0x44] sm:$0xf] }
  0x2f   : > { %v646_v40 = vshrl.u32 %v525_v36, 16  ;;  %v599_v41 = vsel %vm15873_vm2, %v15894_v59, %v598_v31  ;;  %v608_v42 = vsel %vm15873_vm2, %v600_v32, %v607_v33  ;;  %v15532_v51 = vld [vmem:[#allocation2 + $0x34] sm:$0xff]   ;;  %v528_v52 = vld [vmem:[#allocation2 + $0x48] sm:$0xf]  ;;  %v649_v54 = vshll.u32 %v525_v36, 16 }
  0x30   : > { %v620_v43 = vor.u32 %v618_v25, %v617_v34  ;;  %v622_v44 = vrot.slane %v617_v34, 4  ;;  %v13336_v47 = vcombine.low %v599_v41, %v608_v42  ;;  %v629_v48 = vor.u32 %v627_v27, %v626_v37  ;;  %v15534_v57 = vld [vmem:[#allocation2 + $0x44] sm:$0xff]   ;;  %v530_v62 = vld [vmem:[#allocation2 + $0x54] sm:$0xf]  ;;  %v531_v63 = vld [vmem:[#allocation2 + $0x58] sm:$0xf] }
  0x31   : > { %v639_v49 = vrot.slane %v637_v38, 7  ;;  %v648_v50 = vrot.slane %v646_v40, 7  ;;  %v659_v55 = vshrl.u32 %v527_v46, 16  ;;  %v662_v56 = vshll.u32 %v527_v46, 16  ;;  %v532_v0 = vld [vmem:[#allocation2 + $0x60] sm:$0x8] }
  0x32   : > { %v621_v53 = vsel %vm15873_vm2, %v15903_v4, %v620_v43  ;;  %14656 = vmatmul.mubr.bf16.vlgmr.msra.gmra.mxu0 %v13336_v47  ;;  %v630_v58 = vsel %vm15873_vm2, %v622_v44, %v629_v48  ;;  %v668_v61 = vshrl.u32 %v528_v52, 16  ;;  %v671_v4 = vshll.u32 %v528_v52, 16  ;;  %v15536_v11 = vld [vmem:[%s19354_s1 + $0xa8] sm:$0xff]   ;;  %v533_v12 = vld [vmem:[#allocation2 + $0x64] sm:$0xf]  ;;  %v15535_v33 = vld [vmem:[#allocation2 + $0x54] sm:$0xff]  }
  0x33   : > { %v642_v59 = vor.u32 %v640_v39, %v639_v49  ;;  %v644_v60 = vrot.slane %v639_v49, 4  ;;  %14736 = vmatpush3.bf16.msra.mxu0 %v15901_v3  ;;  %v13337_v1 = vcombine.low %v621_v53, %v630_v58  ;;  %v651_v2 = vor.u32 %v649_v54, %v648_v50  ;;  %v534_v16 = vld [vmem:[#allocation2 + $0x68] sm:$0xf]  ;;  %v535_v26 = vld [vmem:[#allocation2 + $0x70] sm:$0x8]  ;;  %v15539_v27 = vld [vmem:[%s19354_s1 + $0xa0] sm:$0xff]  }
  0x34   : > { %v661_v6 = vrot.slane %v659_v55, 7  ;;  %14737 = vmatprep.subr.bf16.mxu0 %v15533_v45  ;;  %v670_v8 = vrot.slane %v668_v61, 7  ;;  %v681_v9 = vshrl.u32 %v530_v62, 16  ;;  %v684_v10 = vshll.u32 %v530_v62, 16  ;;  %v335_v20 = vld [vmem:[%s15861_s9 + $0x68] sm:$0xff]  ;;  %v336_v44 = vld [vmem:[%s15861_s9 + $0x70] sm:$0xff] }
  0x35   : > { %v643_v7 = vsel %vm15873_vm2, %v15905_v5, %v642_v59  ;;  %14659 = vmatprep.mubr.bf16.mxu0 %v13337_v1  ;;  %v652_v3 = vsel %vm15873_vm2, %v644_v60, %v651_v2  ;;  %v690_v15 = vshrl.u32 %v531_v63, 16  ;;  %14708 = vmatmul.mubr.bf16.gmra.mxu1 %v15532_v51  ;;  %v693_v19 = vshll.u32 %v531_v63, 16  ;;  %v15537_v39 = vld [vmem:[#allocation2 + $0x64] sm:$0xff]   ;;  %v538_v46 = vld [vmem:[#allocation2 + $0x80] sm:$0x8]  ;;  %v15542_v55 = vld [vmem:[%s19354_s1 + $0x98] sm:$0xff]  }
  0x36   : > { %v664_v13 = vor.u32 %v662_v56, %v661_v6  ;;  %v666_v14 = vrot.slane %v661_v6, 4  ;;  %v13338_v17 = vcombine.low %v643_v7, %v652_v3  ;;  %v673_v5 = vor.u32 %v671_v4, %v670_v8  ;;  %14711 = vmatprep.mubr.bf16.mxu1 %v15534_v57  ;;  %v338_v51 = vld [vmem:[%s15861_s9 + $0x80] sm:$0xff]  ;;  %v339_v52 = vld [vmem:[%s15861_s9 + $0x88] sm:$0xff]  ;;  %v541_v53 = vld [vmem:[#allocation2 + $0x90] sm:$0x8] }
  0x37   : > { %v683_v18 = vrot.slane %v681_v9, 7  ;;  %14738 = vmatpush3.bf16.msra.mxu0 %v15533_v45  ;;  %v692_v23 = vrot.slane %v690_v15, 7  ;;  %v698_v24 = vshrl.u32 %v532_v0, 16  ;;  %v703_v25 = vshrl.u32 %v533_v12, 16  ;;  %v337_v45 = vld [vmem:[%s15861_s9 + $0x78] sm:$0xff]  ;;  %v15544_v61 = vld [vmem:[%s19354_s1 + $0xf0] sm:$0xff]  }
  0x38   : > { %v665_v22 = vsel %vm15873_vm2, %v15909_v21, %v664_v13  ;;  %v674_v29 = vsel %vm15873_vm2, %v666_v14, %v673_v5  ;;  %14739 = vmatprep.subr.bf16.mxu0 %v15536_v11  ;;  %v706_v34 = vshll.u32 %v533_v12, 16  ;;  %v15945_v21 = vld [vmem:[#allocation2 + $0x74] sm:$0xf]  ;;  %v712_v41 = vshrl.u32 %v534_v16, 16  ;;  %v15543_v56 = vld [vmem:[%s19354_s1 + $0xf8] sm:$0xff]   ;;  %v342_v12 = vld [vmem:[%s15861_s9 + $0xa0] sm:$0xff] }
  0x39   : > { %v686_v31 = vor.u32 %v684_v10, %v683_v18  ;;  %v688_v32 = vrot.slane %v683_v18, 4  ;;  %v13339_v35 = vcombine.low %v665_v22, %v674_v29  ;;  %v695_v36 = vor.u32 %v693_v19, %v692_v23  ;;  %14783 = vmatprep.subr.bf16.mxu1 %v15543_v56  ;;  %v340_v4 = vld [vmem:[%s15861_s9 + $0x90] sm:$0xff]  ;;  %v341_v7 = vld [vmem:[%s15861_s9 + $0x98] sm:$0xff]  ;;  %v343_v3 = vld [vmem:[%s15861_s9 + $0xa8] sm:$0xff] }
  0x3a   : > { %v13325_v37 = vrot.slane %v698_v24, 11  ;;  %v705_v38 = vrot.slane %v703_v25, 7  ;;  %14660 = vmatmul.mubr.bf16.gmra.mxu0 %v13338_v17  ;;  %v715_v42 = vshll.u32 %v534_v16, 16  ;;  %v14156_v43 = vpack.c.bf16 %v335_v20, %v335_v20  ;;  %14784 = vmatpush3.bf16.msra.mxu1 %v15543_v56  ;;  %v15980_v17 = vld [vmem:[#allocation2 + $0xb0] sm:$0x8]  ;;  %v15548_v22 = vld [vmem:[%s19354_s1 + $0xe8] sm:$0xff]  }
  0x3b   : > { %v687_v40 = vsel %vm15873_vm2, %v15912_v30, %v686_v31  ;;  %14663 = vmatprep.mubr.bf16.mxu0 %v13339_v35  ;;  %v696_v47 = vsel %vm15873_vm2, %v688_v32, %v695_v36  ;;  %14740 = vmatpush3.bf16.msra.mxu0 %v15536_v11  ;;  %v720_v50 = vshrl.u32 %v535_v26, 16  ;;  %v714_v54 = vrot.slane %v712_v41, 7  ;;  %v544_v11 = vld [vmem:[#allocation2 + $0xa0] sm:$0x8]  ;;  %v15547_v5 = vld [vmem:[%s19354_s1 + $0x90] sm:$0xff]  }
  0x3c   : > { %v708_v48 = vor.u32 %v706_v34, %v705_v38  ;;  %v710_v49 = vrot.slane %v705_v38, 4  ;;  %495 = vst [vmem:[#allocation2 + $0x78] sm:$0xf] %v14156_v43  ;;  %v725_v30 = vshrl.u32 %v15945_v21, 16  ;;  %14741 = vmatprep.subr.bf16.mxu0 %v15539_v27  ;;  %v13340_v57 = vcombine.low %v687_v40, %v696_v47  ;;  %14785 = vmatprep.subr.bf16.mxu1 %v15544_v61  ;;  %v15549_v32 = vld [vmem:[%s19354_s1 + $0xe0] sm:$0xff]   ;;  %v344_v34 = vld [vmem:[%s15861_s9 + $0xb0] sm:$0xff] }
  0x3d   : > { %v14157_v59 = vpack.c.bf16 %v336_v44, %v336_v44  ;;  %v14158_v60 = vpack.c.bf16 %v337_v45, %v337_v45  ;;  %14712 = vmatmul.mubr.bf16.gmra.mxu1 %v15535_v33  ;;  %v717_v62 = vor.u32 %v715_v42, %v714_v54  ;;  %v742_v0 = vshrl.u32 %v538_v46, 16 }
  0x3e   : > { %v709_v58 = vsel %vm15873_vm2, %v13325_v37, %v708_v48  ;;  %v15968_v63 = vrot.slane %v725_v30, 7  ;;  %v14159_v1 = vpack.c.bf16 %v338_v51, %v338_v51  ;;  %14715 = vmatprep.mubr.bf16.mxu1 %v15537_v39  ;;  %v14160_v2 = vpack.c.bf16 %v339_v52, %v339_v52  ;;  %14786 = vmatpush3.bf16.msra.mxu1 %v15544_v61 }
  0x3f   : > { %14742 = vmatpush3.bf16.msra.mxu0 %v15539_v27  ;;  %496 = vst [vmem:[#allocation2 + $0x84] sm:$0xf] %v14157_v59  ;;  %497 = vst [vmem:[#allocation2 + $0x88] sm:$0xf] %v14158_v60  ;;  %v764_v6 = vshrl.u32 %v541_v53, 16  ;;  %v718_v8 = vsel %vm15873_vm2, %v710_v49, %v717_v62  ;;  %v15974_v9 = vrot.slane %v720_v50, 11  ;;  %v14161_v15 = vpack.c.bf16 %v340_v4, %v340_v4 }
  0x40   : > { %v728_v10 = vshll.u32 %v15945_v21, 16  ;;  %498 = vst [vmem:[#allocation2 + $0x94] sm:$0xf] %v14159_v1  ;;  %14743 = vmatprep.subr.bf16.mxu0 %v15542_v55  ;;  %v13341_v13 = vcombine.low %v709_v58, %v718_v8  ;;  %v732_v14 = vrot.slane %v15968_v63, 4  ;;  %499 = vst [vmem:[#allocation2 + $0x98] sm:$0xf] %v14160_v2  ;;  %v14162_v16 = vpack.c.bf16 %v341_v7, %v341_v7 }
  0x41   : > { %v15985_v18 = vrot.slane %v742_v0, 11  ;;  %v14163_v19 = vpack.c.bf16 %v342_v12, %v342_v12  ;;  %v14164_v20 = vpack.c.bf16 %v343_v3, %v343_v3  ;;  %v15990_v25 = vrot.slane %v764_v6, 11  ;;  %500 = vst [vmem:[#allocation2 + $0xa4] sm:$0xf] %v14161_v15  ;;  %14787 = vmatprep.subr.bf16.mxu1 %v15548_v22 }
  0x42   : > { %14664 = vmatmul.mubr.bf16.gmra.mxu0 %v13340_v57  ;;  %501 = vst [vmem:[#allocation2 + $0xa8] sm:$0xf] %v14162_v16  ;;  %v730_v26 = vor.u32 %v728_v10, %v15968_v63  ;;  %v786_v31 = vshrl.u32 %v544_v11, 16  ;;  %v808_v33 = vshrl.u32 %v15980_v17, 16  ;;  %v14165_v38 = vpack.c.bf16 %v344_v34, %v344_v34  ;;  %14788 = vmatpush3.bf16.msra.mxu1 %v15548_v22 }
  0x43   : > { %14667 = vmatprep.mubr.bf16.mxu0 %v13341_v13  ;;  %v537_v23 = vld [vmem:[#allocation2 + $0x78] sm:$0xf]  ;;  %14744 = vmatpush3.bf16.msra.mxu0 %v15542_v55  ;;  %502 = vst [vmem:[#allocation2 + $0xb4] sm:$0xf] %v14163_v19  ;;  %503 = vst [vmem:[#allocation2 + $0xb8] sm:$0xf] %v14164_v20 }
  0x44   : > { %v15538_v24 = vld [vmem:[#allocation2 + $0x74] sm:$0xff]   ;;  %v734_v27 = vshrl.u32 %v537_v23, 16  ;;  %v737_v29 = vshll.u32 %v537_v23, 16  ;;  %14745 = vmatprep.subr.bf16.mxu0 %v15547_v5  ;;  %v731_v43 = vsel %vm15873_vm2, %v15974_v9, %v730_v26  ;;  %504 = vst [vmem:[#allocation2 + $0xc4] sm:$0xf] %v14165_v38  ;;  %v13329_v50 = vrot.slane %v786_v31, 11  ;;  %14789 = vmatprep.subr.bf16.mxu1 %v15549_v32 }
  0x45   : > { %14716 = vmatmul.mubr.bf16.gmra.mxu1 %v15538_v24  ;;  %v345_v13 = vld [vmem:[%s15861_s9 + $0xb8] sm:$0xff]  ;;  %v15552_v38 = vld [vmem:[%s19354_s1 + $0x88] sm:$0xff]   ;;  %vm1736_vm3 = vsmask.f32 3328  ;;  %vm1737_vm4 = vsmask.f32 7440 }
  0x46   : > { %v736_v21 = vrot.slane %v734_v27, 7  ;;  %v539_v35 = vld [vmem:[#allocation2 + $0x84] sm:$0xf]  ;;  %v540_v36 = vld [vmem:[#allocation2 + $0x88] sm:$0xf]  ;;  %14790 = vmatpush3.bf16.msra.mxu1 %v15549_v32  ;;  %v13330_v32 = vrot.slane %v808_v33, 11  ;;  %vm16079_vm5 = vmor %vm1736_vm3, %vm1737_vm4 }
  0x47   : > { %v15540_v37 = vld [vmem:[#allocation2 + $0x84] sm:$0xff]   ;;  %v747_v39 = vshrl.u32 %v539_v35, 16  ;;  %v750_v40 = vshll.u32 %v539_v35, 16  ;;  %v756_v41 = vshrl.u32 %v540_v36, 16  ;;  %v759_v42 = vshll.u32 %v540_v36, 16  ;;  %14746 = vmatpush3.bf16.msra.mxu0 %v15547_v5  ;;  %v15541_v30 = vld [vmem:[#allocation2 + $0x94] sm:$0xff]  }
  0x48   : > { %v739_v44 = vor.u32 %v737_v29, %v736_v21  ;;  %14719 = vmatprep.mubr.bf16.mxu1 %v15540_v37  ;;  %v542_v45 = vld [vmem:[#allocation2 + $0x94] sm:$0xf]  ;;  %v543_v46 = vld [vmem:[#allocation2 + $0x98] sm:$0xf]  ;;  %v545_v59 = vld [vmem:[#allocation2 + $0xa4] sm:$0xf]  ;;  %v14166_v35 = vpack.c.bf16 %v345_v13, %v345_v13  ;;  %14747 = vmatprep.subr.bf16.mxu0 %v15552_v38 }
  0x49   : > { %v749_v47 = vrot.slane %v747_v39, 7  ;;  %v758_v48 = vrot.slane %v756_v41, 7  ;;  %v769_v49 = vshrl.u32 %v542_v45, 16  ;;  %v772_v52 = vshll.u32 %v542_v45, 16  ;;  %v546_v60 = vld [vmem:[#allocation2 + $0xa8] sm:$0xf] }
  0x4a   : > { %v740_v51 = vsel %vm15873_vm2, %v732_v14, %v739_v44  ;;  %v778_v53 = vshrl.u32 %v543_v46, 16  ;;  %v781_v54 = vshll.u32 %v543_v46, 16  ;;  %v15545_v61 = vld [vmem:[#allocation2 + $0xa4] sm:$0xff]   ;;  %v791_v0 = vshrl.u32 %v545_v59, 16  ;;  %v548_v8 = vld [vmem:[#allocation2 + $0xb4] sm:$0xf] }
  0x4b   : > { %v13342_v55 = vcombine.low %v731_v43, %v740_v51  ;;  %v752_v56 = vor.u32 %v750_v40, %v749_v47  ;;  %v754_v57 = vrot.slane %v749_v47, 4  ;;  %v761_v58 = vor.u32 %v759_v42, %v758_v48  ;;  %v549_v3 = vld [vmem:[#allocation2 + $0xb8] sm:$0xf]  ;;  %v16014_v23 = vld [vmem:[#allocation2 + $0xc4] sm:$0xf]  ;;  %v347_v37 = vld [vmem:[%s15861_s9 + $0xc8] sm:$0xff]  ;;  %14748 = vmatpush3.bf16.msra.mxu0 %v15552_v38 }
  0x4c   : > { %v771_v62 = vrot.slane %v769_v49, 7  ;;  %v780_v63 = vrot.slane %v778_v53, 7  ;;  %v794_v1 = vshll.u32 %v545_v59, 16  ;;  %v800_v4 = vshrl.u32 %v546_v60, 16  ;;  %v15546_v31 = vld [vmem:[#allocation2 + $0xb4] sm:$0xff]   ;;  %v346_v36 = vld [vmem:[%s15861_s9 + $0xc0] sm:$0xff] }
  0x4d   : > { %14668 = vmatmul.mubr.bf16.gmra.mxu0 %v13342_v55  ;;  %v753_v2 = vsel %vm15873_vm2, %v15985_v18, %v752_v56  ;;  %v762_v6 = vsel %vm15873_vm2, %v754_v57, %v761_v58  ;;  %v803_v7 = vshll.u32 %v546_v60, 16  ;;  %14720 = vmatmul.mubr.bf16.gmra.mxu1 %v15541_v30  ;;  %v793_v14 = vrot.slane %v791_v0, 7  ;;  %505 = vst [vmem:[#allocation2 + $0xc8] sm:$0xf] %v14166_v35  ;;  %v15553_v44 = vld [vmem:[%s19354_s1 + $0xd8] sm:$0xff]   ;;  %v348_v51 = vld [vmem:[%s15861_s9 + $0xd0] sm:$0xff] }
  0x4e   : > { %v13343_v9 = vcombine.low %v753_v2, %v762_v6  ;;  %v774_v10 = vor.u32 %v772_v52, %v771_v62  ;;  %v776_v11 = vrot.slane %v771_v62, 4  ;;  %v783_v12 = vor.u32 %v781_v54, %v780_v63  ;;  %14723 = vmatprep.mubr.bf16.mxu1 %v15545_v61  ;;  %v553_v47 = vld [vmem:[#allocation2 + $0xd0] sm:$0x8]  ;;  %v349_v52 = vld [vmem:[%s15861_s9 + $0xd8] sm:$0xff]  ;;  %14791 = vmatprep.subr.bf16.mxu1 %v15553_v44  ;;  %v556_v55 = vld [vmem:[#allocation2 + $0xe0] sm:$0x8] }
  0x4f   : > { %v802_v15 = vrot.slane %v800_v4, 7  ;;  %v813_v16 = vshrl.u32 %v548_v8, 16  ;;  %v816_v5 = vshll.u32 %v548_v8, 16  ;;  %v822_v20 = vshrl.u32 %v549_v3, 16  ;;  %v350_v56 = vld [vmem:[%s15861_s9 + $0xe0] sm:$0xff]  ;;  %v351_v57 = vld [vmem:[%s15861_s9 + $0xe8] sm:$0xff]  ;;  %14792 = vmatpush3.bf16.msra.mxu1 %v15553_v44 }
  0x50   : > { %14671 = vmatprep.mubr.bf16.mxu0 %v13343_v9  ;;  %v775_v18 = vsel %vm15873_vm2, %v15990_v25, %v774_v10  ;;  %v784_v19 = vsel %vm15873_vm2, %v776_v11, %v783_v12  ;;  %v825_v22 = vshll.u32 %v549_v3, 16  ;;  %v796_v26 = vor.u32 %v794_v1, %v793_v14  ;;  %v550_v25 = vld [vmem:[#allocation2 + $0xc0] sm:$0x8]  ;;  %v559_v62 = vld [vmem:[#allocation2 + $0xf0] sm:$0x8]  ;;  %v15558_v6 = vld [vmem:[%s19354_s1 + $0xc8] sm:$0xff]  }
  0x51   : > { %v13344_v24 = vcombine.low %v775_v18, %v784_v19  ;;  %v798_v27 = vrot.slane %v793_v14, 4  ;;  %v805_v29 = vor.u32 %v803_v7, %v802_v15  ;;  %v815_v34 = vrot.slane %v813_v16, 7  ;;  %v15557_v2 = vld [vmem:[%s19354_s1 + $0x80] sm:$0xff]   ;;  %v16052_v12 = vld [vmem:[%s19354_s1 + $0x138] sm:$0xff]  }
  0x52   : > { %v824_v21 = vrot.slane %v822_v20, 7  ;;  %v797_v39 = vsel %vm15873_vm2, %v13329_v50, %v796_v26  ;;  %v835_v41 = vshrl.u32 %v16014_v23, 16  ;;  %v14167_v45 = vpack.c.bf16 %v346_v36, %v346_v36  ;;  %v15554_v50 = vld [vmem:[%s19354_s1 + $0xd0] sm:$0xff]   ;;  %14749 = vmatprep.subr.bf16.mxu0 %v15557_v2  ;;  %v15559_v16 = vld [vmem:[%s19354_s1 + $0xc0] sm:$0xff]  }
  0x53   : > { %v806_v40 = vsel %vm15873_vm2, %v798_v27, %v805_v29  ;;  %v818_v33 = vor.u32 %v816_v5, %v815_v34  ;;  %v820_v42 = vrot.slane %v815_v34, 4  ;;  %v14168_v46 = vpack.c.bf16 %v347_v37, %v347_v37  ;;  %14793 = vmatprep.subr.bf16.mxu1 %v15554_v50  ;;  %14750 = vmatpush3.bf16.msra.mxu0 %v15557_v2 }
  0x54   : > { %v13345_v17 = vcombine.low %v797_v39, %v806_v40  ;;  %v827_v43 = vor.u32 %v825_v22, %v824_v21  ;;  %v830_v53 = vshrl.u32 %v550_v25, 16  ;;  %v838_v54 = vshll.u32 %v16014_v23, 16  ;;  %506 = vst [vmem:[#allocation2 + $0xd4] sm:$0xf] %v14167_v45  ;;  %v552_v4 = vld [vmem:[#allocation2 + $0xc8] sm:$0xf]  ;;  %14794 = vmatpush3.bf16.msra.mxu1 %v15554_v50  ;;  %14831 = vmatprep.subr.bf16.mxu0 %v16052_v12 }
  0x55   : > { %14672 = vmatmul.mubr.bf16.gmra.mxu0 %v13344_v24  ;;  %v819_v48 = vsel %vm15873_vm2, %v13330_v32, %v818_v33  ;;  %14724 = vmatmul.mubr.bf16.gmra.mxu1 %v15546_v31  ;;  %507 = vst [vmem:[#allocation2 + $0xd8] sm:$0xf] %v14168_v46  ;;  %v14169_v30 = vpack.c.bf16 %v348_v51, %v348_v51  ;;  %v837_v58 = vrot.slane %v835_v41, 7  ;;  %v852_v59 = vshrl.u32 %v553_v47, 16  ;;  %v15550_v7 = vld [vmem:[#allocation2 + $0xc4] sm:$0xff]  }
  0x56   : > { %14675 = vmatprep.mubr.bf16.mxu0 %v13345_v17  ;;  %v828_v49 = vsel %vm15873_vm2, %v820_v42, %v827_v43  ;;  %v14170_v60 = vpack.c.bf16 %v349_v52, %v349_v52  ;;  %v14171_v61 = vpack.c.bf16 %v350_v56, %v350_v56  ;;  %v874_v0 = vshrl.u32 %v556_v55, 16  ;;  %14727 = vmatprep.mubr.bf16.mxu1 %v15550_v7  ;;  %v1688_v41 = vld [vmem:[#allocation2 + $0x4] sm:$0xf] }
  0x57   : > { %v13346_v63 = vcombine.low %v819_v48, %v828_v49  ;;  %508 = vst [vmem:[#allocation2 + $0xe4] sm:$0xf] %v14169_v30  ;;  %v14172_v1 = vpack.c.bf16 %v351_v57, %v351_v57  ;;  %v13331_v8 = vrot.slane %v830_v53, 11  ;;  %v840_v9 = vor.u32 %v838_v54, %v837_v58  ;;  %14795 = vmatprep.subr.bf16.mxu1 %v15558_v6  ;;  %v1689_v30 = vld [vmem:[#allocation2 + $0x8] sm:$0xf] }
  0x58   : > { %509 = vst [vmem:[#allocation2 + $0xe8] sm:$0xf] %v14170_v60  ;;  %510 = vst [vmem:[#allocation2 + $0xf4] sm:$0xf] %v14171_v61  ;;  %v844_v10 = vshrl.u32 %v552_v4, 16  ;;  %v847_v11 = vshll.u32 %v552_v4, 16  ;;  %14796 = vmatpush3.bf16.msra.mxu1 %v15558_v6 }
  0x59   : > { %511 = vst [vmem:[#allocation2 + $0xf8] sm:$0xf] %v14172_v1  ;;  %v842_v3 = vrot.slane %v837_v58, 4  ;;  %v13332_v13 = vrot.slane %v852_v59, 11  ;;  %v16054_v14 = vrot.slane %v874_v0, 11  ;;  %v896_v15 = vshrl.u32 %v559_v62, 16  ;;  %14797 = vmatprep.subr.bf16.mxu1 %v15559_v16 }
  0x5a   : > { %v846_v5 = vrot.slane %v844_v10, 7  ;;  %v841_v27 = vsel %vm15873_vm2, %v13331_v8, %v840_v9  ;;  %v1690_v59 = vld [vmem:[#allocation2 + $0xc] sm:$0x1]  ;;  %v1740_v62 = vshrl.u32 %v1688_v41, 16  ;;  %v1749_v2 = vshll.u32 %v1689_v30, 16 }
  0x5b   : > { %v554_v18 = vld [vmem:[#allocation2 + $0xd4] sm:$0xf]  ;;  %v13334_v25 = vrot.slane %v896_v15, 11  ;;  %v1753_v6 = vshrl.u32 %v1689_v30, 16 }
  0x5c   : > { %v555_v19 = vld [vmem:[#allocation2 + $0xd8] sm:$0xf]  ;;  %v857_v22 = vshrl.u32 %v554_v18, 16  ;;  %v860_v23 = vshll.u32 %v554_v18, 16  ;;  %v849_v29 = vor.u32 %v847_v11, %v846_v5  ;;  %14798 = vmatpush3.bf16.msra.mxu1 %v15559_v16  ;;  %v1691_v4 = vld [vmem:[#allocation2 + $0x14] sm:$0xf] }
  0x5d   : > { %14676 = vmatmul.mubr.bf16.gmra.mxu0 %v13346_v63  ;;  %v15551_v20 = vld [vmem:[#allocation2 + $0xd4] sm:$0xff]   ;;  %v866_v24 = vshrl.u32 %v555_v19, 16  ;;  %v869_v26 = vshll.u32 %v555_v19, 16  ;;  %v1743_v63 = vshll.u32 %v1688_v41, 16  ;;  %v1742_v11 = vrot.slane %v1740_v62, 4 }
  0x5e   : > { %14728 = vmatmul.mubr.bf16.gmra.mxu1 %v15551_v20  ;;  %v557_v31 = vld [vmem:[#allocation2 + $0xe4] sm:$0xf]  ;;  %v859_v32 = vrot.slane %v857_v22, 7  ;;  %v850_v36 = vsel %vm15873_vm2, %v842_v3, %v849_v29  ;;  %v1755_v15 = vrot.slane %v1753_v6, 4  ;;  %v1692_v16 = vld [vmem:[#allocation2 + $0x18] sm:$0xf] }
  0x5f   : > { %v868_v34 = vrot.slane %v866_v24, 7  ;;  %v558_v21 = vld [vmem:[#allocation2 + $0xe8] sm:$0xf]  ;;  %v879_v35 = vshrl.u32 %v557_v31, 16  ;;  %v882_v37 = vshll.u32 %v557_v31, 16  ;;  %v13347_v17 = vcombine.low %v841_v27, %v850_v36 }
  0x60   : > { %v888_v38 = vshrl.u32 %v558_v21, 16  ;;  %v891_v39 = vshll.u32 %v558_v21, 16  ;;  %v15555_v40 = vld [vmem:[#allocation2 + $0xe4] sm:$0xff]   ;;  %v862_v33 = vor.u32 %v860_v23, %v859_v32  ;;  %v864_v42 = vrot.slane %v859_v32, 4  ;;  %v560_v44 = vld [vmem:[#allocation2 + $0xf4] sm:$0xf] }
  0x61   : > { %v871_v43 = vor.u32 %v869_v26, %v868_v34  ;;  %v561_v45 = vld [vmem:[#allocation2 + $0xf8] sm:$0xf]  ;;  %v881_v47 = vrot.slane %v879_v35, 7  ;;  %14731 = vmatprep.mubr.bf16.mxu1 %v15555_v40  ;;  %v901_v49 = vshrl.u32 %v560_v44, 16  ;;  %v904_v50 = vshll.u32 %v560_v44, 16  ;;  %14679 = vmatprep.mubr.bf16.mxu0 %v13347_v17 }
  0x62   : > { %v15556_v46 = vld [vmem:[#allocation2 + $0xf4] sm:$0xff]   ;;  %v890_v48 = vrot.slane %v888_v38, 7  ;;  %v863_v51 = vsel %vm15873_vm2, %v13332_v13, %v862_v33  ;;  %v910_v53 = vshrl.u32 %v561_v45, 16  ;;  %v913_v54 = vshll.u32 %v561_v45, 16  ;;  %v1693_v19 = vld [vmem:[#allocation2 + $0x1c] sm:$0x1] }
  0x63   : > { %v872_v52 = vsel %vm15873_vm2, %v864_v42, %v871_v43  ;;  %v884_v56 = vor.u32 %v882_v37, %v881_v47  ;;  %v886_v57 = vrot.slane %v881_v47, 4  ;;  %v903_v60 = vrot.slane %v901_v49, 7  ;;  %v2509_v27 = vld [vmem:[#allocation2 + $0x10] sm:$0x8]  ;;  %v2510_v29 = vld [vmem:[#allocation2 + $0x14] sm:$0xf] }
  0x64   : > { %v13348_v55 = vcombine.low %v863_v51, %v872_v52  ;;  %v893_v58 = vor.u32 %v891_v39, %v890_v48  ;;  %v912_v61 = vrot.slane %v910_v53, 7  ;;  %v1745_v3 = vrot.slane %v1743_v63, 5  ;;  %v2511_v39 = vld [vmem:[#allocation2 + $0x18] sm:$0xf]  ;;  %v2512_v42 = vld [vmem:[#allocation2 + $0x20] sm:$0x8] }
  0x65   : > { %v885_v0 = vsel %vm15873_vm2, %v16054_v14, %v884_v56  ;;  %v906_v8 = vor.u32 %v904_v50, %v903_v60  ;;  %v908_v9 = vrot.slane %v903_v60, 4  ;;  %v1751_v13 = vrot.slane %v1749_v2, 5  ;;  %v2513_v47 = vld [vmem:[#allocation2 + $0x24] sm:$0xf]  ;;  %v16090_v48 = vld [vmem:[%s19354_s1 + $0x178] sm:$0xff]  }
  0x66   : > { %14680 = vmatmul.mubr.bf16.gmra.mxu0 %v13348_v55  ;;  %v894_v1 = vsel %vm15873_vm2, %v886_v57, %v893_v58  ;;  %14732 = vmatmul.mubr.bf16.gmra.mxu1 %v15556_v46  ;;  %v915_v10 = vor.u32 %v913_v54, %v912_v61  ;;  %v1759_v18 = vshll.u32 %v1690_v59, 16  ;;  %v1764_v20 = vshrl.u32 %v1691_v4, 16  ;;  %v2514_v56 = vld [vmem:[#allocation2 + $0x28] sm:$0xf] }
  0x67   : > { %v13349_v7 = vcombine.low %v885_v0, %v894_v1  ;;  %v907_v14 = vsel %vm15873_vm2, %v13334_v25, %v906_v8  ;;  %v1746_v23 = vor.u32 %v1745_v3, %v1742_v11  ;;  %v1756_v24 = vor.u32 %v1755_v15, %v1751_v13  ;;  %14879 = vmatprep.subr.bf16.mxu1 %v16090_v48  ;;  %v1694_v1 = vld [vmem:[#allocation2 + $0x24] sm:$0xf]  ;;  %v1695_v8 = vld [vmem:[#allocation2 + $0x28] sm:$0xf]  ;;  %v15561_v15 = vld [vmem:[%s19354_s1 + $0x130] sm:$0xff]  }
  0x68   : > { %v916_v5 = vsel %vm15873_vm2, %v908_v9, %v915_v10  ;;  %v1767_v26 = vshll.u32 %v1691_v4, 16  ;;  %v19374_v31 = vmov 0  ;;  %v1761_v32 = vrot.slane %v1759_v18, 5 }
  0x69   : > { %14683 = vmatprep.mubr.bf16.mxu0 %v13349_v7  ;;  %v13350_v22 = vcombine.low %v907_v14, %v916_v5  ;;  %v19375_v31 = vsel %vm16079_vm5, 4294967295, %v19374_v31  ;;  %v1766_v34 = vrot.slane %v1764_v20, 4  ;;  %v1773_v21 = vshll.u32 %v1692_v16, 16 }
  0x6a   : > { %19376 = vst [vmem:[#allocation5_spill] sm:$0xff] %v19375_v31  ;;  %v1777_v35 = vshrl.u32 %v1692_v16, 16  ;;  %v1747_v25 = vrot.slane %v1746_v23, 4  ;;  %v1757_v36 = vrot.slane %v1756_v24, 4  ;;  %v1769_v37 = vrot.slane %v1767_v26, 5 }
  0x6b   : > { %v1783_v38 = vshll.u32 %v1693_v19, 16  ;;  %v1775_v40 = vrot.slane %v1773_v21, 5  ;;  %v2558_v17 = vshrl.u32 %v2509_v27, 16  ;;  %v2563_v33 = vshrl.u32 %v2510_v29, 16  ;;  %v1697_v19 = vld [vmem:[#allocation2 + $0x34] sm:$0xf] }
  0x6c   : > { %v1779_v41 = vrot.slane %v1777_v35, 4  ;;  %v1752_v43 = vsel %vm16079_vm5, %v1747_v25, %v1751_v13  ;;  %v1762_v44 = vsel %vm16079_vm5, %v1757_v36, %v1761_v32  ;;  %v1770_v45 = vor.u32 %v1769_v37, %v1766_v34  ;;  %v1696_v13 = vld [vmem:[#allocation2 + $0x2c] sm:$0x1]  ;;  %v1698_v26 = vld [vmem:[#allocation2 + $0x38] sm:$0xf] }
  0x6d   : > { %v1785_v46 = vrot.slane %v1783_v38, 5  ;;  %v13415_v49 = vcombine.low %v1752_v43, %v1762_v44  ;;  %v13439_v51 = vrot.slane %v2558_v17, 11  ;;  %v2565_v52 = vrot.slane %v2563_v33, 7  ;;  %v1699_v21 = vld [vmem:[#allocation2 + $0x3c] sm:$0x1]  ;;  %v15562_v25 = vld [vmem:[%s19354_s1 + $0x128] sm:$0xff]  }
  0x6e   : > { %14684 = vmatmul.mubr.bf16.gmra.mxu0 %v13350_v22  ;;  %v1780_v50 = vor.u32 %v1779_v41, %v1775_v40  ;;  %v1771_v53 = vrot.slane %v1770_v45, 4  ;;  %v2566_v54 = vshll.u32 %v2510_v29, 16  ;;  %v2572_v30 = vshrl.u32 %v2511_v39, 16  ;;  %v2515_v35 = vld [vmem:[#allocation2 + $0x30] sm:$0x8] }
  0x6f   : > { %v2575_v55 = vshll.u32 %v2511_v39, 16  ;;  %14751 = vmatprep.mubr.bf16.mxu0 %v13415_v49  ;;  %v2570_v58 = vrot.slane %v2565_v52, 4  ;;  %v2580_v59 = vshrl.u32 %v2512_v42, 16  ;;  %v2585_v60 = vshrl.u32 %v2513_v47, 16  ;;  %v2516_v45 = vld [vmem:[#allocation2 + $0x34] sm:$0xf] }
  0x70   : > { %v1781_v57 = vrot.slane %v1780_v50, 4  ;;  %v1776_v61 = vsel %vm16079_vm5, %v1771_v53, %v1775_v40  ;;  %v2568_v62 = vor.u32 %v2566_v54, %v2565_v52  ;;  %v2574_v63 = vrot.slane %v2572_v30, 7  ;;  %v2517_v53 = vld [vmem:[#allocation2 + $0x38] sm:$0xf] }
  0x71   : > { %v2588_v0 = vshll.u32 %v2513_v47, 16  ;;  %v13440_v6 = vrot.slane %v2580_v59, 11  ;;  %v2587_v4 = vrot.slane %v2585_v60, 7  ;;  %v2594_v7 = vshrl.u32 %v2514_v56, 16  ;;  %v15566_v47 = vld [vmem:[%s19354_s1 + $0x170] sm:$0xff]  }
  0x72   : > { %v1786_v2 = vsel %vm16079_vm5, %v1781_v57, %v1785_v46  ;;  %v2569_v10 = vsel %vm15873_vm2, %v13439_v51, %v2568_v62  ;;  %v2577_v11 = vor.u32 %v2575_v55, %v2574_v63  ;;  %v2597_v3 = vshll.u32 %v2514_v56, 16  ;;  %v15563_v46 = vld [vmem:[%s19354_s1 + $0x120] sm:$0xff]  }
  0x73   : > { %v13416_v9 = vcombine.low %v1776_v61, %v1786_v2  ;;  %v2590_v16 = vor.u32 %v2588_v0, %v2587_v4  ;;  %v2592_v14 = vrot.slane %v2587_v4, 4  ;;  %v2596_v5 = vrot.slane %v2594_v7, 7  ;;  %v2518_v57 = vld [vmem:[#allocation2 + $0x40] sm:$0x8]  ;;  %v2519_v62 = vld [vmem:[#allocation2 + $0x44] sm:$0xf] }
  0x74   : > { %v1788_v18 = vshrl.u32 %v1694_v1, 16  ;;  %v2578_v20 = vsel %vm15873_vm2, %v2570_v58, %v2577_v11  ;;  %v1791_v22 = vshll.u32 %v1694_v1, 16  ;;  %v1797_v23 = vshll.u32 %v1695_v8, 16 }
  0x75   : > { %v1801_v24 = vshrl.u32 %v1695_v8, 16  ;;  %v13471_v27 = vcombine.low %v2569_v10, %v2578_v20  ;;  %v2591_v29 = vsel %vm15873_vm2, %v13440_v6, %v2590_v16  ;;  %v2599_v32 = vor.u32 %v2597_v3, %v2596_v5  ;;  %v15568_v6 = vld [vmem:[%s19354_s1 + $0x168] sm:$0xff]   ;;  %v1700_v16 = vld [vmem:[#allocation2 + $0x44] sm:$0xf] }
  0x76   : > { %14752 = vmatmul.mubr.bf16.vlgmr.msra.gmra.mxu0 %v13416_v9  ;;  %v1790_v34 = vrot.slane %v1788_v18, 4  ;;  %v1793_v36 = vrot.slane %v1791_v22, 5  ;;  %v1799_v37 = vrot.slane %v1797_v23, 5  ;;  %v1807_v39 = vshll.u32 %v1696_v13, 16  ;;  %v2520_v10 = vld [vmem:[#allocation2 + $0x48] sm:$0xf] }
  0x77   : > { %14832 = vmatpush3.bf16.msra.mxu0 %v16052_v12  ;;  %v1803_v38 = vrot.slane %v1801_v24, 4  ;;  %14799 = vmatprep.mubr.bf16.mxu1 %v13471_v27  ;;  %v2600_v12 = vsel %vm15873_vm2, %v2592_v14, %v2599_v32  ;;  %v1812_v40 = vshrl.u32 %v1697_v19, 16  ;;  %v1815_v41 = vshll.u32 %v1697_v19, 16  ;;  %v1701_v20 = vld [vmem:[#allocation2 + $0x48] sm:$0xf]  ;;  %v15569_v22 = vld [vmem:[%s19354_s1 + $0x160] sm:$0xff]  }
  0x78   : > { %14833 = vmatprep.subr.bf16.mxu0 %v15561_v15  ;;  %v1821_v17 = vshll.u32 %v1698_v26, 16  ;;  %v13472_v33 = vcombine.low %v2591_v29, %v2600_v12  ;;  %v1794_v42 = vor.u32 %v1793_v36, %v1790_v34  ;;  %v1809_v44 = vrot.slane %v1807_v39, 5  ;;  %v15567_v39 = vld [vmem:[%s19354_s1 + $0x110] sm:$0xff]  }
  0x79   : > { %v1804_v43 = vor.u32 %v1803_v38, %v1799_v37  ;;  %v1814_v49 = vrot.slane %v1812_v40, 4  ;;  %v1817_v50 = vrot.slane %v1815_v41, 5  ;;  %v1825_v52 = vshrl.u32 %v1698_v26, 16 }
  0x7a   : > { %v1823_v51 = vrot.slane %v1821_v17, 5  ;;  %14800 = vmatmul.mubr.bf16.vlgmr.msra.gmra.mxu1 %v13472_v33  ;;  %v1795_v54 = vrot.slane %v1794_v42, 4  ;;  %v1831_v55 = vshll.u32 %v1699_v21, 16  ;;  %v2602_v56 = vshrl.u32 %v2515_v35, 16  ;;  %v1702_v35 = vld [vmem:[#allocation2 + $0x4c] sm:$0x1] }
  0x7b   : > { %14834 = vmatpush3.bf16.msra.mxu0 %v15561_v15  ;;  %v1805_v30 = vrot.slane %v1804_v43, 4  ;;  %v1818_v58 = vor.u32 %v1817_v50, %v1814_v49  ;;  %v1827_v59 = vrot.slane %v1825_v52, 4  ;;  %v2607_v60 = vshrl.u32 %v2516_v45, 16  ;;  %14880 = vmatpush3.bf16.msra.mxu1 %v16090_v48  ;;  %v15564_v48 = vld [vmem:[%s19354_s1 + $0x118] sm:$0xff]   ;;  %v1703_v33 = vld [vmem:[#allocation2 + $0x54] sm:$0xf] }
  0x7c   : > { %14835 = vmatprep.subr.bf16.mxu0 %v15562_v25  ;;  %v2610_v61 = vshll.u32 %v2516_v45, 16  ;;  %v1800_v63 = vsel %vm16079_vm5, %v1795_v54, %v1799_v37  ;;  %v1833_v1 = vrot.slane %v1831_v55, 5  ;;  %v13441_v2 = vrot.slane %v2602_v56, 11  ;;  %14881 = vmatprep.subr.bf16.mxu1 %v15566_v47  ;;  %v15570_v54 = vld [vmem:[%s19354_s1 + $0x108] sm:$0xff]  }
  0x7d   : > { %v1810_v0 = vsel %vm16079_vm5, %v1805_v30, %v1809_v44  ;;  %v1819_v7 = vrot.slane %v1818_v58, 4  ;;  %v1828_v8 = vor.u32 %v1827_v59, %v1823_v51  ;;  %v2609_v9 = vrot.slane %v2607_v60, 7  ;;  %v2521_v58 = vld [vmem:[#allocation2 + $0x50] sm:$0x8] }
  0x7e   : > { %v13417_v4 = vcombine.low %v1800_v63, %v1810_v0  ;;  %v2616_v11 = vshrl.u32 %v2517_v53, 16  ;;  %v2619_v3 = vshll.u32 %v2517_v53, 16  ;;  %v2624_v13 = vshrl.u32 %v2518_v57, 16  ;;  %v1705_v53 = vld [vmem:[#allocation2 + $0x5c] sm:$0x1]  ;;  %v15572_v0 = vld [vmem:[%s19354_s1 + $0x150] sm:$0xff]  }
  0x7f   : > { %14836 = vmatpush3.bf16.msra.mxu0 %v15562_v25  ;;  %v2629_v15 = vshrl.u32 %v2519_v62, 16  ;;  %v1824_v14 = vsel %vm16079_vm5, %v1819_v7, %v1823_v51  ;;  %v1829_v5 = vrot.slane %v1828_v8, 4  ;;  %v2612_v18 = vor.u32 %v2610_v61, %v2609_v9  ;;  %14882 = vmatpush3.bf16.msra.mxu1 %v15566_v47  ;;  %v15571_v47 = vld [vmem:[%s19354_s1 + $0x158] sm:$0xff]   ;;  %v2522_v63 = vld [vmem:[#allocation2 + $0x54] sm:$0xf] }
  0x80   : > { %14837 = vmatprep.subr.bf16.mxu0 %v15563_v46  ;;  %14755 = vmatprep.mubr.bf16.mxu0 %v13417_v4  ;;  %v2614_v19 = vrot.slane %v2609_v9, 4  ;;  %v2618_v23 = vrot.slane %v2616_v11, 7  ;;  %v13442_v24 = vrot.slane %v2624_v13, 11  ;;  %v2632_v27 = vshll.u32 %v2519_v62, 16  ;;  %v2523_v7 = vld [vmem:[#allocation2 + $0x58] sm:$0xf] }
  0x81   : > { %v2631_v26 = vrot.slane %v2629_v15, 7  ;;  %14883 = vmatprep.subr.bf16.mxu1 %v15568_v6  ;;  %v1834_v29 = vsel %vm16079_vm5, %v1829_v5, %v1833_v1  ;;  %v2613_v32 = vsel %vm15873_vm2, %v13441_v2, %v2612_v18  ;;  %v2638_v34 = vshrl.u32 %v2520_v10, 16 }
  0x82   : > { %v2641_v21 = vshll.u32 %v2520_v10, 16  ;;  %v13418_v25 = vcombine.low %v1824_v14, %v1834_v29  ;;  %v2621_v36 = vor.u32 %v2619_v3, %v2618_v23  ;;  %v1836_v40 = vshrl.u32 %v1700_v16, 16  ;;  %v2526_v29 = vld [vmem:[#allocation2 + $0x68] sm:$0xf] }
  0x83   : > { %14838 = vmatpush3.bf16.msra.mxu0 %v15563_v46  ;;  %v2634_v37 = vor.u32 %v2632_v27, %v2631_v26  ;;  %v2636_v38 = vrot.slane %v2631_v26, 4  ;;  %v2640_v12 = vrot.slane %v2638_v34, 7  ;;  %v1839_v41 = vshll.u32 %v1700_v16, 16  ;;  %14884 = vmatpush3.bf16.msra.mxu1 %v15568_v6  ;;  %v1704_v46 = vld [vmem:[#allocation2 + $0x58] sm:$0xf]  ;;  %v15573_v16 = vld [vmem:[%s19354_s1 + $0x100] sm:$0xff]  }
  0x84   : > { %14839 = vmatprep.subr.bf16.mxu0 %v15564_v48  ;;  %v1845_v17 = vshll.u32 %v1701_v20, 16  ;;  %14756 = vmatmul.mubr.bf16.gmra.mxu0 %v13418_v25  ;;  %v2622_v42 = vsel %vm15873_vm2, %v2614_v19, %v2621_v36  ;;  %v1849_v44 = vshrl.u32 %v1701_v20, 16  ;;  %v1855_v45 = vshll.u32 %v1702_v35, 16  ;;  %v2524_v20 = vld [vmem:[#allocation2 + $0x60] sm:$0x8] }
  0x85   : > { %v2635_v43 = vsel %vm15873_vm2, %v13442_v24, %v2634_v37  ;;  %14885 = vmatprep.subr.bf16.mxu1 %v15569_v22  ;;  %v13473_v49 = vcombine.low %v2613_v32, %v2622_v42  ;;  %v2643_v50 = vor.u32 %v2641_v21, %v2640_v12  ;;  %v1838_v51 = vrot.slane %v1836_v40, 4  ;;  %v2525_v27 = vld [vmem:[#allocation2 + $0x64] sm:$0xf]  ;;  %v1707_v36 = vld [vmem:[#allocation2 + $0x68] sm:$0xf] }
  0x86   : > { %v1841_v52 = vrot.slane %v1839_v41, 5  ;;  %v1847_v30 = vrot.slane %v1845_v17, 5  ;;  %v1851_v55 = vrot.slane %v1849_v44, 4  ;;  %v1857_v56 = vrot.slane %v1855_v45, 5  ;;  %v1706_v25 = vld [vmem:[#allocation2 + $0x64] sm:$0xf] }
  0x87   : > { %14840 = vmatpush3.bf16.msra.mxu0 %v15564_v48  ;;  %v1860_v57 = vshrl.u32 %v1703_v33, 16  ;;  %14803 = vmatprep.mubr.bf16.mxu1 %v13473_v49  ;;  %v2644_v59 = vsel %vm15873_vm2, %v2636_v38, %v2643_v50  ;;  %v1863_v61 = vshll.u32 %v1703_v33, 16  ;;  %v1869_v62 = vshll.u32 %v1704_v46, 16  ;;  %v15574_v40 = vld [vmem:[%s19354_s1 + $0x148] sm:$0xff]  }
  0x88   : > { %14841 = vmatprep.subr.bf16.mxu0 %v15567_v39  ;;  %v1842_v60 = vor.u32 %v1841_v52, %v1838_v51  ;;  %14886 = vmatpush3.bf16.msra.mxu1 %v15569_v22  ;;  %v13474_v1 = vcombine.low %v2635_v43, %v2644_v59  ;;  %v1852_v2 = vor.u32 %v1851_v55, %v1847_v30  ;;  %v1873_v4 = vshrl.u32 %v1704_v46, 16  ;;  %v15575_v43 = vld [vmem:[%s19354_s1 + $0x140] sm:$0xff]  }
  0x89   : > { %v1862_v6 = vrot.slane %v1860_v57, 4  ;;  %14887 = vmatprep.subr.bf16.mxu1 %v15571_v47  ;;  %v1865_v9 = vrot.slane %v1863_v61, 5  ;;  %v1871_v10 = vrot.slane %v1869_v62, 5  ;;  %v1879_v48 = vshll.u32 %v1705_v53, 16  ;;  %v1709_v61 = vld [vmem:[#allocation2 + $0x74] sm:$0xf] }
  0x8a   : > { %v1843_v8 = vrot.slane %v1842_v60, 4  ;;  %14804 = vmatmul.mubr.bf16.gmra.mxu1 %v13474_v1  ;;  %v1853_v11 = vrot.slane %v1852_v2, 4  ;;  %v1875_v3 = vrot.slane %v1873_v4, 4  ;;  %v2646_v13 = vshrl.u32 %v2521_v58, 16  ;;  %v1710_v2 = vld [vmem:[#allocation2 + $0x78] sm:$0xf] }
  0x8b   : > { %14842 = vmatpush3.bf16.msra.mxu0 %v15567_v39  ;;  %v2651_v15 = vshrl.u32 %v2522_v63, 16  ;;  %v1866_v5 = vor.u32 %v1865_v9, %v1862_v6  ;;  %v1881_v18 = vrot.slane %v1879_v48, 5  ;;  %v2654_v19 = vshll.u32 %v2522_v63, 16  ;;  %v1711_v48 = vld [vmem:[#allocation2 + $0x7c] sm:$0x1] }
  0x8c   : > { %14843 = vmatprep.subr.bf16.mxu0 %v15570_v54  ;;  %v1848_v14 = vsel %vm16079_vm5, %v1843_v8, %v1847_v30  ;;  %14888 = vmatpush3.bf16.msra.mxu1 %v15571_v47  ;;  %v1858_v22 = vsel %vm16079_vm5, %v1853_v11, %v1857_v56  ;;  %v1876_v23 = vor.u32 %v1875_v3, %v1871_v10  ;;  %v13443_v24 = vrot.slane %v2646_v13, 11  ;;  %v2527_v13 = vld [vmem:[#allocation2 + $0x70] sm:$0x8] }
  0x8d   : > { %v2653_v26 = vrot.slane %v2651_v15, 7  ;;  %14889 = vmatprep.subr.bf16.mxu1 %v15572_v0  ;;  %v13419_v32 = vcombine.low %v1848_v14, %v1858_v22  ;;  %v1867_v34 = vrot.slane %v1866_v5, 4  ;;  %v2660_v21 = vshrl.u32 %v2523_v7, 16 }
  0x8e   : > { %v2663_v35 = vshll.u32 %v2523_v7, 16  ;;  %v1877_v37 = vrot.slane %v1876_v23, 4  ;;  %v2668_v12 = vshrl.u32 %v2524_v20, 16  ;;  %v2673_v33 = vshrl.u32 %v2525_v27, 16 }
  0x8f   : > { %14844 = vmatpush3.bf16.msra.mxu0 %v15570_v54  ;;  %v2656_v38 = vor.u32 %v2654_v19, %v2653_v26  ;;  %v2658_v39 = vrot.slane %v2653_v26, 4  ;;  %14759 = vmatprep.mubr.bf16.mxu0 %v13419_v32  ;;  %v1872_v41 = vsel %vm16079_vm5, %v1867_v34, %v1871_v10  ;;  %v2662_v17 = vrot.slane %v2660_v21, 7  ;;  %v1708_v54 = vld [vmem:[#allocation2 + $0x6c] sm:$0x1]  ;;  %v2530_v26 = vld [vmem:[#allocation2 + $0x80] sm:$0x8] }
  0x90   : > { %14845 = vmatprep.subr.bf16.mxu0 %v15573_v16  ;;  %v2676_v42 = vshll.u32 %v2525_v27, 16  ;;  %14890 = vmatpush3.bf16.msra.mxu1 %v15572_v0  ;;  %v1882_v44 = vsel %vm16079_vm5, %v1877_v37, %v1881_v18  ;;  %v13444_v46 = vrot.slane %v2668_v12, 11  ;;  %v2682_v47 = vshrl.u32 %v2526_v29, 16  ;;  %v2528_v18 = vld [vmem:[#allocation2 + $0x74] sm:$0xf] }
  0x91   : > { %v2657_v45 = vsel %vm15873_vm2, %v13443_v24, %v2656_v38  ;;  %14891 = vmatprep.subr.bf16.mxu1 %v15574_v40  ;;  %v13420_v49 = vcombine.low %v1872_v41, %v1882_v44  ;;  %v2665_v50 = vor.u32 %v2663_v35, %v2662_v17  ;;  %v2675_v51 = vrot.slane %v2673_v33, 7  ;;  %v2529_v24 = vld [vmem:[#allocation2 + $0x78] sm:$0xf]  ;;  %v2531_v21 = vld [vmem:[#allocation2 + $0x84] sm:$0xf] }
  0x92   : > { %v2685_v52 = vshll.u32 %v2526_v29, 16  ;;  %v2684_v53 = vrot.slane %v2682_v47, 7  ;;  %v1884_v30 = vshrl.u32 %v1706_v25, 16  ;;  %v1887_v55 = vshll.u32 %v1706_v25, 16 }
  0x93   : > { %14846 = vmatpush3.bf16.msra.mxu0 %v15573_v16  ;;  %v1893_v56 = vshll.u32 %v1707_v36, 16  ;;  %v2666_v57 = vsel %vm15873_vm2, %v2658_v39, %v2665_v50  ;;  %v2678_v58 = vor.u32 %v2676_v42, %v2675_v51  ;;  %v2680_v59 = vrot.slane %v2675_v51, 4 }
  0x94   : > { %14760 = vmatmul.mubr.bf16.gmra.mxu0 %v13420_v49  ;;  %v1897_v60 = vshrl.u32 %v1707_v36, 16  ;;  %14892 = vmatpush3.bf16.msra.mxu1 %v15574_v40  ;;  %v13475_v62 = vcombine.low %v2657_v45, %v2666_v57  ;;  %v2687_v63 = vor.u32 %v2685_v52, %v2684_v53  ;;  %v1886_v0 = vrot.slane %v1884_v30, 4  ;;  %v2532_v45 = vld [vmem:[#allocation2 + $0x88] sm:$0xf]  ;;  %v1712_v53 = vld [vmem:[#allocation2 + $0x84] sm:$0xf] }
  0x95   : > { %v1889_v1 = vrot.slane %v1887_v55, 5  ;;  %14893 = vmatprep.subr.bf16.mxu1 %v15575_v43  ;;  %v2679_v6 = vsel %vm15873_vm2, %v13444_v46, %v2678_v58  ;;  %v1895_v4 = vrot.slane %v1893_v56, 5  ;;  %v1903_v8 = vshll.u32 %v1708_v54, 16  ;;  %v1713_v57 = vld [vmem:[#allocation2 + $0x88] sm:$0xf] }
  0x96   : > { %v1899_v7 = vrot.slane %v1897_v60, 4  ;;  %14807 = vmatprep.mubr.bf16.mxu1 %v13475_v62  ;;  %v2688_v9 = vsel %vm15873_vm2, %v2680_v59, %v2687_v63  ;;  %v1908_v11 = vshrl.u32 %v1709_v61, 16  ;;  %v1911_v3 = vshll.u32 %v1709_v61, 16  ;;  %v1714_v62 = vld [vmem:[#allocation2 + $0x8c] sm:$0x1] }
  0x97   : > { %v1890_v10 = vor.u32 %v1889_v1, %v1886_v0  ;;  %v13476_v15 = vcombine.low %v2679_v6, %v2688_v9  ;;  %v1905_v14 = vrot.slane %v1903_v8, 5  ;;  %v1917_v5 = vshll.u32 %v1710_v2, 16  ;;  %v16194_v6 = vld [vmem:[%s19354_s1 + $0x1b8] sm:$0xff]  }
  0x98   : > { %v1900_v16 = vor.u32 %v1899_v7, %v1895_v4  ;;  %14894 = vmatpush3.bf16.msra.mxu1 %v15575_v43  ;;  %v1910_v20 = vrot.slane %v1908_v11, 4  ;;  %v1913_v22 = vrot.slane %v1911_v3, 5  ;;  %v1921_v23 = vshrl.u32 %v1710_v2, 16  ;;  %14927 = vmatprep.subr.bf16.mxu0 %v16194_v6 }
  0x99   : > { %v1891_v19 = vrot.slane %v1890_v10, 4  ;;  %14808 = vmatmul.mubr.bf16.gmra.mxu1 %v13476_v15  ;;  %v1919_v29 = vrot.slane %v1917_v5, 5  ;;  %v1927_v32 = vshll.u32 %v1711_v48, 16  ;;  %v2690_v34 = vshrl.u32 %v2527_v13, 16  ;;  %v1715_v10 = vld [vmem:[#allocation2 + $0x94] sm:$0xf] }
  0x9a   : > { %v1901_v27 = vrot.slane %v1900_v16, 4  ;;  %v1914_v25 = vor.u32 %v1913_v22, %v1910_v20  ;;  %v1923_v36 = vrot.slane %v1921_v23, 4  ;;  %v2695_v37 = vshrl.u32 %v2528_v18, 16  ;;  %v1716_v15 = vld [vmem:[#allocation2 + $0x98] sm:$0xf] }
  0x9b   : > { %v1896_v35 = vsel %vm16079_vm5, %v1891_v19, %v1895_v4  ;;  %v1929_v39 = vrot.slane %v1927_v32, 5  ;;  %v13445_v12 = vrot.slane %v2690_v34, 11  ;;  %v2698_v40 = vshll.u32 %v2528_v18, 16  ;;  %v1717_v16 = vld [vmem:[#allocation2 + $0x9c] sm:$0x1] }
  0x9c   : > { %v1906_v38 = vsel %vm16079_vm5, %v1901_v27, %v1905_v14  ;;  %v1915_v17 = vrot.slane %v1914_v25, 4  ;;  %v1924_v33 = vor.u32 %v1923_v36, %v1919_v29  ;;  %v2697_v42 = vrot.slane %v2695_v37, 7  ;;  %v2533_v20 = vld [vmem:[#allocation2 + $0x90] sm:$0x8]  ;;  %v2534_v22 = vld [vmem:[#allocation2 + $0x94] sm:$0xf] }
  0x9d   : > { %v13421_v41 = vcombine.low %v1896_v35, %v1906_v38  ;;  %v2704_v43 = vshrl.u32 %v2529_v24, 16  ;;  %v2707_v44 = vshll.u32 %v2529_v24, 16  ;;  %v2712_v46 = vshrl.u32 %v2530_v26, 16 }
  0x9e   : > { %v2717_v47 = vshrl.u32 %v2531_v21, 16  ;;  %v1920_v49 = vsel %vm16079_vm5, %v1915_v17, %v1919_v29  ;;  %v1925_v50 = vrot.slane %v1924_v33, 4  ;;  %v2700_v51 = vor.u32 %v2698_v40, %v2697_v42  ;;  %v2535_v33 = vld [vmem:[#allocation2 + $0x98] sm:$0xf] }
  0x9f   : > { %14763 = vmatprep.mubr.bf16.mxu0 %v13421_v41  ;;  %v2702_v52 = vrot.slane %v2697_v42, 4  ;;  %v2706_v54 = vrot.slane %v2704_v43, 7  ;;  %v13446_v30 = vrot.slane %v2712_v46, 11  ;;  %v2720_v56 = vshll.u32 %v2531_v21, 16 }
  0xa0   : > { %v2719_v55 = vrot.slane %v2717_v47, 7  ;;  %v1930_v58 = vsel %vm16079_vm5, %v1925_v50, %v1929_v39  ;;  %v2701_v59 = vsel %vm15873_vm2, %v13445_v12, %v2700_v51  ;;  %v2726_v60 = vshrl.u32 %v2532_v45, 16  ;;  %v2537_v50 = vld [vmem:[#allocation2 + $0xa4] sm:$0xf] }
  0xa1   : > { %v2729_v61 = vshll.u32 %v2532_v45, 16  ;;  %v13422_v63 = vcombine.low %v1920_v49, %v1930_v58  ;;  %v2709_v0 = vor.u32 %v2707_v44, %v2706_v54  ;;  %v1932_v7 = vshrl.u32 %v1712_v53, 16  ;;  %v2536_v49 = vld [vmem:[#allocation2 + $0xa0] sm:$0x8] }
  0xa2   : > { %v2722_v1 = vor.u32 %v2720_v56, %v2719_v55  ;;  %v2724_v2 = vrot.slane %v2719_v55, 4  ;;  %v2728_v4 = vrot.slane %v2726_v60, 7  ;;  %v1935_v8 = vshll.u32 %v1712_v53, 16 }
  0xa3   : > { %v1941_v9 = vshll.u32 %v1713_v57, 16  ;;  %14764 = vmatmul.mubr.bf16.gmra.mxu0 %v13422_v63  ;;  %v2710_v48 = vsel %vm15873_vm2, %v2702_v52, %v2709_v0  ;;  %v1945_v3 = vshrl.u32 %v1713_v57, 16  ;;  %v1951_v13 = vshll.u32 %v1714_v62, 16  ;;  %v1718_v63 = vld [vmem:[#allocation2 + $0xa4] sm:$0xf] }
  0xa4   : > { %v2723_v11 = vsel %vm15873_vm2, %v13446_v30, %v2722_v1  ;;  %v13477_v14 = vcombine.low %v2701_v59, %v2710_v48  ;;  %v2731_v5 = vor.u32 %v2729_v61, %v2728_v4  ;;  %v1934_v18 = vrot.slane %v1932_v7, 4  ;;  %v2538_v30 = vld [vmem:[#allocation2 + $0xa8] sm:$0xf] }
  0xa5   : > { %v1937_v19 = vrot.slane %v1935_v8, 5  ;;  %v1943_v23 = vrot.slane %v1941_v9, 5  ;;  %v1947_v24 = vrot.slane %v1945_v3, 4  ;;  %v1953_v26 = vrot.slane %v1951_v13, 5  ;;  %v1719_v7 = vld [vmem:[#allocation2 + $0xa8] sm:$0xf] }
  0xa6   : > { %v1956_v27 = vshrl.u32 %v1715_v10, 16  ;;  %14811 = vmatprep.mubr.bf16.mxu1 %v13477_v14  ;;  %v2732_v29 = vsel %vm15873_vm2, %v2724_v2, %v2731_v5  ;;  %v1959_v34 = vshll.u32 %v1715_v10, 16  ;;  %v1965_v21 = vshll.u32 %v1716_v15, 16  ;;  %v1721_v14 = vld [vmem:[#allocation2 + $0xb4] sm:$0xf] }
  0xa7   : > { %v1938_v32 = vor.u32 %v1937_v19, %v1934_v18  ;;  %v13478_v35 = vcombine.low %v2723_v11, %v2732_v29  ;;  %v1948_v25 = vor.u32 %v1947_v24, %v1943_v23  ;;  %v1969_v37 = vshrl.u32 %v1716_v15, 16  ;;  %v1720_v11 = vld [vmem:[#allocation2 + $0xac] sm:$0x1] }
  0xa8   : > { %v1958_v36 = vrot.slane %v1956_v27, 4  ;;  %v1961_v39 = vrot.slane %v1959_v34, 5  ;;  %v1967_v12 = vrot.slane %v1965_v21, 5  ;;  %v1975_v40 = vshll.u32 %v1717_v16, 16 }
  0xa9   : > { %v1939_v38 = vrot.slane %v1938_v32, 4  ;;  %14812 = vmatmul.mubr.bf16.gmra.mxu1 %v13478_v35  ;;  %v1949_v41 = vrot.slane %v1948_v25, 4  ;;  %v1971_v17 = vrot.slane %v1969_v37, 4  ;;  %v2734_v42 = vshrl.u32 %v2533_v20, 16  ;;  %v1723_v35 = vld [vmem:[#allocation2 + $0xbc] sm:$0x1] }
  0xaa   : > { %v2739_v43 = vshrl.u32 %v2534_v22, 16  ;;  %v1962_v45 = vor.u32 %v1961_v39, %v1958_v36  ;;  %v1977_v46 = vrot.slane %v1975_v40, 5  ;;  %v2742_v47 = vshll.u32 %v2534_v22, 16  ;;  %v1722_v22 = vld [vmem:[#allocation2 + $0xb8] sm:$0xf] }
  0xab   : > { %v1944_v44 = vsel %vm16079_vm5, %v1939_v38, %v1943_v23  ;;  %v1954_v51 = vsel %vm16079_vm5, %v1949_v41, %v1953_v26  ;;  %v1972_v52 = vor.u32 %v1971_v17, %v1967_v12  ;;  %v13447_v53 = vrot.slane %v2734_v42, 11  ;;  %v2539_v25 = vld [vmem:[#allocation2 + $0xb0] sm:$0x8] }
  0xac   : > { %v2741_v54 = vrot.slane %v2739_v43, 7  ;;  %v13423_v55 = vcombine.low %v1944_v44, %v1954_v51  ;;  %v1963_v56 = vrot.slane %v1962_v45, 4  ;;  %v2748_v57 = vshrl.u32 %v2535_v33, 16  ;;  %v2540_v45 = vld [vmem:[#allocation2 + $0xb4] sm:$0xf] }
  0xad   : > { %v2751_v58 = vshll.u32 %v2535_v33, 16  ;;  %v1973_v59 = vrot.slane %v1972_v52, 4  ;;  %v2756_v62 = vshrl.u32 %v2536_v49, 16  ;;  %v2761_v2 = vshrl.u32 %v2537_v50, 16 }
  0xae   : > { %v2744_v60 = vor.u32 %v2742_v47, %v2741_v54  ;;  %v2746_v61 = vrot.slane %v2741_v54, 4  ;;  %14767 = vmatprep.mubr.bf16.mxu0 %v13423_v55  ;;  %v1968_v0 = vsel %vm16079_vm5, %v1963_v56, %v1967_v12  ;;  %v2750_v1 = vrot.slane %v2748_v57, 7  ;;  %v2541_v54 = vld [vmem:[#allocation2 + $0xb8] sm:$0xf] }
  0xaf   : > { %v2764_v4 = vshll.u32 %v2537_v50, 16  ;;  %v1978_v8 = vsel %vm16079_vm5, %v1973_v59, %v1977_v46  ;;  %v13448_v10 = vrot.slane %v2756_v62, 11  ;;  %v2770_v48 = vshrl.u32 %v2538_v30, 16  ;;  %v2542_v59 = vld [vmem:[#allocation2 + $0xc0] sm:$0x8] }
  0xb0   : > { %v2745_v9 = vsel %vm15873_vm2, %v13447_v53, %v2744_v60  ;;  %v13424_v3 = vcombine.low %v1968_v0, %v1978_v8  ;;  %v2753_v13 = vor.u32 %v2751_v58, %v2750_v1  ;;  %v2763_v15 = vrot.slane %v2761_v2, 7  ;;  %v2543_v60 = vld [vmem:[#allocation2 + $0xc4] sm:$0xf]  ;;  %v2544_v1 = vld [vmem:[#allocation2 + $0xc8] sm:$0xf] }
  0xb1   : > { %v2773_v16 = vshll.u32 %v2538_v30, 16  ;;  %v2772_v5 = vrot.slane %v2770_v48, 7  ;;  %v1980_v18 = vshrl.u32 %v1718_v63, 16  ;;  %v1983_v19 = vshll.u32 %v1718_v63, 16 }
  0xb2   : > { %v1989_v20 = vshll.u32 %v1719_v7, 16  ;;  %14768 = vmatmul.mubr.bf16.gmra.mxu0 %v13424_v3  ;;  %v2754_v23 = vsel %vm15873_vm2, %v2746_v61, %v2753_v13  ;;  %v2766_v24 = vor.u32 %v2764_v4, %v2763_v15  ;;  %v2768_v26 = vrot.slane %v2763_v15, 4  ;;  %v1724_v3 = vld [vmem:[#allocation2 + $0xc4] sm:$0xf] }
  0xb3   : > { %v1993_v27 = vshrl.u32 %v1719_v7, 16  ;;  %v13479_v29 = vcombine.low %v2745_v9, %v2754_v23  ;;  %v2775_v32 = vor.u32 %v2773_v16, %v2772_v5  ;;  %v1982_v34 = vrot.slane %v1980_v18, 4 }
  0xb4   : > { %v1985_v21 = vrot.slane %v1983_v19, 5  ;;  %v2767_v36 = vsel %vm15873_vm2, %v13448_v10, %v2766_v24  ;;  %v1991_v37 = vrot.slane %v1989_v20, 5  ;;  %v1999_v39 = vshll.u32 %v1720_v11, 16 }
  0xb5   : > { %v1995_v38 = vrot.slane %v1993_v27, 4  ;;  %14815 = vmatprep.mubr.bf16.mxu1 %v13479_v29  ;;  %v2776_v12 = vsel %vm15873_vm2, %v2768_v26, %v2775_v32  ;;  %v2004_v41 = vshrl.u32 %v1721_v14, 16  ;;  %v2007_v17 = vshll.u32 %v1721_v14, 16  ;;  %v1726_v29 = vld [vmem:[#allocation2 + $0xcc] sm:$0x1] }
  0xb6   : > { %v1986_v40 = vor.u32 %v1985_v21, %v1982_v34  ;;  %v13480_v33 = vcombine.low %v2767_v36, %v2776_v12  ;;  %v2001_v43 = vrot.slane %v1999_v39, 5  ;;  %v2013_v44 = vshll.u32 %v1722_v22, 16  ;;  %v1728_v12 = vld [vmem:[#allocation2 + $0xd8] sm:$0xf] }
  0xb7   : > { %v1996_v42 = vor.u32 %v1995_v38, %v1991_v37  ;;  %v2006_v47 = vrot.slane %v2004_v41, 4  ;;  %v2009_v49 = vrot.slane %v2007_v17, 5  ;;  %v2017_v50 = vshrl.u32 %v1722_v22, 16  ;;  %v1725_v22 = vld [vmem:[#allocation2 + $0xc8] sm:$0xf] }
  0xb8   : > { %v1987_v46 = vrot.slane %v1986_v40, 4  ;;  %14816 = vmatmul.mubr.bf16.gmra.mxu1 %v13480_v33  ;;  %v2015_v52 = vrot.slane %v2013_v44, 5  ;;  %v2023_v53 = vshll.u32 %v1723_v35, 16  ;;  %v2778_v30 = vshrl.u32 %v2539_v25, 16  ;;  %v1727_v25 = vld [vmem:[#allocation2 + $0xd4] sm:$0xf] }
  0xb9   : > { %v1997_v51 = vrot.slane %v1996_v42, 4  ;;  %v2010_v56 = vor.u32 %v2009_v49, %v2006_v47  ;;  %v2019_v57 = vrot.slane %v2017_v50, 4  ;;  %v2783_v58 = vshrl.u32 %v2540_v45, 16  ;;  %v1729_v42 = vld [vmem:[#allocation2 + $0xdc] sm:$0x1] }
  0xba   : > { %v1992_v55 = vsel %vm16079_vm5, %v1987_v46, %v1991_v37  ;;  %v2025_v62 = vrot.slane %v2023_v53, 5  ;;  %v13449_v63 = vrot.slane %v2778_v30, 11  ;;  %v2786_v0 = vshll.u32 %v2540_v45, 16  ;;  %v2545_v47 = vld [vmem:[#allocation2 + $0xd0] sm:$0x8] }
  0xbb   : > { %v2002_v61 = vsel %vm16079_vm5, %v1997_v51, %v2001_v43  ;;  %v2011_v4 = vrot.slane %v2010_v56, 4  ;;  %v2020_v7 = vor.u32 %v2019_v57, %v2015_v52  ;;  %v2785_v8 = vrot.slane %v2783_v58, 7  ;;  %v2546_v56 = vld [vmem:[#allocation2 + $0xd4] sm:$0xf] }
  0xbc   : > { %v13425_v2 = vcombine.low %v1992_v55, %v2002_v61  ;;  %v2792_v9 = vshrl.u32 %v2541_v54, 16  ;;  %v2795_v10 = vshll.u32 %v2541_v54, 16  ;;  %v2800_v48 = vshrl.u32 %v2542_v59, 16 }
  0xbd   : > { %v2805_v11 = vshrl.u32 %v2543_v60, 16  ;;  %v2016_v13 = vsel %vm16079_vm5, %v2011_v4, %v2015_v52  ;;  %v2021_v15 = vrot.slane %v2020_v7, 4  ;;  %v2788_v16 = vor.u32 %v2786_v0, %v2785_v8 }
  0xbe   : > { %14771 = vmatprep.mubr.bf16.mxu0 %v13425_v2  ;;  %v2790_v14 = vrot.slane %v2785_v8, 4  ;;  %v2794_v5 = vrot.slane %v2792_v9, 7  ;;  %v13450_v18 = vrot.slane %v2800_v48, 11  ;;  %v2808_v20 = vshll.u32 %v2543_v60, 16  ;;  %v2548_v9 = vld [vmem:[#allocation2 + $0xe0] sm:$0x8] }
  0xbf   : > { %v2807_v19 = vrot.slane %v2805_v11, 7  ;;  %v2026_v23 = vsel %vm16079_vm5, %v2021_v15, %v2025_v62  ;;  %v2789_v24 = vsel %vm15873_vm2, %v13449_v63, %v2788_v16  ;;  %v2814_v26 = vshrl.u32 %v2544_v1, 16 }
  0xc0   : > { %v2817_v27 = vshll.u32 %v2544_v1, 16  ;;  %v13426_v32 = vcombine.low %v2016_v13, %v2026_v23  ;;  %v2797_v34 = vor.u32 %v2795_v10, %v2794_v5  ;;  %v2028_v37 = vshrl.u32 %v1724_v3, 16  ;;  %v2547_v1 = vld [vmem:[#allocation2 + $0xd8] sm:$0xf]  ;;  %v2549_v13 = vld [vmem:[#allocation2 + $0xe4] sm:$0xf] }
  0xc1   : > { %v2810_v21 = vor.u32 %v2808_v20, %v2807_v19  ;;  %v2812_v35 = vrot.slane %v2807_v19, 4  ;;  %v2816_v36 = vrot.slane %v2814_v26, 7  ;;  %v2031_v38 = vshll.u32 %v1724_v3, 16  ;;  %v1731_v26 = vld [vmem:[#allocation2 + $0xe8] sm:$0xf] }
  0xc2   : > { %v2037_v39 = vshll.u32 %v1725_v22, 16  ;;  %14772 = vmatmul.mubr.bf16.gmra.mxu0 %v13426_v32  ;;  %v2798_v40 = vsel %vm15873_vm2, %v2790_v14, %v2797_v34  ;;  %v2041_v17 = vshrl.u32 %v1725_v22, 16  ;;  %v2047_v33 = vshll.u32 %v1726_v29, 16 }
  0xc3   : > { %v2811_v41 = vsel %vm15873_vm2, %v13450_v18, %v2810_v21  ;;  %v13481_v43 = vcombine.low %v2789_v24, %v2798_v40  ;;  %v2819_v44 = vor.u32 %v2817_v27, %v2816_v36  ;;  %v2030_v45 = vrot.slane %v2028_v37, 4  ;;  %v2550_v18 = vld [vmem:[#allocation2 + $0xe8] sm:$0xf]  ;;  %v1730_v24 = vld [vmem:[#allocation2 + $0xe4] sm:$0xf] }
  0xc4   : > { %v2033_v46 = vrot.slane %v2031_v38, 5  ;;  %v2039_v49 = vrot.slane %v2037_v39, 5  ;;  %v2043_v50 = vrot.slane %v2041_v17, 4  ;;  %v2049_v51 = vrot.slane %v2047_v33, 5 }
  0xc5   : > { %v2052_v52 = vshrl.u32 %v1727_v25, 16  ;;  %14819 = vmatprep.mubr.bf16.mxu1 %v13481_v43  ;;  %v2820_v53 = vsel %vm15873_vm2, %v2812_v35, %v2819_v44  ;;  %v2055_v30 = vshll.u32 %v1727_v25, 16  ;;  %v2061_v55 = vshll.u32 %v1728_v12, 16  ;;  %v1732_v43 = vld [vmem:[#allocation2 + $0xec] sm:$0x1] }
  0xc6   : > { %v2034_v54 = vor.u32 %v2033_v46, %v2030_v45  ;;  %v13482_v57 = vcombine.low %v2811_v41, %v2820_v53  ;;  %v2044_v58 = vor.u32 %v2043_v50, %v2039_v49  ;;  %v2065_v60 = vshrl.u32 %v1728_v12, 16  ;;  %v1734_v53 = vld [vmem:[#allocation2 + $0xf8] sm:$0xf] }
  0xc7   : > { %v2054_v59 = vrot.slane %v2052_v52, 4  ;;  %v2057_v62 = vrot.slane %v2055_v30, 5  ;;  %v2063_v63 = vrot.slane %v2061_v55, 5  ;;  %v2071_v0 = vshll.u32 %v1729_v42, 16  ;;  %v1733_v52 = vld [vmem:[#allocation2 + $0xf4] sm:$0xf] }
  0xc8   : > { %v2035_v61 = vrot.slane %v2034_v54, 4  ;;  %14820 = vmatmul.mubr.bf16.gmra.mxu1 %v13482_v57  ;;  %v2045_v2 = vrot.slane %v2044_v58, 4  ;;  %v2067_v4 = vrot.slane %v2065_v60, 4  ;;  %v2822_v7 = vshrl.u32 %v2545_v47, 16  ;;  %v1735_v57 = vld [vmem:[#allocation2 + $0xfc] sm:$0x1] }
  0xc9   : > { %v2827_v8 = vshrl.u32 %v2546_v56, 16  ;;  %v2058_v48 = vor.u32 %v2057_v62, %v2054_v59  ;;  %v2073_v11 = vrot.slane %v2071_v0, 5  ;;  %v2830_v3 = vshll.u32 %v2546_v56, 16  ;;  %v2551_v58 = vld [vmem:[#allocation2 + $0xf0] sm:$0x8] }
  0xca   : > { %v2040_v10 = vsel %vm16079_vm5, %v2035_v61, %v2039_v49  ;;  %v2050_v15 = vsel %vm16079_vm5, %v2045_v2, %v2049_v51  ;;  %v2068_v16 = vor.u32 %v2067_v4, %v2063_v63  ;;  %v13451_v14 = vrot.slane %v2822_v7, 11 }
  0xcb   : > { %v2829_v5 = vrot.slane %v2827_v8, 7  ;;  %v13427_v19 = vcombine.low %v2040_v10, %v2050_v15  ;;  %v2059_v20 = vrot.slane %v2058_v48, 4  ;;  %v2836_v22 = vshrl.u32 %v2547_v1, 16  ;;  %v2552_v10 = vld [vmem:[#allocation2 + $0xf4] sm:$0xf] }
  0xcc   : > { %v2839_v23 = vshll.u32 %v2547_v1, 16  ;;  %v2069_v27 = vrot.slane %v2068_v16, 4  ;;  %v2844_v34 = vshrl.u32 %v2548_v9, 16  ;;  %v2849_v25 = vshrl.u32 %v2549_v13, 16  ;;  %v352_v15 = vld [vmem:[%s15861_s9 + $0xf0] sm:$0xff]  ;;  %v353_v16 = vld [vmem:[%s15861_s9 + $0xf8] sm:$0xff] }
  0xcd   : > { %v2832_v29 = vor.u32 %v2830_v3, %v2829_v5  ;;  %v2834_v32 = vrot.slane %v2829_v5, 4  ;;  %14775 = vmatprep.mubr.bf16.mxu0 %v13427_v19  ;;  %v2064_v21 = vsel %vm16079_vm5, %v2059_v20, %v2063_v63  ;;  %v2838_v35 = vrot.slane %v2836_v22, 7  ;;  %v2553_v19 = vld [vmem:[#allocation2 + $0xf8] sm:$0xf] }
  0xce   : > { %v2852_v36 = vshll.u32 %v2549_v13, 16  ;;  %v2074_v37 = vsel %vm16079_vm5, %v2069_v27, %v2073_v11  ;;  %v13452_v39 = vrot.slane %v2844_v34, 11  ;;  %v2858_v12 = vshrl.u32 %v2550_v18, 16  ;;  %v2554_v27 = vld [vmem:[#allocation2 + $0x100] sm:$0x8] }
  0xcf   : > { %v2833_v38 = vsel %vm15873_vm2, %v13451_v14, %v2832_v29  ;;  %v13428_v40 = vcombine.low %v2064_v21, %v2074_v37  ;;  %v2841_v41 = vor.u32 %v2839_v23, %v2838_v35  ;;  %v2851_v17 = vrot.slane %v2849_v25, 7  ;;  %v3745_v29 = vld [vmem:[#allocation2 + $0x14] sm:$0xf]  ;;  %v3746_v25 = vld [vmem:[#allocation2 + $0x18] sm:$0xf] }
  0xd0   : > { %v2861_v33 = vshll.u32 %v2550_v18, 16  ;;  %v2860_v42 = vrot.slane %v2858_v12, 7  ;;  %v2076_v44 = vshrl.u32 %v1730_v24, 16  ;;  %v2079_v45 = vshll.u32 %v1730_v24, 16 }
  0xd1   : > { %v2085_v46 = vshll.u32 %v1731_v26, 16  ;;  %14776 = vmatmul.mubr.bf16.gmra.mxu0 %v13428_v40  ;;  %v2842_v47 = vsel %vm15873_vm2, %v2834_v32, %v2841_v41  ;;  %v2854_v49 = vor.u32 %v2852_v36, %v2851_v17  ;;  %v2856_v50 = vrot.slane %v2851_v17, 4  ;;  %v16260_v36 = vld [vmem:[%s19354_s1 + $0x1f8] sm:$0xff]  }
  0xd2   : > { %v2089_v51 = vshrl.u32 %v1731_v26, 16  ;;  %v13483_v54 = vcombine.low %v2833_v38, %v2842_v47  ;;  %v2863_v30 = vor.u32 %v2861_v33, %v2860_v42  ;;  %v2078_v55 = vrot.slane %v2076_v44, 4  ;;  %v3747_v42 = vld [vmem:[#allocation2 + $0x1c] sm:$0x1]  ;;  %14975 = vmatprep.subr.bf16.mxu1 %v16260_v36  ;;  %v15576_v47 = vld [vmem:[#allocation2 + $0x14] sm:$0xff]  }
  0xd3   : > { %v2081_v56 = vrot.slane %v2079_v45, 5  ;;  %v2855_v59 = vsel %vm15873_vm2, %v13452_v39, %v2854_v49  ;;  %v2087_v60 = vrot.slane %v2085_v46, 5  ;;  %v2095_v62 = vshll.u32 %v1732_v43, 16  ;;  %v3748_v49 = vld [vmem:[#allocation2 + $0x24] sm:$0xf] }
  0xd4   : > { %v2091_v61 = vrot.slane %v2089_v51, 4  ;;  %14823 = vmatprep.mubr.bf16.mxu1 %v13483_v54  ;;  %v2864_v63 = vsel %vm15873_vm2, %v2856_v50, %v2863_v30  ;;  %v2100_v1 = vshrl.u32 %v1733_v52, 16  ;;  %v2103_v2 = vshll.u32 %v1733_v52, 16  ;;  %v3749_v50 = vld [vmem:[#allocation2 + $0x28] sm:$0xf] }
  0xd5   : > { %v2082_v0 = vor.u32 %v2081_v56, %v2078_v55  ;;  %v13484_v4 = vcombine.low %v2855_v59, %v2864_v63  ;;  %v2097_v8 = vrot.slane %v2095_v62, 5  ;;  %v2109_v9 = vshll.u32 %v1734_v53, 16 }
  0xd6   : > { %v2092_v7 = vor.u32 %v2091_v61, %v2087_v60  ;;  %v2102_v11 = vrot.slane %v2100_v1, 4  ;;  %v2105_v3 = vrot.slane %v2103_v2, 5  ;;  %v2113_v13 = vshrl.u32 %v1734_v53, 16 }
  0xd7   : > { %v2083_v48 = vrot.slane %v2082_v0, 4  ;;  %14824 = vmatmul.mubr.bf16.gmra.mxu1 %v13484_v4  ;;  %v2111_v5 = vrot.slane %v2109_v9, 5  ;;  %v2119_v18 = vshll.u32 %v1735_v57, 16  ;;  %v2866_v20 = vshrl.u32 %v2551_v58, 16 }
  0xd8   : > { %v2093_v14 = vrot.slane %v2092_v7, 4  ;;  %v2106_v23 = vor.u32 %v2105_v3, %v2102_v11  ;;  %v2115_v24 = vrot.slane %v2113_v13, 4  ;;  %v2871_v26 = vshrl.u32 %v2552_v10, 16  ;;  %v15577_v3 = vld [vmem:[#allocation2 + $0x24] sm:$0xff]   ;;  %v3750_v13 = vld [vmem:[#allocation2 + $0x2c] sm:$0x1] }
  0xd9   : > { %v2088_v22 = vsel %vm16079_vm5, %v2083_v48, %v2087_v60  ;;  %v2121_v34 = vrot.slane %v2119_v18, 5  ;;  %v13453_v21 = vrot.slane %v2866_v20, 11  ;;  %v2874_v35 = vshll.u32 %v2552_v10, 16 }
  0xda   : > { %v2098_v32 = vsel %vm16079_vm5, %v2093_v14, %v2097_v8  ;;  %v2107_v38 = vrot.slane %v2106_v23, 4  ;;  %v2116_v39 = vor.u32 %v2115_v24, %v2111_v5  ;;  %v2873_v12 = vrot.slane %v2871_v26, 7 }
  0xdb   : > { %v13429_v37 = vcombine.low %v2088_v22, %v2098_v32  ;;  %v2880_v40 = vshrl.u32 %v2553_v19, 16  ;;  %v2883_v41 = vshll.u32 %v2553_v19, 16  ;;  %v14173_v17 = vpack.c.bf16 %v352_v15, %v352_v15 }
  0xdc   : > { %v14174_v33 = vpack.c.bf16 %v353_v16, %v353_v16  ;;  %v2112_v43 = vsel %vm16079_vm5, %v2107_v38, %v2111_v5  ;;  %v2117_v44 = vrot.slane %v2116_v39, 4  ;;  %v2876_v45 = vor.u32 %v2874_v35, %v2873_v12 }
  0xdd   : > { %14779 = vmatprep.mubr.bf16.mxu0 %v13429_v37  ;;  %v2878_v46 = vrot.slane %v2873_v12, 4  ;;  %v2882_v51 = vrot.slane %v2880_v40, 7  ;;  %512 = vst [vmem:[#allocation2 + $0x104] sm:$0xf] %v14173_v17  ;;  %v2888_v52 = vshrl.u32 %v2554_v27, 16  ;;  %v3794_v53 = vshrl.u32 %v3745_v29, 16 }
  0xde   : > { %513 = vst [vmem:[#allocation2 + $0x108] sm:$0xf] %v14174_v33  ;;  %v3797_v54 = vshll.u32 %v3745_v29, 16  ;;  %v2122_v30 = vsel %vm16079_vm5, %v2117_v44, %v2121_v34  ;;  %v2877_v55 = vsel %vm15873_vm2, %v13453_v21, %v2876_v45  ;;  %v3803_v56 = vshll.u32 %v3746_v25, 16  ;;  %v3751_v29 = vld [vmem:[#allocation2 + $0x34] sm:$0xf] }
  0xdf   : > { %v3807_v57 = vshrl.u32 %v3746_v25, 16  ;;  %v13430_v58 = vcombine.low %v2112_v43, %v2122_v30  ;;  %v2885_v59 = vor.u32 %v2883_v41, %v2882_v51  ;;  %v16269_v60 = vrot.slane %v2888_v52, 11  ;;  %v15579_v25 = vld [vmem:[#allocation2 + $0x34] sm:$0xff]   ;;  %v3753_v17 = vld [vmem:[#allocation2 + $0x3c] sm:$0x1] }
  0xe0   : > { %v3796_v61 = vrot.slane %v3794_v53, 4  ;;  %v3799_v62 = vrot.slane %v3797_v54, 5  ;;  %v3805_v63 = vrot.slane %v3803_v56, 5  ;;  %v3813_v1 = vshll.u32 %v3747_v42, 16  ;;  %v3752_v37 = vld [vmem:[#allocation2 + $0x38] sm:$0xf] }
  0xe1   : > { %v3809_v0 = vrot.slane %v3807_v57, 4  ;;  %14780 = vmatmul.mubr.bf16.gmra.mxu0 %v13430_v58  ;;  %v2886_v2 = vsel %vm15873_vm2, %v2878_v46, %v2885_v59  ;;  %v3818_v4 = vshrl.u32 %v3748_v49, 16  ;;  %v3821_v7 = vshll.u32 %v3748_v49, 16  ;;  %v15581_v41 = vld [vmem:[%s19354_s1 + $0x1b0] sm:$0xff]   ;;  %v3754_v45 = vld [vmem:[#allocation2 + $0x44] sm:$0xf] }
  0xe2   : > { %v3827_v8 = vshll.u32 %v3749_v50, 16  ;;  %v13485_v9 = vcombine.low %v2877_v55, %v2886_v2  ;;  %14847 = vmatprep.mubr.bf16.mxu0 %v15576_v47  ;;  %v3800_v10 = vor.u32 %v3799_v62, %v3796_v61  ;;  %v3815_v11 = vrot.slane %v3813_v1, 5  ;;  %v3755_v51 = vld [vmem:[#allocation2 + $0x48] sm:$0xf]  ;;  %v3756_v55 = vld [vmem:[#allocation2 + $0x4c] sm:$0x1] }
  0xe3   : > { %v3810_v48 = vor.u32 %v3809_v0, %v3805_v63  ;;  %v3820_v15 = vrot.slane %v3818_v4, 4  ;;  %v3823_v16 = vrot.slane %v3821_v7, 5  ;;  %v3831_v5 = vshrl.u32 %v3749_v50, 16  ;;  %v15584_v56 = vld [vmem:[%s19354_s1 + $0x1a8] sm:$0xff]  }
  0xe4   : > { %v3829_v14 = vrot.slane %v3827_v8, 5  ;;  %14827 = vmatprep.mubr.bf16.mxu1 %v13485_v9  ;;  %v2555_v18 = vld [vmem:[#allocation2 + $0x104] sm:$0xf]  ;;  %v3801_v20 = vrot.slane %v3800_v10, 4  ;;  %v3837_v40 = vshll.u32 %v3750_v13, 16  ;;  %v3842_v43 = vshrl.u32 %v3751_v29, 16 }
  0xe5   : > { %v2556_v19 = vld [vmem:[#allocation2 + $0x108] sm:$0xf]  ;;  %v3811_v22 = vrot.slane %v3810_v48, 4  ;;  %v2893_v23 = vshrl.u32 %v2555_v18, 16  ;;  %v2896_v24 = vshll.u32 %v2555_v18, 16  ;;  %v3824_v21 = vor.u32 %v3823_v16, %v3820_v15  ;;  %v15582_v15 = vld [vmem:[#allocation2 + $0x54] sm:$0xff]  }
  0xe6   : > { %v2902_v26 = vshrl.u32 %v2556_v19, 16  ;;  %v2905_v27 = vshll.u32 %v2556_v19, 16  ;;  %v3806_v32 = vsel %vm16079_vm5, %v3801_v20, %v3805_v63  ;;  %v3833_v35 = vrot.slane %v3831_v5, 4  ;;  %v15580_v7 = vld [vmem:[#allocation2 + $0x44] sm:$0xff]   ;;  %v3757_v10 = vld [vmem:[#allocation2 + $0x54] sm:$0xf] }
  0xe7   : > { %v3816_v34 = vsel %vm16079_vm5, %v3811_v22, %v3815_v11  ;;  %v2895_v38 = vrot.slane %v2893_v23, 7  ;;  %v3825_v33 = vrot.slane %v3824_v21, 4  ;;  %v3845_v44 = vshll.u32 %v3751_v29, 16  ;;  %v3758_v22 = vld [vmem:[#allocation2 + $0x58] sm:$0xf]  ;;  %v15587_v23 = vld [vmem:[%s19354_s1 + $0x1a0] sm:$0xff]  }
  0xe8   : > { %v2904_v39 = vrot.slane %v2902_v26, 7  ;;  %v13551_v12 = vcombine.low %v3806_v32, %v3816_v34  ;;  %v3834_v42 = vor.u32 %v3833_v35, %v3829_v14  ;;  %v3839_v50 = vrot.slane %v3837_v40, 5  ;;  %v3759_v29 = vld [vmem:[#allocation2 + $0x5c] sm:$0x1] }
  0xe9   : > { %v2898_v46 = vor.u32 %v2896_v24, %v2895_v38  ;;  %v2900_v47 = vrot.slane %v2895_v38, 4  ;;  %14848 = vmatmul.mubr.bf16.vlgmr.msra.gmra.mxu0 %v15577_v3  ;;  %v3830_v52 = vsel %vm16079_vm5, %v3825_v33, %v3829_v14  ;;  %v3844_v54 = vrot.slane %v3842_v43, 4  ;;  %v3761_v33 = vld [vmem:[#allocation2 + $0x68] sm:$0xf] }
  0xea   : > { %v2907_v49 = vor.u32 %v2905_v27, %v2904_v39  ;;  %14928 = vmatpush3.bf16.msra.mxu0 %v16194_v6  ;;  %v3835_v53 = vrot.slane %v3834_v42, 4  ;;  %14851 = vmatprep.mubr.bf16.mxu0 %v15579_v25  ;;  %v3847_v30 = vrot.slane %v3845_v44, 5  ;;  %v3851_v59 = vshll.u32 %v3752_v37, 16  ;;  %v3760_v39 = vld [vmem:[#allocation2 + $0x64] sm:$0xf]  ;;  %v15590_v42 = vld [vmem:[%s19354_s1 + $0x198] sm:$0xff]  }
  0xeb   : > { %v2899_v58 = vsel %vm15873_vm2, %v16269_v60, %v2898_v46  ;;  %14929 = vmatprep.subr.bf16.mxu0 %v15581_v41  ;;  %v3855_v61 = vshrl.u32 %v3752_v37, 16  ;;  %v3861_v1 = vshll.u32 %v3753_v17, 16  ;;  %v3866_v60 = vshrl.u32 %v3754_v45, 16 }
  0xec   : > { %v2908_v6 = vsel %vm15873_vm2, %v2900_v47, %v2907_v49  ;;  %v3840_v63 = vsel %vm16079_vm5, %v3835_v53, %v3839_v50  ;;  %v3848_v0 = vor.u32 %v3847_v30, %v3844_v54  ;;  %v3853_v8 = vrot.slane %v3851_v59, 5  ;;  %v15583_v47 = vld [vmem:[#allocation2 + $0x64] sm:$0xff]   ;;  %v3762_v30 = vld [vmem:[#allocation2 + $0x6c] sm:$0x1] }
  0xed   : > { %v16286_v57 = vpop.f32.mrf.mxu1  ;;  %v13486_v62 = vcombine.low %v2899_v58, %v2908_v6  ;;  %v16297_v4 = vcombine.low %v3830_v52, %v3840_v63  ;;  %v3857_v9 = vrot.slane %v3855_v61, 4  ;;  %v3863_v11 = vrot.slane %v3861_v1, 5  ;;  %v15592_v1 = vld [vmem:[%s19354_s1 + $0x1f0] sm:$0xff]  }
  0xee   : > { %v3849_v48 = vrot.slane %v3848_v0, 4  ;;  %14930 = vmatpush3.bf16.msra.mxu0 %v15581_v41  ;;  %v3869_v3 = vshll.u32 %v3754_v45, 16  ;;  %v3875_v13 = vshll.u32 %v3755_v51, 16  ;;  %v3868_v18 = vrot.slane %v3866_v60, 4  ;;  %v16325_v0 = vld [vmem:[#allocation2 + $0x78] sm:$0xf] }
  0xef   : > { %v16295_v2 = vpop.f32.mrf.mxu1  ;;  %14828 = vmatmul.mubr.bf16.gmra.mxu1 %v13486_v62  ;;  %v3858_v5 = vor.u32 %v3857_v9, %v3853_v8  ;;  %v3879_v19 = vshrl.u32 %v3755_v51, 16  ;;  %v3885_v20 = vshll.u32 %v3756_v55, 16  ;;  %14931 = vmatprep.subr.bf16.mxu0 %v15584_v56  ;;  %v3890_v32 = vshrl.u32 %v3757_v10, 16  ;;  %v15585_v55 = vld [vmem:[#allocation2 + $0x74] sm:$0xff]  }
  0xf0   : > { %14895 = vmatprep.mubr.bf16.mxu1 %v13551_v12  ;;  %v3854_v24 = vsel %vm16079_vm5, %v3849_v48, %v3853_v8  ;;  %v3871_v26 = vrot.slane %v3869_v3, 5  ;;  %v3877_v27 = vrot.slane %v3875_v13, 5  ;;  %v3893_v38 = vshll.u32 %v3757_v10, 16 }
  0xf1   : > { %v16301_v14 = vpop.f32.mrf.mxu1  ;;  %14852 = vmatmul.mubr.bf16.gmra.mxu0 %v15580_v7  ;;  %v3859_v35 = vrot.slane %v3858_v5, 4  ;;  %v3881_v25 = vrot.slane %v3879_v19, 4  ;;  %v3887_v37 = vrot.slane %v3885_v20, 5  ;;  %v3892_v40 = vrot.slane %v3890_v32, 4 }
  0xf2   : > { %v16299_v16 = vpop.f32.mrf.mxu0  ;;  %v3872_v12 = vor.u32 %v3871_v26, %v3868_v18  ;;  %14855 = vmatprep.mubr.bf16.mxu0 %v15582_v15  ;;  %v3899_v41 = vshll.u32 %v3758_v22, 16  ;;  %v3903_v17 = vshrl.u32 %v3758_v22, 16  ;;  %14932 = vmatpush3.bf16.msra.mxu0 %v15584_v56  ;;  %v3895_v49 = vrot.slane %v3893_v38, 5  ;;  %v3763_v56 = vld [vmem:[#allocation2 + $0x74] sm:$0xf] }
  0xf3   : > { %v16310_v21 = vpop.f32.mrf.mxu1  ;;  %v3864_v45 = vsel %vm16079_vm5, %v3859_v35, %v3863_v11  ;;  %v3882_v46 = vor.u32 %v3881_v25, %v3877_v27  ;;  %v3909_v50 = vshll.u32 %v3759_v29, 16  ;;  %14933 = vmatprep.subr.bf16.mxu0 %v15587_v23  ;;  %v3914_v63 = vshrl.u32 %v3760_v39, 16  ;;  %v3765_v22 = vld [vmem:[#allocation2 + $0x7c] sm:$0x1]  ;;  %v15596_v35 = vld [vmem:[%s19354_s1 + $0x1e8] sm:$0xff]  }
  0xf4   : > { %v16308_v34 = vpop.f32.mrf.mxu0  ;;  %19377 = vst [vmem:[#allocation6_spill] sm:$0xff] %v16310_v21  ;;  %v13553_v51 = vcombine.low %v3854_v24, %v3864_v45  ;;  %v3873_v52 = vrot.slane %v3872_v12, 4  ;;  %v3901_v53 = vrot.slane %v3899_v41, 5  ;;  %v3905_v54 = vrot.slane %v3903_v17, 4  ;;  %v15586_v45 = vld [vmem:[#allocation2 + $0x84] sm:$0xff]  }
  0xf5   : > { %v16317_v44 = vpop.f32.mrf.mxu1  ;;  %v3883_v59 = vrot.slane %v3882_v46, 4  ;;  %v3896_v61 = vor.u32 %v3895_v49, %v3892_v40  ;;  %v3911_v62 = vrot.slane %v3909_v50, 5  ;;  %v3917_v9 = vshll.u32 %v3760_v39, 16  ;;  %v3766_v39 = vld [vmem:[#allocation2 + $0x84] sm:$0xf]  ;;  %v15600_v49 = vld [vmem:[%s19354_s1 + $0x188] sm:$0xff]  }
  0xf6   : > { %v16315_v43 = vpop.f32.mrf.mxu0  ;;  %v3878_v7 = vsel %vm16079_vm5, %v3873_v52, %v3877_v27  ;;  %v3906_v8 = vor.u32 %v3905_v54, %v3901_v53  ;;  %v3923_v60 = vshll.u32 %v3761_v33, 16  ;;  %14934 = vmatpush3.bf16.msra.mxu0 %v15587_v23  ;;  %v3916_v13 = vrot.slane %v3914_v63, 4  ;;  %v3769_v54 = vld [vmem:[#allocation2 + $0x94] sm:$0xf] }
  0xf7   : > { %v16323_v6 = vpop.f32.mrf.mxu1  ;;  %14896 = vmatmul.mubr.bf16.vlgmr.msra.gmra.mxu1 %v16297_v4  ;;  %v3888_v11 = vsel %vm16079_vm5, %v3883_v59, %v3887_v37  ;;  %v3897_v3 = vrot.slane %v3896_v61, 4  ;;  %v3927_v15 = vshrl.u32 %v3761_v33, 16  ;;  %14935 = vmatprep.subr.bf16.mxu0 %v15590_v42  ;;  %v15595_v4 = vld [vmem:[%s19354_s1 + $0x190] sm:$0xff]   ;;  %v3919_v19 = vrot.slane %v3917_v9, 5 }
  0xf8   : > { %v16321_v58 = vpop.f32.mrf.mxu0  ;;  %14899 = vmatprep.mubr.bf16.mxu1 %v13553_v51  ;;  %v13554_v5 = vcombine.low %v3878_v7, %v3888_v11  ;;  %v3907_v18 = vrot.slane %v3906_v8, 4  ;;  %v3925_v20 = vrot.slane %v3923_v60, 5  ;;  %14976 = vmatpush3.bf16.msra.mxu1 %v16260_v36  ;;  %v3933_v29 = vshll.u32 %v3762_v30, 16  ;;  %v15588_v63 = vld [vmem:[#allocation2 + $0x94] sm:$0xff]   ;;  %v15597_v7 = vld [vmem:[%s19354_s1 + $0x1e0] sm:$0xff]  }
  0xf9   : > { %19378 = vst [vmem:[#allocation7_spill] sm:$0xff] %v16321_v58  ;;  %v16335_v48 = vpop.f32.mrf.mxu1  ;;  %14856 = vmatmul.mubr.bf16.gmra.mxu0 %v15583_v47  ;;  %v3902_v26 = vsel %vm16079_vm5, %v3897_v3, %v3901_v53  ;;  %v3929_v27 = vrot.slane %v3927_v15, 4  ;;  %v3938_v32 = vshrl.u32 %v3763_v56, 16  ;;  %14977 = vmatprep.subr.bf16.mxu1 %v15592_v1  ;;  %v3920_v36 = vor.u32 %v3919_v19, %v3916_v13  ;;  %v3767_v47 = vld [vmem:[#allocation2 + $0x88] sm:$0xf] }
  0xfa   : > { %v16333_v10 = vpop.f32.mrf.mxu0  ;;  %v3912_v25 = vsel %vm16079_vm5, %v3907_v18, %v3911_v62  ;;  %14859 = vmatprep.mubr.bf16.mxu0 %v15585_v55  ;;  %v3941_v37 = vshll.u32 %v3763_v56, 16  ;;  %v3947_v38 = vshll.u32 %v16325_v0, 16  ;;  %14936 = vmatpush3.bf16.msra.mxu0 %v15590_v42  ;;  %v3935_v33 = vrot.slane %v3933_v29, 5  ;;  %v3768_v53 = vld [vmem:[#allocation2 + $0x8c] sm:$0x1] }
  0xfb   : > { %v16345_v24 = vpop.f32.mrf.mxu1  ;;  %v13555_v41 = vcombine.low %v3902_v26, %v3912_v25  ;;  %v3930_v17 = vor.u32 %v3929_v27, %v3925_v20  ;;  %v3940_v46 = vrot.slane %v3938_v32, 4  ;;  %14937 = vmatprep.subr.bf16.mxu0 %v15595_v4  ;;  %v3921_v50 = vrot.slane %v3920_v36, 4  ;;  %v3770_v60 = vld [vmem:[#allocation2 + $0x98] sm:$0xf] }
  0xfc   : > { %v16343_v23 = vpop.f32.mrf.mxu0  ;;  %19379 = vst [vmem:[#allocation8_spill] sm:$0xff] %v16345_v24  ;;  %v3943_v51 = vrot.slane %v3941_v37, 5  ;;  %v16362_v52 = vrot.slane %v3947_v38, 5  ;;  %v3951_v42 = vshrl.u32 %v16325_v0, 16  ;;  %14978 = vmatpush3.bf16.msra.mxu1 %v15592_v1  ;;  %v3957_v59 = vshll.u32 %v3765_v22, 16 }
  0xfd   : > { %v16357_v40 = vpop.f32.mrf.mxu1  ;;  %v3931_v56 = vrot.slane %v3930_v17, 4  ;;  %v3962_v61 = vshrl.u32 %v3766_v39, 16  ;;  %v3965_v62 = vshll.u32 %v3766_v39, 16  ;;  %14979 = vmatprep.subr.bf16.mxu1 %v15596_v35  ;;  %v3926_v0 = vsel %vm16079_vm5, %v3921_v50, %v3925_v20  ;;  %v3771_v37 = vld [vmem:[#allocation2 + $0x9c] sm:$0x1] }
  0xfe   : > { %v16355_v12 = vpop.f32.mrf.mxu0  ;;  %v3944_v8 = vor.u32 %v3943_v51, %v3940_v46  ;;  %v3953_v1 = vrot.slane %v3951_v42, 4  ;;  %v3971_v9 = vshll.u32 %v3767_v47, 16  ;;  %14938 = vmatpush3.bf16.msra.mxu0 %v15595_v4  ;;  %v3959_v15 = vrot.slane %v3957_v59, 5  ;;  %v15601_v39 = vld [vmem:[%s19354_s1 + $0x1d8] sm:$0xff]   ;;  %v3772_v46 = vld [vmem:[#allocation2 + $0xa4] sm:$0xf] }
  0xff   : > { %v16367_v55 = vpop.f32.mrf.mxu1  ;;  %14900 = vmatmul.mubr.bf16.gmra.mxu1 %v13554_v5  ;;  %v3936_v13 = vsel %vm16079_vm5, %v3931_v56, %v3935_v33  ;;  %v3964_v18 = vrot.slane %v3962_v61, 4  ;;  %v3967_v19 = vrot.slane %v3965_v62, 5  ;;  %14939 = vmatprep.subr.bf16.mxu0 %v15600_v49  ;;  %v15605_v5 = vld [vmem:[%s19354_s1 + $0x180] sm:$0xff]   ;;  %v3975_v25 = vshrl.u32 %v3767_v47, 16  ;;  %v16403_v56 = vld [vmem:[%s19354_s1 + $0x238] sm:$0xff]  }
 0x100   : > { %v16365_v30 = vpop.f32.mrf.mxu0  ;;  %14903 = vmatprep.mubr.bf16.mxu1 %v13555_v41  ;;  %v13556_v20 = vcombine.low %v3926_v0, %v3936_v13  ;;  %v3945_v22 = vrot.slane %v3944_v8, 4  ;;  %v3954_v4 = vor.u32 %v3953_v1, %v16362_v52  ;;  %v16384_v26 = vrot.slane %v3971_v9, 5  ;;  %14980 = vmatpush3.bf16.msra.mxu1 %v15596_v35  ;;  %v3773_v61 = vld [vmem:[#allocation2 + $0xa8] sm:$0xf]  ;;  %v3774_v13 = vld [vmem:[#allocation2 + $0xac] sm:$0x1] }
 0x101   : > { %19380 = vst [vmem:[#allocation9_spill] sm:$0xff] %v16365_v30  ;;  %v16376_v3 = vpop.f32.mrf.mxu1  ;;  %14860 = vmatmul.mubr.bf16.gmra.mxu0 %v15586_v45  ;;  %v3968_v32 = vor.u32 %v3967_v19, %v3964_v18  ;;  %v3981_v36 = vshll.u32 %v3768_v53, 16  ;;  %v3986_v38 = vshrl.u32 %v3769_v54, 16  ;;  %14981 = vmatprep.subr.bf16.mxu1 %v15597_v7  ;;  %v3989_v17 = vshll.u32 %v3769_v54, 16  ;;  %v15589_v1 = vld [vmem:[#allocation2 + $0xa4] sm:$0xff]  }
 0x102   : > { %v16374_v11 = vpop.f32.mrf.mxu0  ;;  %v3950_v41 = vsel %vm16079_vm5, %v3945_v22, %v16362_v52  ;;  %v3955_v35 = vrot.slane %v3954_v4, 4  ;;  %14863 = vmatprep.mubr.bf16.mxu0 %v15588_v63  ;;  %v3995_v33 = vshll.u32 %v3770_v60, 16  ;;  %14940 = vmatpush3.bf16.msra.mxu0 %v15600_v49  ;;  %v3977_v51 = vrot.slane %v3975_v25, 4  ;;  %v15593_v4 = vld [vmem:[#allocation2 + $0xb4] sm:$0xff]   ;;  %v15599_v30 = vld [vmem:[#allocation2 + $0xe4] sm:$0xff]  }
 0x103   : > { %v16388_v29 = vpop.f32.mrf.mxu1  ;;  %v3969_v50 = vrot.slane %v3968_v32, 4  ;;  %v3983_v42 = vrot.slane %v3981_v36, 5  ;;  %v3988_v53 = vrot.slane %v3986_v38, 4  ;;  %14941 = vmatprep.subr.bf16.mxu0 %v15605_v5  ;;  %v3991_v54 = vrot.slane %v3989_v17, 5  ;;  %v3775_v32 = vld [vmem:[#allocation2 + $0xb4] sm:$0xf] }
 0x104   : > { %v16386_v27 = vpop.f32.mrf.mxu0  ;;  %19381 = vst [vmem:[#allocation10_spill] sm:$0xff] %v16388_v29  ;;  %v3960_v52 = vsel %vm16079_vm5, %v3955_v35, %v3959_v15  ;;  %v16407_v59 = vrot.slane %v3995_v33, 5  ;;  %v3999_v49 = vshrl.u32 %v3770_v60, 16  ;;  %14982 = vmatpush3.bf16.msra.mxu1 %v15597_v7  ;;  %v3978_v8 = vor.u32 %v3977_v51, %v16384_v26  ;;  %v15602_v15 = vld [vmem:[%s19354_s1 + $0x1d0] sm:$0xff]  }
 0x105   : > { %v16398_v47 = vpop.f32.mrf.mxu1  ;;  %v13557_v63 = vcombine.low %v3950_v41, %v3960_v52  ;;  %v3974_v0 = vsel %vm16079_vm5, %v3969_v50, %v16384_v26  ;;  %v4005_v9 = vshll.u32 %v3771_v37, 16  ;;  %14983 = vmatprep.subr.bf16.mxu1 %v15601_v39  ;;  %v3992_v7 = vor.u32 %v3991_v54, %v3988_v53  ;;  %v3776_v41 = vld [vmem:[#allocation2 + $0xb8] sm:$0xf]  ;;  %v15606_v52 = vld [vmem:[%s19354_s1 + $0x1c8] sm:$0xff]  }
 0x106   : > { %v16396_v45 = vpop.f32.mrf.mxu0  ;;  %v4001_v18 = vrot.slane %v3999_v49, 4  ;;  %v4010_v19 = vshrl.u32 %v3772_v46, 16  ;;  %v4013_v22 = vshll.u32 %v3772_v46, 16  ;;  %14942 = vmatpush3.bf16.msra.mxu0 %v15605_v5  ;;  %v3979_v26 = vrot.slane %v3978_v8, 4 }
 0x107   : > { %v16409_v62 = vpop.f32.mrf.mxu1  ;;  %14904 = vmatmul.mubr.bf16.gmra.mxu1 %v13556_v20  ;;  %v4007_v36 = vrot.slane %v4005_v9, 5  ;;  %v4019_v37 = vshll.u32 %v3773_v61, 16  ;;  %v4023_v38 = vshrl.u32 %v3773_v61, 16  ;;  %15023 = vmatprep.subr.bf16.mxu0 %v16403_v56  ;;  %v3993_v35 = vrot.slane %v3992_v7, 4  ;;  %v3777_v9 = vld [vmem:[#allocation2 + $0xbc] sm:$0x1] }
 0x108   : > { %v16418_v60 = vpop.f32.mrf.mxu0  ;;  %14907 = vmatprep.mubr.bf16.mxu1 %v13557_v63  ;;  %v4002_v20 = vor.u32 %v4001_v18, %v16407_v59  ;;  %v4012_v17 = vrot.slane %v4010_v19, 4  ;;  %v4015_v33 = vrot.slane %v4013_v22, 5  ;;  %14984 = vmatpush3.bf16.msra.mxu1 %v15601_v39  ;;  %v3984_v5 = vsel %vm16079_vm5, %v3979_v26, %v3983_v42  ;;  %v15594_v22 = vld [vmem:[#allocation2 + $0xc4] sm:$0xff]  }
 0x109   : > { %19382 = vst [vmem:[#allocation11_spill] sm:$0xff] %v16418_v60  ;;  %v16420_v25 = vpop.f32.mrf.mxu1  ;;  %14864 = vmatmul.mubr.bf16.gmra.mxu0 %v15589_v1  ;;  %v4021_v50 = vrot.slane %v4019_v37, 5  ;;  %v4025_v51 = vrot.slane %v4023_v38, 4  ;;  %v4029_v53 = vshll.u32 %v3774_v13, 16  ;;  %14985 = vmatprep.subr.bf16.mxu1 %v15602_v15  ;;  %v13558_v49 = vcombine.low %v3974_v0, %v3984_v5 }
 0x10a   : > { %v3998_v39 = vsel %vm16079_vm5, %v3993_v35, %v16407_v59  ;;  %v4003_v61 = vrot.slane %v4002_v20, 4  ;;  %v4016_v63 = vor.u32 %v4015_v33, %v4012_v17  ;;  %14867 = vmatprep.mubr.bf16.mxu0 %v15593_v4  ;;  %v4034_v13 = vshrl.u32 %v3775_v32, 16  ;;  %v3778_v59 = vld [vmem:[#allocation2 + $0xc4] sm:$0xf]  ;;  %v3779_v33 = vld [vmem:[#allocation2 + $0xc8] sm:$0xf] }
 0x10b   : > { %v16424_v46 = vpop.f32.mrf.mxu1  ;;  %v4026_v8 = vor.u32 %v4025_v51, %v4021_v50  ;;  %v4031_v1 = vrot.slane %v4029_v53, 5  ;;  %v4037_v7 = vshll.u32 %v3775_v32, 16  ;;  %v4043_v26 = vshll.u32 %v3776_v41, 16  ;;  %v15607_v32 = vld [vmem:[%s19354_s1 + $0x1c0] sm:$0xff]   ;;  %v3780_v53 = vld [vmem:[#allocation2 + $0xcc] sm:$0x1] }
 0x10c   : > { %19383 = vst [vmem:[#allocation12_spill] sm:$0xff] %v16424_v46  ;;  %v4008_v19 = vsel %vm16079_vm5, %v4003_v61, %v4007_v36  ;;  %v4017_v0 = vrot.slane %v4016_v63, 4  ;;  %v4047_v37 = vshrl.u32 %v3776_v41, 16  ;;  %14986 = vmatpush3.bf16.msra.mxu1 %v15602_v15  ;;  %v4036_v20 = vrot.slane %v4034_v13, 4  ;;  %v3782_v46 = vld [vmem:[#allocation2 + $0xd8] sm:$0xf] }
 0x10d   : > { %v16431_v54 = vpop.f32.mrf.mxu0  ;;  %v16436_v42 = vpop.f32.mrf.mxu1  ;;  %v13559_v4 = vcombine.low %v3998_v39, %v4008_v19  ;;  %v4027_v35 = vrot.slane %v4026_v8, 4  ;;  %v4039_v17 = vrot.slane %v4037_v7, 5  ;;  %14987 = vmatprep.subr.bf16.mxu1 %v15606_v52  ;;  %v4045_v41 = vrot.slane %v4043_v26, 5  ;;  %v15598_v39 = vld [vmem:[#allocation2 + $0xd4] sm:$0xff]  }
 0x10e   : > { %v4022_v36 = vsel %vm16079_vm5, %v4017_v0, %v4021_v50  ;;  %v4049_v15 = vrot.slane %v4047_v37, 4  ;;  %v4053_v51 = vshll.u32 %v3777_v9, 16  ;;  %v4058_v13 = vshrl.u32 %v3778_v59, 16  ;;  %v3781_v19 = vld [vmem:[#allocation2 + $0xd4] sm:$0xf] }
 0x10f   : > { %v16438_v18 = vpop.f32.mrf.mxu0  ;;  %v16442_v38 = vpop.f32.mrf.mxu1  ;;  %14908 = vmatmul.mubr.bf16.gmra.mxu1 %v13558_v49  ;;  %v4032_v63 = vsel %vm16079_vm5, %v4027_v35, %v4031_v1  ;;  %v4040_v8 = vor.u32 %v4039_v17, %v4036_v20  ;;  %v4061_v7 = vshll.u32 %v3778_v59, 16  ;;  %v4067_v26 = vshll.u32 %v3779_v33, 16  ;;  %v3783_v1 = vld [vmem:[#allocation2 + $0xdc] sm:$0x1]  ;;  %v3784_v35 = vld [vmem:[#allocation2 + $0xe4] sm:$0xf] }
 0x110   : > { %14911 = vmatprep.mubr.bf16.mxu1 %v13559_v4  ;;  %v13560_v29 = vcombine.low %v4022_v36, %v4032_v63  ;;  %v4050_v50 = vor.u32 %v4049_v15, %v4045_v41  ;;  %v4055_v0 = vrot.slane %v4053_v51, 5  ;;  %14988 = vmatpush3.bf16.msra.mxu1 %v15606_v52  ;;  %v4060_v4 = vrot.slane %v4058_v13, 4 }
 0x111   : > { %v16447_v5 = vpop.f32.mrf.mxu0  ;;  %v16451_v61 = vpop.f32.mrf.mxu1  ;;  %14868 = vmatmul.mubr.bf16.gmra.mxu0 %v15594_v22  ;;  %v4041_v37 = vrot.slane %v4040_v8, 4  ;;  %v4063_v60 = vrot.slane %v4061_v7, 5  ;;  %v4071_v24 = vshrl.u32 %v3779_v33, 16  ;;  %14989 = vmatprep.subr.bf16.mxu1 %v15607_v32  ;;  %v4069_v17 = vrot.slane %v4067_v26, 5 }
 0x112   : > { %v4051_v20 = vrot.slane %v4050_v50, 4  ;;  %14871 = vmatprep.mubr.bf16.mxu0 %v15598_v39  ;;  %v4082_v36 = vshrl.u32 %v3781_v19, 16  ;;  %v4085_v63 = vshll.u32 %v3781_v19, 16  ;;  %v4091_v50 = vshll.u32 %v3782_v46, 16 }
 0x113   : > { %v16455_v49 = vpop.f32.mrf.mxu0  ;;  %v16457_v9 = vpop.f32.mrf.mxu1  ;;  %v4046_v52 = vsel %vm16079_vm5, %v4041_v37, %v4045_v41  ;;  %v4064_v22 = vor.u32 %v4063_v60, %v4060_v4  ;;  %v4073_v51 = vrot.slane %v4071_v24, 4  ;;  %v3785_v41 = vld [vmem:[#allocation2 + $0xe8] sm:$0xf]  ;;  %v15603_v60 = vld [vmem:[#allocation2 + $0xf4] sm:$0xff]   ;;  %v4095_v37 = vshrl.u32 %v3782_v46, 16 }
 0x114   : > { %19384 = vst [vmem:[#allocation13_spill] sm:$0xff] %v16455_v49  ;;  %19385 = vst [vmem:[#allocation14_spill] sm:$0xff] %v16457_v9  ;;  %v4077_v49 = vshll.u32 %v3780_v53, 16  ;;  %v4056_v33 = vsel %vm16079_vm5, %v4051_v20, %v4055_v0  ;;  %v4084_v7 = vrot.slane %v4082_v36, 4  ;;  %14990 = vmatpush3.bf16.msra.mxu1 %v15607_v32  ;;  %v4087_v21 = vrot.slane %v4085_v63, 5 }
 0x115   : > { %v16459_v59 = vpop.f32.mrf.mxu0  ;;  %v16461_v15 = vpop.f32.mrf.mxu1  ;;  %v13561_v39 = vcombine.low %v4046_v52, %v4056_v33  ;;  %v4065_v26 = vrot.slane %v4064_v22, 4  ;;  %v4074_v9 = vor.u32 %v4073_v51, %v4069_v17  ;;  %v4093_v19 = vrot.slane %v4091_v50, 5  ;;  %v3786_v0 = vld [vmem:[#allocation2 + $0xec] sm:$0x1]  ;;  %v3787_v22 = vld [vmem:[#allocation2 + $0xf4] sm:$0xf] }
 0x116   : > { %19386 = vst [vmem:[#allocation15_spill] sm:$0xff] %v16461_v15  ;;  %v4079_v13 = vrot.slane %v4077_v49, 5  ;;  %v4101_v4 = vshll.u32 %v3783_v1, 16  ;;  %v4106_v49 = vshrl.u32 %v3784_v35, 16  ;;  %v4088_v36 = vor.u32 %v4087_v21, %v4084_v7  ;;  %v3788_v51 = vld [vmem:[#allocation2 + $0xf8] sm:$0xf] }
 0x117   : > { %v16465_v8 = vpop.f32.mrf.mxu0  ;;  %v16469_v53 = vpop.f32.mrf.mxu1  ;;  %14912 = vmatmul.mubr.bf16.gmra.mxu1 %v13560_v29  ;;  %v4070_v32 = vsel %vm16079_vm5, %v4065_v26, %v4069_v17  ;;  %v4075_v20 = vrot.slane %v4074_v9, 4  ;;  %v4109_v52 = vshll.u32 %v3784_v35, 16  ;;  %v4097_v33 = vrot.slane %v4095_v37, 4  ;;  %v3789_v9 = vld [vmem:[#allocation2 + $0xfc] sm:$0x1] }
 0x118   : > { %19387 = vst [vmem:[#allocation16_spill] sm:$0xff] %v16469_v53  ;;  %14915 = vmatprep.mubr.bf16.mxu1 %v13561_v39  ;;  %v4103_v58 = vrot.slane %v4101_v4, 5  ;;  %v4108_v53 = vrot.slane %v4106_v49, 4  ;;  %v4115_v29 = vshll.u32 %v3785_v41, 16  ;;  %v4089_v1 = vrot.slane %v4088_v36, 4 }
 0x119   : > { %v16471_v24 = vpop.f32.mrf.mxu0  ;;  %v16477_v50 = vpop.f32.mrf.mxu1  ;;  %v4080_v46 = vsel %vm16079_vm5, %v4075_v20, %v4079_v13  ;;  %14872 = vmatmul.mubr.bf16.gmra.mxu0 %v15599_v30  ;;  %v4111_v39 = vrot.slane %v4109_v52, 5  ;;  %v4119_v17 = vshrl.u32 %v3785_v41, 16  ;;  %v4098_v7 = vor.u32 %v4097_v33, %v4093_v19  ;;  %v15604_v33 = vld [vmem:[#allocation2 + $0x104] sm:$0xff]  }
 0x11a   : > { %19389 = vst [vmem:[#allocation18_spill] sm:$0xff] %v16477_v50  ;;  %v13562_v35 = vcombine.low %v4070_v32, %v4080_v46  ;;  %v4117_v26 = vrot.slane %v4115_v29, 5  ;;  %14875 = vmatprep.mubr.bf16.mxu0 %v15603_v60  ;;  %v4094_v37 = vsel %vm16079_vm5, %v4089_v1, %v4093_v19  ;;  %v4130_v50 = vshrl.u32 %v3787_v22, 16  ;;  %v3790_v60 = vld [vmem:[#allocation2 + $0x104] sm:$0xf] }
 0x11b   : > { %v16475_v63 = vpop.f32.mrf.mxu0  ;;  %v4112_v4 = vor.u32 %v4111_v39, %v4108_v53  ;;  %v4121_v49 = vrot.slane %v4119_v17, 4  ;;  %v4099_v30 = vrot.slane %v4098_v7, 4  ;;  %v4133_v20 = vshll.u32 %v3787_v22, 16  ;;  %v16487_v36 = vpop.f32.mrf.mxu1 }
 0x11c   : > { %19388 = vst [vmem:[#allocation17_spill] sm:$0xff] %v16475_v63  ;;  %v4125_v63 = vshll.u32 %v3786_v0, 16  ;;  %v4139_v41 = vshll.u32 %v3788_v51, 16  ;;  %19392 = vst [vmem:[#allocation21_spill] sm:$0xff] %v16487_v36  ;;  %v4132_v29 = vrot.slane %v4130_v50, 4  ;;  %v4143_v0 = vshrl.u32 %v3788_v51, 16 }
 0x11d   : > { %v16481_v21 = vpop.f32.mrf.mxu0  ;;  %v4113_v52 = vrot.slane %v4112_v4, 4  ;;  %v4122_v32 = vor.u32 %v4121_v49, %v4117_v26  ;;  %v4104_v53 = vsel %vm16079_vm5, %v4099_v30, %v4103_v58  ;;  %v4135_v19 = vrot.slane %v4133_v20, 5  ;;  %v3792_v49 = vld [vmem:[#allocation2 + $0x10c] sm:$0x1]  ;;  %v4564_v50 = vld [vmem:[#allocation2 + $0x20] sm:$0x8] }
 0x11e   : > { %19390 = vst [vmem:[#allocation19_spill] sm:$0xff] %v16481_v21  ;;  %v4127_v13 = vrot.slane %v4125_v63, 5  ;;  %v4141_v1 = vrot.slane %v4139_v41, 5  ;;  %v4149_v39 = vshll.u32 %v3789_v9, 16  ;;  %v3791_v63 = vld [vmem:[#allocation2 + $0x108] sm:$0xf]  ;;  %v13563_v22 = vcombine.low %v4094_v37, %v4104_v53  ;;  %v16497_v58 = vpop.f32.mrf.mxu1 }
 0x11f   : > { %v16485_v15 = vpop.f32.mrf.mxu0  ;;  %14916 = vmatmul.mubr.bf16.gmra.mxu1 %v13562_v35  ;;  %v4118_v17 = vsel %vm16079_vm5, %v4113_v52, %v4117_v26  ;;  %v4123_v7 = vrot.slane %v4122_v32, 4  ;;  %v4145_v4 = vrot.slane %v4143_v0, 4  ;;  %v4136_v51 = vor.u32 %v4135_v19, %v4132_v29  ;;  %v4565_v35 = vld [vmem:[#allocation2 + $0x24] sm:$0xf]  ;;  %19395 = vst [vmem:[#allocation24_spill] sm:$0xff] %v16497_v58 }
 0x120   : > { %19391 = vst [vmem:[#allocation20_spill] sm:$0xff] %v16485_v15  ;;  %v4151_v36 = vrot.slane %v4149_v39, 5  ;;  %v4154_v15 = vshrl.u32 %v3790_v60, 16  ;;  %14919 = vmatprep.mubr.bf16.mxu1 %v13563_v22  ;;  %v4163_v26 = vshll.u32 %v3791_v63, 16  ;;  %v4167_v30 = vshrl.u32 %v3791_v63, 16 }
 0x121   : > { %v16489_v46 = vpop.f32.mrf.mxu0  ;;  %v4128_v9 = vsel %vm16079_vm5, %v4123_v7, %v4127_v13  ;;  %14876 = vmatmul.mubr.bf16.gmra.mxu0 %v15604_v33  ;;  %v4146_v37 = vor.u32 %v4145_v4, %v4141_v1  ;;  %v4137_v41 = vrot.slane %v4136_v51, 4  ;;  %v4566_v29 = vld [vmem:[#allocation2 + $0x28] sm:$0xf]  ;;  %v4173_v19 = vshll.u32 %v3792_v49, 16  ;;  %v16505_v33 = vpop.f32.mrf.mxu1  ;;  %v4567_v7 = vld [vmem:[#allocation2 + $0x30] sm:$0x8] }
 0x122   : > { %19393 = vst [vmem:[#allocation22_spill] sm:$0xff] %v16489_v46  ;;  %v4157_v46 = vshll.u32 %v3790_v60, 16  ;;  %v13564_v20 = vcombine.low %v4118_v17, %v4128_v9  ;;  %v4156_v52 = vrot.slane %v4154_v15, 4  ;;  %v4165_v60 = vrot.slane %v4163_v26, 5 }
 0x123   : > { %v16495_v21 = vpop.f32.mrf.mxu0  ;;  %v4147_v0 = vrot.slane %v4146_v37, 4  ;;  %v4169_v53 = vrot.slane %v4167_v30, 4  ;;  %v4142_v39 = vsel %vm16079_vm5, %v4137_v41, %v4141_v1  ;;  %v4618_v58 = vshrl.u32 %v4565_v35, 16  ;;  %v4568_v1 = vld [vmem:[#allocation2 + $0x34] sm:$0xf] }
 0x124   : > { %19394 = vst [vmem:[#allocation23_spill] sm:$0xff] %v16495_v21  ;;  %v4159_v32 = vrot.slane %v4157_v46, 5  ;;  %v4613_v21 = vshrl.u32 %v4564_v50, 16  ;;  %v4175_v46 = vrot.slane %v4173_v19, 5  ;;  %v4621_v17 = vshll.u32 %v4565_v35, 16 }
 0x125   : > { %v4152_v63 = vsel %vm16079_vm5, %v4147_v0, %v4151_v36  ;;  %v4170_v15 = vor.u32 %v4169_v53, %v4165_v60  ;;  %v4620_v9 = vrot.slane %v4618_v58, 7  ;;  %v4627_v26 = vshrl.u32 %v4566_v29, 16  ;;  %v4569_v36 = vld [vmem:[#allocation2 + $0x38] sm:$0xf]  ;;  %v4571_v58 = vld [vmem:[#allocation2 + $0x44] sm:$0xf]  ;;  %v16519_v53 = vpop.f32.mrf.mxu1 }
 0x126   : > { %v4160_v22 = vor.u32 %v4159_v32, %v4156_v52  ;;  %v16503_v13 = vpop.f32.mrf.mxu0  ;;  %v13565_v4 = vcombine.low %v4142_v39, %v4152_v63  ;;  %v13575_v51 = vrot.slane %v4613_v21, 11  ;;  %v4630_v30 = vshll.u32 %v4566_v29, 16  ;;  %v4570_v21 = vld [vmem:[#allocation2 + $0x40] sm:$0x8]  ;;  %v15609_v39 = vld [vmem:[#allocation2 + $0x24] sm:$0xff]  }
 0x127   : > { %14920 = vmatmul.mubr.bf16.gmra.mxu1 %v13564_v20  ;;  %v4171_v50 = vrot.slane %v4170_v15, 4  ;;  %v16513_v41 = vadd.f32 %v16286_v57, %v16299_v16  ;;  %v4623_v20 = vor.u32 %v4621_v17, %v4620_v9  ;;  %v4625_v52 = vrot.slane %v4620_v9, 4 }
 0x128   : > { %v4161_v49 = vrot.slane %v4160_v22, 4  ;;  %v16509_v37 = vpop.f32.mrf.mxu0  ;;  %14923 = vmatprep.mubr.bf16.mxu1 %v13565_v4  ;;  %v4635_v32 = vshrl.u32 %v4567_v7, 16  ;;  %v4629_v19 = vrot.slane %v4627_v26, 7  ;;  %v4640_v57 = vshrl.u32 %v4568_v1, 16 }
 0x129   : > { %v4176_v29 = vsel %vm16079_vm5, %v4171_v50, %v4175_v46  ;;  %v4643_v16 = vshll.u32 %v4568_v1, 16  ;;  %v4649_v15 = vshrl.u32 %v4569_v36, 16  ;;  %v16529_v9 = vadd.f32 %v16295_v2, %v16308_v34  ;;  %v4572_v50 = vld [vmem:[#allocation2 + $0x48] sm:$0xf]  ;;  %v4574_v2 = vld [vmem:[#allocation2 + $0x54] sm:$0xf] }
 0x12a   : > { %v4166_v35 = vsel %vm16079_vm5, %v4161_v49, %v4165_v60  ;;  %v16517_v0 = vpop.f32.mrf.mxu0  ;;  %v4624_v60 = vsel %vm15873_vm2, %v13575_v51, %v4623_v20  ;;  %v13576_v63 = vrot.slane %v4635_v32, 11  ;;  %v4632_v7 = vor.u32 %v4630_v30, %v4629_v19 }
 0x12b   : > { %v13566_v22 = vcombine.low %v4166_v35, %v4176_v29  ;;  %v4642_v4 = vrot.slane %v4640_v57, 7  ;;  %v4652_v49 = vshll.u32 %v4569_v36, 16  ;;  %v4651_v46 = vrot.slane %v4649_v15, 7  ;;  %v16535_v35 = vpop.f32.mrf.mxu1  ;;  %v4573_v29 = vld [vmem:[#allocation2 + $0x50] sm:$0x8] }
 0x12c   : > { %v16525_v17 = vpop.f32.mrf.mxu0  ;;  %v16533_v1 = vadd.f32 %v16301_v14, %v16315_v43  ;;  %v4657_v26 = vshrl.u32 %v4570_v21, 16  ;;  %19398 = vst [vmem:[#allocation27_spill] sm:$0xff] %v16535_v35  ;;  %v4633_v30 = vsel %vm15873_vm2, %v4625_v52, %v4632_v7  ;;  %v4662_v32 = vshrl.u32 %v4571_v58, 16  ;;  %v4575_v52 = vld [vmem:[#allocation2 + $0x58] sm:$0xf] }
 0x12d   : > { %19396 = vst [vmem:[#allocation25_spill] sm:$0xff] %v16525_v17  ;;  %v4645_v20 = vor.u32 %v4643_v16, %v4642_v4  ;;  %v4647_v36 = vrot.slane %v4642_v4, 4  ;;  %v13607_v34 = vcombine.low %v4624_v60, %v4633_v30  ;;  %v4654_v19 = vor.u32 %v4652_v49, %v4651_v46  ;;  %v15611_v16 = vld [vmem:[%s19354_s1 + $0x230] sm:$0xff]   ;;  %v4577_v4 = vld [vmem:[#allocation2 + $0x64] sm:$0xf]  ;;  %v16554_v49 = vpop.f32.mrf.mxu1 }
 0x12e   : > { %19397 = vst [vmem:[#allocation26_spill] sm:$0xff] %v16533_v1  ;;  %v16537_v51 = vpop.f32.mrf.mxu0  ;;  %v13577_v57 = vrot.slane %v4657_v26, 11  ;;  %v4665_v14 = vshll.u32 %v4571_v58, 16  ;;  %v4664_v15 = vrot.slane %v4662_v32, 7  ;;  %v4671_v35 = vshrl.u32 %v4572_v50, 16  ;;  %v15610_v60 = vld [vmem:[#allocation2 + $0x34] sm:$0xff]  }
 0x12f   : > { %14924 = vmatmul.mubr.bf16.gmra.mxu1 %v13566_v22  ;;  %v4646_v21 = vsel %vm15873_vm2, %v13576_v63, %v4645_v20  ;;  %v4674_v17 = vshll.u32 %v4572_v50, 16  ;;  %14943 = vmatprep.mubr.bf16.mxu0 %v13607_v34  ;;  %v4655_v22 = vsel %vm15873_vm2, %v4647_v36, %v4654_v19  ;;  %v16552_v58 = vadd.f32 %v16317_v44, %v16333_v10 }
 0x130   : > { %v16541_v43 = vpop.f32.mrf.mxu0  ;;  %14991 = vmatprep.mubr.bf16.mxu1 %v15609_v39  ;;  %v4679_v7 = vshrl.u32 %v4573_v29, 16  ;;  %v4684_v63 = vshrl.u32 %v4574_v2, 16  ;;  %v4576_v39 = vld [vmem:[#allocation2 + $0x60] sm:$0x8]  ;;  %v13608_v50 = vcombine.low %v4646_v21, %v4655_v22  ;;  %v4667_v26 = vor.u32 %v4665_v14, %v4664_v15  ;;  %v4579_v22 = vld [vmem:[#allocation2 + $0x70] sm:$0x8] }
 0x131   : > { %19399 = vst [vmem:[#allocation28_spill] sm:$0xff] %v16552_v58  ;;  %v4669_v30 = vrot.slane %v4664_v15, 4  ;;  %v4673_v20 = vrot.slane %v4671_v35, 7  ;;  %v4687_v36 = vshll.u32 %v4574_v2, 16  ;;  %v4693_v19 = vshrl.u32 %v4575_v52, 16  ;;  %v15612_v58 = vld [vmem:[#allocation2 + $0x44] sm:$0xff]  }
 0x132   : > { %v16556_v46 = vpop.f32.mrf.mxu0  ;;  %v13578_v32 = vrot.slane %v4679_v7, 11  ;;  %v4686_v34 = vrot.slane %v4684_v63, 7  ;;  %14944 = vmatmul.mubr.bf16.vlgmr.msra.gmra.mxu0 %v13608_v50  ;;  %v4668_v44 = vsel %vm15873_vm2, %v13577_v57, %v4667_v26  ;;  %v4696_v29 = vshll.u32 %v4575_v52, 16  ;;  %v4578_v15 = vld [vmem:[#allocation2 + $0x68] sm:$0xf]  ;;  %v16574_v57 = vpop.f32.mrf.mxu1 }
 0x133   : > { %v4676_v10 = vor.u32 %v4674_v17, %v4673_v20  ;;  %v16564_v31 = vadd.f32 %v16323_v6, %v16343_v23  ;;  %15024 = vmatpush3.bf16.msra.mxu0 %v16403_v56  ;;  %v4695_v21 = vrot.slane %v4693_v19, 7  ;;  %v16569_v2 = vadd.f32 %v16335_v48, %v16355_v12  ;;  %v15614_v17 = vld [vmem:[%s19354_s1 + $0x228] sm:$0xff]   ;;  %v4580_v7 = vld [vmem:[#allocation2 + $0x74] sm:$0xf]  ;;  %v4581_v26 = vld [vmem:[#allocation2 + $0x78] sm:$0xf] }
 0x134   : > { %v16558_v1 = vpop.f32.mrf.mxu0  ;;  %v4689_v35 = vor.u32 %v4687_v36, %v4686_v34  ;;  %v4691_v14 = vrot.slane %v4686_v34, 4  ;;  %15025 = vmatprep.subr.bf16.mxu0 %v15611_v16  ;;  %v4701_v23 = vshrl.u32 %v4576_v39, 16  ;;  %v4706_v56 = vshrl.u32 %v4577_v4, 16  ;;  %v15617_v39 = vld [vmem:[%s19354_s1 + $0x220] sm:$0xff]  }
 0x135   : > { %19400 = vst [vmem:[#allocation29_spill] sm:$0xff] %v16558_v1  ;;  %v4677_v6 = vsel %vm15873_vm2, %v4669_v30, %v4676_v10  ;;  %v4698_v63 = vor.u32 %v4696_v29, %v4695_v21  ;;  %v4709_v50 = vshll.u32 %v4577_v4, 16  ;;  %v4715_v36 = vshrl.u32 %v4578_v15, 16  ;;  %v15613_v30 = vld [vmem:[#allocation2 + $0x54] sm:$0xff]   ;;  %v16591_v10 = vpop.f32.mrf.mxu1 }
 0x136   : > { %v16576_v52 = vpop.f32.mrf.mxu0  ;;  %v13609_v48 = vcombine.low %v4668_v44, %v4677_v6  ;;  %v4690_v12 = vsel %vm15873_vm2, %v13578_v32, %v4689_v35  ;;  %v13579_v20 = vrot.slane %v4701_v23, 11  ;;  %v4708_v34 = vrot.slane %v4706_v56, 7  ;;  %v4582_v44 = vld [vmem:[#allocation2 + $0x80] sm:$0x8] }
 0x137   : > { %14992 = vmatmul.mubr.bf16.vlgmr.msra.gmra.mxu1 %v15610_v60  ;;  %v4718_v19 = vshll.u32 %v4578_v15, 16  ;;  %v4699_v60 = vsel %vm15873_vm2, %v4691_v14, %v4698_v63  ;;  %15026 = vmatpush3.bf16.msra.mxu0 %v15611_v16  ;;  %v16589_v32 = vadd.f32 %v16357_v40, %v16374_v11  ;;  %v4723_v4 = vshrl.u32 %v4579_v22, 16  ;;  %v15615_v63 = vld [vmem:[#allocation2 + $0x64] sm:$0xff]  }
 0x138   : > { %14995 = vmatprep.mubr.bf16.mxu1 %v15612_v58  ;;  %14947 = vmatprep.mubr.bf16.mxu0 %v13609_v48  ;;  %v4728_v58 = vshrl.u32 %v4580_v7, 16  ;;  %v16593_v29 = vpop.f32.mrf.mxu0  ;;  %v13610_v35 = vcombine.low %v4690_v12, %v4699_v60  ;;  %v4711_v21 = vor.u32 %v4709_v50, %v4708_v34  ;;  %v4713_v15 = vrot.slane %v4708_v34, 4  ;;  %v4583_v48 = vld [vmem:[#allocation2 + $0x84] sm:$0xf]  ;;  %v4584_v12 = vld [vmem:[#allocation2 + $0x88] sm:$0xf] }
 0x139   : > { %v4717_v6 = vrot.slane %v4715_v36, 7  ;;  %15027 = vmatprep.subr.bf16.mxu0 %v15614_v17  ;;  %v13580_v23 = vrot.slane %v4723_v4, 11  ;;  %v4731_v16 = vshll.u32 %v4580_v7, 16  ;;  %v4737_v56 = vshrl.u32 %v4581_v26, 16  ;;  %v15620_v50 = vld [vmem:[%s19354_s1 + $0x218] sm:$0xff]  }
 0x13a   : > { %v4730_v14 = vrot.slane %v4728_v58, 7  ;;  %14948 = vmatmul.mubr.bf16.gmra.mxu0 %v13610_v35  ;;  %v4712_v40 = vsel %vm15873_vm2, %v13579_v20, %v4711_v21  ;;  %v4740_v22 = vshll.u32 %v4581_v26, 16  ;;  %v16599_v1 = vadd.f32 %v16367_v55, %v16386_v27  ;;  %v4585_v20 = vld [vmem:[#allocation2 + $0x90] sm:$0x8]  ;;  %v4586_v26 = vld [vmem:[#allocation2 + $0x94] sm:$0xf]  ;;  %v16610_v4 = vpop.f32.mrf.mxu0 }
 0x13b   : > { %v4720_v11 = vor.u32 %v4718_v19, %v4717_v6  ;;  %v4739_v36 = vrot.slane %v4737_v56, 7  ;;  %15028 = vmatpush3.bf16.msra.mxu0 %v15614_v17  ;;  %v16606_v60 = vadd.f32 %v16376_v3, %v16396_v45  ;;  %v16608_v19 = vpop.f32.mrf.mxu1  ;;  %v4745_v27 = vshrl.u32 %v4582_v44, 16  ;;  %v4587_v35 = vld [vmem:[#allocation2 + $0x98] sm:$0xf] }
 0x13c   : > { %v4733_v34 = vor.u32 %v4731_v16, %v4730_v14  ;;  %v4735_v7 = vrot.slane %v4730_v14, 4  ;;  %19401 = vst [vmem:[#allocation30_spill] sm:$0xff] %v16608_v19  ;;  %v4750_v58 = vshrl.u32 %v4583_v48, 16  ;;  %15029 = vmatprep.subr.bf16.mxu0 %v15617_v39  ;;  %v4753_v45 = vshll.u32 %v4583_v48, 16 }
 0x13d   : > { %v4721_v55 = vsel %vm15873_vm2, %v4713_v15, %v4720_v11  ;;  %v4742_v3 = vor.u32 %v4740_v22, %v4739_v36  ;;  %v16616_v6 = vpop.f32.mrf.mxu1  ;;  %v13581_v14 = vrot.slane %v4745_v27, 11  ;;  %v4759_v56 = vshrl.u32 %v4584_v12, 16  ;;  %v15616_v11 = vld [vmem:[#allocation2 + $0x74] sm:$0xff]   ;;  %v4588_v36 = vld [vmem:[#allocation2 + $0xa0] sm:$0x8] }
 0x13e   : > { %v13611_v21 = vcombine.low %v4712_v40, %v4721_v55  ;;  %v4734_v17 = vsel %vm15873_vm2, %v13580_v23, %v4733_v34  ;;  %v4752_v16 = vrot.slane %v4750_v58, 7  ;;  %v4762_v19 = vshll.u32 %v4584_v12, 16  ;;  %v16624_v23 = vpop.f32.mrf.mxu0  ;;  %v15623_v12 = vld [vmem:[%s19354_s1 + $0x210] sm:$0xff]  }
 0x13f   : > { %14996 = vmatmul.mubr.bf16.gmra.mxu1 %v15613_v30  ;;  %v4743_v44 = vsel %vm15873_vm2, %v4735_v7, %v4742_v3  ;;  %v16622_v30 = vadd.f32 %v16398_v47, %v16431_v54  ;;  %v4767_v15 = vshrl.u32 %v4585_v20, 16  ;;  %v4772_v40 = vshrl.u32 %v4586_v26, 16  ;;  %15030 = vmatpush3.bf16.msra.mxu0 %v15617_v39  ;;  %19402 = vst [vmem:[#allocation31_spill] sm:$0xff] %v16624_v23  ;;  %v4589_v20 = vld [vmem:[#allocation2 + $0xa4] sm:$0xf]  ;;  %v16629_v27 = vpop.f32.mrf.mxu1 }
 0x140   : > { %14999 = vmatprep.mubr.bf16.mxu1 %v15615_v63  ;;  %14951 = vmatprep.mubr.bf16.mxu0 %v13611_v21  ;;  %v13612_v48 = vcombine.low %v4734_v17, %v4743_v44  ;;  %v4755_v22 = vor.u32 %v4753_v45, %v4752_v16  ;;  %v4757_v63 = vrot.slane %v4752_v16, 4  ;;  %v4761_v34 = vrot.slane %v4759_v56, 7  ;;  %v15618_v17 = vld [vmem:[#allocation2 + $0x84] sm:$0xff]  }
 0x141   : > { %15031 = vmatprep.subr.bf16.mxu0 %v15620_v50  ;;  %v13582_v7 = vrot.slane %v4767_v15, 11  ;;  %v4774_v55 = vrot.slane %v4772_v40, 7  ;;  %v4775_v47 = vshll.u32 %v4586_v26, 16  ;;  %v4781_v54 = vshrl.u32 %v4587_v35, 16  ;;  %v4590_v44 = vld [vmem:[#allocation2 + $0xa8] sm:$0xf] }
 0x142   : > { %14952 = vmatmul.mubr.bf16.gmra.mxu0 %v13612_v48  ;;  %v4756_v39 = vsel %vm15873_vm2, %v13581_v14, %v4755_v22  ;;  %v4764_v58 = vor.u32 %v4762_v19, %v4761_v34  ;;  %v4784_v21 = vshll.u32 %v4587_v35, 16  ;;  %v16635_v3 = vadd.f32 %v16409_v62, %v16438_v18  ;;  %v15626_v14 = vld [vmem:[%s19354_s1 + $0x208] sm:$0xff]   ;;  %v4591_v15 = vld [vmem:[#allocation2 + $0xb0] sm:$0x8]  ;;  %v4592_v40 = vld [vmem:[#allocation2 + $0xb4] sm:$0xf]  ;;  %v16650_v22 = vpop.f32.mrf.mxu1 }
 0x143   : > { %v4777_v45 = vor.u32 %v4775_v47, %v4774_v55  ;;  %v4779_v16 = vrot.slane %v4774_v55, 4  ;;  %v4783_v56 = vrot.slane %v4781_v54, 7  ;;  %v16639_v26 = vadd.f32 %v16420_v25, %v16447_v5  ;;  %15032 = vmatpush3.bf16.msra.mxu0 %v15620_v50  ;;  %v4601_v23 = vld [vmem:[#allocation2 + $0xe4] sm:$0xf] }
 0x144   : > { %v16644_v19 = vpop.f32.mrf.mxu0  ;;  %v4765_v35 = vsel %vm15873_vm2, %v4757_v63, %v4764_v58  ;;  %v4789_v62 = vshrl.u32 %v4588_v36, 16  ;;  %v4794_v18 = vshrl.u32 %v4589_v20, 16  ;;  %15033 = vmatprep.subr.bf16.mxu0 %v15623_v12  ;;  %v4797_v50 = vshll.u32 %v4589_v20, 16  ;;  %v4593_v63 = vld [vmem:[#allocation2 + $0xb8] sm:$0xf] }
 0x145   : > { %v13613_v48 = vcombine.low %v4756_v39, %v4765_v35  ;;  %v4778_v25 = vsel %vm15873_vm2, %v13582_v7, %v4777_v45  ;;  %v4786_v5 = vor.u32 %v4784_v21, %v4783_v56  ;;  %v4803_v47 = vshrl.u32 %v4590_v44, 16  ;;  %v15619_v21 = vld [vmem:[#allocation2 + $0x94] sm:$0xff]   ;;  %v15629_v35 = vld [vmem:[%s19354_s1 + $0x200] sm:$0xff]  }
 0x146   : > { %v13583_v34 = vrot.slane %v4789_v62, 11  ;;  %v4796_v55 = vrot.slane %v4794_v18, 7  ;;  %v4806_v54 = vshll.u32 %v4590_v44, 16  ;;  %v16652_v36 = vpop.f32.mrf.mxu0  ;;  %v16658_v39 = vadd.f32 %v16436_v42, %v16459_v59  ;;  %v4594_v44 = vld [vmem:[#allocation2 + $0xc0] sm:$0x8]  ;;  %v16663_v59 = vpop.f32.mrf.mxu1 }
 0x147   : > { %15000 = vmatmul.mubr.bf16.gmra.mxu1 %v15616_v11  ;;  %14955 = vmatprep.mubr.bf16.mxu0 %v13613_v48  ;;  %v4787_v11 = vsel %vm15873_vm2, %v4779_v16, %v4786_v5  ;;  %v4811_v7 = vshrl.u32 %v4591_v15, 16  ;;  %v4816_v20 = vshrl.u32 %v4592_v40, 16  ;;  %v4805_v56 = vrot.slane %v4803_v47, 7  ;;  %v4595_v42 = vld [vmem:[#allocation2 + $0xc4] sm:$0xf]  ;;  %19404 = vst [vmem:[#allocation33_spill] sm:$0xff] %v16663_v59 }
 0x148   : > { %15003 = vmatprep.mubr.bf16.mxu1 %v15618_v17  ;;  %19403 = vst [vmem:[#allocation32_spill] sm:$0xff] %v16658_v39  ;;  %15034 = vmatpush3.bf16.msra.mxu0 %v15623_v12  ;;  %v13614_v58 = vcombine.low %v4778_v25, %v4787_v11  ;;  %v4799_v17 = vor.u32 %v4797_v50, %v4796_v55  ;;  %v4801_v45 = vrot.slane %v4796_v55, 4  ;;  %v4819_v18 = vshll.u32 %v4592_v40, 16  ;;  %v15621_v5 = vld [vmem:[#allocation2 + $0xa4] sm:$0xff]   ;;  %v16671_v55 = vpop.f32.mrf.mxu0 }
 0x149   : > { %15035 = vmatprep.subr.bf16.mxu0 %v15626_v14  ;;  %v13584_v62 = vrot.slane %v4811_v7, 11  ;;  %v4818_v16 = vrot.slane %v4816_v20, 7  ;;  %v4825_v48 = vshrl.u32 %v4593_v63, 16  ;;  %v4808_v15 = vor.u32 %v4806_v54, %v4805_v56  ;;  %v4596_v20 = vld [vmem:[#allocation2 + $0xc8] sm:$0xf] }
 0x14a   : > { %14956 = vmatmul.mubr.bf16.gmra.mxu0 %v13614_v58  ;;  %v4800_v12 = vsel %vm15873_vm2, %v13583_v34, %v4799_v17  ;;  %v4828_v25 = vshll.u32 %v4593_v63, 16  ;;  %v16669_v50 = vadd.f32 %v16442_v38, %v16465_v8  ;;  %v16675_v7 = vadd.f32 %v16451_v61, %v16471_v24  ;;  %v4597_v58 = vld [vmem:[#allocation2 + $0xd0] sm:$0x8]  ;;  %v4598_v17 = vld [vmem:[#allocation2 + $0xd4] sm:$0xf] }
 0x14b   : > { %v4821_v47 = vor.u32 %v4819_v18, %v4818_v16  ;;  %v4823_v11 = vrot.slane %v4818_v16, 4  ;;  %v4827_v40 = vrot.slane %v4825_v48, 7  ;;  %v4809_v34 = vsel %vm15873_vm2, %v4801_v45, %v4808_v15  ;;  %v16681_v18 = vpop.f32.mrf.mxu1  ;;  %v4599_v45 = vld [vmem:[#allocation2 + $0xd8] sm:$0xf] }
 0x14c   : > { %19405 = vst [vmem:[#allocation34_spill] sm:$0xff] %v16669_v50  ;;  %19406 = vst [vmem:[#allocation35_spill] sm:$0xff] %v16675_v7  ;;  %15036 = vmatpush3.bf16.msra.mxu0 %v15626_v14  ;;  %v4833_v54 = vshrl.u32 %v4594_v44, 16  ;;  %v4838_v63 = vshrl.u32 %v4595_v42, 16  ;;  %v13615_v38 = vcombine.low %v4800_v12, %v4809_v34  ;;  %v4841_v16 = vshll.u32 %v4595_v42, 16  ;;  %v16683_v44 = vpop.f32.mrf.mxu0  ;;  %v19408_v12 = vld [vmem:[#allocation19_spill] sm:$0xff] }
 0x14d   : > { %15037 = vmatprep.subr.bf16.mxu0 %v15629_v35  ;;  %v4822_v8 = vsel %vm15873_vm2, %v13584_v62, %v4821_v47  ;;  %v4830_v56 = vor.u32 %v4828_v25, %v4827_v40  ;;  %v4847_v14 = vshrl.u32 %v4596_v20, 16  ;;  %v4850_v48 = vshll.u32 %v4596_v20, 16  ;;  %19407 = vst [vmem:[#allocation36_spill] sm:$0xff] %v16683_v44  ;;  %v19409_v15 = vld [vmem:[#allocation15_spill] sm:$0xff]  ;;  %v4600_v20 = vld [vmem:[#allocation2 + $0xe0] sm:$0x8]  ;;  %v16691_v7 = vpop.f32.mrf.mxu1 }
 0x14e   : > { %v13585_v61 = vrot.slane %v4833_v54, 11  ;;  %v4840_v24 = vrot.slane %v4838_v63, 7  ;;  %14959 = vmatprep.mubr.bf16.mxu0 %v13615_v38  ;;  %v16689_v34 = vadd.f32 %v19409_v15, %v19408_v12  ;;  %v4855_v62 = vshrl.u32 %v4597_v58, 16  ;;  %v19414_v15 = vld [vmem:[#allocation22_spill] sm:$0xff] }
 0x14f   : > { %15004 = vmatmul.mubr.bf16.gmra.mxu1 %v15619_v21  ;;  %v4831_v21 = vsel %vm15873_vm2, %v4823_v11, %v4830_v56  ;;  %v4860_v42 = vshrl.u32 %v4598_v17, 16  ;;  %v4849_v54 = vrot.slane %v4847_v14, 7  ;;  %v4863_v44 = vshll.u32 %v4598_v17, 16 }
 0x150   : > { %15007 = vmatprep.mubr.bf16.mxu1 %v15621_v5  ;;  %19410 = vst [vmem:[#allocation19_spill] sm:$0xff] %v16689_v34  ;;  %15038 = vmatpush3.bf16.msra.mxu0 %v15629_v35  ;;  %v13616_v25 = vcombine.low %v4822_v8, %v4831_v21  ;;  %v15622_v5 = vld [vmem:[#allocation2 + $0xb4] sm:$0xff]   ;;  %v4843_v47 = vor.u32 %v4841_v16, %v4840_v24  ;;  %v4845_v40 = vrot.slane %v4840_v24, 4  ;;  %v13586_v63 = vrot.slane %v4855_v62, 11  ;;  %v15624_v35 = vld [vmem:[#allocation2 + $0xc4] sm:$0xff]  }
 0x151   : > { %v4862_v59 = vrot.slane %v4860_v42, 7  ;;  %v4869_v38 = vshrl.u32 %v4599_v45, 16  ;;  %v4852_v58 = vor.u32 %v4850_v48, %v4849_v54  ;;  %v4872_v56 = vshll.u32 %v4599_v45, 16  ;;  %v19411_v8 = vld [vmem:[#allocation20_spill] sm:$0xff]  ;;  %v19415_v62 = vld [vmem:[#allocation18_spill] sm:$0xff] }
 0x152   : > { %14960 = vmatmul.mubr.bf16.gmra.mxu0 %v13616_v25  ;;  %v4844_v11 = vsel %vm15873_vm2, %v13585_v61, %v4843_v47  ;;  %v19412_v21 = vld [vmem:[#allocation16_spill] sm:$0xff]  ;;  %v16703_v42 = vadd.f32 %v19415_v62, %v19414_v15  ;;  %v4602_v25 = vld [vmem:[#allocation2 + $0xe8] sm:$0xf]  ;;  %v4877_v48 = vshrl.u32 %v4600_v20, 16  ;;  %v4882_v45 = vshrl.u32 %v4601_v23, 16 }
 0x153   : > { %v16697_v16 = vadd.f32 %v19412_v21, %v19411_v8  ;;  %v4865_v14 = vor.u32 %v4863_v44, %v4862_v59  ;;  %v4867_v12 = vrot.slane %v4862_v59, 4  ;;  %v4871_v17 = vrot.slane %v4869_v38, 7  ;;  %v4603_v47 = vld [vmem:[#allocation2 + $0xf0] sm:$0x8]  ;;  %v4604_v54 = vld [vmem:[#allocation2 + $0xf4] sm:$0xf]  ;;  %v16709_v38 = vpop.f32.mrf.mxu1 }
 0x154   : > { %v16699_v24 = vpop.f32.mrf.mxu0  ;;  %19416 = vst [vmem:[#allocation20_spill] sm:$0xff] %v16703_v42  ;;  %v4853_v61 = vsel %vm15873_vm2, %v4845_v40, %v4852_v58  ;;  %v4885_v59 = vshll.u32 %v4601_v23, 16  ;;  %v13587_v15 = vrot.slane %v4877_v48, 11  ;;  %v4884_v62 = vrot.slane %v4882_v45, 7  ;;  %v4605_v34 = vld [vmem:[#allocation2 + $0xf8] sm:$0xf] }
 0x155   : > { %19413 = vst [vmem:[#allocation15_spill] sm:$0xff] %v16697_v16  ;;  %v13617_v8 = vcombine.low %v4844_v11, %v4853_v61  ;;  %v4866_v21 = vsel %vm15873_vm2, %v13586_v63, %v4865_v14  ;;  %v4874_v44 = vor.u32 %v4872_v56, %v4871_v17  ;;  %v4891_v42 = vshrl.u32 %v4602_v25, 16  ;;  %v19417_v20 = vld [vmem:[#allocation24_spill] sm:$0xff]  ;;  %v15625_v56 = vld [vmem:[#allocation2 + $0xd4] sm:$0xff]   ;;  %v16719_v39 = vpop.f32.mrf.mxu1 }
 0x156   : > { %v4894_v16 = vshll.u32 %v4602_v25, 16  ;;  %v16711_v40 = vpop.f32.mrf.mxu0  ;;  %v16717_v11 = vadd.f32 %v19417_v20, %v16503_v13  ;;  %v4899_v63 = vshrl.u32 %v4603_v47, 16  ;;  %v4904_v23 = vshrl.u32 %v4604_v54, 16  ;;  %v4606_v61 = vld [vmem:[#allocation2 + $0x100] sm:$0x8]  ;;  %19418 = vst [vmem:[#allocation16_spill] sm:$0xff] %v16719_v39 }
 0x157   : > { %15008 = vmatmul.mubr.bf16.gmra.mxu1 %v15622_v5  ;;  %14963 = vmatprep.mubr.bf16.mxu0 %v13617_v8  ;;  %v4875_v5 = vsel %vm15873_vm2, %v4867_v12, %v4874_v44  ;;  %v4889_v14 = vrot.slane %v4884_v62, 4  ;;  %v4893_v17 = vrot.slane %v4891_v42, 7  ;;  %v4907_v45 = vshll.u32 %v4604_v54, 16  ;;  %v4607_v8 = vld [vmem:[#allocation2 + $0x104] sm:$0xf] }
 0x158   : > { %15011 = vmatprep.mubr.bf16.mxu1 %v15624_v35  ;;  %v13618_v58 = vcombine.low %v4866_v21, %v4875_v5  ;;  %v4887_v35 = vor.u32 %v4885_v59, %v4884_v62  ;;  %v13588_v25 = vrot.slane %v4899_v63, 11  ;;  %v4906_v48 = vrot.slane %v4904_v23, 7  ;;  %v15627_v44 = vld [vmem:[#allocation2 + $0xe4] sm:$0xff]   ;;  %v4609_v59 = vld [vmem:[#allocation2 + $0x110] sm:$0x8]  ;;  %v16727_v62 = vpop.f32.mrf.mxu0 }
 0x159   : > { %v4913_v50 = vshrl.u32 %v4605_v34, 16  ;;  %v4896_v12 = vor.u32 %v4894_v16, %v4893_v17  ;;  %v4916_v47 = vshll.u32 %v4605_v34, 16  ;;  %v16725_v21 = vadd.f32 %v16505_v33, %v16509_v37  ;;  %v4608_v42 = vld [vmem:[#allocation2 + $0x108] sm:$0xf]  ;;  %v4610_v23 = vld [vmem:[#allocation2 + $0x114] sm:$0xf] }
 0x15a   : > { %14964 = vmatmul.mubr.bf16.gmra.mxu0 %v13618_v58  ;;  %v4888_v13 = vsel %vm15873_vm2, %v13587_v15, %v4887_v35  ;;  %v4909_v54 = vor.u32 %v4907_v45, %v4906_v48  ;;  %v4911_v5 = vrot.slane %v4906_v48, 4  ;;  %v16731_v63 = vadd.f32 %v16519_v53, %v16517_v0  ;;  %v4611_v58 = vld [vmem:[#allocation2 + $0x118] sm:$0xf]  ;;  %v16737_v48 = vpop.f32.mrf.mxu1  ;;  %v16739_v39 = vpop.f32.mrf.mxu0 }
 0x15b   : > { %v4915_v20 = vrot.slane %v4913_v50, 7  ;;  %v4897_v34 = vsel %vm15873_vm2, %v4889_v14, %v4896_v12  ;;  %v4921_v16 = vshrl.u32 %v4606_v61, 16  ;;  %v4926_v15 = vshrl.u32 %v4607_v8, 16  ;;  %19419 = vst [vmem:[#allocation22_spill] sm:$0xff] %v16739_v39 }
 0x15c   : > { %v13619_v33 = vcombine.low %v4888_v13, %v4897_v34  ;;  %v4910_v37 = vsel %vm15873_vm2, %v13588_v25, %v4909_v54  ;;  %v4929_v17 = vshll.u32 %v4607_v8, 16  ;;  %v4935_v53 = vshrl.u32 %v4608_v42, 16  ;;  %v5800_v13 = vld [vmem:[#allocation2 + $0x24] sm:$0xf]  ;;  %v16747_v39 = vpop.f32.mrf.mxu1 }
 0x15d   : > { %v4918_v35 = vor.u32 %v4916_v47, %v4915_v20  ;;  %v13589_v50 = vrot.slane %v4921_v16, 11  ;;  %v4928_v0 = vrot.slane %v4926_v15, 7  ;;  %v4938_v45 = vshll.u32 %v4608_v42, 16  ;;  %v5801_v20 = vld [vmem:[#allocation2 + $0x28] sm:$0xf] }
 0x15e   : > { %14967 = vmatprep.mubr.bf16.mxu0 %v13619_v33  ;;  %v16745_v61 = vadd.f32 %v16554_v49, %v16537_v51  ;;  %v4943_v25 = vshrl.u32 %v4609_v59, 16  ;;  %v4948_v8 = vshrl.u32 %v4610_v23, 16  ;;  %v4937_v54 = vrot.slane %v4935_v53, 7  ;;  %v5802_v33 = vld [vmem:[#allocation2 + $0x2c] sm:$0x1] }
 0x15f   : > { %15012 = vmatmul.mubr.bf16.gmra.mxu1 %v15625_v56  ;;  %v4919_v14 = vsel %vm15873_vm2, %v4911_v5, %v4918_v35  ;;  %v15628_v56 = vld [vmem:[#allocation2 + $0xf4] sm:$0xff]   ;;  %v4931_v47 = vor.u32 %v4929_v17, %v4928_v0  ;;  %v4951_v16 = vshll.u32 %v4610_v23, 16  ;;  %v4957_v15 = vshrl.u32 %v4611_v58, 16  ;;  %v15630_v5 = vld [vmem:[#allocation2 + $0x104] sm:$0xff]  }
 0x160   : > { %15015 = vmatprep.mubr.bf16.mxu1 %v15627_v44  ;;  %v13620_v12 = vcombine.low %v4910_v37, %v4919_v14  ;;  %v4933_v44 = vrot.slane %v4928_v0, 4  ;;  %v13590_v42 = vrot.slane %v4943_v25, 11  ;;  %v4950_v34 = vrot.slane %v4948_v8, 7  ;;  %v5803_v35 = vld [vmem:[#allocation2 + $0x34] sm:$0xf] }
 0x161   : > { %v4932_v51 = vsel %vm15873_vm2, %v13589_v50, %v4931_v47  ;;  %v4940_v49 = vor.u32 %v4938_v45, %v4937_v54  ;;  %v4960_v59 = vshll.u32 %v4611_v58, 16  ;;  %v16753_v37 = vadd.f32 %v16574_v57, %v16541_v43  ;;  %v5804_v25 = vld [vmem:[#allocation2 + $0x38] sm:$0xf]  ;;  %v5805_v47 = vld [vmem:[#allocation2 + $0x3c] sm:$0x1]  ;;  %v16765_v54 = vpop.f32.mrf.mxu1 }
 0x162   : > { %14968 = vmatmul.mubr.bf16.gmra.mxu0 %v13620_v12  ;;  %v4953_v0 = vor.u32 %v4951_v16, %v4950_v34  ;;  %v4955_v23 = vrot.slane %v4950_v34, 4  ;;  %v4959_v53 = vrot.slane %v4957_v15, 7  ;;  %v16759_v14 = vadd.f32 %v16591_v10, %v16556_v46 }
 0x163   : > { %v16755_v17 = vpop.f32.mrf.mxu0  ;;  %v4941_v50 = vsel %vm15873_vm2, %v4933_v44, %v4940_v49  ;;  %v5849_v45 = vshrl.u32 %v5800_v13, 16  ;;  %v5852_v58 = vshll.u32 %v5800_v13, 16  ;;  %v5858_v12 = vshll.u32 %v5801_v20, 16  ;;  %v15631_v13 = vld [vmem:[#allocation2 + $0x114] sm:$0xff]  }
 0x164   : > { %v13621_v8 = vcombine.low %v4932_v51, %v4941_v50  ;;  %v4954_v43 = vsel %vm15873_vm2, %v13590_v42, %v4953_v0  ;;  %v4962_v57 = vor.u32 %v4960_v59, %v4959_v53  ;;  %v5862_v16 = vshrl.u32 %v5801_v20, 16  ;;  %v5806_v20 = vld [vmem:[#allocation2 + $0x44] sm:$0xf] }
 0x165   : > { %v16767_v34 = vpop.f32.mrf.mxu0  ;;  %v5851_v46 = vrot.slane %v5849_v45, 4  ;;  %v5854_v10 = vrot.slane %v5852_v58, 5  ;;  %v5868_v44 = vshll.u32 %v5802_v33, 16  ;;  %v5860_v15 = vrot.slane %v5858_v12, 5  ;;  %v16773_v33 = vpop.f32.mrf.mxu1 }
 0x166   : > { %14971 = vmatprep.mubr.bf16.mxu0 %v13621_v8  ;;  %v2447_v42 = vadd.f32 %v16576_v52, %v16513_v41  ;;  %v5873_v51 = vshrl.u32 %v5803_v35, 16  ;;  %v5864_v0 = vrot.slane %v5862_v16, 4  ;;  %v5882_v45 = vshll.u32 %v5804_v25, 16  ;;  %19420 = vst [vmem:[#allocation18_spill] sm:$0xff] %v16773_v33  ;;  %v5807_v52 = vld [vmem:[#allocation2 + $0x48] sm:$0xf] }
 0x167   : > { %15016 = vmatmul.mubr.bf16.gmra.mxu1 %v15628_v56  ;;  %v4963_v56 = vsel %vm15873_vm2, %v4955_v23, %v4962_v57  ;;  %v5855_v59 = vor.u32 %v5854_v10, %v5851_v46  ;;  %v5870_v53 = vrot.slane %v5868_v44, 5  ;;  %v5886_v58 = vshrl.u32 %v5804_v25, 16  ;;  %v16775_v8 = vpop.f32.mrf.mxu0  ;;  %v5808_v25 = vld [vmem:[#allocation2 + $0x4c] sm:$0x1] }
 0x168   : > { %15019 = vmatprep.mubr.bf16.mxu1 %v15630_v5  ;;  %v13622_v49 = vcombine.low %v4954_v43, %v4963_v56  ;;  %v5875_v50 = vrot.slane %v5873_v51, 4  ;;  %v5876_v5 = vshll.u32 %v5803_v35, 16  ;;  %v5865_v57 = vor.u32 %v5864_v0, %v5860_v15 }
 0x169   : > { %v5856_v23 = vrot.slane %v5855_v59, 4  ;;  %v5892_v12 = vshll.u32 %v5805_v47, 16  ;;  %v2445_v41 = vadd.f32 %v16593_v29, %v16529_v9  ;;  %v5884_v46 = vrot.slane %v5882_v45, 5  ;;  %v16789_v29 = vpop.f32.mrf.mxu1 }
 0x16a   : > { %14972 = vmatmul.mubr.bf16.gmra.mxu0 %v13622_v49  ;;  %v5878_v43 = vrot.slane %v5876_v5, 5  ;;  %v5888_v10 = vrot.slane %v5886_v58, 4  ;;  %v16780_v35 = vadd.f32 %v16616_v6, %v2447_v42  ;;  %v5866_v56 = vrot.slane %v5865_v57, 4  ;;  %v19422_v49 = vld [vmem:[#allocation26_spill] sm:$0xff]  ;;  %v16791_v5 = vpop.f32.mrf.mxu0 }
 0x16b   : > { %v5861_v44 = vsel %vm16079_vm5, %v5856_v23, %v5860_v15  ;;  %v5894_v51 = vrot.slane %v5892_v12, 5  ;;  %v2448_v59 = vadd.f32 %v16610_v4, %v19422_v49  ;;  %v16787_v9 = vadd.f32 %v16629_v27, %v2445_v41  ;;  %19423 = vst [vmem:[#allocation24_spill] sm:$0xff] %v16791_v5  ;;  %v5809_v58 = vld [vmem:[#allocation2 + $0x54] sm:$0xf]  ;;  %v5810_v4 = vld [vmem:[#allocation2 + $0x58] sm:$0xf] }
 0x16c   : > { %v5879_v47 = vor.u32 %v5878_v43, %v5875_v50  ;;  %v5889_v0 = vor.u32 %v5888_v10, %v5884_v46  ;;  %v5871_v6 = vsel %vm16079_vm5, %v5866_v56, %v5870_v53  ;;  %v5897_v42 = vshrl.u32 %v5806_v20, 16  ;;  %v5811_v27 = vld [vmem:[#allocation2 + $0x5c] sm:$0x1]  ;;  %v5813_v5 = vld [vmem:[#allocation2 + $0x68] sm:$0xf] }
 0x16d   : > { %v16796_v15 = vadd.f32 %v16650_v22, %v2448_v59  ;;  %v5900_v45 = vshll.u32 %v5806_v20, 16  ;;  %v5906_v57 = vshll.u32 %v5807_v52, 16  ;;  %v5910_v43 = vshrl.u32 %v5807_v52, 16  ;;  %v19424_v20 = vld [vmem:[#allocation28_spill] sm:$0xff] }
 0x16e   : > { %v5880_v50 = vrot.slane %v5879_v47, 4  ;;  %v5890_v23 = vrot.slane %v5889_v0, 4  ;;  %v5899_v12 = vrot.slane %v5897_v42, 4  ;;  %v5916_v10 = vshll.u32 %v5808_v25, 16 }
 0x16f   : > { %15020 = vmatmul.mubr.bf16.gmra.mxu1 %v15631_v13  ;;  %v13687_v13 = vcombine.low %v5861_v44, %v5871_v6  ;;  %v5902_v41 = vrot.slane %v5900_v45, 5  ;;  %v5908_v56 = vrot.slane %v5906_v57, 5  ;;  %v2451_v49 = vadd.f32 %v16644_v19, %v19424_v20  ;;  %v16804_v44 = vpop.f32.mrf.mxu1 }
 0x170   : > { %v5885_v53 = vsel %vm16079_vm5, %v5880_v50, %v5884_v46  ;;  %v5895_v22 = vsel %vm16079_vm5, %v5890_v23, %v5894_v51  ;;  %v5912_v6 = vrot.slane %v5910_v43, 4  ;;  %v5918_v52 = vrot.slane %v5916_v10, 5  ;;  %v5814_v10 = vld [vmem:[#allocation2 + $0x6c] sm:$0x1] }
 0x171   : > { %15039 = vmatprep.mubr.bf16.mxu0 %v13687_v13  ;;  %v13688_v47 = vcombine.low %v5885_v53, %v5895_v22  ;;  %v5903_v0 = vor.u32 %v5902_v41, %v5899_v12  ;;  %v5921_v25 = vshrl.u32 %v5809_v58, 16  ;;  %v5924_v42 = vshll.u32 %v5809_v58, 16  ;;  %v5812_v13 = vld [vmem:[#allocation2 + $0x64] sm:$0xf]  ;;  %v16810_v53 = vpop.f32.mrf.mxu1 }
 0x172   : > { %v16806_v59 = vpop.f32.mrf.mxu0  ;;  %v5930_v45 = vshll.u32 %v5810_v4, 16  ;;  %v5913_v50 = vor.u32 %v5912_v6, %v5908_v56  ;;  %v5934_v51 = vshrl.u32 %v5810_v4, 16  ;;  %v5940_v23 = vshll.u32 %v5811_v27, 16 }
 0x173   : > { %15040 = vmatmul.mubr.bf16.vlgmr.msra.gmra.mxu0 %v13688_v47  ;;  %v5904_v46 = vrot.slane %v5903_v0, 4  ;;  %v5923_v57 = vrot.slane %v5921_v25, 4  ;;  %v5926_v33 = vrot.slane %v5924_v42, 5  ;;  %v2449_v20 = vadd.f32 %v16652_v36, %v16564_v31 }
 0x174   : > { %v5932_v19 = vrot.slane %v5930_v45, 5  ;;  %v16812_v12 = vpop.f32.mrf.mxu0  ;;  %v5914_v41 = vrot.slane %v5913_v50, 4  ;;  %v5936_v43 = vrot.slane %v5934_v51, 4  ;;  %v16817_v4 = vadd.f32 %v16681_v18, %v2451_v49  ;;  %v5816_v49 = vld [vmem:[#allocation2 + $0x78] sm:$0xf]  ;;  %v16829_v45 = vpop.f32.mrf.mxu1 }
 0x175   : > { %v5909_v58 = vsel %vm16079_vm5, %v5904_v46, %v5908_v56  ;;  %v5927_v22 = vor.u32 %v5926_v33, %v5923_v57  ;;  %v2452_v27 = vadd.f32 %v16671_v55, %v16569_v2  ;;  %v16822_v31 = vadd.f32 %v16691_v7, %v2449_v20  ;;  %v5815_v56 = vld [vmem:[#allocation2 + $0x74] sm:$0xf]  ;;  %19425 = vst [vmem:[#allocation26_spill] sm:$0xff] %v16829_v45  ;;  %v5843_v45 = vld [vmem:[#allocation2 + $0x108] sm:$0xf] }
 0x176   : > { %v5919_v36 = vsel %vm16079_vm5, %v5914_v41, %v5918_v52  ;;  %v5937_v47 = vor.u32 %v5936_v43, %v5932_v19  ;;  %v5942_v0 = vrot.slane %v5940_v23, 5  ;;  %v5945_v6 = vshrl.u32 %v5812_v13, 16  ;;  %v16831_v2 = vpop.f32.mrf.mxu0  ;;  %v5817_v52 = vld [vmem:[#allocation2 + $0x7c] sm:$0x1] }
 0x177   : > { %v13689_v25 = vcombine.low %v5909_v58, %v5919_v36  ;;  %v5928_v42 = vrot.slane %v5927_v22, 4  ;;  %v16827_v33 = vadd.f32 %v16709_v38, %v2452_v27  ;;  %v5948_v18 = vshll.u32 %v5812_v13, 16 }
 0x178   : > { %v5938_v55 = vrot.slane %v5937_v47, 4  ;;  %v5947_v7 = vrot.slane %v5945_v6, 4  ;;  %v5954_v46 = vshll.u32 %v5813_v5, 16  ;;  %v5958_v50 = vshrl.u32 %v5813_v5, 16  ;;  %v16839_v5 = vpop.f32.mrf.mxu1  ;;  %v16841_v36 = vpop.f32.mrf.mxu0 }
 0x179   : > { %15043 = vmatprep.mubr.bf16.mxu0 %v13689_v25  ;;  %v5933_v51 = vsel %vm16079_vm5, %v5928_v42, %v5932_v19  ;;  %v5950_v23 = vrot.slane %v5948_v18, 5  ;;  %v5964_v57 = vshll.u32 %v5814_v10, 16  ;;  %v2455_v38 = vadd.f32 %v16699_v24, %v16589_v32  ;;  %v5818_v25 = vld [vmem:[#allocation2 + $0x84] sm:$0xf]  ;;  %v5819_v18 = vld [vmem:[#allocation2 + $0x88] sm:$0xf] }
 0x17a   : > { %v5943_v13 = vsel %vm16079_vm5, %v5938_v55, %v5942_v0  ;;  %v5956_v20 = vrot.slane %v5954_v46, 5  ;;  %v5960_v58 = vrot.slane %v5958_v50, 4  ;;  %v5969_v27 = vshrl.u32 %v5815_v56, 16 }
 0x17b   : > { %v13690_v41 = vcombine.low %v5933_v51, %v5943_v13  ;;  %v5951_v43 = vor.u32 %v5950_v23, %v5947_v7  ;;  %v5966_v22 = vrot.slane %v5964_v57, 5  ;;  %v5972_v19 = vshll.u32 %v5815_v56, 16  ;;  %v5820_v51 = vld [vmem:[#allocation2 + $0x8c] sm:$0x1] }
 0x17c   : > { %v5961_v47 = vor.u32 %v5960_v58, %v5956_v20  ;;  %v5978_v6 = vshll.u32 %v5816_v49, 16  ;;  %v5982_v10 = vshrl.u32 %v5816_v49, 16  ;;  %v5971_v24 = vrot.slane %v5969_v27, 4  ;;  %v5822_v27 = vld [vmem:[#allocation2 + $0x98] sm:$0xf] }
 0x17d   : > { %15044 = vmatmul.mubr.bf16.gmra.mxu0 %v13690_v41  ;;  %v5952_v32 = vrot.slane %v5951_v43, 4  ;;  %v5988_v42 = vshll.u32 %v5817_v52, 16  ;;  %v2453_v0 = vadd.f32 %v16711_v40, %v16599_v1  ;;  %v5974_v7 = vrot.slane %v5972_v19, 5  ;;  %v16852_v52 = vpop.f32.mrf.mxu1 }
 0x17e   : > { %v5962_v55 = vrot.slane %v5961_v47, 4  ;;  %v5980_v46 = vrot.slane %v5978_v6, 5  ;;  %v5984_v50 = vrot.slane %v5982_v10, 4  ;;  %v16848_v49 = vadd.f32 %v16737_v48, %v2455_v38  ;;  %v5821_v38 = vld [vmem:[#allocation2 + $0x94] sm:$0xf] }
 0x17f   : > { %v5957_v23 = vsel %vm16079_vm5, %v5952_v32, %v5956_v20  ;;  %v5990_v56 = vrot.slane %v5988_v42, 5  ;;  %v2456_v57 = vadd.f32 %v16727_v62, %v16606_v60  ;;  %v5975_v40 = vor.u32 %v5974_v7, %v5971_v24  ;;  %v5823_v6 = vld [vmem:[#allocation2 + $0x9c] sm:$0x1]  ;;  %v16868_v42 = vpop.f32.mrf.mxu1 }
 0x180   : > { %v5967_v1 = vsel %vm16079_vm5, %v5962_v55, %v5966_v22  ;;  %v5985_v58 = vor.u32 %v5984_v50, %v5980_v46  ;;  %v16859_v41 = vadd.f32 %v16747_v39, %v2453_v0  ;;  %v5993_v48 = vshrl.u32 %v5818_v25, 16 }
 0x181   : > { %v13691_v20 = vcombine.low %v5957_v23, %v5967_v1  ;;  %v16862_v43 = vadd.f32 %v16765_v54, %v2456_v57  ;;  %v5976_v60 = vrot.slane %v5975_v40, 4  ;;  %v5996_v47 = vshll.u32 %v5818_v25, 16  ;;  %v5824_v40 = vld [vmem:[#allocation2 + $0xa4] sm:$0xf] }
 0x182   : > { %v16854_v13 = vpop.f32.mrf.mxu0  ;;  %v5986_v62 = vrot.slane %v5985_v58, 4  ;;  %v6002_v19 = vshll.u32 %v5819_v18, 16  ;;  %v5995_v22 = vrot.slane %v5993_v48, 4  ;;  %v6006_v32 = vshrl.u32 %v5819_v18, 16 }
 0x183   : > { %15047 = vmatprep.mubr.bf16.mxu0 %v13691_v20  ;;  %v6012_v24 = vshll.u32 %v5820_v51, 16  ;;  %v2459_v39 = vadd.f32 %v16755_v17, %v16622_v30  ;;  %v5981_v54 = vsel %vm16079_vm5, %v5976_v60, %v5980_v46  ;;  %v5998_v25 = vrot.slane %v5996_v47, 5 }
 0x184   : > { %v16864_v10 = vpop.f32.mrf.mxu0  ;;  %v5991_v0 = vsel %vm16079_vm5, %v5986_v62, %v5990_v56  ;;  %v6004_v55 = vrot.slane %v6002_v19, 5  ;;  %v6008_v50 = vrot.slane %v6006_v32, 4  ;;  %v6017_v1 = vshrl.u32 %v5821_v38, 16  ;;  %v16878_v56 = vpop.f32.mrf.mxu1  ;;  %v5825_v19 = vld [vmem:[#allocation2 + $0xa8] sm:$0xf] }
 0x185   : > { %v13692_v7 = vcombine.low %v5981_v54, %v5991_v0  ;;  %v6014_v23 = vrot.slane %v6012_v24, 5  ;;  %v5999_v57 = vor.u32 %v5998_v25, %v5995_v22  ;;  %v6020_v18 = vshll.u32 %v5821_v38, 16  ;;  %19426 = vst [vmem:[#allocation28_spill] sm:$0xff] %v16878_v56  ;;  %v5826_v24 = vld [vmem:[#allocation2 + $0xac] sm:$0x1] }
 0x186   : > { %v6026_v51 = vshll.u32 %v5822_v27, 16  ;;  %v16874_v58 = vpop.f32.mrf.mxu0  ;;  %v6009_v30 = vor.u32 %v6008_v50, %v6004_v55  ;;  %v6030_v17 = vshrl.u32 %v5822_v27, 16  ;;  %v6036_v20 = vshll.u32 %v5823_v6, 16 }
 0x187   : > { %15048 = vmatmul.mubr.bf16.gmra.mxu0 %v13692_v7  ;;  %v2457_v46 = vadd.f32 %v16767_v34, %v16635_v3  ;;  %v6000_v48 = vrot.slane %v5999_v57, 4  ;;  %v6019_v60 = vrot.slane %v6017_v1, 4  ;;  %v6022_v62 = vrot.slane %v6020_v18, 5 }
 0x188   : > { %v6028_v47 = vrot.slane %v6026_v51, 5  ;;  %v6010_v22 = vrot.slane %v6009_v30, 4  ;;  %v6032_v38 = vrot.slane %v6030_v17, 4  ;;  %v16881_v32 = vadd.f32 %v16789_v29, %v2459_v39  ;;  %v16890_v54 = vpop.f32.mrf.mxu0  ;;  %v5827_v39 = vld [vmem:[#allocation2 + $0xb4] sm:$0xf]  ;;  %v16894_v50 = vpop.f32.mrf.mxu1 }
 0x189   : > { %v6005_v27 = vsel %vm16079_vm5, %v6000_v48, %v6004_v55  ;;  %v6023_v6 = vor.u32 %v6022_v62, %v6019_v60  ;;  %v2460_v3 = vadd.f32 %v16775_v8, %v16639_v26  ;;  %v16888_v34 = vadd.f32 %v16804_v44, %v2457_v46  ;;  %v5828_v8 = vld [vmem:[#allocation2 + $0xb8] sm:$0xf]  ;;  %v5829_v17 = vld [vmem:[#allocation2 + $0xbc] sm:$0x1]  ;;  %v19427_v48 = vld [vmem:[#allocation32_spill] sm:$0xff] }
 0x18a   : > { %v6015_v0 = vsel %vm16079_vm5, %v6010_v22, %v6014_v23  ;;  %v6033_v25 = vor.u32 %v6032_v38, %v6028_v47  ;;  %v6038_v7 = vrot.slane %v6036_v20, 5  ;;  %v6041_v29 = vshrl.u32 %v5824_v40, 16  ;;  %v16907_v38 = vpop.f32.mrf.mxu1 }
 0x18b   : > { %v13693_v57 = vcombine.low %v6005_v27, %v6015_v0  ;;  %v6024_v55 = vrot.slane %v6023_v6, 4  ;;  %v16897_v1 = vadd.f32 %v16810_v53, %v2460_v3  ;;  %v6044_v26 = vshll.u32 %v5824_v40, 16 }
 0x18c   : > { %v6034_v44 = vrot.slane %v6033_v25, 4  ;;  %v6043_v18 = vrot.slane %v6041_v29, 4  ;;  %v6050_v51 = vshll.u32 %v5825_v19, 16  ;;  %v6054_v30 = vshrl.u32 %v5825_v19, 16  ;;  %v5830_v29 = vld [vmem:[#allocation2 + $0xc4] sm:$0xf] }
 0x18d   : > { %15051 = vmatprep.mubr.bf16.mxu0 %v13693_v57  ;;  %v6029_v23 = vsel %vm16079_vm5, %v6024_v55, %v6028_v47  ;;  %v6046_v20 = vrot.slane %v6044_v26, 5  ;;  %v6060_v46 = vshll.u32 %v5826_v24, 16  ;;  %v2463_v60 = vadd.f32 %v16806_v59, %v19427_v48  ;;  %v19428_v26 = vld [vmem:[#allocation34_spill] sm:$0xff]  ;;  %v16913_v48 = vpop.f32.mrf.mxu1 }
 0x18e   : > { %v6039_v53 = vsel %vm16079_vm5, %v6034_v44, %v6038_v7  ;;  %v6052_v40 = vrot.slane %v6050_v51, 5  ;;  %v6056_v22 = vrot.slane %v6054_v30, 4  ;;  %v6065_v3 = vshrl.u32 %v5827_v39, 16  ;;  %v5831_v44 = vld [vmem:[#allocation2 + $0xc8] sm:$0xf] }
 0x18f   : > { %v13694_v19 = vcombine.low %v6029_v23, %v6039_v53  ;;  %v6047_v27 = vor.u32 %v6046_v20, %v6043_v18  ;;  %v6062_v6 = vrot.slane %v6060_v46, 5  ;;  %v6068_v47 = vshll.u32 %v5827_v39, 16  ;;  %v5832_v46 = vld [vmem:[#allocation2 + $0xcc] sm:$0x1] }
 0x190   : > { %v6057_v0 = vor.u32 %v6056_v22, %v6052_v40  ;;  %v6074_v25 = vshll.u32 %v5828_v8, 16  ;;  %v6078_v24 = vshrl.u32 %v5828_v8, 16  ;;  %v6067_v57 = vrot.slane %v6065_v3, 4  ;;  %v15632_v22 = vld [vmem:[%s19355_s2 + $0x38] sm:$0xff]  }
 0x191   : > { %v16903_v62 = vpop.f32.mrf.mxu0  ;;  %15052 = vmatmul.mubr.bf16.gmra.mxu0 %v13694_v19  ;;  %v6048_v59 = vrot.slane %v6047_v27, 4  ;;  %v6084_v55 = vshll.u32 %v5829_v17, 16  ;;  %v2461_v7 = vadd.f32 %v16812_v12, %v19428_v26  ;;  %v6070_v23 = vrot.slane %v6068_v47, 5  ;;  %v19429_v17 = vld [vmem:[#allocation35_spill] sm:$0xff]  ;;  %15071 = vmatprep.subr.bf16.mxu1 %v15632_v22 }
 0x192   : > { %v6058_v30 = vrot.slane %v6057_v0, 4  ;;  %v6076_v18 = vrot.slane %v6074_v25, 5  ;;  %v6080_v20 = vrot.slane %v6078_v24, 4  ;;  %v16918_v53 = vadd.f32 %v16839_v5, %v2463_v60  ;;  %v5833_v60 = vld [vmem:[#allocation2 + $0xd4] sm:$0xf]  ;;  %15072 = vmatpush3.bf16.msra.mxu1 %v15632_v22 }
 0x193   : > { %v16911_v51 = vpop.f32.mrf.mxu0  ;;  %v6053_v39 = vsel %vm16079_vm5, %v6048_v59, %v6052_v40  ;;  %v6086_v8 = vrot.slane %v6084_v55, 5  ;;  %v2464_v12 = vadd.f32 %v16831_v2, %v19429_v17  ;;  %v6071_v27 = vor.u32 %v6070_v23, %v6067_v57  ;;  %v5834_v25 = vld [vmem:[#allocation2 + $0xd8] sm:$0xf]  ;;  %v16935_v57 = vpop.f32.mrf.mxu1 }
 0x194   : > { %v6063_v19 = vsel %vm16079_vm5, %v6058_v30, %v6062_v6  ;;  %v6081_v3 = vor.u32 %v6080_v20, %v6076_v18  ;;  %v16928_v0 = vadd.f32 %v16852_v52, %v2461_v7  ;;  %v6089_v5 = vshrl.u32 %v5830_v29, 16  ;;  %v5835_v6 = vld [vmem:[#allocation2 + $0xdc] sm:$0x1]  ;;  %19430 = vst [vmem:[#allocation32_spill] sm:$0xff] %v16935_v57 }
 0x195   : > { %v13695_v40 = vcombine.low %v6053_v39, %v6063_v19  ;;  %v16931_v47 = vadd.f32 %v16868_v42, %v2464_v12  ;;  %v16933_v2 = vpop.f32.mrf.mxu0  ;;  %v6072_v24 = vrot.slane %v6071_v27, 4  ;;  %v6092_v55 = vshll.u32 %v5830_v29, 16  ;;  %v19431_v42 = vld [vmem:[#allocation19_spill] sm:$0xff] }
 0x196   : > { %v6082_v59 = vrot.slane %v6081_v3, 4  ;;  %v6098_v26 = vshll.u32 %v5831_v44, 16  ;;  %v6091_v52 = vrot.slane %v6089_v5, 4  ;;  %v6102_v7 = vshrl.u32 %v5831_v44, 16  ;;  %v5836_v5 = vld [vmem:[#allocation2 + $0xe4] sm:$0xf] }
 0x197   : > { %15055 = vmatprep.mubr.bf16.mxu0 %v13695_v40  ;;  %v6108_v30 = vshll.u32 %v5832_v46, 16  ;;  %v2467_v23 = vadd.f32 %v16854_v13, %v19431_v42  ;;  %v6077_v20 = vsel %vm16079_vm5, %v6072_v24, %v6076_v18  ;;  %v6094_v17 = vrot.slane %v6092_v55, 5  ;;  %v16943_v3 = vpop.f32.mrf.mxu0  ;;  %v16945_v57 = vpop.f32.mrf.mxu1  ;;  %v19432_v42 = vld [vmem:[#allocation15_spill] sm:$0xff] }
 0x198   : > { %v6087_v39 = vsel %vm16079_vm5, %v6082_v59, %v6086_v8  ;;  %v6100_v29 = vrot.slane %v6098_v26, 5  ;;  %v6104_v19 = vrot.slane %v6102_v7, 4  ;;  %v6113_v40 = vshrl.u32 %v5833_v60, 16  ;;  %v15633_v59 = vld [vmem:[%s19355_s2 + $0x30] sm:$0xff]  }
 0x199   : > { %v13696_v12 = vcombine.low %v6077_v20, %v6087_v39  ;;  %v6110_v27 = vrot.slane %v6108_v30, 5  ;;  %v6095_v22 = vor.u32 %v6094_v17, %v6091_v52  ;;  %v6116_v44 = vshll.u32 %v5833_v60, 16  ;;  %v5837_v60 = vld [vmem:[#allocation2 + $0xe8] sm:$0xf]  ;;  %v5838_v17 = vld [vmem:[#allocation2 + $0xec] sm:$0x1]  ;;  %15073 = vmatprep.subr.bf16.mxu1 %v15633_v59 }
 0x19a   : > { %v6122_v46 = vshll.u32 %v5834_v25, 16  ;;  %v6105_v13 = vor.u32 %v6104_v19, %v6100_v29  ;;  %v6126_v18 = vshrl.u32 %v5834_v25, 16  ;;  %v6132_v24 = vshll.u32 %v5835_v6, 16  ;;  %15074 = vmatpush3.bf16.msra.mxu1 %v15633_v59 }
 0x19b   : > { %15056 = vmatmul.mubr.bf16.gmra.mxu0 %v13696_v12  ;;  %v2465_v8 = vadd.f32 %v16864_v10, %v19432_v42  ;;  %v6096_v55 = vrot.slane %v6095_v22, 4  ;;  %v6115_v26 = vrot.slane %v6113_v40, 4  ;;  %v6118_v52 = vrot.slane %v6116_v44, 5  ;;  %v19433_v12 = vld [vmem:[#allocation20_spill] sm:$0xff]  ;;  %v3168_v40 = vpop.f32.mrf.mxu1 }
 0x19c   : > { %v6124_v7 = vrot.slane %v6122_v46, 5  ;;  %v6106_v30 = vrot.slane %v6105_v13, 4  ;;  %v6128_v20 = vrot.slane %v6126_v18, 4  ;;  %v16953_v39 = vadd.f32 %v16894_v50, %v2467_v23  ;;  %v5839_v13 = vld [vmem:[#allocation2 + $0xf4] sm:$0xf] }
 0x19d   : > { %v6101_v10 = vsel %vm16079_vm5, %v6096_v55, %v6100_v29  ;;  %v6119_v6 = vor.u32 %v6118_v52, %v6115_v26  ;;  %v2468_v19 = vadd.f32 %v16874_v58, %v19433_v12  ;;  %v16962_v22 = vadd.f32 %v16907_v38, %v2465_v8  ;;  %v5840_v26 = vld [vmem:[#allocation2 + $0xf8] sm:$0xf]  ;;  %v5841_v12 = vld [vmem:[#allocation2 + $0xfc] sm:$0x1] }
 0x19e   : > { %v6111_v50 = vsel %vm16079_vm5, %v6106_v30, %v6110_v27  ;;  %v6129_v23 = vor.u32 %v6128_v20, %v6124_v7  ;;  %v6134_v44 = vrot.slane %v6132_v24, 5  ;;  %v6137_v46 = vshrl.u32 %v5836_v5, 16 }
 0x19f   : > { %v13697_v42 = vcombine.low %v6101_v10, %v6111_v50  ;;  %v6120_v29 = vrot.slane %v6119_v6, 4  ;;  %v16969_v55 = vadd.f32 %v16913_v48, %v2468_v19  ;;  %v6140_v58 = vshll.u32 %v5836_v5, 16  ;;  %v14826_v48 = vpop.f32.mrf.mxu1 }
 0x1a0   : > { %v6130_v38 = vrot.slane %v6129_v23, 4  ;;  %v6139_v8 = vrot.slane %v6137_v46, 4  ;;  %v6146_v52 = vshll.u32 %v5837_v60, 16  ;;  %v6150_v59 = vshrl.u32 %v5837_v60, 16  ;;  %v15634_v60 = vld [vmem:[%s19355_s2 + $0x28] sm:$0xff]  }
 0x1a1   : > { %v16955_v25 = vpop.f32.mrf.mxu0  ;;  %15059 = vmatprep.mubr.bf16.mxu0 %v13697_v42  ;;  %v6125_v27 = vsel %vm16079_vm5, %v6120_v29, %v6124_v7  ;;  %v6142_v24 = vrot.slane %v6140_v58, 5  ;;  %v6156_v30 = vshll.u32 %v5838_v17, 16  ;;  %v2471_v20 = vadd.f32 %v16903_v62, %v16717_v11  ;;  %v5842_v62 = vld [vmem:[#allocation2 + $0x104] sm:$0xf]  ;;  %15075 = vmatprep.subr.bf16.mxu1 %v15634_v60 }
 0x1a2   : > { %v6135_v5 = vsel %vm16079_vm5, %v6130_v38, %v6134_v44  ;;  %v6148_v10 = vrot.slane %v6146_v52, 5  ;;  %v6152_v6 = vrot.slane %v6150_v59, 4  ;;  %v6161_v46 = vshrl.u32 %v5839_v13, 16  ;;  %15076 = vmatpush3.bf16.msra.mxu1 %v15634_v60 }
 0x1a3   : > { %v16966_v18 = vpop.f32.mrf.mxu0  ;;  %v13698_v50 = vcombine.low %v6125_v27, %v6135_v5  ;;  %v6143_v23 = vor.u32 %v6142_v24, %v6139_v8  ;;  %v6158_v7 = vrot.slane %v6156_v30, 5  ;;  %v6164_v42 = vshll.u32 %v5839_v13, 16  ;;  %v16988_v27 = vpop.f32.mrf.mxu1 }
 0x1a4   : > { %v6153_v17 = vor.u32 %v6152_v6, %v6148_v10  ;;  %v6170_v29 = vshll.u32 %v5840_v26, 16  ;;  %v6174_v11 = vshrl.u32 %v5840_v26, 16  ;;  %v6163_v38 = vrot.slane %v6161_v46, 4  ;;  %19435 = vst [vmem:[#allocation35_spill] sm:$0xff] %v16988_v27  ;;  %v5844_v26 = vld [vmem:[#allocation2 + $0x10c] sm:$0x1] }
 0x1a5   : > { %v16971_v56 = vpop.f32.mrf.mxu0  ;;  %15060 = vmatmul.mubr.bf16.gmra.mxu0 %v13698_v50  ;;  %v6144_v44 = vrot.slane %v6143_v23, 4  ;;  %v6180_v52 = vshll.u32 %v5841_v12, 16  ;;  %v2469_v59 = vadd.f32 %v16911_v51, %v16725_v21  ;;  %v6166_v24 = vrot.slane %v6164_v42, 5 }
 0x1a6   : > { %v6154_v8 = vrot.slane %v6153_v17, 4  ;;  %v6172_v13 = vrot.slane %v6170_v29, 5  ;;  %v6176_v30 = vrot.slane %v6174_v11, 4  ;;  %v16995_v12 = vadd.f32 %v16945_v57, %v2471_v20  ;;  %v5845_v11 = vld [vmem:[#allocation2 + $0x114] sm:$0xf] }
 0x1a7   : > { %v16979_v19 = vpop.f32.mrf.mxu0  ;;  %v6149_v6 = vsel %vm16079_vm5, %v6144_v44, %v6148_v10  ;;  %v6182_v50 = vrot.slane %v6180_v52, 5  ;;  %v2472_v21 = vadd.f32 %v16933_v2, %v16731_v63  ;;  %v6167_v60 = vor.u32 %v6166_v24, %v6163_v38  ;;  %v5846_v44 = vld [vmem:[#allocation2 + $0x118] sm:$0xf]  ;;  %v5847_v2 = vld [vmem:[#allocation2 + $0x11c] sm:$0x1] }
 0x1a8   : > { %19434 = vst [vmem:[#allocation34_spill] sm:$0xff] %v16979_v19  ;;  %v6159_v51 = vsel %vm16079_vm5, %v6154_v8, %v6158_v7  ;;  %v6177_v23 = vor.u32 %v6176_v30, %v6172_v13  ;;  %v17001_v46 = vadd.f32 %v3168_v40, %v2469_v59  ;;  %v6185_v10 = vshrl.u32 %v5842_v62, 16  ;;  %v15635_v40 = vld [vmem:[%s19355_s2 + $0x20] sm:$0xff]  }
 0x1a9   : > { %v16984_v58 = vpop.f32.mrf.mxu0  ;;  %v13699_v42 = vcombine.low %v6149_v6, %v6159_v51  ;;  %v17005_v29 = vadd.f32 %v14826_v48, %v2472_v21  ;;  %v6168_v20 = vrot.slane %v6167_v60, 4  ;;  %v6188_v27 = vshll.u32 %v5842_v62, 16  ;;  %v15636_v48 = vld [vmem:[%s19355_s2 + $0x78] sm:$0xff]   ;;  %15077 = vmatprep.subr.bf16.mxu1 %v15635_v40 }
 0x1aa   : > { %v6178_v52 = vrot.slane %v6177_v23, 4  ;;  %v6194_v63 = vshll.u32 %v5843_v45, 16  ;;  %v6187_v7 = vrot.slane %v6185_v10, 4  ;;  %v6198_v38 = vshrl.u32 %v5843_v45, 16  ;;  %15119 = vmatprep.subr.bf16.mxu0 %v15636_v48  ;;  %15078 = vmatpush3.bf16.msra.mxu1 %v15635_v40 }
 0x1ab   : > { %v16990_v5 = vpop.f32.mrf.mxu0  ;;  %15063 = vmatprep.mubr.bf16.mxu0 %v13699_v42  ;;  %v6204_v59 = vshll.u32 %v5844_v26, 16  ;;  %v2475_v8 = vadd.f32 %v16955_v25, %v16745_v61  ;;  %v6173_v24 = vsel %vm16079_vm5, %v6168_v20, %v6172_v13  ;;  %v6190_v6 = vrot.slane %v6188_v27, 5  ;;  %15120 = vmatpush3.bf16.msra.mxu0 %v15636_v48  ;;  %v15637_v13 = vld [vmem:[%s19355_s2 + $0x70] sm:$0xff]  }
 0x1ac   : > { %v6183_v30 = vsel %vm16079_vm5, %v6178_v52, %v6182_v50  ;;  %v6196_v21 = vrot.slane %v6194_v63, 5  ;;  %v6200_v23 = vrot.slane %v6198_v38, 4  ;;  %v6209_v61 = vshrl.u32 %v5845_v11, 16  ;;  %15121 = vmatprep.subr.bf16.mxu0 %v15637_v13 }
 0x1ad   : > { %v17003_v17 = vpop.f32.mrf.mxu0  ;;  %v13700_v60 = vcombine.low %v6173_v24, %v6183_v30  ;;  %v6206_v42 = vrot.slane %v6204_v59, 5  ;;  %v6191_v26 = vor.u32 %v6190_v6, %v6187_v7  ;;  %v6212_v25 = vshll.u32 %v5845_v11, 16 }
 0x1ae   : > { %v6218_v10 = vshll.u32 %v5846_v44, 16  ;;  %v6201_v27 = vor.u32 %v6200_v23, %v6196_v21  ;;  %v6222_v50 = vshrl.u32 %v5846_v44, 16  ;;  %v6228_v20 = vshll.u32 %v5847_v2, 16 }
 0x1af   : > { %v14829_v57 = vpop.f32.mrf.mxu1  ;;  %v17007_v19 = vpop.f32.mrf.mxu0  ;;  %15064 = vmatmul.mubr.bf16.gmra.mxu0 %v13700_v60  ;;  %v2473_v52 = vadd.f32 %v16966_v18, %v16753_v37  ;;  %v6192_v40 = vrot.slane %v6191_v26, 4  ;;  %v6211_v48 = vrot.slane %v6209_v61, 4  ;;  %v6214_v7 = vrot.slane %v6212_v25, 5 }
 0x1b0   : > { %19436 = vst [vmem:[#allocation19_spill] sm:$0xff] %v17007_v19  ;;  %v6220_v38 = vrot.slane %v6218_v10, 5  ;;  %v6202_v59 = vrot.slane %v6201_v27, 4  ;;  %v6224_v24 = vrot.slane %v6222_v50, 4  ;;  %v17028_v30 = vadd.f32 %v14829_v57, %v2475_v8  ;;  %15122 = vmatpush3.bf16.msra.mxu0 %v15637_v13 }
 0x1b1   : > { %v3184_v62 = vpop.f32.mrf.mxu1  ;;  %v14853_v51 = vpop.f32.mrf.mxu0  ;;  %v6197_v44 = vsel %vm16079_vm5, %v6192_v40, %v6196_v21  ;;  %v6215_v2 = vor.u32 %v6214_v7, %v6211_v48  ;;  %v2476_v37 = vadd.f32 %v16971_v56, %v16759_v14  ;;  %v6230_v57 = vrot.slane %v6228_v20, 5 }
 0x1b2   : > { %v17036_v18 = vadd.f32 %v3184_v62, %v2473_v52  ;;  %v6207_v23 = vsel %vm16079_vm5, %v6202_v59, %v6206_v42  ;;  %v6225_v26 = vor.u32 %v6224_v24, %v6220_v38  ;;  %v17044_v8 = vadd.f32 %v16984_v58, %v16780_v35  ;;  %v15640_v24 = vld [vmem:[%s19355_s2 + $0x60] sm:$0xff]  }
 0x1b3   : > { %v14830_v45 = vpop.f32.mrf.mxu1  ;;  %v3538_v19 = vpop.f32.mrf.mxu0  ;;  %v13701_v21 = vcombine.low %v6197_v44, %v6207_v23  ;;  %v6216_v25 = vrot.slane %v6215_v2, 4  ;;  %v17052_v14 = vadd.f32 %v16990_v5, %v16787_v9  ;;  %v17056_v42 = vadd.f32 %v17003_v17, %v16796_v15 }
 0x1b4   : > { %v17048_v10 = vadd.f32 %v14830_v45, %v2476_v37  ;;  %v6226_v62 = vrot.slane %v6225_v26, 4  ;;  %v17063_v58 = vadd.f32 %v14853_v51, %v16817_v4  ;;  %v17070_v27 = vadd.f32 %v3538_v19, %v16822_v31 }
 0x1b5   : > { %v17026_v63 = vpop.f32.mrf.mxu1  ;;  %v14854_v11 = vpop.f32.mrf.mxu0  ;;  %15067 = vmatprep.mubr.bf16.mxu0 %v13701_v21  ;;  %v6221_v35 = vsel %vm16079_vm5, %v6216_v25, %v6220_v38 }
 0x1b6   : > { %v6231_v9 = vsel %vm16079_vm5, %v6226_v62, %v6230_v57  ;;  %v17073_v15 = vadd.f32 %v14854_v11, %v16827_v33 }
 0x1b7   : > { %v17030_v6 = vpop.f32.mrf.mxu1  ;;  %v17038_v60 = vpop.f32.mrf.mxu0  ;;  %v13702_v17 = vcombine.low %v6221_v35, %v6231_v9  ;;  %v15641_v35 = vld [vmem:[%s19355_s2 + $0x10] sm:$0xff]  }
 0x1b9   : > { %v17046_v61 = vpop.f32.mrf.mxu1  ;;  %v14857_v56 = vpop.f32.mrf.mxu0  ;;  %15068 = vmatmul.mubr.bf16.gmra.mxu0 %v13702_v17 }
 0x1ba   : > { %v3691_v50 = vadd.f32 %v14857_v56, %v16848_v49  ;;  %v15638_v49 = vld [vmem:[%s19355_s2 + $0x18] sm:$0xff]  }
 0x1bb   : > { %v17058_v13 = vpop.f32.mrf.mxu1  ;;  %v3554_v45 = vpop.f32.mrf.mxu0  ;;  %15079 = vmatprep.subr.bf16.mxu1 %v15638_v49 }
 0x1bc   : > { %v3689_v4 = vadd.f32 %v3554_v45, %v16859_v41  ;;  %v15639_v41 = vld [vmem:[%s19355_s2 + $0x68] sm:$0xff]   ;;  %15080 = vmatpush3.bf16.msra.mxu1 %v15638_v49  ;;  %v15642_v45 = vld [vmem:[%s19355_s2 + $0x58] sm:$0xff]  }
 0x1bd   : > { %v17067_v5 = vpop.f32.mrf.mxu1  ;;  %v14858_v20 = vpop.f32.mrf.mxu0  ;;  %15123 = vmatprep.subr.bf16.mxu0 %v15639_v41  ;;  %15081 = vmatprep.subr.bf16.mxu1 %v15641_v35 }
 0x1be   : > { %v3692_v51 = vadd.f32 %v14858_v20, %v16862_v43  ;;  %15124 = vmatpush3.bf16.msra.mxu0 %v15639_v41 }
 0x1bf   : > { %v17076_v52 = vpop.f32.mrf.mxu1  ;;  %v17080_v40 = vpop.f32.mrf.mxu0  ;;  %15125 = vmatprep.subr.bf16.mxu0 %v15640_v24 }
 0x1c0   : > { %15082 = vmatpush3.bf16.msra.mxu1 %v15641_v35  ;;  %v15646_v35 = vld [vmem:[%s19355_s2 + $0x40] sm:$0xff]  }
 0x1c1   : > { %v17082_v48 = vpop.f32.mrf.mxu1  ;;  %v14861_v31 = vpop.f32.mrf.mxu0 }
 0x1c2   : > { %v3695_v33 = vadd.f32 %v14861_v31, %v16881_v32  ;;  %15126 = vmatpush3.bf16.msra.mxu0 %v15640_v24 }
 0x1c3   : > { %v17084_v19 = vpop.f32.mrf.mxu1  ;;  %v3570_v7 = vpop.f32.mrf.mxu0  ;;  %15127 = vmatprep.subr.bf16.mxu0 %v15642_v45 }
 0x1c4   : > { %v3693_v38 = vadd.f32 %v3570_v7, %v16888_v34 }
 0x1c5   : > { %v17093_v43 = vpop.f32.mrf.mxu1  ;;  %v14862_v11 = vpop.f32.mrf.mxu0 }
 0x1c6   : > { %v3696_v32 = vadd.f32 %v14862_v11, %v16897_v1  ;;  %15128 = vmatpush3.bf16.msra.mxu0 %v15642_v45 }
 0x1c7   : > { %v14905_v59 = vpop.f32.mrf.mxu1  ;;  %v17102_v2 = vpop.f32.mrf.mxu0 }
 0x1c8   : > { %v17100_v44 = vadd.f32 %v14905_v59, %v3691_v50 }
 0x1c9   : > { %v4372_v37 = vpop.f32.mrf.mxu1  ;;  %v14865_v34 = vpop.f32.mrf.mxu0 }
 0x1ca   : > { %v17104_v23 = vadd.f32 %v4372_v37, %v3689_v4  ;;  %v3699_v57 = vadd.f32 %v14865_v34, %v16918_v53 }
 0x1cb   : > { %v14906_v26 = vpop.f32.mrf.mxu1  ;;  %v3586_v1 = vpop.f32.mrf.mxu0 }
 0x1cc   : > { %v17107_v21 = vadd.f32 %v14906_v26, %v3692_v51  ;;  %v3697_v56 = vadd.f32 %v3586_v1, %v16928_v0  ;;  %v15643_v51 = vld [vmem:[%s19355_s2 + $0x50] sm:$0xff]  }
 0x1cd   : > { %v17109_v25 = vpop.f32.mrf.mxu1  ;;  %v14866_v62 = vpop.f32.mrf.mxu0  ;;  %15129 = vmatprep.subr.bf16.mxu0 %v15643_v51 }
 0x1ce   : > { %v3700_v17 = vadd.f32 %v14866_v62, %v16931_v47  ;;  %15130 = vmatpush3.bf16.msra.mxu0 %v15643_v51  ;;  %v6921_v51 = vld [vmem:[#allocation2 + $0x4] sm:$0xf] }
 0x1cf   : > { %v14909_v9 = vpop.f32.mrf.mxu1  ;;  %v17121_v50 = vpop.f32.mrf.mxu0 }
 0x1d0   : > { %v17119_v53 = vadd.f32 %v14909_v9, %v3695_v33 }
 0x1d1   : > { %v4388_v20 = vpop.f32.mrf.mxu1  ;;  %v14869_v4 = vpop.f32.mrf.mxu0 }
 0x1d2   : > { %v17123_v0 = vadd.f32 %v4388_v20, %v3693_v38  ;;  %v3703_v49 = vadd.f32 %v14869_v4, %v16953_v39  ;;  %v15644_v39 = vld [vmem:[%s19355_s2 + $0x8] sm:$0xff]  }
 0x1d3   : > { %v14910_v31 = vpop.f32.mrf.mxu1  ;;  %v3602_v33 = vpop.f32.mrf.mxu0  ;;  %15083 = vmatprep.subr.bf16.mxu1 %v15644_v39 }
 0x1d4   : > { %v17129_v47 = vadd.f32 %v14910_v31, %v3696_v32  ;;  %v3701_v7 = vadd.f32 %v3602_v33, %v16962_v22  ;;  %v15645_v32 = vld [vmem:[%s19355_s2 + $0x48] sm:$0xff]   ;;  %15084 = vmatpush3.bf16.msra.mxu1 %v15644_v39 }
 0x1d5   : > { %v17131_v41 = vpop.f32.mrf.mxu1  ;;  %v14870_v11 = vpop.f32.mrf.mxu0  ;;  %15131 = vmatprep.subr.bf16.mxu0 %v15645_v32  ;;  %v6922_v31 = vld [vmem:[#allocation2 + $0x8] sm:$0xf] }
 0x1d6   : > { %19437 = vst [vmem:[#allocation15_spill] sm:$0xff] %v17131_v41  ;;  %v3704_v59 = vadd.f32 %v14870_v11, %v16969_v55  ;;  %15132 = vmatpush3.bf16.msra.mxu0 %v15645_v32  ;;  %v6974_v11 = vshrl.u32 %v6921_v51, 16  ;;  %v6920_v32 = vld [vmem:[#allocation2] sm:$0x8] }
 0x1d7   : > { %v14913_v38 = vpop.f32.mrf.mxu1  ;;  %v17137_v37 = vpop.f32.mrf.mxu0  ;;  %15133 = vmatprep.subr.bf16.mxu0 %v15646_v35 }
 0x1d8   : > { %v17135_v24 = vadd.f32 %v14913_v38, %v3699_v57  ;;  %v6983_v38 = vshrl.u32 %v6922_v31, 16 }
 0x1d9   : > { %v4404_v34 = vpop.f32.mrf.mxu1  ;;  %v14873_v22 = vpop.f32.mrf.mxu0 }
 0x1da   : > { %v17145_v26 = vadd.f32 %v4404_v34, %v3697_v56  ;;  %v3707_v55 = vadd.f32 %v14873_v22, %v16995_v12  ;;  %15134 = vmatpush3.bf16.msra.mxu0 %v15646_v35  ;;  %v15648_v12 = vld [vmem:[#allocation2 + $0x4] sm:$0xff]   ;;  %v6969_v22 = vshrl.u32 %v6920_v32, 16 }
 0x1db   : > { %v14914_v1 = vpop.f32.mrf.mxu1  ;;  %v3618_v62 = vpop.f32.mrf.mxu0  ;;  %15135 = vmatprep.mubr.bf16.mxu0 %v15648_v12 }
 0x1dc   : > { %v17148_v57 = vadd.f32 %v14914_v1, %v3700_v17  ;;  %v3705_v56 = vadd.f32 %v3618_v62, %v17001_v46  ;;  %v6976_v1 = vrot.slane %v6974_v11, 7  ;;  %v6977_v62 = vshll.u32 %v6921_v51, 16 }
 0x1dd   : > { %v17153_v45 = vpop.f32.mrf.mxu1  ;;  %v14874_v9 = vpop.f32.mrf.mxu0  ;;  %v13745_v12 = vrot.slane %v6969_v22, 11 }
 0x1de   : > { %19438 = vst [vmem:[#allocation20_spill] sm:$0xff] %v17153_v45  ;;  %v3708_v4 = vadd.f32 %v14874_v9, %v17005_v29  ;;  %v6985_v9 = vrot.slane %v6983_v38, 7  ;;  %v6979_v41 = vor.u32 %v6977_v62, %v6976_v1 }
 0x1df   : > { %v14917_v20 = vpop.f32.mrf.mxu1  ;;  %v17159_v33 = vpop.f32.mrf.mxu0 }
 0x1e0   : > { %v17157_v17 = vadd.f32 %v14917_v20, %v3703_v49  ;;  %v15647_v49 = vld [vmem:[%s19355_s2] sm:$0xff]   ;;  %v6986_v20 = vshll.u32 %v6922_v31, 16 }
 0x1e1   : > { %v4420_v39 = vpop.f32.mrf.mxu1  ;;  %v14877_v46 = vpop.f32.mrf.mxu0  ;;  %15085 = vmatprep.subr.bf16.mxu1 %v15647_v49 }
 0x1e2   : > { %v17161_v34 = vadd.f32 %v4420_v39, %v3701_v7  ;;  %v3711_v35 = vadd.f32 %v14877_v46, %v17028_v30  ;;  %v6981_v7 = vrot.slane %v6976_v1, 4  ;;  %v6988_v51 = vor.u32 %v6986_v20, %v6985_v9  ;;  %15086 = vmatpush3.bf16.msra.mxu1 %v15647_v49 }
 0x1e3   : > { %v14918_v29 = vpop.f32.mrf.mxu1  ;;  %v3634_v45 = vpop.f32.mrf.mxu0  ;;  %v6980_v30 = vsel %vm15873_vm2, %v13745_v12, %v6979_v41  ;;  %v17188_v41 = vld [vmem:[%s19355_s2 + $0xb8] sm:$0xff]  }
 0x1e4   : > { %v17167_v16 = vadd.f32 %v14918_v29, %v3704_v59  ;;  %v3709_v11 = vadd.f32 %v3634_v45, %v17036_v18  ;;  %v6989_v59 = vsel %vm15873_vm2, %v6981_v7, %v6988_v51  ;;  %19440 = vst [vmem:[#allocation38_spill] sm:$0xff] %v17188_v41  ;;  %15167 = vmatprep.subr.bf16.mxu1 %v17188_v41 }
 0x1e5   : > { %v17169_v39 = vpop.f32.mrf.mxu1  ;;  %v14878_v32 = vpop.f32.mrf.mxu0  ;;  %v13761_v22 = vcombine.low %v6980_v30, %v6989_v59 }
 0x1e6   : > { %v3712_v31 = vadd.f32 %v14878_v32, %v17048_v10 }
 0x1e7   : > { %v14921_v46 = vpop.f32.mrf.mxu1  ;;  %15087 = vmatprep.mubr.bf16.mxu1 %v13761_v22  ;;  %v17193_v49 = vpop.f32.mrf.mxu0 }
 0x1e8   : > { %v17177_v38 = vadd.f32 %v14921_v46, %v3707_v55 }
 0x1e9   : > { %v4436_v1 = vpop.f32.mrf.mxu1 }
 0x1ea   : > { %v17179_v62 = vadd.f32 %v4436_v1, %v3705_v56 }
 0x1eb   : > { %v14922_v18 = vpop.f32.mrf.mxu1 }
 0x1ec   : > { %v17181_v45 = vadd.f32 %v14922_v18, %v3708_v4 }
 0x1ed   : > { %v17183_v29 = vpop.f32.mrf.mxu1 }
 0x1ee   : > { %19439 = vst [vmem:[#allocation37_spill] sm:$0xff] %v17181_v45  ;;  %v19488_v45 = vld [vmem:[#allocation27_spill] sm:$0xff] }
 0x1ef   : > { %v14925_v10 = vpop.f32.mrf.mxu1 }
 0x1f0   : > { %v17191_v55 = vadd.f32 %v14925_v10, %v3711_v35  ;;  %v17228_v10 = vld [vmem:[%s19355_s2 + $0xf8] sm:$0xff]  }
 0x1f1   : > { %v4452_v56 = vpop.f32.mrf.mxu1  ;;  %19452 = vst [vmem:[#allocation50_spill] sm:$0xff] %v17228_v10  ;;  %15215 = vmatprep.subr.bf16.mxu0 %v17228_v10 }
 0x1f2   : > { %19441 = vst [vmem:[#allocation39_spill] sm:$0xff] %v17191_v55  ;;  %v17195_v9 = vadd.f32 %v4452_v56, %v3709_v11  ;;  %v17199_v12 = vpop.f32.mrf.mxu0 }
 0x1f3   : > { %v14926_v20 = vpop.f32.mrf.mxu1 }
 0x1f4   : > { %19442 = vst [vmem:[#allocation40_spill] sm:$0xff] %v17195_v9  ;;  %v17197_v4 = vadd.f32 %v14926_v20, %v3712_v31  ;;  %v17203_v51 = vpop.f32.mrf.mxu0 }
 0x1f5   : > { %v17201_v7 = vpop.f32.mrf.mxu1 }
 0x1f6   : > { %19443 = vst [vmem:[#allocation41_spill] sm:$0xff] %v17197_v4  ;;  %v17207_v30 = vpop.f32.mrf.mxu0 }
 0x1f7   : > { %v17205_v32 = vpop.f32.mrf.mxu1 }
 0x1f8   : > { %19444 = vst [vmem:[#allocation42_spill] sm:$0xff] %v17205_v32  ;;  %v17211_v46 = vpop.f32.mrf.mxu0 }
 0x1f9   : > { %v17209_v35 = vpop.f32.mrf.mxu1 }
 0x1fa   : > { %19445 = vst [vmem:[#allocation43_spill] sm:$0xff] %v17209_v35  ;;  %v17215_v11 = vpop.f32.mrf.mxu0 }
 0x1fb   : > { %v17213_v59 = vpop.f32.mrf.mxu1  ;;  %19447 = vst [vmem:[#allocation45_spill] sm:$0xff] %v17215_v11 }
 0x1fc   : > { %19446 = vst [vmem:[#allocation44_spill] sm:$0xff] %v17213_v59  ;;  %v17219_v22 = vpop.f32.mrf.mxu0 }
 0x1fd   : > { %v17217_v31 = vpop.f32.mrf.mxu1  ;;  %19449 = vst [vmem:[#allocation47_spill] sm:$0xff] %v17219_v22 }
 0x1fe   : > { %19448 = vst [vmem:[#allocation46_spill] sm:$0xff] %v17217_v31  ;;  %v17223_v18 = vpop.f32.mrf.mxu0 }
 0x1ff   : > { %v17221_v1 = vpop.f32.mrf.mxu1  ;;  %19451 = vst [vmem:[#allocation49_spill] sm:$0xff] %v17223_v18  ;;  %v19486_v18 = vld [vmem:[#allocation31_spill] sm:$0xff] }
 0x200   : > { %19450 = vst [vmem:[#allocation48_spill] sm:$0xff] %v17221_v1  ;;  %v17232_v20 = vpop.f32.mrf.mxu0 }
 0x201   : > { %v17230_v56 = vpop.f32.mrf.mxu1  ;;  %19454 = vst [vmem:[#allocation52_spill] sm:$0xff] %v17232_v20  ;;  %v19484_v20 = vld [vmem:[#allocation23_spill] sm:$0xff] }
 0x202   : > { %19453 = vst [vmem:[#allocation51_spill] sm:$0xff] %v17230_v56  ;;  %v14953_v28 = vpop.f32.mrf.mxu0 }
 0x203   : > { %v17235_v41 = vpop.f32.mrf.mxu1  ;;  %v17238_v4 = vadd.f32 %v14953_v28, %v17100_v44 }
 0x204   : > { %19455 = vst [vmem:[#allocation53_spill] sm:$0xff] %v17235_v41  ;;  %v5159_v55 = vpop.f32.mrf.mxu0 }
 0x205   : > { %19456 = vst [vmem:[#allocation54_spill] sm:$0xff] %v17238_v4  ;;  %v17240_v9 = vpop.f32.mrf.mxu1  ;;  %v17243_v1 = vadd.f32 %v5159_v55, %v17104_v23 }
 0x206   : > { %19457 = vst [vmem:[#allocation55_spill] sm:$0xff] %v17240_v9  ;;  %v14954_v59 = vpop.f32.mrf.mxu0  ;;  %v19475_v9 = vld [vmem:[#allocation8_spill] sm:$0xff] }
 0x207   : > { %19458 = vst [vmem:[#allocation56_spill] sm:$0xff] %v17243_v1  ;;  %v17245_v31 = vpop.f32.mrf.mxu1  ;;  %v17248_v56 = vadd.f32 %v14954_v59, %v17107_v21 }
 0x208   : > { %19459 = vst [vmem:[#allocation57_spill] sm:$0xff] %v17245_v31  ;;  %v17252_v10 = vpop.f32.mrf.mxu0  ;;  %v19474_v31 = vld [vmem:[#allocation9_spill] sm:$0xff] }
 0x209   : > { %19460 = vst [vmem:[#allocation58_spill] sm:$0xff] %v17248_v56  ;;  %v17250_v35 = vpop.f32.mrf.mxu1  ;;  %19462 = vst [vmem:[#allocation60_spill] sm:$0xff] %v17252_v10 }
 0x20a   : > { %19461 = vst [vmem:[#allocation59_spill] sm:$0xff] %v17250_v35  ;;  %v14957_v28 = vpop.f32.mrf.mxu0 }
 0x20b   : > { %v17254_v41 = vpop.f32.mrf.mxu1  ;;  %v17257_v44 = vadd.f32 %v14957_v28, %v17119_v53  ;;  %v19472_v53 = vld [vmem:[#allocation7_spill] sm:$0xff]  ;;  %v19473_v28 = vld [vmem:[#allocation6_spill] sm:$0xff] }
 0x20c   : > { %19463 = vst [vmem:[#allocation61_spill] sm:$0xff] %v17254_v41  ;;  %v5175_v23 = vpop.f32.mrf.mxu0 }
 0x20d   : > { %19464 = vst [vmem:[#allocation62_spill] sm:$0xff] %v17257_v44  ;;  %v17259_v4 = vpop.f32.mrf.mxu1  ;;  %v17262_v55 = vadd.f32 %v5175_v23, %v17123_v0  ;;  %v1625_v44 = vadd.f32 %v19473_v28, %v19472_v53  ;;  %v1629_v0 = vadd.f32 %v19475_v9, %v19474_v31  ;;  %v19476_v23 = vld [vmem:[#allocation11_spill] sm:$0xff]  ;;  %v19485_v53 = vld [vmem:[#allocation21_spill] sm:$0xff] }
 0x20e   : > { %19465 = vst [vmem:[#allocation63_spill] sm:$0xff] %v17259_v4  ;;  %v14958_v21 = vpop.f32.mrf.mxu0  ;;  %v1645_v28 = vadd.f32 %v19485_v53, %v19484_v20  ;;  %v19487_v31 = vld [vmem:[#allocation25_spill] sm:$0xff] }
 0x20f   : > { %19466 = vst [vmem:[#allocation64_spill] sm:$0xff] %v17262_v55  ;;  %v17264_v1 = vpop.f32.mrf.mxu1  ;;  %v17267_v59 = vadd.f32 %v14958_v21, %v17129_v47  ;;  %v19477_v55 = vld [vmem:[#allocation10_spill] sm:$0xff]  ;;  %v19480_v21 = vld [vmem:[#allocation13_spill] sm:$0xff]  ;;  %v2446_v22 = vadd.f32 %v19486_v18, %v1625_v44 }
 0x210   : > { %19467 = vst [vmem:[#allocation65_spill] sm:$0xff] %v17264_v1  ;;  %v17271_v35 = vpop.f32.mrf.mxu0  ;;  %v1633_v1 = vadd.f32 %v19477_v55, %v19476_v23  ;;  %v1649_v55 = vadd.f32 %v19488_v45, %v19487_v31  ;;  %v19489_v23 = vld [vmem:[#allocation29_spill] sm:$0xff]  ;;  %v2466_v53 = vadd.f32 %v16890_v54, %v1645_v28  ;;  %v19494_v31 = vld [vmem:[#allocation34_spill] sm:$0xff] }
 0x211   : > { %19468 = vst [vmem:[#allocation66_spill] sm:$0xff] %v17267_v59  ;;  %v17269_v56 = vpop.f32.mrf.mxu1  ;;  %19470 = vst [vmem:[#allocation68_spill] sm:$0xff] %v17271_v35  ;;  %v19481_v59 = vld [vmem:[#allocation12_spill] sm:$0xff]  ;;  %v19482_v35 = vld [vmem:[#allocation17_spill] sm:$0xff] }
 0x212   : > { %19469 = vst [vmem:[#allocation67_spill] sm:$0xff] %v17269_v56  ;;  %v14961_v4 = vpop.f32.mrf.mxu0  ;;  %v1637_v56 = vadd.f32 %v19481_v59, %v19480_v21  ;;  %v19493_v21 = vld [vmem:[#allocation24_spill] sm:$0xff]  ;;  %v2470_v45 = vadd.f32 %v16943_v3, %v1649_v55  ;;  %v19500_v54 = vld [vmem:[#allocation26_spill] sm:$0xff] }
 0x213   : > { %v17273_v41 = vpop.f32.mrf.mxu1  ;;  %v17282_v10 = vadd.f32 %v14961_v4, %v17135_v24  ;;  %v19490_v24 = vld [vmem:[#allocation30_spill] sm:$0xff]  ;;  %v19501_v3 = vld [vmem:[#allocation28_spill] sm:$0xff] }
 0x214   : > { %19471 = vst [vmem:[#allocation69_spill] sm:$0xff] %v17273_v41  ;;  %v19483_v41 = vld [vmem:[#allocation14_spill] sm:$0xff]  ;;  %v5191_v9 = vpop.f32.mrf.mxu0  ;;  %v1653_v4 = vadd.f32 %v19490_v24, %v19489_v23  ;;  %v2458_v20 = vadd.f32 %v19493_v21, %v1637_v56 }
 0x215   : > { %19478 = vst [vmem:[#allocation7_spill] sm:$0xff] %v17282_v10  ;;  %v17284_v47 = vpop.f32.mrf.mxu1  ;;  %v1641_v32 = vadd.f32 %v19483_v41, %v19482_v35  ;;  %v19491_v10 = vld [vmem:[#allocation36_spill] sm:$0xff]  ;;  %v17299_v11 = vadd.f32 %v5191_v9, %v17145_v26  ;;  %v19492_v41 = vld [vmem:[#allocation22_spill] sm:$0xff] }
 0x216   : > { %19479 = vst [vmem:[#allocation6_spill] sm:$0xff] %v17284_v47  ;;  %v2450_v47 = vadd.f32 %v19491_v10, %v1629_v0  ;;  %v2454_v35 = vadd.f32 %v19492_v41, %v1633_v1  ;;  %v14962_v44 = vpop.f32.mrf.mxu0  ;;  %v2474_v23 = vadd.f32 %v19494_v31, %v1653_v4  ;;  %v19497_v0 = vld [vmem:[#allocation33_spill] sm:$0xff]  ;;  %v19498_v1 = vld [vmem:[#allocation16_spill] sm:$0xff]  ;;  %v3244_v28 = vadd.f32 %v19500_v54, %v2458_v20  ;;  %v19502_v4 = vld [vmem:[#allocation19_spill] sm:$0xff] }
 0x217   : > { %v17301_v59 = vpop.f32.mrf.mxu1  ;;  %v2462_v18 = vadd.f32 %v16841_v36, %v1641_v32  ;;  %v17310_v10 = vadd.f32 %v14962_v44, %v17148_v57  ;;  %v3232_v9 = vadd.f32 %v19497_v0, %v2446_v22  ;;  %v19499_v36 = vld [vmem:[#allocation18_spill] sm:$0xff]  ;;  %v6926_v44 = vld [vmem:[#allocation2 + $0x20] sm:$0x8]  ;;  %v4501_v20 = vadd.f32 %v17030_v6, %v17044_v8 }
 0x218   : > { %v17315_v24 = vpop.f32.mrf.mxu0  ;;  %v3236_v56 = vadd.f32 %v19498_v1, %v2450_v47  ;;  %v3240_v32 = vadd.f32 %v19499_v36, %v2454_v35  ;;  %v19503_v31 = vld [vmem:[#allocation32_spill] sm:$0xff]  ;;  %v3260_v0 = vadd.f32 %v17026_v63, %v2474_v23  ;;  %v6923_v35 = vld [vmem:[#allocation2 + $0x10] sm:$0x8]  ;;  %v7013_v6 = vshrl.u32 %v6926_v44, 16 }
 0x219   : > { %19495 = vst [vmem:[#allocation9_spill] sm:$0xff] %v17310_v10  ;;  %v17312_v26 = vpop.f32.mrf.mxu1  ;;  %v3248_v55 = vadd.f32 %v19501_v3, %v2462_v18  ;;  %v3682_v21 = vadd.f32 %v19502_v4, %v3232_v9  ;;  %v3252_v10 = vadd.f32 %v19503_v31, %v2466_v53  ;;  %v4499_v18 = vadd.f32 %v17046_v61, %v17052_v14  ;;  %v6929_v8 = vld [vmem:[#allocation2 + $0x30] sm:$0x8]  ;;  %v6944_v31 = vld [vmem:[#allocation2 + $0x80] sm:$0x8] }
 0x21a   : > { %19496 = vst [vmem:[#allocation8_spill] sm:$0xff] %v17312_v26  ;;  %v14965_v57 = vpop.f32.mrf.mxu0  ;;  %v19504_v26 = vld [vmem:[#allocation35_spill] sm:$0xff]  ;;  %v4502_v9 = vadd.f32 %v17058_v13, %v17056_v42  ;;  %v3686_v53 = vadd.f32 %v17038_v60, %v3236_v56  ;;  %v3690_v63 = vadd.f32 %v17080_v40, %v3240_v32  ;;  %v8909_v54 = vld [vmem:[#allocation2 + $0x10] sm:$0x8]  ;;  %v6991_v13 = vshrl.u32 %v6923_v35, 16 }
 0x21b   : > { %v17318_v41 = vpop.f32.mrf.mxu1  ;;  %v3256_v22 = vadd.f32 %v19504_v26, %v2470_v45  ;;  %v17328_v47 = vadd.f32 %v14965_v57, %v17157_v17  ;;  %v6932_v26 = vld [vmem:[#allocation2 + $0x40] sm:$0x8]  ;;  %v3694_v17 = vadd.f32 %v17102_v2, %v3244_v28  ;;  %v4500_v61 = vadd.f32 %v17067_v5, %v3682_v21  ;;  %v6935_v3 = vld [vmem:[#allocation2 + $0x50] sm:$0x8] }
 0x21c   : > { %v5207_v45 = vpop.f32.mrf.mxu0  ;;  %v3698_v14 = vadd.f32 %v17121_v50, %v3248_v55  ;;  %v3702_v60 = vadd.f32 %v17137_v37, %v3252_v10  ;;  %v4505_v40 = vadd.f32 %v17076_v52, %v17063_v58  ;;  %v4503_v2 = vadd.f32 %v17082_v48, %v17070_v27  ;;  %v6938_v28 = vld [vmem:[#allocation2 + $0x60] sm:$0x8] }
 0x21d   : > { %v17330_v1 = vpop.f32.mrf.mxu1  ;;  %v17342_v23 = vadd.f32 %v5207_v45, %v17161_v34  ;;  %v7057_v32 = vshrl.u32 %v6932_v26, 16  ;;  %v4506_v5 = vadd.f32 %v17084_v19, %v17073_v15  ;;  %v3706_v50 = vadd.f32 %v17159_v33, %v3256_v22  ;;  %v19506_v21 = vld [vmem:[#allocation20_spill] sm:$0xff] }
 0x21e   : > { %v14966_v42 = vpop.f32.mrf.mxu0  ;;  %v7035_v10 = vshrl.u32 %v6929_v8, 16  ;;  %v8958_v58 = vshrl.u32 %v8909_v54, 16  ;;  %v4504_v52 = vadd.f32 %v17093_v43, %v3686_v53  ;;  %v4508_v27 = vadd.f32 %v17109_v25, %v3690_v63  ;;  %v6941_v43 = vld [vmem:[#allocation2 + $0x70] sm:$0x8]  ;;  %v6950_v45 = vld [vmem:[#allocation2 + $0xa0] sm:$0x8] }
 0x21f   : > { %v17344_v36 = vpop.f32.mrf.mxu1  ;;  %v17354_v34 = vadd.f32 %v14966_v42, %v17167_v16  ;;  %v19505_v16 = vld [vmem:[#allocation15_spill] sm:$0xff]  ;;  %v17370_v4 = vrot.slane %v7013_v6, 11  ;;  %v17373_v15 = vadd.f32 %v19506_v21, %v3698_v14  ;;  %v17376_v19 = vadd.f32 %v17169_v39, %v3702_v60  ;;  %v6947_v14 = vld [vmem:[#allocation2 + $0x90] sm:$0x8] }
 0x220   : > { %v17361_v37 = vpop.f32.mrf.mxu0  ;;  %v17366_v48 = vadd.f32 %v19505_v16, %v3694_v17  ;;  %v17378_v57 = vrot.slane %v6991_v13, 11  ;;  %v7101_v44 = vshrl.u32 %v6938_v28, 16  ;;  %v3710_v25 = vadd.f32 %v17193_v49, %v3260_v0  ;;  %v6953_v21 = vld [vmem:[#allocation2 + $0xb0] sm:$0x8] }
 0x221   : > { %v17356_v56 = vpop.f32.mrf.mxu1  ;;  %v17384_v35 = vrot.slane %v7057_v32, 11  ;;  %v7079_v53 = vshrl.u32 %v6935_v3, 16  ;;  %v17387_v26 = vadd.f32 %v17183_v29, %v3706_v50  ;;  %v5288_v39 = vadd.f32 %v17199_v12, %v4501_v20  ;;  %v19512_v32 = vld [vmem:[#allocation37_spill] sm:$0xff]  ;;  %v6956_v50 = vld [vmem:[#allocation2 + $0xc0] sm:$0x8] }
 0x222   : > { %v14969_v33 = vpop.f32.mrf.mxu0  ;;  %v17390_v17 = vrot.slane %v7035_v10, 11  ;;  %v17392_v6 = vrot.slane %v8958_v58, 11  ;;  %v5286_v8 = vadd.f32 %v17203_v51, %v4499_v18  ;;  %v7123_v0 = vshrl.u32 %v6941_v43, 16  ;;  %v19511_v51 = vld [vmem:[#allocation45_spill] sm:$0xff]  ;;  %v19514_v10 = vld [vmem:[#allocation47_spill] sm:$0xff] }
 0x223   : > { %v17368_v55 = vpop.f32.mrf.mxu1  ;;  %v17382_v22 = vadd.f32 %v14969_v33, %v17177_v38  ;;  %19507 = vst [vmem:[#allocation11_spill] sm:$0xff] %v17384_v35  ;;  %v7145_v54 = vshrl.u32 %v6944_v31, 16  ;;  %v5289_v29 = vadd.f32 %v17207_v30, %v4502_v9  ;;  %v5287_v60 = vadd.f32 %v17211_v46, %v4500_v61  ;;  %v19515_v30 = vld [vmem:[#allocation49_spill] sm:$0xff]  ;;  %v19516_v46 = vld [vmem:[#allocation52_spill] sm:$0xff] }
 0x224   : > { %v5223_v63 = vpop.f32.mrf.mxu0  ;;  %19508 = vst [vmem:[#allocation10_spill] sm:$0xff] %v17390_v17  ;;  %19509 = vst [vmem:[#allocation13_spill] sm:$0xff] %v17392_v6  ;;  %v17402_v20 = vrot.slane %v7101_v44, 11  ;;  %v7189_v42 = vshrl.u32 %v6950_v45, 16  ;;  %v17405_v13 = vadd.f32 %v17201_v7, %v3710_v25  ;;  %v5292_v18 = vadd.f32 %v19511_v51, %v4505_v40  ;;  %v19517_v7 = vld [vmem:[#allocation42_spill] sm:$0xff]  ;;  %v19518_v40 = vld [vmem:[#allocation43_spill] sm:$0xff] }
 0x225   : > { %v17395_v49 = vpop.f32.mrf.mxu1  ;;  %v17398_v38 = vadd.f32 %v5223_v63, %v17179_v62  ;;  %v17411_v62 = vrot.slane %v7079_v53, 11  ;;  %v5290_v3 = vadd.f32 %v19514_v10, %v4503_v2  ;;  %v5293_v9 = vadd.f32 %v19515_v30, %v4506_v5  ;;  %v19521_v2 = vld [vmem:[#allocation44_spill] sm:$0xff]  ;;  %v19538_v6 = vld [vmem:[#allocation61_spill] sm:$0xff] }
 0x226   : > { %v14970_v12 = vpop.f32.mrf.mxu0  ;;  %19510 = vst [vmem:[#allocation12_spill] sm:$0xff] %v17402_v20  ;;  %v5291_v61 = vadd.f32 %v19516_v46, %v4504_v52  ;;  %v7167_v16 = vshrl.u32 %v6947_v14, 16  ;;  %v17419_v33 = vadd.f32 %v19517_v7, %v5288_v39  ;;  %v17422_v44 = vadd.f32 %v19518_v40, %v5286_v8  ;;  %v19522_v52 = vld [vmem:[#allocation46_spill] sm:$0xff]  ;;  %v19524_v14 = vld [vmem:[#allocation48_spill] sm:$0xff] }
 0x227   : > { %v17409_v28 = vadd.f32 %v14970_v12, %v19512_v32  ;;  %19513 = vst [vmem:[#allocation17_spill] sm:$0xff] %v17411_v62  ;;  %v17424_v43 = vpop.f32.mrf.mxu1  ;;  %v17426_v31 = vrot.slane %v7123_v0, 11  ;;  %v17428_v25 = vrot.slane %v7145_v54, 11  ;;  %v17431_v5 = vadd.f32 %v19521_v2, %v5289_v29  ;;  %v19525_v8 = vld [vmem:[#allocation60_spill] sm:$0xff]  ;;  %v19526_v32 = vld [vmem:[#allocation39_spill] sm:$0xff]  ;;  %v19543_v20 = vld [vmem:[#allocation62_spill] sm:$0xff] }
 0x228   : > { %v17416_v58 = vpop.f32.mrf.mxu0  ;;  %v17434_v53 = vadd.f32 %v19522_v52, %v5287_v60  ;;  %v17436_v63 = vrot.slane %v7189_v42, 11  ;;  %v7233_v39 = vshrl.u32 %v6956_v50, 16  ;;  %v17439_v12 = vadd.f32 %v19524_v14, %v5292_v18  ;;  %v6962_v10 = vld [vmem:[#allocation2 + $0xe0] sm:$0x8]  ;;  %v19527_v29 = vld [vmem:[#allocation51_spill] sm:$0xff]  ;;  %v19528_v60 = vld [vmem:[#allocation53_spill] sm:$0xff] }
 0x229   : > { %19519 = vst [vmem:[#allocation14_spill] sm:$0xff] %v17426_v31  ;;  %19520 = vst [vmem:[#allocation23_spill] sm:$0xff] %v17428_v25  ;;  %v5295_v51 = vadd.f32 %v19525_v8, %v4508_v27  ;;  %v7211_v54 = vshrl.u32 %v6953_v21, 16  ;;  %v8912_v30 = vld [vmem:[#allocation2 + $0x20] sm:$0x8]  ;;  %v17446_v46 = vadd.f32 %v19527_v29, %v5290_v3  ;;  %v17449_v7 = vadd.f32 %v19528_v60, %v5293_v9  ;;  %v19529_v42 = vld [vmem:[#allocation55_spill] sm:$0xff]  ;;  %v17466_v9 = vpop.f32.mrf.mxu1 }
 0x22a   : > { %v14973_v45 = vpop.f32.mrf.mxu0  ;;  %19523 = vst [vmem:[#allocation21_spill] sm:$0xff] %v17436_v63  ;;  %v17452_v40 = vadd.f32 %v19529_v42, %v5291_v61  ;;  %v17454_v18 = vrot.slane %v7167_v16, 11  ;;  %v6959_v2 = vld [vmem:[#allocation2 + $0xd0] sm:$0x8]  ;;  %v19532_v52 = vld [vmem:[#allocation57_spill] sm:$0xff]  ;;  %v19533_v21 = vld [vmem:[#allocation56_spill] sm:$0xff] }
 0x22b   : > { %v17443_v0 = vadd.f32 %v14973_v45, %v19526_v32  ;;  %v19531_v27 = vld [vmem:[#allocation54_spill] sm:$0xff]  ;;  %v19534_v14 = vld [vmem:[#allocation59_spill] sm:$0xff]  ;;  %v19535_v3 = vld [vmem:[#allocation68_spill] sm:$0xff]  ;;  %v17483_v31 = vrot.slane %v7211_v54, 11 }
 0x22c   : > { %v5239_v50 = vpop.f32.mrf.mxu0  ;;  %19530 = vst [vmem:[#allocation31_spill] sm:$0xff] %v17454_v18  ;;  %v17458_v45 = vadd.f32 %v19532_v52, %v19531_v27  ;;  %v17462_v8 = vadd.f32 %v19534_v14, %v19533_v21  ;;  %v5299_v32 = vadd.f32 %v19535_v3, %v17366_v48  ;;  %v19536_v29 = vld [vmem:[#allocation40_spill] sm:$0xff]  ;;  %v6965_v60 = vld [vmem:[#allocation2 + $0xf0] sm:$0x8]  ;;  %v17475_v52 = vrot.slane %v7233_v39, 11  ;;  %v19540_v14 = vld [vmem:[#allocation63_spill] sm:$0xff] }
 0x22d   : > { %v17469_v61 = vadd.f32 %v5239_v50, %v19536_v29  ;;  %v8091_v16 = vld [vmem:[#allocation2 + $0x4] sm:$0xf]  ;;  %v19537_v42 = vld [vmem:[#allocation58_spill] sm:$0xff]  ;;  %v7277_v18 = vshrl.u32 %v6962_v10, 16  ;;  %v8980_v21 = vshrl.u32 %v8912_v30, 16  ;;  %v17478_v25 = vadd.f32 %v19540_v14, %v5295_v51  ;;  %v19541_v48 = vld [vmem:[#allocation41_spill] sm:$0xff] }
 0x22e   : > { %v17473_v63 = vadd.f32 %v19538_v6, %v19537_v42  ;;  %v14974_v27 = vpop.f32.mrf.mxu0  ;;  %19539 = vst [vmem:[#allocation25_spill] sm:$0xff] %v17475_v52  ;;  %19542 = vst [vmem:[#allocation27_spill] sm:$0xff] %v17483_v31  ;;  %v7255_v50 = vshrl.u32 %v6959_v2, 16  ;;  %v8092_v29 = vld [vmem:[#allocation2 + $0x8] sm:$0xf]  ;;  %v7299_v39 = vshrl.u32 %v6965_v60, 16 }
 0x22f   : > { %v17481_v3 = vadd.f32 %v14974_v27, %v19541_v48  ;;  %v19544_v62 = vld [vmem:[#allocation65_spill] sm:$0xff]  ;;  %v8915_v42 = vld [vmem:[#allocation2 + $0x30] sm:$0x8]  ;;  %v8140_v10 = vshrl.u32 %v8091_v16, 16  ;;  %v8143_v30 = vshll.u32 %v8091_v16, 16  ;;  %v19546_v52 = vld [vmem:[#allocation64_spill] sm:$0xff] }
 0x230   : > { %v17487_v17 = vadd.f32 %v19544_v62, %v19543_v20  ;;  %v17489_v6 = vpop.f32.mrf.mxu0  ;;  %v19547_v51 = vld [vmem:[#allocation67_spill] sm:$0xff]  ;;  %v19548_v27 = vld [vmem:[#allocation66_spill] sm:$0xff]  ;;  %v19549_v48 = vld [vmem:[#allocation69_spill] sm:$0xff]  ;;  %v5303_v20 = vadd.f32 %v17315_v24, %v17373_v15  ;;  %v17504_v62 = vpop.f32.mrf.mxu1  ;;  %v17506_v60 = vrot.slane %v7277_v18, 11  ;;  %v17508_v35 = vrot.slane %v8980_v21, 11 }
 0x231   : > { %v17493_v14 = vadd.f32 %v19547_v51, %v19546_v52  ;;  %v17497_v54 = vadd.f32 %v19549_v48, %v19548_v27  ;;  %v19550_v2 = vld [vmem:[#allocation6_spill] sm:$0xff]  ;;  %v8149_v16 = vshll.u32 %v8092_v29, 16  ;;  %v19553_v52 = vld [vmem:[#allocation7_spill] sm:$0xff]  ;;  %v5307_v27 = vadd.f32 %v17361_v37, %v17376_v19  ;;  %v19554_v24 = vld [vmem:[#allocation8_spill] sm:$0xff] }
 0x232   : > { %19545 = vst [vmem:[#allocation29_spill] sm:$0xff] %v17487_v17  ;;  %v17500_v31 = vadd.f32 %v19550_v2, %v5299_v32  ;;  %19551 = vst [vmem:[#allocation30_spill] sm:$0xff] %v17506_v60  ;;  %v8153_v17 = vshrl.u32 %v8092_v29, 16  ;;  %v17512_v51 = vadd.f32 %v17301_v59, %v19553_v52  ;;  %v17516_v32 = vrot.slane %v7255_v50, 11  ;;  %v17525_v21 = vld [vmem:[%s19356_s3] ss:$0 sm:$0xff]  ;;  %v5676_v50 = vpop.f32.mrf.mxu1 }
 0x233   : > { %19552 = vst [vmem:[#allocation36_spill] sm:$0xff] %v17508_v35  ;;  %v9002_v48 = vshrl.u32 %v8915_v42, 16  ;;  %v17520_v15 = vadd.f32 %v19554_v24, %v17299_v11  ;;  %v15041_v18 = vpop.f32.mrf.mxu0  ;;  %v17527_v29 = vrot.slane %v7299_v39, 11  ;;  %v8142_v59 = vrot.slane %v8140_v10, 4  ;;  %v19556_v52 = vld [vmem:[#allocation9_spill] sm:$0xff] }
 0x234   : > { %v8145_v2 = vrot.slane %v8143_v30, 5  ;;  %v17531_v37 = vadd.f32 %v17318_v41, %v19556_v52  ;;  %v17534_v19 = vadd.f32 %v17330_v1, %v5303_v20  ;;  %v17538_v11 = vadd.f32 %v17344_v36, %v17328_v47  ;;  %v8093_v24 = vld [vmem:[#allocation2 + $0xc] sm:$0x1]  ;;  %v8096_v35 = vld [vmem:[#allocation2 + $0x1c] sm:$0x1] }
 0x235   : > { %19555 = vst [vmem:[#allocation22_spill] sm:$0xff] %v17527_v29  ;;  %v6556_v42 = vadd.f32 %v15041_v18, %v17419_v33  ;;  %v8099_v39 = vld [vmem:[#allocation2 + $0x2c] sm:$0x1]  ;;  %v17543_v10 = vadd.f32 %v17356_v56, %v17342_v23  ;;  %v17547_v41 = vadd.f32 %v17368_v55, %v17354_v34  ;;  %v17552_v1 = vld [vmem:[%s19357_s4] ss:$0 sm:$0xff]  ;;  %v6395_v47 = vpop.f32.mrf.mxu0  ;;  %v17554_v36 = vrot.slane %v8149_v16, 5 }
 0x236   : > { %v8155_v33 = vrot.slane %v8153_v17, 4  ;;  %v17557_v30 = vadd.f32 %v17395_v49, %v5307_v27  ;;  %v6554_v23 = vadd.f32 %v6395_v47, %v17422_v44  ;;  %v17561_v56 = vrot.slane %v9002_v48, 11  ;;  %v8918_v34 = vld [vmem:[#allocation2 + $0x40] sm:$0x8]  ;;  %v15021_v17 = vpop.f32.mrf.mxu1  ;;  %v8921_v47 = vld [vmem:[#allocation2 + $0x50] sm:$0x8] }
 0x237   : > { %v6659_v20 = vmul.f32 %v17525_v21, %v6556_v42  ;;  %v15042_v55 = vpop.f32.mrf.mxu0  ;;  %v8146_v18 = vor.u32 %v8145_v2, %v8142_v59  ;;  %v8159_v52 = vshll.u32 %v8093_v24, 16  ;;  %v8183_v29 = vshll.u32 %v8096_v35, 16 }
 0x238   : > { %v8207_v60 = vshll.u32 %v8099_v39, 16  ;;  %v17565_v16 = vadd.f32 %v17424_v43, %v17382_v22  ;;  %v6657_v27 = vmul.f32 %v17525_v21, %v6554_v23  ;;  %v6557_v42 = vadd.f32 %v15042_v55, %v17431_v5  ;;  %v8102_v55 = vld [vmem:[#allocation2 + $0x3c] sm:$0x1] }
 0x239   : > { %v6698_v49 = vadd.f32 %v17552_v1, %v6659_v20  ;;  %v17572_v44 = vadd.f32 %v17466_v9, %v17398_v38  ;;  %v5311_v48 = vadd.f32 %v17416_v58, %v17387_v26  ;;  %v6398_v35 = vpop.f32.mrf.mxu0  ;;  %v8156_v59 = vor.u32 %v8155_v33, %v17554_v36  ;;  %v5689_v26 = vpop.f32.mrf.mxu1 }
 0x23a   : > { %v9024_v2 = vshrl.u32 %v8918_v34, 16  ;;  %v6696_v43 = vadd.f32 %v17552_v1, %v6657_v27  ;;  %v6660_v24 = vmul.f32 %v17525_v21, %v6557_v42  ;;  %v6555_v39 = vadd.f32 %v6398_v35, %v17434_v53  ;;  %v8927_v27 = vld [vmem:[#allocation2 + $0x70] sm:$0x8] }
 0x23b   : > { %v6730_v22 = vmax.f32 %v6698_v49, 0.0  ;;  %v17580_v5 = vrot.slane %v8146_v18, 4  ;;  %v17582_v20 = vrot.slane %v8159_v52, 5  ;;  %v17584_v38 = vrot.slane %v8183_v29, 5  ;;  %v8105_v49 = vld [vmem:[#allocation2 + $0x4c] sm:$0x1] }
 0x23c   : > { %v17586_v9 = vrot.slane %v8207_v60, 5  ;;  %v6728_v33 = vmax.f32 %v6696_v43, 0.0  ;;  %v6699_v23 = vadd.f32 %v17552_v1, %v6660_v24  ;;  %v6658_v34 = vmul.f32 %v17525_v21, %v6555_v39  ;;  %v8924_v60 = vld [vmem:[#allocation2 + $0x60] sm:$0x8] }
 0x23d   : > { %19557 = vst [vmem:[#allocation24_spill] sm:$0xff] %v17584_v38  ;;  %v14177_v58 = vpack.c.bf16 %v6730_v22, %v6730_v22  ;;  %v17592_v53 = vadd.f32 %v17504_v62, %v17409_v28  ;;  %v17594_v18 = vadd.f32 %v5676_v50, %v5311_v48  ;;  %v17596_v52 = vrot.slane %v8156_v59, 4  ;;  %v15045_v43 = vpop.f32.mrf.mxu0  ;;  %v8108_v48 = vld [vmem:[#allocation2 + $0x5c] sm:$0x1]  ;;  %v8111_v59 = vld [vmem:[#allocation2 + $0x6c] sm:$0x1] }
 0x23e   : > { %19558 = vst [vmem:[#allocation34_spill] sm:$0xff] %v17586_v9  ;;  %v9046_v29 = vshrl.u32 %v8921_v47, 16  ;;  %v14175_v42 = vpack.c.bf16 %v6728_v33, %v6728_v33  ;;  %v6731_v35 = vmax.f32 %v6699_v23, 0.0  ;;  %v6697_v22 = vadd.f32 %v17552_v1, %v6658_v34  ;;  %v15022_v47 = vpop.f32.mrf.mxu1 }
 0x23f   : > { %6890 = vst [vmem:[#allocation2 + $0x24] sm:$0xf] %v14177_v58  ;;  %v17599_v24 = vrot.slane %v9024_v2, 11  ;;  %v17602_v39 = vadd.f32 %v15021_v17, %v17443_v0  ;;  %v6560_v28 = vadd.f32 %v15045_v43, %v17439_v12  ;;  %v8231_v62 = vshll.u32 %v8102_v55, 16  ;;  %v6411_v33 = vpop.f32.mrf.mxu0 }
 0x240   : > { %v8255_v50 = vshll.u32 %v8105_v49, 16  ;;  %6888 = vst [vmem:[#allocation2 + $0x14] sm:$0xf] %v14175_v42  ;;  %v14178_v9 = vpack.c.bf16 %v6731_v35, %v6731_v35  ;;  %v6729_v58 = vmax.f32 %v6697_v22, 0.0  ;;  %v9068_v23 = vshrl.u32 %v8924_v60, 16 }
 0x241   : > { %v9090_v38 = vshrl.u32 %v8927_v27, 16  ;;  %v17606_v34 = vadd.f32 %v5689_v26, %v17469_v61  ;;  %v6663_v2 = vmul.f32 %v17525_v21, %v6560_v28  ;;  %v6558_v0 = vadd.f32 %v6411_v33, %v17446_v46  ;;  %v15046_v49 = vpop.f32.mrf.mxu0 }
 0x242   : > { %v17610_v17 = vrot.slane %v9046_v29, 11  ;;  %v17614_v12 = vadd.f32 %v17489_v6, %v17405_v13  ;;  %6891 = vst [vmem:[#allocation2 + $0x28] sm:$0xf] %v14178_v9  ;;  %v14176_v55 = vpack.c.bf16 %v6729_v58, %v6729_v58  ;;  %v8279_v42 = vshll.u32 %v8108_v48, 16  ;;  %v17622_v29 = vld [vmem:[#allocation2 + $0x80] sm:$0x8] }
 0x243   : > { %v8303_v35 = vshll.u32 %v8111_v59, 16  ;;  %v17617_v60 = vadd.f32 %v15022_v47, %v17481_v3  ;;  %v6702_v61 = vadd.f32 %v17552_v1, %v6663_v2  ;;  %v6661_v26 = vmul.f32 %v17525_v21, %v6558_v0  ;;  %19559 = vst [vmem:[#allocation33_spill] sm:$0xff] %v17622_v29  ;;  %v6414_v27 = vpop.f32.mrf.mxu0 }
 0x244   : > { %v6561_v46 = vadd.f32 %v15046_v49, %v17449_v7  ;;  %6889 = vst [vmem:[#allocation2 + $0x18] sm:$0xf] %v14176_v55  ;;  %v17624_v13 = vrot.slane %v8231_v62, 5  ;;  %v17626_v6 = vrot.slane %v8255_v50, 5  ;;  %v17628_v9 = vrot.slane %v9068_v23, 11 }
 0x245   : > { %v17630_v22 = vrot.slane %v9090_v38, 11  ;;  %v6734_v3 = vmax.f32 %v6702_v61, 0.0  ;;  %v6700_v43 = vadd.f32 %v17552_v1, %v6661_v26  ;;  %v6559_v48 = vadd.f32 %v6414_v27, %v17452_v40 }
 0x246   : > { %v6664_v28 = vmul.f32 %v17525_v21, %v6561_v46  ;;  %v6927_v7 = vld [vmem:[#allocation2 + $0x24] sm:$0xf]  ;;  %v17637_v58 = vrot.slane %v8279_v42, 5  ;;  %v17639_v62 = vrot.slane %v8303_v35, 5 }
 0x247   : > { %19560 = vst [vmem:[#allocation16_spill] sm:$0xff] %v17630_v22  ;;  %v7018_v59 = vshrl.u32 %v6927_v7, 16  ;;  %v17635_v47 = vld [vmem:[#allocation2 + $0x24] sm:$0xf]  ;;  %v14181_v33 = vpack.c.bf16 %v6734_v3, %v6734_v3  ;;  %v6732_v38 = vmax.f32 %v6700_v43, 0.0  ;;  %v6662_v2 = vmul.f32 %v17525_v21, %v6559_v48  ;;  %v15049_v55 = vpop.f32.mrf.mxu0 }
 0x248   : > { %19561 = vst [vmem:[#allocation18_spill] sm:$0xff] %v17637_v58  ;;  %19562 = vst [vmem:[#allocation26_spill] sm:$0xff] %v17639_v62  ;;  %v6703_v23 = vadd.f32 %v17552_v1, %v6664_v28  ;;  %v6924_v0 = vld [vmem:[#allocation2 + $0x14] sm:$0xf]  ;;  %v7021_v26 = vshll.u32 %v6927_v7, 16  ;;  %v6564_v27 = vadd.f32 %v15049_v55, %v17458_v45 }
 0x249   : > { %v6996_v49 = vshrl.u32 %v6924_v0, 16  ;;  %v6999_v40 = vshll.u32 %v6924_v0, 16  ;;  %v17644_v61 = vrot.slane %v7018_v59, 7  ;;  %6894 = vst [vmem:[#allocation2 + $0x44] sm:$0xf] %v14181_v33  ;;  %v14179_v42 = vpack.c.bf16 %v6732_v38, %v6732_v38  ;;  %v6427_v43 = vpop.f32.mrf.mxu0  ;;  %v15664_v59 = vld [vmem:[%s19355_s2 + $0xf0] sm:$0xff]  }
 0x24a   : > { %v6735_v46 = vmax.f32 %v6703_v23, 0.0  ;;  %v6701_v35 = vadd.f32 %v17552_v1, %v6662_v2  ;;  %v6928_v3 = vld [vmem:[#allocation2 + $0x28] sm:$0xf]  ;;  %v6667_v23 = vmul.f32 %v17525_v21, %v6564_v27  ;;  %v6562_v45 = vadd.f32 %v6427_v43, %v17462_v8 }
 0x24b   : > { %v6998_v50 = vrot.slane %v6996_v49, 7  ;;  %v17649_v28 = vor.u32 %v7021_v26, %v17644_v61  ;;  %v7027_v48 = vshrl.u32 %v6928_v3, 16  ;;  %6892 = vst [vmem:[#allocation2 + $0x34] sm:$0xf] %v14179_v42  ;;  %v15649_v2 = vld [vmem:[#allocation2 + $0x14] sm:$0xff]   ;;  %v15050_v55 = vpop.f32.mrf.mxu0  ;;  %v15650_v49 = vld [vmem:[#allocation2 + $0x24] sm:$0xff]  }
 0x24c   : > { %v14182_v33 = vpack.c.bf16 %v6735_v46, %v6735_v46  ;;  %v6733_v38 = vmax.f32 %v6701_v35, 0.0  ;;  %v6925_v0 = vld [vmem:[#allocation2 + $0x18] sm:$0xf]  ;;  %v7025_v29 = vrot.slane %v17644_v61, 4  ;;  %v6706_v7 = vadd.f32 %v17552_v1, %v6667_v23  ;;  %15136 = vmatmul.mubr.bf16.vlgmr.msra.gmra.mxu0 %v15649_v2  ;;  %v17661_v35 = vld [vmem:[#allocation2 + $0x14] sm:$0xf] }
 0x24d   : > { %v7001_v26 = vor.u32 %v6999_v40, %v6998_v50  ;;  %v7003_v62 = vrot.slane %v6998_v50, 4  ;;  %v7005_v58 = vshrl.u32 %v6925_v0, 16  ;;  %v6665_v42 = vmul.f32 %v17525_v21, %v6562_v45  ;;  %v6430_v8 = vpop.f32.mrf.mxu0  ;;  %15139 = vmatprep.mubr.bf16.mxu0 %v15650_v49  ;;  %v15667_v2 = vld [vmem:[%s19355_s2 + $0xe8] sm:$0xff]  }
 0x24e   : > { %6895 = vst [vmem:[#allocation2 + $0x48] sm:$0xf] %v14182_v33  ;;  %v14180_v22 = vpack.c.bf16 %v6733_v38, %v6733_v38  ;;  %v6565_v46 = vadd.f32 %v15050_v55, %v17473_v63  ;;  %v7008_v43 = vshll.u32 %v6925_v0, 16  ;;  %v7029_v61 = vrot.slane %v7027_v48, 7  ;;  %v19564_v33 = vld [vmem:[#allocation50_spill] sm:$0xff] }
 0x24f   : > { %v7002_v50 = vsel %vm15873_vm2, %v17378_v57, %v7001_v26  ;;  %v7007_v40 = vrot.slane %v7005_v58, 7  ;;  %15216 = vmatpush3.bf16.msra.mxu0 %v19564_v33  ;;  %v6738_v38 = vmax.f32 %v6706_v7, 0.0  ;;  %v6704_v23 = vadd.f32 %v17552_v1, %v6665_v42 }
 0x250   : > { %6893 = vst [vmem:[#allocation2 + $0x38] sm:$0xf] %v14180_v22  ;;  %v6668_v63 = vmul.f32 %v17525_v21, %v6565_v46  ;;  %v6563_v45 = vadd.f32 %v6430_v8, %v17478_v25  ;;  %15217 = vmatprep.subr.bf16.mxu0 %v15664_v59  ;;  %v7024_v57 = vsel %vm15873_vm2, %v17370_v4, %v17649_v28  ;;  %v7030_v58 = vshll.u32 %v6928_v3, 16  ;;  %v6933_v22 = vld [vmem:[#allocation2 + $0x44] sm:$0xf] }
 0x251   : > { %v7010_v55 = vor.u32 %v7008_v43, %v7007_v40  ;;  %v14185_v7 = vpack.c.bf16 %v6738_v38, %v6738_v38  ;;  %v6736_v0 = vmax.f32 %v6704_v23, 0.0  ;;  %v7062_v8 = vshrl.u32 %v6933_v22, 16  ;;  %v5692_v43 = vpop.f32.mrf.mxu1  ;;  %v15053_v33 = vpop.f32.mrf.mxu0  ;;  %v15654_v23 = vld [vmem:[%s19355_s2 + $0xb0] sm:$0xff]  }
 0x252   : > { %v6707_v49 = vadd.f32 %v17552_v1, %v6668_v63  ;;  %v6666_v25 = vmul.f32 %v17525_v21, %v6563_v45  ;;  %v7032_v42 = vor.u32 %v7030_v58, %v7029_v61  ;;  %v6930_v46 = vld [vmem:[#allocation2 + $0x34] sm:$0xf]  ;;  %v7065_v40 = vshll.u32 %v6933_v22, 16  ;;  %v19565_v63 = vld [vmem:[#allocation29_spill] sm:$0xff] }
 0x253   : > { %v7011_v26 = vsel %vm15873_vm2, %v7003_v62, %v7010_v55  ;;  %15218 = vmatpush3.bf16.msra.mxu0 %v15664_v59  ;;  %6898 = vst [vmem:[#allocation2 + $0x64] sm:$0xf] %v14185_v7  ;;  %v14183_v4 = vpack.c.bf16 %v6736_v0, %v6736_v0  ;;  %v6568_v62 = vadd.f32 %v15053_v33, %v19565_v63  ;;  %v7040_v45 = vshrl.u32 %v6930_v46, 16  ;;  %v6443_v22 = vpop.f32.mrf.mxu0 }
 0x254   : > { %v6739_v3 = vmax.f32 %v6707_v49, 0.0  ;;  %v6705_v28 = vadd.f32 %v17552_v1, %v6666_v25  ;;  %v13762_v38 = vcombine.low %v7002_v50, %v7011_v26  ;;  %15219 = vmatprep.subr.bf16.mxu0 %v15667_v2  ;;  %v7033_v61 = vsel %vm15873_vm2, %v7025_v29, %v7032_v42  ;;  %v15669_v50 = vld [vmem:[%s19355_s2 + $0xe0] sm:$0xff]   ;;  %v19566_v42 = vld [vmem:[#allocation38_spill] sm:$0xff] }
 0x255   : > { %v7043_v59 = vshll.u32 %v6930_v46, 16  ;;  %6896 = vst [vmem:[#allocation2 + $0x54] sm:$0xf] %v14183_v4  ;;  %v13763_v7 = vcombine.low %v7024_v57, %v7033_v61  ;;  %v17689_v0 = vrot.slane %v7062_v8, 7  ;;  %v17695_v49 = vadd.f32 %v5692_v43, %v17614_v12  ;;  %v15054_v8 = vpop.f32.mrf.mxu0  ;;  %v15672_v43 = vld [vmem:[%s19355_s2 + $0xd8] sm:$0xff]  }
 0x256   : > { %v14186_v55 = vpack.c.bf16 %v6739_v3, %v6739_v3  ;;  %v6737_v58 = vmax.f32 %v6705_v28, 0.0  ;;  %15088 = vmatmul.mubr.bf16.vlgmr.msra.gmra.mxu1 %v13762_v38  ;;  %v6671_v25 = vmul.f32 %v17525_v21, %v6568_v62  ;;  %v6566_v29 = vadd.f32 %v6443_v22, %v17493_v14  ;;  %v15653_v3 = vld [vmem:[#allocation2 + $0x44] sm:$0xff]  }
 0x257   : > { %v15652_v26 = vld [vmem:[#allocation2 + $0x34] sm:$0xff]   ;;  %15168 = vmatpush3.bf16.msra.mxu1 %v19566_v42  ;;  %v7042_v4 = vrot.slane %v7040_v45, 7  ;;  %15220 = vmatpush3.bf16.msra.mxu0 %v15667_v2  ;;  %v17701_v12 = vor.u32 %v7065_v40, %v17689_v0  ;;  %v15657_v14 = vld [vmem:[%s19355_s2 + $0xa8] sm:$0xff]   ;;  %v6569_v63 = vadd.f32 %v15054_v8, %v17497_v54  ;;  %v6446_v40 = vpop.f32.mrf.mxu0 }
 0x258   : > { %v6931_v46 = vld [vmem:[#allocation2 + $0x38] sm:$0xf]  ;;  %6899 = vst [vmem:[#allocation2 + $0x68] sm:$0xf] %v14186_v55  ;;  %v14184_v57 = vpack.c.bf16 %v6737_v58, %v6737_v58  ;;  %15091 = vmatprep.mubr.bf16.mxu1 %v13763_v7  ;;  %15169 = vmatprep.subr.bf16.mxu1 %v15654_v23  ;;  %v6710_v2 = vadd.f32 %v17552_v1, %v6671_v25  ;;  %v6934_v61 = vld [vmem:[#allocation2 + $0x48] sm:$0xf] }
 0x259   : > { %v7049_v28 = vshrl.u32 %v6931_v46, 16  ;;  %v7052_v33 = vshll.u32 %v6931_v46, 16  ;;  %v6669_v38 = vmul.f32 %v17525_v21, %v6566_v29  ;;  %15140 = vmatmul.mubr.bf16.gmra.mxu0 %v15652_v26  ;;  %v7045_v62 = vor.u32 %v7043_v59, %v7042_v4  ;;  %v19567_v58 = vld [vmem:[#allocation11_spill] sm:$0xff]  ;;  %15221 = vmatprep.subr.bf16.mxu0 %v15669_v50  ;;  %v19568_v26 = vld [vmem:[#allocation10_spill] sm:$0xff] }
 0x25a   : > { %6897 = vst [vmem:[#allocation2 + $0x58] sm:$0xf] %v14184_v57  ;;  %15143 = vmatprep.mubr.bf16.mxu0 %v15653_v3  ;;  %v7047_v45 = vrot.slane %v7042_v4, 4  ;;  %v7069_v7 = vrot.slane %v17689_v0, 4  ;;  %v6742_v25 = vmax.f32 %v6710_v2, 0.0  ;;  %v6672_v54 = vmul.f32 %v17525_v21, %v6569_v63  ;;  %v15660_v0 = vld [vmem:[%s19355_s2 + $0xa0] sm:$0xff]  }
 0x25b   : > { %v7051_v55 = vrot.slane %v7049_v28, 7  ;;  %v6708_v29 = vadd.f32 %v17552_v1, %v6669_v38  ;;  %v6567_v59 = vadd.f32 %v6446_v40, %v17500_v31  ;;  %15170 = vmatpush3.bf16.msra.mxu1 %v15654_v23  ;;  %15222 = vmatpush3.bf16.msra.mxu0 %v15669_v50  ;;  %v7046_v42 = vsel %vm15873_vm2, %v19568_v26, %v7045_v62  ;;  %v17723_v8 = vld [vmem:[#allocation2 + $0x64] sm:$0xf]  ;;  %v15674_v31 = vld [vmem:[%s19355_s2 + $0xd0] sm:$0xff]   ;;  %v15057_v2 = vpop.f32.mrf.mxu0 }
 0x25c   : > { %v7071_v4 = vshrl.u32 %v6934_v61, 16  ;;  %v7074_v57 = vshll.u32 %v6934_v61, 16  ;;  %15171 = vmatprep.subr.bf16.mxu1 %v15657_v14  ;;  %15223 = vmatprep.subr.bf16.mxu0 %v15672_v43  ;;  %v14189_v23 = vpack.c.bf16 %v6742_v25, %v6742_v25  ;;  %v6711_v3 = vadd.f32 %v17552_v1, %v6672_v54 }
 0x25d   : > { %v7054_v46 = vor.u32 %v7052_v33, %v7051_v55  ;;  %v6740_v50 = vmax.f32 %v6708_v29, 0.0  ;;  %v6670_v28 = vmul.f32 %v17525_v21, %v6567_v59  ;;  %v6936_v33 = vld [vmem:[#allocation2 + $0x54] sm:$0xf]  ;;  %v6572_v25 = vadd.f32 %v15057_v2, %v17512_v51  ;;  %v6459_v29 = vpop.f32.mrf.mxu0  ;;  %v15677_v2 = vld [vmem:[%s19355_s2 + $0xc8] sm:$0xff]  }
 0x25e   : > { %v7073_v63 = vrot.slane %v7071_v4, 7  ;;  %v7084_v62 = vshrl.u32 %v6936_v33, 16  ;;  %v7087_v61 = vshll.u32 %v6936_v33, 16  ;;  %6902 = vst [vmem:[#allocation2 + $0x84] sm:$0xf] %v14189_v23  ;;  %v6743_v55 = vmax.f32 %v6711_v3, 0.0 }
 0x25f   : > { %v7055_v38 = vsel %vm15873_vm2, %v7047_v45, %v7054_v46  ;;  %v14187_v40 = vpack.c.bf16 %v6740_v50, %v6740_v50  ;;  %v6709_v26 = vadd.f32 %v17552_v1, %v6670_v28  ;;  %15172 = vmatpush3.bf16.msra.mxu1 %v15657_v14  ;;  %15224 = vmatpush3.bf16.msra.mxu0 %v15672_v43  ;;  %v7106_v22 = vshrl.u32 %v17723_v8, 16  ;;  %v15665_v45 = vld [vmem:[%s19355_s2 + $0x98] sm:$0xff]   ;;  %v15656_v50 = vld [vmem:[#allocation2 + $0x64] sm:$0xff]  }
 0x260   : > { %v13764_v54 = vcombine.low %v7046_v42, %v7055_v38  ;;  %v7076_v59 = vor.u32 %v7074_v57, %v7073_v63  ;;  %v7086_v48 = vrot.slane %v7084_v62, 7  ;;  %15173 = vmatprep.subr.bf16.mxu1 %v15660_v0  ;;  %15225 = vmatprep.subr.bf16.mxu0 %v15674_v31  ;;  %v14190_v46 = vpack.c.bf16 %v6743_v55, %v6743_v55  ;;  %v15058_v42 = vpop.f32.mrf.mxu0 }
 0x261   : > { %6900 = vst [vmem:[#allocation2 + $0x74] sm:$0xf] %v14187_v40  ;;  %v6741_v4 = vmax.f32 %v6709_v26, 0.0  ;;  %v6675_v23 = vmul.f32 %v17525_v21, %v6572_v25  ;;  %v6570_v51 = vadd.f32 %v6459_v29, %v17520_v15  ;;  %v15655_v14 = vld [vmem:[#allocation2 + $0x54] sm:$0xff]   ;;  %v6573_v62 = vadd.f32 %v15058_v42, %v17531_v37  ;;  %v6940_v40 = vld [vmem:[#allocation2 + $0x68] sm:$0xf] }
 0x262   : > { %v6937_v43 = vld [vmem:[#allocation2 + $0x58] sm:$0xf]  ;;  %15092 = vmatmul.mubr.bf16.gmra.mxu1 %v13764_v54  ;;  %v7077_v57 = vsel %vm15873_vm2, %v7069_v7, %v7076_v59  ;;  %v7089_v3 = vor.u32 %v7087_v61, %v7086_v48  ;;  %v7091_v28 = vrot.slane %v7086_v48, 4  ;;  %6903 = vst [vmem:[#allocation2 + $0x88] sm:$0xf] %v14190_v46  ;;  %15144 = vmatmul.mubr.bf16.gmra.mxu0 %v15655_v14  ;;  %v6462_v55 = vpop.f32.mrf.mxu0  ;;  %v19570_v61 = vld [vmem:[#allocation17_spill] sm:$0xff] }
 0x263   : > { %v7093_v33 = vshrl.u32 %v6937_v43, 16  ;;  %v14188_v38 = vpack.c.bf16 %v6741_v4, %v6741_v4  ;;  %v6714_v63 = vadd.f32 %v17552_v1, %v6675_v23  ;;  %v6673_v15 = vmul.f32 %v17525_v21, %v6570_v51  ;;  %15147 = vmatprep.mubr.bf16.mxu0 %v15656_v50  ;;  %15174 = vmatpush3.bf16.msra.mxu1 %v15660_v0  ;;  %v15678_v51 = vld [vmem:[%s19355_s2 + $0xc0] sm:$0xff]  }
 0x264   : > { %v19569_v48 = vsel %vm15873_vm2, %v19567_v58, %v17701_v12  ;;  %v7090_v26 = vsel %vm15873_vm2, %v19570_v61, %v7089_v3  ;;  %v7096_v29 = vshll.u32 %v6937_v43, 16  ;;  %v6676_v59 = vmul.f32 %v17525_v21, %v6573_v62  ;;  %15175 = vmatprep.subr.bf16.mxu1 %v15665_v45  ;;  %v15670_v12 = vld [vmem:[%s19355_s2 + $0x90] sm:$0xff]   ;;  %15226 = vmatpush3.bf16.msra.mxu0 %v15674_v31 }
 0x265   : > { %v13765_v7 = vcombine.low %v19569_v48, %v7077_v57  ;;  %v7095_v25 = vrot.slane %v7093_v33, 7  ;;  %6901 = vst [vmem:[#allocation2 + $0x78] sm:$0xf] %v14188_v38  ;;  %v6746_v54 = vmax.f32 %v6714_v63, 0.0  ;;  %v6712_v37 = vadd.f32 %v17552_v1, %v6673_v15  ;;  %15227 = vmatprep.subr.bf16.mxu0 %v15677_v2  ;;  %v17771_v57 = vld [vmem:[#allocation2 + $0x84] sm:$0xf]  ;;  %v15061_v15 = vpop.f32.mrf.mxu0 }
 0x266   : > { %v6571_v46 = vadd.f32 %v6462_v55, %v17534_v19  ;;  %v7108_v4 = vrot.slane %v7106_v22, 7  ;;  %v7109_v23 = vshll.u32 %v17723_v8, 16  ;;  %v7115_v0 = vshrl.u32 %v6940_v40, 16  ;;  %v15675_v55 = vld [vmem:[%s19355_s2 + $0x88] sm:$0xff]   ;;  %v19571_v48 = vld [vmem:[#allocation12_spill] sm:$0xff] }
 0x267   : > { %15095 = vmatprep.mubr.bf16.mxu1 %v13765_v7  ;;  %v7098_v58 = vor.u32 %v7096_v29, %v7095_v25  ;;  %v14193_v14 = vpack.c.bf16 %v6746_v54, %v6746_v54  ;;  %v6744_v43 = vmax.f32 %v6712_v37, 0.0  ;;  %v6715_v19 = vadd.f32 %v17552_v1, %v6676_v59  ;;  %15176 = vmatpush3.bf16.msra.mxu1 %v15665_v45  ;;  %v6475_v54 = vpop.f32.mrf.mxu0 }
 0x268   : > { %v6674_v42 = vmul.f32 %v17525_v21, %v6571_v46  ;;  %v7111_v22 = vor.u32 %v7109_v23, %v7108_v4  ;;  %v7113_v50 = vrot.slane %v7108_v4, 4  ;;  %v7117_v8 = vrot.slane %v7115_v0, 7  ;;  %v6942_v3 = vld [vmem:[#allocation2 + $0x74] sm:$0xf]  ;;  %15177 = vmatprep.subr.bf16.mxu1 %v15670_v12  ;;  %15228 = vmatpush3.bf16.msra.mxu0 %v15677_v2  ;;  %v17787_v2 = vld [vmem:[%s19355_s2 + $0x178] sm:$0xff]  }
 0x269   : > { %v7099_v31 = vsel %vm15873_vm2, %v7091_v28, %v7098_v58  ;;  %6906 = vst [vmem:[#allocation2 + $0xa4] sm:$0xf] %v14193_v14  ;;  %v14191_v33 = vpack.c.bf16 %v6744_v43, %v6744_v43  ;;  %v6747_v38 = vmax.f32 %v6715_v19, 0.0  ;;  %v6576_v28 = vadd.f32 %v15061_v15, %v17538_v11  ;;  %15229 = vmatprep.subr.bf16.mxu0 %v15678_v51  ;;  %v15062_v0 = vpop.f32.mrf.mxu0  ;;  %v15659_v14 = vld [vmem:[#allocation2 + $0x84] sm:$0xff]  }
 0x26a   : > { %v6713_v63 = vadd.f32 %v17552_v1, %v6674_v42  ;;  %v13766_v62 = vcombine.low %v7090_v26, %v7099_v31  ;;  %v7112_v7 = vsel %vm15873_vm2, %v19571_v48, %v7111_v22  ;;  %v7118_v45 = vshll.u32 %v6940_v40, 16  ;;  %v15679_v31 = vld [vmem:[%s19355_s2 + $0x80] sm:$0xff]   ;;  %v6946_v48 = vld [vmem:[#allocation2 + $0x88] sm:$0xf] }
 0x26b   : > { %v7128_v61 = vshrl.u32 %v6942_v3, 16  ;;  %6904 = vst [vmem:[#allocation2 + $0x94] sm:$0xf] %v14191_v33  ;;  %v14194_v25 = vpack.c.bf16 %v6747_v38, %v6747_v38  ;;  %v7131_v26 = vshll.u32 %v6942_v3, 16  ;;  %v7150_v37 = vshrl.u32 %v17771_v57, 16  ;;  %15178 = vmatpush3.bf16.msra.mxu1 %v15670_v12  ;;  %v6478_v3 = vpop.f32.mrf.mxu0 }
 0x26c   : > { %v6745_v29 = vmax.f32 %v6713_v63, 0.0  ;;  %15096 = vmatmul.mubr.bf16.gmra.mxu1 %v13766_v62  ;;  %v6679_v11 = vmul.f32 %v17525_v21, %v6576_v28  ;;  %v6574_v59 = vadd.f32 %v6475_v54, %v17543_v10  ;;  %v7120_v40 = vor.u32 %v7118_v45, %v7117_v8  ;;  %v15658_v46 = vld [vmem:[#allocation2 + $0x74] sm:$0xff]   ;;  %15179 = vmatprep.subr.bf16.mxu1 %v15675_v55 }
 0x26d   : > { %v6943_v58 = vld [vmem:[#allocation2 + $0x78] sm:$0xf]  ;;  %v7130_v4 = vrot.slane %v7128_v61, 7  ;;  %6907 = vst [vmem:[#allocation2 + $0xa8] sm:$0xf] %v14194_v25  ;;  %v17791_v42 = vrot.slane %v7150_v37, 7  ;;  %15230 = vmatpush3.bf16.msra.mxu0 %v15678_v51  ;;  %v6577_v12 = vadd.f32 %v15062_v0, %v17547_v41  ;;  %v6575_v41 = vadd.f32 %v6478_v3, %v17557_v30 }
 0x26e   : > { %v14192_v23 = vpack.c.bf16 %v6745_v29, %v6745_v29  ;;  %v7137_v43 = vshrl.u32 %v6943_v58, 16  ;;  %v7140_v19 = vshll.u32 %v6943_v58, 16  ;;  %v6718_v10 = vadd.f32 %v17552_v1, %v6679_v11  ;;  %15148 = vmatmul.mubr.bf16.gmra.mxu0 %v15658_v46  ;;  %15311 = vmatprep.subr.bf16.mxu0 %v17787_v2  ;;  %v17813_v29 = vld [vmem:[%s19355_s2 + $0x138] sm:$0xff]  }
 0x26f   : > { %v6677_v22 = vmul.f32 %v17525_v21, %v6574_v59  ;;  %v7121_v8 = vsel %vm15873_vm2, %v7113_v50, %v7120_v40  ;;  %15151 = vmatprep.mubr.bf16.mxu0 %v15659_v14  ;;  %v7133_v38 = vor.u32 %v7131_v26, %v7130_v4  ;;  %v7135_v51 = vrot.slane %v7130_v4, 4  ;;  %15180 = vmatpush3.bf16.msra.mxu1 %v15675_v55  ;;  %v19572_v50 = vld [vmem:[#allocation14_spill] sm:$0xff]  ;;  %v15065_v11 = vpop.f32.mrf.mxu0 }
 0x270   : > { %6905 = vst [vmem:[#allocation2 + $0x98] sm:$0xf] %v14192_v23  ;;  %v13767_v33 = vcombine.low %v7112_v7, %v7121_v8  ;;  %v7139_v63 = vrot.slane %v7137_v43, 7  ;;  %v6750_v15 = vmax.f32 %v6718_v10, 0.0  ;;  %v6680_v28 = vmul.f32 %v17525_v21, %v6577_v12  ;;  %15181 = vmatprep.subr.bf16.mxu1 %v15679_v31 }
 0x271   : > { %v6716_v62 = vadd.f32 %v17552_v1, %v6677_v22  ;;  %v7134_v7 = vsel %vm15873_vm2, %v19572_v50, %v7133_v38  ;;  %v7153_v61 = vshll.u32 %v17771_v57, 16  ;;  %v7157_v25 = vrot.slane %v17791_v42, 4  ;;  %v6491_v14 = vpop.f32.mrf.mxu0 }
 0x272   : > { %15099 = vmatprep.mubr.bf16.mxu1 %v13767_v33  ;;  %v7142_v45 = vor.u32 %v7140_v19, %v7139_v63  ;;  %v14197_v54 = vpack.c.bf16 %v6750_v15, %v6750_v15  ;;  %v6719_v55 = vadd.f32 %v17552_v1, %v6680_v28  ;;  %v6678_v26 = vmul.f32 %v17525_v21, %v6575_v41  ;;  %v6948_v37 = vld [vmem:[#allocation2 + $0x94] sm:$0xf]  ;;  %v19573_v19 = vld [vmem:[#allocation23_spill] sm:$0xff] }
 0x273   : > { %v6748_v30 = vmax.f32 %v6716_v62, 0.0  ;;  %v7155_v57 = vor.u32 %v7153_v61, %v17791_v42  ;;  %v7159_v40 = vshrl.u32 %v6946_v48, 16  ;;  %v7162_v46 = vshll.u32 %v6946_v48, 16  ;;  %15182 = vmatpush3.bf16.msra.mxu1 %v15679_v31  ;;  %v15066_v31 = vpop.f32.mrf.mxu0 }
 0x274   : > { %v7143_v59 = vsel %vm15873_vm2, %v7135_v51, %v7142_v45  ;;  %6910 = vst [vmem:[#allocation2 + $0xc4] sm:$0xf] %v14197_v54  ;;  %v6751_v4 = vmax.f32 %v6719_v55, 0.0  ;;  %v6717_v23 = vadd.f32 %v17552_v1, %v6678_v26  ;;  %v6580_v0 = vadd.f32 %v15065_v11, %v17565_v16  ;;  %15263 = vmatprep.subr.bf16.mxu1 %v17813_v29  ;;  %v15663_v63 = vld [vmem:[#allocation2 + $0xa4] sm:$0xff]  }
 0x275   : > { %v14195_v58 = vpack.c.bf16 %v6748_v30, %v6748_v30  ;;  %v13768_v43 = vcombine.low %v7134_v7, %v7143_v59  ;;  %v7156_v10 = vsel %vm15873_vm2, %v19573_v19, %v7155_v57  ;;  %v7161_v22 = vrot.slane %v7159_v40, 7  ;;  %v6951_v45 = vld [vmem:[#allocation2 + $0xa4] sm:$0xf]  ;;  %v6952_v57 = vld [vmem:[#allocation2 + $0xa8] sm:$0xf]  ;;  %v19574_v40 = vld [vmem:[#allocation31_spill] sm:$0xff] }
 0x276   : > { %v7172_v12 = vshrl.u32 %v6948_v37, 16  ;;  %v14198_v42 = vpack.c.bf16 %v6751_v4, %v6751_v4  ;;  %v6749_v8 = vmax.f32 %v6717_v23, 0.0  ;;  %v6683_v3 = vmul.f32 %v17525_v21, %v6580_v0 }
 0x277   : > { %6908 = vst [vmem:[#allocation2 + $0xb4] sm:$0xf] %v14195_v58  ;;  %v6578_v33 = vadd.f32 %v6491_v14, %v17572_v44  ;;  %v15661_v38 = vld [vmem:[#allocation2 + $0x94] sm:$0xff]   ;;  %15100 = vmatmul.mubr.bf16.gmra.mxu1 %v13768_v43  ;;  %v7164_v51 = vor.u32 %v7162_v46, %v7161_v22  ;;  %v7175_v62 = vshll.u32 %v6948_v37, 16  ;;  %v6581_v7 = vadd.f32 %v15066_v31, %v17592_v53  ;;  %v6494_v44 = vpop.f32.mrf.mxu0 }
 0x278   : > { %v6949_v16 = vld [vmem:[#allocation2 + $0x98] sm:$0xf]  ;;  %v7174_v15 = vrot.slane %v7172_v12, 7  ;;  %6911 = vst [vmem:[#allocation2 + $0xc8] sm:$0xf] %v14198_v42  ;;  %v14196_v41 = vpack.c.bf16 %v6749_v8, %v6749_v8  ;;  %v6722_v48 = vadd.f32 %v17552_v1, %v6683_v3  ;;  %15152 = vmatmul.mubr.bf16.gmra.mxu0 %v15661_v38  ;;  %v6579_v59 = vadd.f32 %v6494_v44, %v17594_v18 }
 0x279   : > { %v7181_v28 = vshrl.u32 %v6949_v16, 16  ;;  %v6681_v50 = vmul.f32 %v17525_v21, %v6578_v33  ;;  %v7165_v61 = vsel %vm15873_vm2, %v7157_v25, %v7164_v51  ;;  %15155 = vmatprep.mubr.bf16.mxu0 %v15663_v63  ;;  %v6684_v11 = vmul.f32 %v17525_v21, %v6581_v7  ;;  %v15069_v8 = vpop.f32.mrf.mxu0 }
 0x27a   : > { %v7177_v54 = vor.u32 %v7175_v62, %v7174_v15  ;;  %v7179_v30 = vrot.slane %v7174_v15, 4  ;;  %6909 = vst [vmem:[#allocation2 + $0xb8] sm:$0xf] %v14196_v41  ;;  %v6754_v26 = vmax.f32 %v6722_v48, 0.0  ;;  %v13769_v53 = vcombine.low %v7156_v10, %v7165_v61 }
 0x27b   : > { %v7183_v55 = vrot.slane %v7181_v28, 7  ;;  %v6720_v37 = vadd.f32 %v17552_v1, %v6681_v50  ;;  %v7184_v58 = vshll.u32 %v6949_v16, 16  ;;  %v7194_v25 = vshrl.u32 %v6951_v45, 16  ;;  %v6507_v62 = vpop.f32.mrf.mxu0  ;;  %v6957_v48 = vld [vmem:[#allocation2 + $0xc4] sm:$0xf] }
 0x27c   : > { %v7178_v46 = vsel %vm15873_vm2, %v19574_v40, %v7177_v54  ;;  %v14201_v4 = vpack.c.bf16 %v6754_v26, %v6754_v26  ;;  %v6723_v0 = vadd.f32 %v17552_v1, %v6684_v11  ;;  %v6682_v14 = vmul.f32 %v17525_v21, %v6579_v59  ;;  %15103 = vmatprep.mubr.bf16.mxu1 %v13769_v53 }
 0x27d   : > { %v6752_v23 = vmax.f32 %v6720_v37, 0.0  ;;  %v7186_v43 = vor.u32 %v7184_v58, %v7183_v55  ;;  %v7196_v19 = vrot.slane %v7194_v25, 7  ;;  %v7197_v22 = vshll.u32 %v6951_v45, 16  ;;  %v19575_v45 = vld [vmem:[#allocation21_spill] sm:$0xff]  ;;  %v15070_v55 = vpop.f32.mrf.mxu0 }
 0x27e   : > { %v7203_v12 = vshrl.u32 %v6952_v57, 16  ;;  %6914 = vst [vmem:[#allocation2 + $0xe4] sm:$0xf] %v14201_v4  ;;  %v6755_v10 = vmax.f32 %v6723_v0, 0.0  ;;  %v6721_v42 = vadd.f32 %v17552_v1, %v6682_v14  ;;  %v7206_v3 = vshll.u32 %v6952_v57, 16 }
 0x27f   : > { %v14199_v18 = vpack.c.bf16 %v6752_v23, %v6752_v23  ;;  %v6954_v33 = vld [vmem:[#allocation2 + $0xb4] sm:$0xf]  ;;  %v6584_v38 = vadd.f32 %v15069_v8, %v17602_v39  ;;  %v7187_v16 = vsel %vm15873_vm2, %v7179_v30, %v7186_v43  ;;  %v7199_v31 = vor.u32 %v7197_v22, %v7196_v19  ;;  %v15668_v37 = vld [vmem:[#allocation2 + $0xc4] sm:$0xff]  }
 0x280   : > { %v7201_v51 = vrot.slane %v7196_v19, 4  ;;  %v14202_v63 = vpack.c.bf16 %v6755_v10, %v6755_v10  ;;  %v6753_v15 = vmax.f32 %v6721_v42, 0.0  ;;  %v13770_v28 = vcombine.low %v7178_v46, %v7187_v16  ;;  %v6510_v46 = vpop.f32.mrf.mxu0 }
 0x281   : > { %6912 = vst [vmem:[#allocation2 + $0xd4] sm:$0xf] %v14199_v18  ;;  %v7205_v41 = vrot.slane %v7203_v12, 7  ;;  %v6687_v50 = vmul.f32 %v17525_v21, %v6584_v38  ;;  %v6582_v7 = vadd.f32 %v6507_v62, %v17606_v34  ;;  %v7200_v39 = vsel %vm15873_vm2, %v19575_v45, %v7199_v31  ;;  %v15666_v44 = vld [vmem:[#allocation2 + $0xb4] sm:$0xff]   ;;  %v15752_v21 = vld [vmem:[%s19356_s3] ss:$0 sm:$0xff] }
 0x282   : > { %v6955_v61 = vld [vmem:[#allocation2 + $0xb8] sm:$0xf]  ;;  %v7216_v54 = vshrl.u32 %v6954_v33, 16  ;;  %6915 = vst [vmem:[#allocation2 + $0xe8] sm:$0xf] %v14202_v63  ;;  %v14200_v30 = vpack.c.bf16 %v6753_v15, %v6753_v15  ;;  %15104 = vmatmul.mubr.bf16.gmra.mxu1 %v13770_v28  ;;  %v7219_v11 = vshll.u32 %v6954_v33, 16  ;;  %v6585_v53 = vadd.f32 %v15070_v55, %v17617_v60  ;;  %15156 = vmatmul.mubr.bf16.gmra.mxu0 %v15666_v44 }
 0x283   : > { %v7208_v26 = vor.u32 %v7206_v3, %v7205_v41  ;;  %v7225_v59 = vshrl.u32 %v6955_v61, 16  ;;  %v6726_v57 = vadd.f32 %v17552_v1, %v6687_v50  ;;  %v6685_v34 = vmul.f32 %v15752_v21, %v6582_v7  ;;  %15159 = vmatprep.mubr.bf16.mxu0 %v15668_v37  ;;  %v15753_v1 = vld [vmem:[%s19357_s4] ss:$0 sm:$0xff]  ;;  %v6958_v33 = vld [vmem:[#allocation2 + $0xc8] sm:$0xf]  ;;  %v19576_v38 = vld [vmem:[#allocation27_spill] sm:$0xff] }
 0x284   : > { %v7218_v40 = vrot.slane %v7216_v54, 7  ;;  %6913 = vst [vmem:[#allocation2 + $0xd8] sm:$0xf] %v14200_v30  ;;  %v7228_v4 = vshll.u32 %v6955_v61, 16  ;;  %v7238_v23 = vshrl.u32 %v6957_v48, 16  ;;  %v6688_v43 = vmul.f32 %v15752_v21, %v6585_v53 }
 0x285   : > { %v7209_v58 = vsel %vm15873_vm2, %v7201_v51, %v7208_v26  ;;  %v7227_v25 = vrot.slane %v7225_v59, 7  ;;  %v6758_v0 = vmax.f32 %v6726_v57, 0.0  ;;  %v6724_v14 = vadd.f32 %v15753_v1, %v6685_v34  ;;  %v19578_v59 = vld [vmem:[#allocation25_spill] sm:$0xff] }
 0x286   : > { %v6583_v60 = vadd.f32 %v6510_v46, %v17695_v49  ;;  %v13771_v19 = vcombine.low %v7200_v39, %v7209_v58  ;;  %v7221_v22 = vor.u32 %v7219_v11, %v7218_v40  ;;  %v7223_v12 = vrot.slane %v7218_v40, 4  ;;  %v6963_v49 = vld [vmem:[#allocation2 + $0xe4] sm:$0xf] }
 0x287   : > { %v7230_v18 = vor.u32 %v7228_v4, %v7227_v25  ;;  %v14205_v10 = vpack.c.bf16 %v6758_v0, %v6758_v0  ;;  %v6756_v42 = vmax.f32 %v6724_v14, 0.0  ;;  %v6727_v8 = vadd.f32 %v15753_v1, %v6688_v43 }
 0x288   : > { %v6686_v3 = vmul.f32 %v15752_v21, %v6583_v60  ;;  %15107 = vmatprep.mubr.bf16.mxu1 %v13771_v19  ;;  %v7222_v16 = vsel %vm15873_vm2, %v19576_v38, %v7221_v22  ;;  %v7240_v51 = vrot.slane %v7238_v23, 7  ;;  %v7241_v63 = vshll.u32 %v6957_v48, 16  ;;  %v6960_v50 = vld [vmem:[#allocation2 + $0xd4] sm:$0xf] }
 0x289   : > { %v7231_v31 = vsel %vm15873_vm2, %v7223_v12, %v7230_v18  ;;  %6918 = vst [vmem:[#allocation2 + $0x104] sm:$0xf] %v14205_v10  ;;  %v14203_v15 = vpack.c.bf16 %v6756_v42, %v6756_v42  ;;  %v6759_v62 = vmax.f32 %v6727_v8, 0.0  ;;  %v7247_v39 = vshrl.u32 %v6958_v33, 16  ;;  %v6964_v61 = vld [vmem:[#allocation2 + $0xe8] sm:$0xf] }
 0x28a   : > { %v6725_v28 = vadd.f32 %v15753_v1, %v6686_v3  ;;  %v13772_v41 = vcombine.low %v7222_v16, %v7231_v31  ;;  %v7243_v7 = vor.u32 %v7241_v63, %v7240_v51  ;;  %v7245_v45 = vrot.slane %v7240_v51, 4  ;;  %v15673_v34 = vld [vmem:[#allocation2 + $0xe4] sm:$0xff]   ;;  %v8911_v18 = vld [vmem:[#allocation2 + $0x18] sm:$0xf] }
 0x28b   : > { %v7250_v44 = vshll.u32 %v6958_v33, 16  ;;  %6916 = vst [vmem:[#allocation2 + $0xf4] sm:$0xf] %v14203_v15  ;;  %v14206_v54 = vpack.c.bf16 %v6759_v62, %v6759_v62  ;;  %v15671_v55 = vld [vmem:[#allocation2 + $0xd4] sm:$0xff]   ;;  %v8152_v37 = vsel %vm16079_vm5, %v17580_v5, %v17554_v36  ;;  %v8162_v11 = vsel %vm16079_vm5, %v17596_v52, %v17582_v20 }
 0x28c   : > { %v6757_v30 = vmax.f32 %v6725_v28, 0.0  ;;  %15108 = vmatmul.mubr.bf16.gmra.mxu1 %v13772_v41  ;;  %v6961_v26 = vld [vmem:[#allocation2 + $0xd8] sm:$0xf]  ;;  %v7244_v57 = vsel %vm15873_vm2, %v19578_v59, %v7243_v7  ;;  %v7249_v21 = vrot.slane %v7247_v39, 7  ;;  %v7260_v53 = vshrl.u32 %v6960_v50, 16  ;;  %15160 = vmatmul.mubr.bf16.gmra.mxu0 %v15671_v55  ;;  %v19582_v55 = vld [vmem:[#allocation13_spill] sm:$0xff] }
 0x28d   : > { %v7263_v40 = vshll.u32 %v6960_v50, 16  ;;  %6919 = vst [vmem:[#allocation2 + $0x108] sm:$0xf] %v14206_v54  ;;  %v7269_v58 = vshrl.u32 %v6961_v26, 16  ;;  %v7272_v25 = vshll.u32 %v6961_v26, 16  ;;  %v7282_v4 = vshrl.u32 %v6963_v49, 16  ;;  %15163 = vmatprep.mubr.bf16.mxu0 %v15673_v34 }
 0x28e   : > { %v14204_v46 = vpack.c.bf16 %v6757_v30, %v6757_v30  ;;  %v7252_v36 = vor.u32 %v7250_v44, %v7249_v21  ;;  %v7262_v5 = vrot.slane %v7260_v53, 7  ;;  %v7285_v23 = vshll.u32 %v6963_v49, 16  ;;  %v19580_v49 = vld [vmem:[#allocation30_spill] sm:$0xff]  ;;  %v8914_v44 = vld [vmem:[#allocation2 + $0x28] sm:$0xf] }
 0x28f   : > { %v7291_v0 = vshrl.u32 %v6964_v61, 16  ;;  %v7271_v20 = vrot.slane %v7269_v58, 7  ;;  %v7284_v52 = vrot.slane %v7282_v4, 7  ;;  %v7294_v1 = vshll.u32 %v6964_v61, 16 }
 0x290   : > { %6917 = vst [vmem:[#allocation2 + $0xf8] sm:$0xf] %v14204_v46  ;;  %v19579_v14 = vshrl.u32 %v17661_v35, 16  ;;  %v7253_v60 = vsel %vm15873_vm2, %v7245_v45, %v7252_v36  ;;  %v7265_v19 = vor.u32 %v7263_v40, %v7262_v5  ;;  %v7267_v22 = vrot.slane %v7262_v5, 4  ;;  %v15754_v46 = vld [vmem:[#allocation2 + $0x24] sm:$0xf] }
 0x291   : > { %v7293_v12 = vrot.slane %v7291_v0, 7  ;;  %v13773_v10 = vcombine.low %v7244_v57, %v7253_v60  ;;  %v7274_v42 = vor.u32 %v7272_v25, %v7271_v20  ;;  %v7287_v8 = vor.u32 %v7285_v23, %v7284_v52  ;;  %v8916_v25 = vld [vmem:[#allocation2 + $0x34] sm:$0xf]  ;;  %v8917_v23 = vld [vmem:[#allocation2 + $0x38] sm:$0xf] }
 0x292   : > { %v8965_v43 = vrot.slane %v19579_v14, 7  ;;  %v7289_v3 = vrot.slane %v7284_v52, 4  ;;  %v7266_v33 = vsel %vm15873_vm2, %v17516_v32, %v7265_v19  ;;  %v8966_v16 = vshll.u32 %v17661_v35, 16  ;;  %v6966_v51 = vld [vmem:[#allocation2 + $0xf4] sm:$0xf] }
 0x293   : > { %v7296_v38 = vor.u32 %v7294_v1, %v7293_v12  ;;  %15111 = vmatprep.mubr.bf16.mxu1 %v13773_v10  ;;  %v7275_v63 = vsel %vm15873_vm2, %v7267_v22, %v7274_v42  ;;  %v7288_v15 = vsel %vm15873_vm2, %v19580_v49, %v7287_v8  ;;  %v8972_v62 = vshrl.u32 %v8911_v18, 16 }
 0x294   : > { %v8970_v31 = vrot.slane %v8965_v43, 4  ;;  %v8975_v28 = vshll.u32 %v8911_v18, 16  ;;  %v13774_v41 = vcombine.low %v7266_v33, %v7275_v63  ;;  %v8968_v32 = vor.u32 %v8966_v16, %v8965_v43  ;;  %v19583_v43 = vld [vmem:[#allocation22_spill] sm:$0xff]  ;;  %v19584_v18 = vld [vmem:[#allocation36_spill] sm:$0xff] }
 0x295   : > { %v7297_v50 = vsel %vm15873_vm2, %v7289_v3, %v7296_v38  ;;  %v7304_v7 = vshrl.u32 %v6966_v51, 16  ;;  %v8974_v35 = vrot.slane %v8972_v62, 7  ;;  %v7307_v39 = vshll.u32 %v6966_v51, 16 }
 0x296   : > { %v13775_v45 = vcombine.low %v7288_v15, %v7297_v50  ;;  %v19581_v61 = vshrl.u32 %v17635_v47, 16  ;;  %15112 = vmatmul.mubr.bf16.gmra.mxu1 %v13774_v41  ;;  %v8969_v26 = vsel %vm15873_vm2, %v19582_v55, %v8968_v32  ;;  %v13841_v21 = vcombine.low %v8152_v37, %v8162_v11  ;;  %v8094_v37 = vld [vmem:[#allocation2 + $0x14] sm:$0xf]  ;;  %v8095_v11 = vld [vmem:[#allocation2 + $0x18] sm:$0xf] }
 0x297   : > { %v15676_v30 = vld [vmem:[#allocation2 + $0xf4] sm:$0xff]   ;;  %v7306_v57 = vrot.slane %v7304_v7, 7  ;;  %v8977_v34 = vor.u32 %v8975_v28, %v8974_v35  ;;  %v8988_v58 = vshll.u32 %v15754_v46, 16  ;;  %v8994_v5 = vshrl.u32 %v8914_v44, 16  ;;  %v8097_v15 = vld [vmem:[#allocation2 + $0x24] sm:$0xf] }
 0x298   : > { %v8987_v54 = vrot.slane %v19581_v61, 7  ;;  %v6967_v59 = vld [vmem:[#allocation2 + $0xf8] sm:$0xf]  ;;  %15115 = vmatprep.mubr.bf16.mxu1 %v13775_v45  ;;  %15164 = vmatmul.mubr.bf16.gmra.mxu0 %v15676_v30  ;;  %v8997_v1 = vshll.u32 %v8914_v44, 16  ;;  %v9007_v22 = vshrl.u32 %v8916_v25, 16  ;;  %v9010_v42 = vshll.u32 %v8916_v25, 16 }
 0x299   : > { %v7313_v53 = vshrl.u32 %v6967_v59, 16  ;;  %v7316_v40 = vshll.u32 %v6967_v59, 16  ;;  %v7309_v4 = vor.u32 %v7307_v39, %v7306_v57  ;;  %v7311_v47 = vrot.slane %v7306_v57, 4  ;;  %v8098_v32 = vld [vmem:[#allocation2 + $0x28] sm:$0xf]  ;;  %v15685_v61 = vld [vmem:[%s19355_s2 + $0x170] sm:$0xff]  }
 0x29a   : > { %v8992_v36 = vrot.slane %v8987_v54, 4  ;;  %v8978_v0 = vsel %vm15873_vm2, %v8970_v31, %v8977_v34  ;;  %v8990_v52 = vor.u32 %v8988_v58, %v8987_v54  ;;  %v8996_v19 = vrot.slane %v8994_v5, 7  ;;  %v8919_v44 = vld [vmem:[#allocation2 + $0x44] sm:$0xf]  ;;  %v8920_v59 = vld [vmem:[#allocation2 + $0x48] sm:$0xf] }
 0x29b   : > { %v7315_v20 = vrot.slane %v7313_v53, 7  ;;  %v13897_v14 = vcombine.low %v8969_v26, %v8978_v0  ;;  %v7310_v60 = vsel %vm15873_vm2, %v19583_v43, %v7309_v4  ;;  %v9016_v8 = vshrl.u32 %v8917_v23, 16  ;;  %v8922_v46 = vld [vmem:[#allocation2 + $0x54] sm:$0xf] }
 0x29c   : > { %v8991_v10 = vsel %vm15873_vm2, %v19584_v18, %v8990_v52  ;;  %v8999_v3 = vor.u32 %v8997_v1, %v8996_v19  ;;  %v9009_v33 = vrot.slane %v9007_v22, 7  ;;  %v9019_v38 = vshll.u32 %v8917_v23, 16  ;;  %v8923_v22 = vld [vmem:[#allocation2 + $0x58] sm:$0xf] }
 0x29d   : > { %v7318_v12 = vor.u32 %v7316_v40, %v7315_v20  ;;  %15231 = vmatprep.mubr.bf16.mxu0 %v13897_v14  ;;  %v8164_v16 = vshrl.u32 %v8094_v37, 16  ;;  %v9018_v51 = vrot.slane %v9016_v8, 7  ;;  %v8167_v63 = vshll.u32 %v8094_v37, 16 }
 0x29e   : > { %v8173_v49 = vshll.u32 %v8095_v11, 16  ;;  %v9000_v28 = vsel %vm15873_vm2, %v8992_v36, %v8999_v3  ;;  %v9012_v41 = vor.u32 %v9010_v42, %v9009_v33  ;;  %v9014_v50 = vrot.slane %v9009_v33, 4  ;;  %v8100_v3 = vld [vmem:[#allocation2 + $0x34] sm:$0xf]  ;;  %v15688_v33 = vld [vmem:[%s19355_s2 + $0x160] sm:$0xff]  }
 0x29f   : > { %v7319_v31 = vsel %vm15873_vm2, %v7311_v47, %v7318_v12  ;;  %v13898_v7 = vcombine.low %v8991_v10, %v9000_v28  ;;  %v9021_v45 = vor.u32 %v9019_v38, %v9018_v51  ;;  %v8166_v35 = vrot.slane %v8164_v16, 4  ;;  %v19585_v38 = vld [vmem:[#allocation24_spill] sm:$0xff] }
 0x2a0   : > { %v13776_v62 = vcombine.low %v7310_v60, %v7319_v31  ;;  %v8169_v39 = vrot.slane %v8167_v63, 5  ;;  %v9013_v54 = vsel %vm15873_vm2, %v17561_v56, %v9012_v41  ;;  %v8175_v30 = vrot.slane %v8173_v49, 5  ;;  %v15687_v56 = vld [vmem:[%s19355_s2 + $0x168] sm:$0xff]   ;;  %v8101_v49 = vld [vmem:[#allocation2 + $0x38] sm:$0xf] }
 0x2a1   : > { %v8177_v55 = vshrl.u32 %v8095_v11, 16  ;;  %v8188_v26 = vshrl.u32 %v8097_v15, 16  ;;  %15232 = vmatmul.mubr.bf16.vlgmr.msra.gmra.mxu0 %v13898_v7  ;;  %v9022_v57 = vsel %vm15873_vm2, %v9014_v50, %v9021_v45  ;;  %v8191_v53 = vshll.u32 %v8097_v15, 16  ;;  %v19586_v50 = vld [vmem:[#allocation34_spill] sm:$0xff] }
 0x2a2   : > { %15116 = vmatmul.mubr.bf16.gmra.mxu1 %v13776_v62  ;;  %v8170_v34 = vor.u32 %v8169_v39, %v8166_v35  ;;  %v8197_v40 = vshll.u32 %v8098_v32, 16  ;;  %v13899_v58 = vcombine.low %v9013_v54, %v9022_v57  ;;  %v8201_v47 = vshrl.u32 %v8098_v32, 16  ;;  %15312 = vmatpush3.bf16.msra.mxu0 %v17787_v2  ;;  %v15681_v39 = vld [vmem:[%s19355_s2 + $0x130] sm:$0xff]  }
 0x2a3   : > { %15183 = vmatprep.mubr.bf16.mxu1 %v13841_v21  ;;  %v8179_v25 = vrot.slane %v8177_v55, 4  ;;  %v8190_v4 = vrot.slane %v8188_v26, 4  ;;  %v8193_v5 = vrot.slane %v8191_v53, 5  ;;  %v9029_v0 = vshrl.u32 %v8919_v44, 16  ;;  %15313 = vmatprep.subr.bf16.mxu0 %v15685_v61  ;;  %v8104_v55 = vld [vmem:[#allocation2 + $0x48] sm:$0xf] }
 0x2a4   : > { %v8171_v36 = vrot.slane %v8170_v34, 4  ;;  %v8199_v23 = vrot.slane %v8197_v40, 5  ;;  %15235 = vmatprep.mubr.bf16.mxu0 %v13899_v58  ;;  %v8203_v20 = vrot.slane %v8201_v47, 4  ;;  %v9032_v52 = vshll.u32 %v8919_v44, 16  ;;  %v8103_v44 = vld [vmem:[#allocation2 + $0x44] sm:$0xf] }
 0x2a5   : > { %v8180_v21 = vor.u32 %v8179_v25, %v8175_v30  ;;  %v9038_v1 = vshrl.u32 %v8920_v59, 16  ;;  %v8194_v11 = vor.u32 %v8193_v5, %v8190_v4  ;;  %v9031_v14 = vrot.slane %v9029_v0, 7  ;;  %v15690_v26 = vld [vmem:[%s19355_s2 + $0x158] sm:$0xff]   ;;  %v8925_v40 = vld [vmem:[#allocation2 + $0x64] sm:$0xf]  ;;  %v15682_v47 = vld [vmem:[%s19355_s2 + $0x128] sm:$0xff]  }
 0x2a6   : > { %v8176_v37 = vsel %vm16079_vm5, %v8171_v36, %v8175_v30  ;;  %v9041_v2 = vshll.u32 %v8920_v59, 16  ;;  %v8204_v60 = vor.u32 %v8203_v20, %v8199_v23  ;;  %v9051_v12 = vshrl.u32 %v8922_v46, 16  ;;  %15314 = vmatpush3.bf16.msra.mxu0 %v15685_v61  ;;  %v8926_v20 = vld [vmem:[#allocation2 + $0x68] sm:$0xf] }
 0x2a7   : > { %v8181_v43 = vrot.slane %v8180_v21, 4  ;;  %v9040_v19 = vrot.slane %v9038_v1, 7  ;;  %v8195_v18 = vrot.slane %v8194_v11, 4  ;;  %v9034_v10 = vor.u32 %v9032_v52, %v9031_v14  ;;  %15315 = vmatprep.subr.bf16.mxu0 %v15687_v56  ;;  %v15691_v52 = vld [vmem:[%s19355_s2 + $0x150] sm:$0xff]  }
 0x2a8   : > { %v9036_v42 = vrot.slane %v9031_v14, 4  ;;  %v9054_v8 = vshll.u32 %v8922_v46, 16  ;;  %v8205_v31 = vrot.slane %v8204_v60, 4  ;;  %v9053_v63 = vrot.slane %v9051_v12, 7  ;;  %v15683_v12 = vld [vmem:[%s19355_s2 + $0x120] sm:$0xff]  }
 0x2a9   : > { %v8186_v16 = vsel %vm16079_vm5, %v8181_v43, %v19585_v38  ;;  %v9043_v51 = vor.u32 %v9041_v2, %v9040_v19  ;;  %v8200_v62 = vsel %vm16079_vm5, %v8195_v18, %v8199_v23  ;;  %v9035_v28 = vsel %vm15873_vm2, %v17599_v24, %v9034_v10  ;;  %v8928_v2 = vld [vmem:[#allocation2 + $0x74] sm:$0xf] }
 0x2aa   : > { %v13842_v15 = vcombine.low %v8176_v37, %v8186_v16  ;;  %v9060_v41 = vshrl.u32 %v8923_v22, 16  ;;  %v8210_v32 = vsel %vm16079_vm5, %v8205_v31, %v19586_v50  ;;  %v9056_v45 = vor.u32 %v9054_v8, %v9053_v63  ;;  %15316 = vmatpush3.bf16.msra.mxu0 %v15687_v56 }
 0x2ab   : > { %v9044_v7 = vsel %vm15873_vm2, %v9036_v42, %v9043_v51  ;;  %v9058_v35 = vrot.slane %v9053_v63, 4  ;;  %v13843_v61 = vcombine.low %v8200_v62, %v8210_v32  ;;  %v9063_v30 = vshll.u32 %v8923_v22, 16  ;;  %15317 = vmatprep.subr.bf16.mxu0 %v15688_v33  ;;  %v15693_v51 = vld [vmem:[%s19355_s2 + $0x148] sm:$0xff]   ;;  %v8929_v62 = vld [vmem:[#allocation2 + $0x78] sm:$0xf] }
 0x2ac   : > { %15184 = vmatmul.mubr.bf16.vlgmr.msra.gmra.mxu1 %v13842_v15  ;;  %v13900_v54 = vcombine.low %v9035_v28, %v9044_v7  ;;  %v9062_v24 = vrot.slane %v9060_v41, 7  ;;  %v9057_v59 = vsel %vm15873_vm2, %v17610_v17, %v9056_v45  ;;  %v8212_v57 = vshrl.u32 %v8100_v3, 16  ;;  %v15686_v45 = vld [vmem:[%s19355_s2 + $0x118] sm:$0xff]  }
 0x2ad   : > { %15264 = vmatpush3.bf16.msra.mxu1 %v17813_v29  ;;  %v8215_v34 = vshll.u32 %v8100_v3, 16  ;;  %v8221_v53 = vshll.u32 %v8101_v49, 16  ;;  %15187 = vmatprep.mubr.bf16.mxu1 %v13843_v61  ;;  %v8225_v58 = vshrl.u32 %v8101_v49, 16  ;;  %v8236_v25 = vshrl.u32 %v8103_v44, 16  ;;  %v8106_v3 = vld [vmem:[#allocation2 + $0x54] sm:$0xf] }
 0x2ae   : > { %15236 = vmatmul.mubr.bf16.gmra.mxu0 %v13900_v54  ;;  %v9065_v46 = vor.u32 %v9063_v30, %v9062_v24  ;;  %v8239_v4 = vshll.u32 %v8103_v44, 16  ;;  %v8214_v56 = vrot.slane %v8212_v57, 4  ;;  %15265 = vmatprep.subr.bf16.mxu1 %v15681_v39  ;;  %v8245_v5 = vshll.u32 %v8104_v55, 16  ;;  %v8107_v30 = vld [vmem:[#allocation2 + $0x58] sm:$0xf] }
 0x2af   : > { %v8217_v29 = vrot.slane %v8215_v34, 5  ;;  %v8223_v36 = vrot.slane %v8221_v53, 5  ;;  %15318 = vmatpush3.bf16.msra.mxu0 %v15688_v33  ;;  %v8227_v23 = vrot.slane %v8225_v58, 4  ;;  %v8238_v0 = vrot.slane %v8236_v25, 4  ;;  %v8109_v53 = vld [vmem:[#allocation2 + $0x64] sm:$0xf] }
 0x2b0   : > { %v9066_v17 = vsel %vm15873_vm2, %v9058_v35, %v9065_v46  ;;  %v8241_v21 = vrot.slane %v8239_v4, 5  ;;  %15319 = vmatprep.subr.bf16.mxu0 %v15690_v26  ;;  %v8247_v11 = vrot.slane %v8245_v5, 5  ;;  %v8249_v14 = vshrl.u32 %v8104_v55, 16  ;;  %v15689_v5 = vld [vmem:[%s19355_s2 + $0x110] sm:$0xff]  }
 0x2b1   : > { %v13901_v1 = vcombine.low %v9057_v59, %v9066_v17  ;;  %v8218_v37 = vor.u32 %v8217_v29, %v8214_v56  ;;  %15266 = vmatpush3.bf16.msra.mxu1 %v15681_v39  ;;  %v8228_v43 = vor.u32 %v8227_v23, %v8223_v36  ;;  %v9073_v19 = vshrl.u32 %v8925_v40, 16 }
 0x2b2   : > { %v8242_v60 = vor.u32 %v8241_v21, %v8238_v0  ;;  %v9076_v22 = vshll.u32 %v8925_v40, 16  ;;  %15267 = vmatprep.subr.bf16.mxu1 %v15682_v47  ;;  %v8251_v10 = vrot.slane %v8249_v14, 4  ;;  %v9082_v42 = vshrl.u32 %v8926_v20, 16  ;;  %v8110_v40 = vld [vmem:[#allocation2 + $0x68] sm:$0xf] }
 0x2b3   : > { %15239 = vmatprep.mubr.bf16.mxu0 %v13901_v1  ;;  %v8219_v18 = vrot.slane %v8218_v37, 4  ;;  %v9085_v8 = vshll.u32 %v8926_v20, 16  ;;  %15320 = vmatpush3.bf16.msra.mxu0 %v15690_v26  ;;  %v8229_v33 = vrot.slane %v8228_v43, 4  ;;  %v9075_v16 = vrot.slane %v9073_v19, 7  ;;  %v15709_v20 = vld [vmem:[%s19355_s2 + $0x1f8] sm:$0xff]  }
 0x2b4   : > { %v8243_v38 = vrot.slane %v8242_v60, 4  ;;  %v9095_v31 = vshrl.u32 %v8928_v2, 16  ;;  %15321 = vmatprep.subr.bf16.mxu0 %v15691_v52  ;;  %v8252_v49 = vor.u32 %v8251_v10, %v8247_v11  ;;  %v9084_v15 = vrot.slane %v9082_v42, 7  ;;  %v8931_v14 = vld [vmem:[#allocation2 + $0x84] sm:$0xf] }
 0x2b5   : > { %v8224_v63 = vsel %vm16079_vm5, %v8219_v18, %v8223_v36  ;;  %v9098_v28 = vshll.u32 %v8928_v2, 16  ;;  %15268 = vmatpush3.bf16.msra.mxu1 %v15682_v47  ;;  %v8234_v41 = vsel %vm16079_vm5, %v8229_v33, %v17624_v13  ;;  %v9078_v32 = vor.u32 %v9076_v22, %v9075_v16  ;;  %v19587_v47 = vld [vmem:[#allocation16_spill] sm:$0xff]  ;;  %v8933_v2 = vld [vmem:[#allocation2 + $0x90] sm:$0x8] }
 0x2b6   : > { %v8248_v50 = vsel %vm16079_vm5, %v8243_v38, %v8247_v11  ;;  %v9080_v7 = vrot.slane %v9075_v16, 4  ;;  %15269 = vmatprep.subr.bf16.mxu1 %v15683_v12  ;;  %v13844_v35 = vcombine.low %v8224_v63, %v8234_v41  ;;  %v8253_v39 = vrot.slane %v8252_v49, 4  ;;  %v19588_v38 = vld [vmem:[#allocation33_spill] sm:$0xff] }
 0x2b7   : > { %v9087_v44 = vor.u32 %v9085_v8, %v9084_v15  ;;  %v9097_v61 = vrot.slane %v9095_v31, 7  ;;  %15322 = vmatpush3.bf16.msra.mxu0 %v15691_v52  ;;  %v9079_v54 = vsel %vm15873_vm2, %v17628_v9, %v9078_v32  ;;  %v9104_v13 = vshrl.u32 %v8929_v62, 16  ;;  %v15694_v9 = vld [vmem:[%s19355_s2 + $0x140] sm:$0xff]  }
 0x2b8   : > { %v9107_v24 = vshll.u32 %v8929_v62, 16  ;;  %v8260_v55 = vshrl.u32 %v8106_v3, 16  ;;  %15323 = vmatprep.subr.bf16.mxu0 %v15693_v51  ;;  %15188 = vmatmul.mubr.bf16.gmra.mxu1 %v13844_v35  ;;  %v8258_v26 = vsel %vm16079_vm5, %v8253_v39, %v17626_v6  ;;  %v8263_v56 = vshll.u32 %v8106_v3, 16  ;;  %v15692_v3 = vld [vmem:[%s19355_s2 + $0x108] sm:$0xff]   ;;  %v19590_v39 = vld [vmem:[#allocation18_spill] sm:$0xff] }
 0x2b9   : > { %v9088_v59 = vsel %vm15873_vm2, %v9080_v7, %v9087_v44  ;;  %v9100_v57 = vor.u32 %v9098_v28, %v9097_v61  ;;  %v9102_v34 = vrot.slane %v9097_v61, 4  ;;  %v13845_v46 = vcombine.low %v8248_v50, %v8258_v26  ;;  %15270 = vmatpush3.bf16.msra.mxu1 %v15683_v12  ;;  %v8932_v12 = vld [vmem:[#allocation2 + $0x88] sm:$0xf]  ;;  %v8934_v7 = vld [vmem:[#allocation2 + $0x94] sm:$0xf] }
 0x2ba   : > { %v13902_v58 = vcombine.low %v9079_v54, %v9088_v59  ;;  %v9106_v25 = vrot.slane %v9104_v13, 7  ;;  %v8262_v4 = vrot.slane %v8260_v55, 4  ;;  %v8269_v29 = vshll.u32 %v8107_v30, 16  ;;  %15271 = vmatprep.subr.bf16.mxu1 %v15686_v45  ;;  %v8935_v13 = vld [vmem:[#allocation2 + $0x98] sm:$0xf] }
 0x2bb   : > { %v9101_v6 = vsel %vm15873_vm2, %v19587_v47, %v9100_v57  ;;  %v8273_v36 = vshrl.u32 %v8107_v30, 16  ;;  %15324 = vmatpush3.bf16.msra.mxu0 %v15693_v51  ;;  %15191 = vmatprep.mubr.bf16.mxu1 %v13845_v46  ;;  %v8284_v23 = vshrl.u32 %v8109_v53, 16  ;;  %v8287_v0 = vshll.u32 %v8109_v53, 16  ;;  %v8112_v59 = vld [vmem:[#allocation2 + $0x74] sm:$0xf]  ;;  %v15695_v57 = vld [vmem:[%s19355_s2 + $0x100] sm:$0xff]  }
 0x2bc   : > { %15240 = vmatmul.mubr.bf16.gmra.mxu0 %v13902_v58  ;;  %v9109_v17 = vor.u32 %v9107_v24, %v9106_v25  ;;  %v8293_v21 = vshll.u32 %v8110_v40, 16  ;;  %v8265_v52 = vrot.slane %v8263_v56, 5  ;;  %v8271_v1 = vrot.slane %v8269_v29, 5  ;;  %15325 = vmatprep.subr.bf16.mxu0 %v15694_v9  ;;  %v8113_v58 = vld [vmem:[#allocation2 + $0x78] sm:$0xf] }
 0x2bd   : > { %v8275_v37 = vrot.slane %v8273_v36, 4  ;;  %v8297_v11 = vshrl.u32 %v8110_v40, 16  ;;  %v8286_v60 = vrot.slane %v8284_v23, 4  ;;  %v8289_v19 = vrot.slane %v8287_v0, 5  ;;  %15272 = vmatpush3.bf16.msra.mxu1 %v15686_v45  ;;  %v8114_v25 = vld [vmem:[#allocation2 + $0x7c] sm:$0x1] }
 0x2be   : > { %v9110_v43 = vsel %vm15873_vm2, %v9102_v34, %v9109_v17  ;;  %v8295_v22 = vrot.slane %v8293_v21, 5  ;;  %v8266_v10 = vor.u32 %v8265_v52, %v8262_v4  ;;  %15273 = vmatprep.subr.bf16.mxu1 %v15689_v5  ;;  %v19589_v16 = vshrl.u32 %v19588_v38, 16  ;;  %v19591_v34 = vld [vmem:[#allocation26_spill] sm:$0xff]  ;;  %v8115_v29 = vld [vmem:[#allocation2 + $0x84] sm:$0xf] }
 0x2bf   : > { %v13903_v18 = vcombine.low %v9101_v6, %v9110_v43  ;;  %v8276_v42 = vor.u32 %v8275_v37, %v8271_v1  ;;  %v8299_v8 = vrot.slane %v8297_v11, 4  ;;  %15326 = vmatpush3.bf16.msra.mxu0 %v15694_v9  ;;  %v8290_v33 = vor.u32 %v8289_v19, %v8286_v60  ;;  %v8116_v43 = vld [vmem:[#allocation2 + $0x88] sm:$0xf] }
 0x2c0   : > { %v13872_v31 = vrot.slane %v19589_v16, 11  ;;  %v9117_v51 = vshrl.u32 %v8931_v14, 16  ;;  %v9120_v63 = vshll.u32 %v8931_v14, 16  ;;  %15407 = vmatprep.subr.bf16.mxu0 %v15709_v20  ;;  %v8267_v49 = vrot.slane %v8266_v10, 4 }
 0x2c1   : > { %15243 = vmatprep.mubr.bf16.mxu0 %v13903_v18  ;;  %v8277_v15 = vrot.slane %v8276_v42, 4  ;;  %v8300_v62 = vor.u32 %v8299_v8, %v8295_v22  ;;  %v9126_v28 = vshrl.u32 %v8932_v12, 16  ;;  %v8291_v41 = vrot.slane %v8290_v33, 4  ;;  %15274 = vmatpush3.bf16.msra.mxu1 %v15689_v5  ;;  %v8117_v42 = vld [vmem:[#allocation2 + $0x8c] sm:$0x1] }
 0x2c2   : > { %v9119_v50 = vrot.slane %v9117_v51, 7  ;;  %v9129_v32 = vshll.u32 %v8932_v12, 16  ;;  %v9134_v45 = vshrl.u32 %v8933_v2, 16  ;;  %v8272_v35 = vsel %vm16079_vm5, %v8267_v49, %v8271_v1  ;;  %15275 = vmatprep.subr.bf16.mxu1 %v15692_v3  ;;  %v18020_v1 = vld [vmem:[%s19355_s2 + $0x1b8] sm:$0xff]   ;;  %v8936_v51 = vld [vmem:[#allocation2 + $0xa0] sm:$0x8] }
 0x2c3   : > { %v8282_v44 = vsel %vm16079_vm5, %v8277_v15, %v19590_v39  ;;  %v8301_v61 = vrot.slane %v8300_v62, 4  ;;  %v9128_v54 = vrot.slane %v9126_v28, 7  ;;  %v8296_v30 = vsel %vm16079_vm5, %v8291_v41, %v8295_v22 }
 0x2c4   : > { %v13846_v24 = vcombine.low %v8272_v35, %v8282_v44  ;;  %v9122_v55 = vor.u32 %v9120_v63, %v9119_v50  ;;  %v9124_v26 = vrot.slane %v9119_v50, 4  ;;  %v13873_v9 = vrot.slane %v9134_v45, 11  ;;  %v8937_v63 = vld [vmem:[#allocation2 + $0xa4] sm:$0xf]  ;;  %v8939_v45 = vld [vmem:[#allocation2 + $0xb0] sm:$0x8] }
 0x2c5   : > { %v8306_v53 = vsel %vm16079_vm5, %v8301_v61, %v19591_v34  ;;  %v9131_v40 = vor.u32 %v9129_v32, %v9128_v54  ;;  %v9139_v46 = vshrl.u32 %v8934_v7, 16  ;;  %v9142_v6 = vshll.u32 %v8934_v7, 16  ;;  %15276 = vmatpush3.bf16.msra.mxu1 %v15692_v3  ;;  %v8938_v44 = vld [vmem:[#allocation2 + $0xa8] sm:$0xf] }
 0x2c6   : > { %15192 = vmatmul.mubr.bf16.gmra.mxu1 %v13846_v24  ;;  %v13847_v4 = vcombine.low %v8296_v30, %v8306_v53  ;;  %v9123_v47 = vsel %vm15873_vm2, %v13872_v31, %v9122_v55  ;;  %v9148_v56 = vshrl.u32 %v8935_v13, 16  ;;  %v9151_v17 = vshll.u32 %v8935_v13, 16  ;;  %15277 = vmatprep.subr.bf16.mxu1 %v15695_v57  ;;  %v8940_v53 = vld [vmem:[#allocation2 + $0xb4] sm:$0xf] }
 0x2c7   : > { %v9132_v36 = vsel %vm15873_vm2, %v9124_v26, %v9131_v40  ;;  %v9141_v5 = vrot.slane %v9139_v46, 7  ;;  %v8308_v23 = vshrl.u32 %v8112_v59, 16  ;;  %v8311_v20 = vshll.u32 %v8112_v59, 16 }
 0x2c8   : > { %15195 = vmatprep.mubr.bf16.mxu1 %v13847_v4  ;;  %v13904_v0 = vcombine.low %v9123_v47, %v9132_v36  ;;  %v9150_v21 = vrot.slane %v9148_v56, 7  ;;  %v8317_v52 = vshll.u32 %v8113_v58, 16  ;;  %v8321_v2 = vshrl.u32 %v8113_v58, 16  ;;  %v8119_v36 = vld [vmem:[#allocation2 + $0x98] sm:$0xf] }
 0x2c9   : > { %v9144_v37 = vor.u32 %v9142_v6, %v9141_v5  ;;  %v9146_v11 = vrot.slane %v9141_v5, 4  ;;  %v8310_v14 = vrot.slane %v8308_v23, 4  ;;  %v8313_v19 = vrot.slane %v8311_v20, 5  ;;  %15278 = vmatpush3.bf16.msra.mxu1 %v15695_v57 }
 0x2ca   : > { %15244 = vmatmul.mubr.bf16.gmra.mxu0 %v13904_v0  ;;  %v9153_v60 = vor.u32 %v9151_v17, %v9150_v21  ;;  %v8319_v22 = vrot.slane %v8317_v52, 5  ;;  %v8327_v12 = vshll.u32 %v8114_v25, 16  ;;  %v8323_v10 = vrot.slane %v8321_v2, 4  ;;  %15359 = vmatprep.subr.bf16.mxu1 %v18020_v1  ;;  %v8941_v25 = vld [vmem:[#allocation2 + $0xb8] sm:$0xf] }
 0x2cb   : > { %v9145_v18 = vsel %vm15873_vm2, %v13873_v9, %v9144_v37  ;;  %v8332_v8 = vshrl.u32 %v8115_v29, 16  ;;  %v8335_v3 = vshll.u32 %v8115_v29, 16  ;;  %v8314_v38 = vor.u32 %v8313_v19, %v8310_v14  ;;  %v8118_v29 = vld [vmem:[#allocation2 + $0x94] sm:$0xf] }
 0x2cc   : > { %v9154_v33 = vsel %vm15873_vm2, %v9146_v11, %v9153_v60  ;;  %v8329_v16 = vrot.slane %v8327_v12, 5  ;;  %v8341_v31 = vshll.u32 %v8116_v43, 16  ;;  %v8324_v15 = vor.u32 %v8323_v10, %v8319_v22  ;;  %v8120_v11 = vld [vmem:[#allocation2 + $0x9c] sm:$0x1]  ;;  %v8121_v10 = vld [vmem:[#allocation2 + $0xa4] sm:$0xf] }
 0x2cd   : > { %v13905_v49 = vcombine.low %v9145_v18, %v9154_v33  ;;  %v8334_v62 = vrot.slane %v8332_v8, 4  ;;  %v8337_v28 = vrot.slane %v8335_v3, 5  ;;  %v8315_v41 = vrot.slane %v8314_v38, 4  ;;  %v8122_v38 = vld [vmem:[#allocation2 + $0xa8] sm:$0xf] }
 0x2ce   : > { %v8343_v50 = vrot.slane %v8341_v31, 5  ;;  %v8345_v32 = vshrl.u32 %v8116_v43, 16  ;;  %v8351_v7 = vshll.u32 %v8117_v42, 16  ;;  %v8325_v35 = vrot.slane %v8324_v15, 4 }
 0x2cf   : > { %15247 = vmatprep.mubr.bf16.mxu0 %v13905_v49  ;;  %v8338_v39 = vor.u32 %v8337_v28, %v8334_v62  ;;  %v9156_v61 = vshrl.u32 %v8936_v51, 16  ;;  %v9161_v54 = vshrl.u32 %v8937_v63, 16  ;;  %v8320_v13 = vsel %vm16079_vm5, %v8315_v41, %v8319_v22  ;;  %v8123_v49 = vld [vmem:[#allocation2 + $0xac] sm:$0x1] }
 0x2d0   : > { %v8347_v24 = vrot.slane %v8345_v32, 4  ;;  %v8353_v30 = vrot.slane %v8351_v7, 5  ;;  %v9164_v55 = vshll.u32 %v8937_v63, 16  ;;  %v8330_v26 = vsel %vm16079_vm5, %v8325_v35, %v8329_v16 }
 0x2d1   : > { %v8339_v59 = vrot.slane %v8338_v39, 4  ;;  %v13874_v57 = vrot.slane %v9156_v61, 11  ;;  %v9163_v34 = vrot.slane %v9161_v54, 7  ;;  %v13848_v40 = vcombine.low %v8320_v13, %v8330_v26  ;;  %v8943_v39 = vld [vmem:[#allocation2 + $0xc4] sm:$0xf] }
 0x2d2   : > { %v8348_v9 = vor.u32 %v8347_v24, %v8343_v50  ;;  %v9170_v46 = vshrl.u32 %v8938_v44, 16  ;;  %v9173_v58 = vshll.u32 %v8938_v44, 16  ;;  %v9178_v56 = vshrl.u32 %v8939_v45, 16  ;;  %v8944_v24 = vld [vmem:[#allocation2 + $0xc8] sm:$0xf] }
 0x2d3   : > { %v8344_v4 = vsel %vm16079_vm5, %v8339_v59, %v8343_v50  ;;  %v9166_v47 = vor.u32 %v9164_v55, %v9163_v34  ;;  %v9168_v6 = vrot.slane %v9163_v34, 4  ;;  %15196 = vmatmul.mubr.bf16.gmra.mxu1 %v13848_v40  ;;  %v9183_v23 = vshrl.u32 %v8940_v53, 16  ;;  %v8942_v50 = vld [vmem:[#allocation2 + $0xc0] sm:$0x8] }
 0x2d4   : > { %v8349_v5 = vrot.slane %v8348_v9, 4  ;;  %v9172_v17 = vrot.slane %v9170_v46, 7  ;;  %v9186_v0 = vshll.u32 %v8940_v53, 16  ;;  %v13875_v20 = vrot.slane %v9178_v56, 11 }
 0x2d5   : > { %v9167_v21 = vsel %vm15873_vm2, %v13874_v57, %v9166_v47  ;;  %v9192_v52 = vshrl.u32 %v8941_v25, 16  ;;  %v9195_v37 = vshll.u32 %v8941_v25, 16  ;;  %v9185_v43 = vrot.slane %v9183_v23, 7 }
 0x2d6   : > { %v8354_v14 = vsel %vm16079_vm5, %v8349_v5, %v8353_v30  ;;  %v9175_v2 = vor.u32 %v9173_v58, %v9172_v17  ;;  %v8356_v60 = vshrl.u32 %v8118_v29, 16  ;;  %v8359_v12 = vshll.u32 %v8118_v29, 16 }
 0x2d7   : > { %v13849_v19 = vcombine.low %v8344_v4, %v8354_v14  ;;  %v9194_v22 = vrot.slane %v9192_v52, 7  ;;  %v8365_v18 = vshll.u32 %v8119_v36, 16  ;;  %v9188_v8 = vor.u32 %v9186_v0, %v9185_v43  ;;  %v8945_v4 = vld [vmem:[#allocation2 + $0xd0] sm:$0x8]  ;;  %v8946_v0 = vld [vmem:[#allocation2 + $0xd4] sm:$0xf] }
 0x2d8   : > { %v9176_v42 = vsel %vm15873_vm2, %v9168_v6, %v9175_v2  ;;  %v9190_v3 = vrot.slane %v9185_v43, 4  ;;  %v8358_v33 = vrot.slane %v8356_v60, 4  ;;  %v8361_v51 = vrot.slane %v8359_v12, 5  ;;  %v8124_v14 = vld [vmem:[#allocation2 + $0xb4] sm:$0xf] }
 0x2d9   : > { %15199 = vmatprep.mubr.bf16.mxu1 %v13849_v19  ;;  %v13906_v16 = vcombine.low %v9167_v21, %v9176_v42  ;;  %v9197_v31 = vor.u32 %v9195_v37, %v9194_v22  ;;  %v8367_v63 = vrot.slane %v8365_v18, 5  ;;  %v9189_v15 = vsel %vm15873_vm2, %v13875_v20, %v9188_v8  ;;  %v8947_v37 = vld [vmem:[#allocation2 + $0xd8] sm:$0xf] }
 0x2da   : > { %v8369_v62 = vshrl.u32 %v8119_v36, 16  ;;  %v8375_v28 = vshll.u32 %v8120_v11, 16  ;;  %v8380_v41 = vshrl.u32 %v8121_v10, 16  ;;  %v8362_v7 = vor.u32 %v8361_v51, %v8358_v33  ;;  %v8125_v22 = vld [vmem:[#allocation2 + $0xb8] sm:$0xf] }
 0x2db   : > { %15248 = vmatmul.mubr.bf16.gmra.mxu0 %v13906_v16  ;;  %v9198_v32 = vsel %vm15873_vm2, %v9190_v3, %v9197_v31  ;;  %v8383_v45 = vshll.u32 %v8121_v10, 16  ;;  %v8389_v35 = vshll.u32 %v8122_v38, 16  ;;  %v8393_v59 = vshrl.u32 %v8122_v38, 16  ;;  %v8126_v51 = vld [vmem:[#allocation2 + $0xbc] sm:$0x1] }
 0x2dc   : > { %v13907_v44 = vcombine.low %v9189_v15, %v9198_v32  ;;  %v8371_v61 = vrot.slane %v8369_v62, 4  ;;  %v8377_v54 = vrot.slane %v8375_v28, 5  ;;  %v8382_v13 = vrot.slane %v8380_v41, 4 }
 0x2dd   : > { %v8363_v30 = vrot.slane %v8362_v7, 4  ;;  %v8385_v55 = vrot.slane %v8383_v45, 5  ;;  %v8391_v26 = vrot.slane %v8389_v35, 5  ;;  %v8399_v34 = vshll.u32 %v8123_v49, 16 }
 0x2de   : > { %15251 = vmatprep.mubr.bf16.mxu0 %v13907_v44  ;;  %v8372_v57 = vor.u32 %v8371_v61, %v8367_v63  ;;  %v9200_v53 = vshrl.u32 %v8942_v50, 16  ;;  %v9205_v40 = vshrl.u32 %v8943_v39, 16  ;;  %v8395_v58 = vrot.slane %v8393_v59, 4  ;;  %v8127_v50 = vld [vmem:[#allocation2 + $0xc4] sm:$0xf] }
 0x2df   : > { %v8368_v9 = vsel %vm16079_vm5, %v8363_v30, %v8367_v63  ;;  %v8386_v46 = vor.u32 %v8385_v55, %v8382_v13  ;;  %v9208_v25 = vshll.u32 %v8943_v39, 16  ;;  %v8401_v6 = vrot.slane %v8399_v34, 5  ;;  %v8128_v39 = vld [vmem:[#allocation2 + $0xc8] sm:$0xf]  ;;  %v8948_v30 = vld [vmem:[#allocation2 + $0xe0] sm:$0x8] }
 0x2e0   : > { %v8373_v47 = vrot.slane %v8372_v57, 4  ;;  %v13876_v56 = vrot.slane %v9200_v53, 11  ;;  %v9207_v29 = vrot.slane %v9205_v40, 7  ;;  %v8396_v5 = vor.u32 %v8395_v58, %v8391_v26  ;;  %v8949_v34 = vld [vmem:[#allocation2 + $0xe4] sm:$0xf] }
 0x2e1   : > { %v8387_v36 = vrot.slane %v8386_v46, 4  ;;  %v9214_v17 = vshrl.u32 %v8944_v24, 16  ;;  %v9217_v23 = vshll.u32 %v8944_v24, 16  ;;  %v9222_v11 = vshrl.u32 %v8945_v4, 16  ;;  %v8129_v24 = vld [vmem:[#allocation2 + $0xcc] sm:$0x1] }
 0x2e2   : > { %v8378_v21 = vsel %vm16079_vm5, %v8373_v47, %v8377_v54  ;;  %v9210_v20 = vor.u32 %v9208_v25, %v9207_v29  ;;  %v9212_v52 = vrot.slane %v9207_v29, 4  ;;  %v8397_v60 = vrot.slane %v8396_v5, 4 }
 0x2e3   : > { %v13850_v2 = vcombine.low %v8368_v9, %v8378_v21  ;;  %v8392_v43 = vsel %vm16079_vm5, %v8387_v36, %v8391_v26  ;;  %v9216_v19 = vrot.slane %v9214_v17, 7  ;;  %v13877_v18 = vrot.slane %v9222_v11, 11 }
 0x2e4   : > { %v9211_v12 = vsel %vm15873_vm2, %v13876_v56, %v9210_v20  ;;  %v9227_v10 = vshrl.u32 %v8946_v0, 16  ;;  %v9230_v42 = vshll.u32 %v8946_v0, 16  ;;  %v8402_v8 = vsel %vm16079_vm5, %v8397_v60, %v8401_v6 }
 0x2e5   : > { %15200 = vmatmul.mubr.bf16.gmra.mxu1 %v13850_v2  ;;  %v9219_v3 = vor.u32 %v9217_v23, %v9216_v19  ;;  %v9236_v33 = vshrl.u32 %v8947_v37, 16  ;;  %v9239_v38 = vshll.u32 %v8947_v37, 16  ;;  %v13851_v16 = vcombine.low %v8392_v43, %v8402_v8  ;;  %v8950_v23 = vld [vmem:[#allocation2 + $0xe8] sm:$0xf]  ;;  %v8952_v2 = vld [vmem:[#allocation2 + $0xf4] sm:$0xf] }
 0x2e6   : > { %v9229_v31 = vrot.slane %v9227_v10, 7  ;;  %v8404_v63 = vshrl.u32 %v8124_v14, 16  ;;  %v8407_v49 = vshll.u32 %v8124_v14, 16  ;;  %v8413_v28 = vshll.u32 %v8125_v22, 16  ;;  %v8951_v14 = vld [vmem:[#allocation2 + $0xf0] sm:$0x8] }
 0x2e7   : > { %v9220_v15 = vsel %vm15873_vm2, %v9212_v52, %v9219_v3  ;;  %v9238_v62 = vrot.slane %v9236_v33, 7  ;;  %v8417_v41 = vshrl.u32 %v8125_v22, 16  ;;  %15203 = vmatprep.mubr.bf16.mxu1 %v13851_v16  ;;  %v8423_v26 = vshll.u32 %v8126_v51, 16  ;;  %v8953_v3 = vld [vmem:[#allocation2 + $0xf8] sm:$0xf] }
 0x2e8   : > { %v13908_v32 = vcombine.low %v9211_v12, %v9220_v15  ;;  %v9232_v7 = vor.u32 %v9230_v42, %v9229_v31  ;;  %v9234_v45 = vrot.slane %v9229_v31, 4  ;;  %v8406_v35 = vrot.slane %v8404_v63, 4  ;;  %v8130_v12 = vld [vmem:[#allocation2 + $0xd4] sm:$0xf]  ;;  %v8131_v51 = vld [vmem:[#allocation2 + $0xd8] sm:$0xf] }
 0x2e9   : > { %v9241_v44 = vor.u32 %v9239_v38, %v9238_v62  ;;  %v8409_v61 = vrot.slane %v8407_v49, 5  ;;  %v8415_v54 = vrot.slane %v8413_v28, 5  ;;  %v8419_v13 = vrot.slane %v8417_v41, 4 }
 0x2ea   : > { %15252 = vmatmul.mubr.bf16.gmra.mxu0 %v13908_v32  ;;  %v9233_v55 = vsel %vm15873_vm2, %v13877_v18, %v9232_v7  ;;  %v8428_v59 = vshrl.u32 %v8127_v50, 16  ;;  %v8431_v57 = vshll.u32 %v8127_v50, 16  ;;  %v8437_v46 = vshll.u32 %v8128_v39, 16 }
 0x2eb   : > { %v9242_v53 = vsel %vm15873_vm2, %v9234_v45, %v9241_v44  ;;  %v8410_v40 = vor.u32 %v8409_v61, %v8406_v35  ;;  %v8420_v9 = vor.u32 %v8419_v13, %v8415_v54  ;;  %v8425_v25 = vrot.slane %v8423_v26, 5 }
 0x2ec   : > { %v13909_v58 = vcombine.low %v9233_v55, %v9242_v53  ;;  %v8430_v4 = vrot.slane %v8428_v59, 4  ;;  %v8433_v47 = vrot.slane %v8431_v57, 5  ;;  %v8439_v29 = vrot.slane %v8437_v46, 5 }
 0x2ed   : > { %v8411_v6 = vrot.slane %v8410_v40, 4  ;;  %v8421_v56 = vrot.slane %v8420_v9, 4  ;;  %v8441_v36 = vshrl.u32 %v8128_v39, 16  ;;  %v8447_v17 = vshll.u32 %v8129_v24, 16  ;;  %v8132_v24 = vld [vmem:[#allocation2 + $0xdc] sm:$0x1] }
 0x2ee   : > { %15255 = vmatprep.mubr.bf16.mxu0 %v13909_v58  ;;  %v8434_v5 = vor.u32 %v8433_v47, %v8430_v4  ;;  %v9244_v0 = vshrl.u32 %v8948_v30, 16  ;;  %v9249_v21 = vshrl.u32 %v8949_v34, 16  ;;  %v9252_v11 = vshll.u32 %v8949_v34, 16  ;;  %v8133_v30 = vld [vmem:[#allocation2 + $0xe4] sm:$0xf] }
 0x2ef   : > { %v8416_v20 = vsel %vm16079_vm5, %v8411_v6, %v8415_v54  ;;  %v8426_v52 = vsel %vm16079_vm5, %v8421_v56, %v8425_v25  ;;  %v8443_v37 = vrot.slane %v8441_v36, 4  ;;  %v8449_v19 = vrot.slane %v8447_v17, 5  ;;  %v8134_v34 = vld [vmem:[#allocation2 + $0xe8] sm:$0xf]  ;;  %v8135_v58 = vld [vmem:[#allocation2 + $0xec] sm:$0x1] }
 0x2f0   : > { %v13852_v43 = vcombine.low %v8416_v20, %v8426_v52  ;;  %v8435_v60 = vrot.slane %v8434_v5, 4  ;;  %v13878_v22 = vrot.slane %v9244_v0, 11  ;;  %v9251_v10 = vrot.slane %v9249_v21, 7  ;;  %v8954_v56 = vld [vmem:[#allocation2 + $0x100] sm:$0x8] }
 0x2f1   : > { %v8444_v18 = vor.u32 %v8443_v37, %v8439_v29  ;;  %v9258_v42 = vshrl.u32 %v8950_v23, 16  ;;  %v9261_v8 = vshll.u32 %v8950_v23, 16  ;;  %v9266_v38 = vshrl.u32 %v8951_v14, 16  ;;  %v8955_v23 = vld [vmem:[#allocation2 + $0x104] sm:$0xf] }
 0x2f2   : > { %15204 = vmatmul.mubr.bf16.gmra.mxu1 %v13852_v43  ;;  %v8440_v33 = vsel %vm16079_vm5, %v8435_v60, %v8439_v29  ;;  %v9271_v16 = vshrl.u32 %v8952_v2, 16  ;;  %v9274_v31 = vshll.u32 %v8952_v2, 16  ;;  %v9254_v49 = vor.u32 %v9252_v11, %v9251_v10  ;;  %v8956_v37 = vld [vmem:[#allocation2 + $0x108] sm:$0xf] }
 0x2f3   : > { %v8445_v63 = vrot.slane %v8444_v18, 4  ;;  %v9256_v15 = vrot.slane %v9251_v10, 4  ;;  %v9260_v62 = vrot.slane %v9258_v42, 7  ;;  %v13879_v28 = vrot.slane %v9266_v38, 11 }
 0x2f4   : > { %v9273_v41 = vrot.slane %v9271_v16, 7  ;;  %v9280_v50 = vshrl.u32 %v8953_v3, 16  ;;  %v9283_v32 = vshll.u32 %v8953_v3, 16  ;;  %v9255_v45 = vsel %vm15873_vm2, %v13878_v22, %v9254_v49 }
 0x2f5   : > { %v8450_v7 = vsel %vm16079_vm5, %v8445_v63, %v8449_v19  ;;  %v9263_v35 = vor.u32 %v9261_v8, %v9260_v62  ;;  %v8452_v39 = vshrl.u32 %v8130_v12, 16  ;;  %v8455_v59 = vshll.u32 %v8130_v12, 16  ;;  %v10146_v62 = vld [vmem:[#allocation2 + $0x18] sm:$0xf] }
 0x2f6   : > { %v13853_v44 = vcombine.low %v8440_v33, %v8450_v7  ;;  %v9276_v61 = vor.u32 %v9274_v31, %v9273_v41  ;;  %v9278_v54 = vrot.slane %v9273_v41, 4  ;;  %v9282_v13 = vrot.slane %v9280_v50, 7  ;;  %v10145_v31 = vld [vmem:[#allocation2 + $0x14] sm:$0xf]  ;;  %v10147_v7 = vld [vmem:[#allocation2 + $0x1c] sm:$0x1] }
 0x2f7   : > { %v9264_v55 = vsel %vm15873_vm2, %v9256_v15, %v9263_v35  ;;  %v8454_v26 = vrot.slane %v8452_v39, 4  ;;  %v8461_v57 = vshll.u32 %v8131_v51, 16  ;;  %v8465_v46 = vshrl.u32 %v8131_v51, 16 }
 0x2f8   : > { %15207 = vmatprep.mubr.bf16.mxu1 %v13853_v44  ;;  %v13910_v53 = vcombine.low %v9255_v45, %v9264_v55  ;;  %v9277_v40 = vsel %vm15873_vm2, %v13879_v28, %v9276_v61  ;;  %v9285_v9 = vor.u32 %v9283_v32, %v9282_v13  ;;  %v8457_v25 = vrot.slane %v8455_v59, 5  ;;  %v8136_v61 = vld [vmem:[#allocation2 + $0xf4] sm:$0xf]  ;;  %v8138_v55 = vld [vmem:[#allocation2 + $0xfc] sm:$0x1] }
 0x2f9   : > { %v8463_v4 = vrot.slane %v8461_v57, 5  ;;  %v8471_v47 = vshll.u32 %v8132_v24, 16  ;;  %v8476_v6 = vshrl.u32 %v8133_v30, 16  ;;  %v8467_v36 = vrot.slane %v8465_v46, 4 }
 0x2fa   : > { %15256 = vmatmul.mubr.bf16.gmra.mxu0 %v13910_v53  ;;  %v9286_v29 = vsel %vm15873_vm2, %v9278_v54, %v9285_v9  ;;  %v8479_v5 = vshll.u32 %v8133_v30, 16  ;;  %v8485_v17 = vshll.u32 %v8134_v34, 16  ;;  %v8458_v21 = vor.u32 %v8457_v25, %v8454_v26  ;;  %v8137_v53 = vld [vmem:[#allocation2 + $0xf8] sm:$0xf] }
 0x2fb   : > { %v13911_v0 = vcombine.low %v9277_v40, %v9286_v29  ;;  %v8473_v20 = vrot.slane %v8471_v47, 5  ;;  %v8478_v52 = vrot.slane %v8476_v6, 4  ;;  %v8468_v11 = vor.u32 %v8467_v36, %v8463_v4  ;;  %v10148_v40 = vld [vmem:[#allocation2 + $0x24] sm:$0xf] }
 0x2fc   : > { %v8481_v14 = vrot.slane %v8479_v5, 5  ;;  %v8487_v2 = vrot.slane %v8485_v17, 5  ;;  %v8489_v43 = vshrl.u32 %v8134_v34, 16  ;;  %v8459_v60 = vrot.slane %v8458_v21, 4 }
 0x2fd   : > { %15259 = vmatprep.mubr.bf16.mxu0 %v13911_v0  ;;  %v8495_v19 = vshll.u32 %v8135_v58, 16  ;;  %v9288_v22 = vshrl.u32 %v8954_v56, 16  ;;  %v9293_v12 = vshrl.u32 %v8955_v23, 16  ;;  %v8469_v18 = vrot.slane %v8468_v11, 4 }
 0x2fe   : > { %v8482_v10 = vor.u32 %v8481_v14, %v8478_v52  ;;  %v8491_v42 = vrot.slane %v8489_v43, 4  ;;  %v9296_v8 = vshll.u32 %v8955_v23, 16  ;;  %v8464_v3 = vsel %vm16079_vm5, %v8459_v60, %v8463_v4  ;;  %v10149_v52 = vld [vmem:[#allocation2 + $0x28] sm:$0xf] }
 0x2ff   : > { %v8497_v33 = vrot.slane %v8495_v19, 5  ;;  %v13880_v38 = vrot.slane %v9288_v22, 11  ;;  %v9295_v16 = vrot.slane %v9293_v12, 7  ;;  %v8474_v51 = vsel %vm16079_vm5, %v8469_v18, %v8473_v20  ;;  %v10151_v18 = vld [vmem:[#allocation2 + $0x34] sm:$0xf] }
 0x300   : > { %v8483_v63 = vrot.slane %v8482_v10, 4  ;;  %v8492_v49 = vor.u32 %v8491_v42, %v8487_v2  ;;  %v9302_v15 = vshrl.u32 %v8956_v37, 16  ;;  %v13854_v28 = vcombine.low %v8464_v3, %v8474_v51  ;;  %v10152_v51 = vld [vmem:[#allocation2 + $0x38] sm:$0xf] }
 0x301   : > { %v9298_v41 = vor.u32 %v9296_v8, %v9295_v16  ;;  %v9300_v50 = vrot.slane %v9295_v16, 4  ;;  %v9305_v32 = vshll.u32 %v8956_v37, 16  ;;  %v10194_v44 = vshrl.u32 %v10145_v31, 16 }
 0x302   : > { %v8488_v45 = vsel %vm16079_vm5, %v8483_v63, %v8487_v2  ;;  %v8493_v35 = vrot.slane %v8492_v49, 4  ;;  %v9304_v39 = vrot.slane %v9302_v15, 7  ;;  %15208 = vmatmul.mubr.bf16.gmra.mxu1 %v13854_v28  ;;  %v10197_v13 = vshll.u32 %v10145_v31, 16  ;;  %v10150_v2 = vld [vmem:[#allocation2 + $0x2c] sm:$0x1] }
 0x303   : > { %v9299_v54 = vsel %vm15873_vm2, %v13880_v38, %v9298_v41  ;;  %v10203_v24 = vshll.u32 %v10146_v62, 16  ;;  %v10207_v30 = vshrl.u32 %v10146_v62, 16  ;;  %v10196_v57 = vrot.slane %v10194_v44, 4 }
 0x304   : > { %v8498_v26 = vsel %vm16079_vm5, %v8493_v35, %v8497_v33  ;;  %v9307_v59 = vor.u32 %v9305_v32, %v9304_v39  ;;  %v10213_v34 = vshll.u32 %v10147_v7, 16  ;;  %v10199_v46 = vrot.slane %v10197_v13, 5  ;;  %v10153_v32 = vld [vmem:[#allocation2 + $0x3c] sm:$0x1] }
 0x305   : > { %v13855_v9 = vcombine.low %v8488_v45, %v8498_v26  ;;  %v10205_v58 = vrot.slane %v10203_v24, 5  ;;  %v10209_v25 = vrot.slane %v10207_v30, 4  ;;  %v8500_v6 = vshrl.u32 %v8136_v61, 16  ;;  %v10155_v26 = vld [vmem:[#allocation2 + $0x48] sm:$0xf] }
 0x306   : > { %v9308_v4 = vsel %vm15873_vm2, %v9300_v50, %v9307_v59  ;;  %v10215_v47 = vrot.slane %v10213_v34, 5  ;;  %v8503_v56 = vshll.u32 %v8136_v61, 16  ;;  %v10200_v36 = vor.u32 %v10199_v46, %v10196_v57  ;;  %v10154_v61 = vld [vmem:[#allocation2 + $0x44] sm:$0xf] }
 0x307   : > { %15211 = vmatprep.mubr.bf16.mxu1 %v13855_v9  ;;  %v13912_v29 = vcombine.low %v9299_v54, %v9308_v4  ;;  %v10210_v5 = vor.u32 %v10209_v25, %v10205_v58  ;;  %v8509_v17 = vshll.u32 %v8137_v53, 16  ;;  %v8502_v23 = vrot.slane %v8500_v6, 4  ;;  %v15696_v9 = vld [vmem:[#allocation2 + $0x14] sm:$0xff]   ;;  %v10156_v4 = vld [vmem:[#allocation2 + $0x4c] sm:$0x1] }
 0x308   : > { %v8505_v0 = vrot.slane %v8503_v56, 5  ;;  %v8513_v21 = vshrl.u32 %v8137_v53, 16  ;;  %v8519_v20 = vshll.u32 %v8138_v55, 16  ;;  %v10201_v37 = vrot.slane %v10200_v36, 4 }
 0x309   : > { %15260 = vmatmul.mubr.bf16.gmra.mxu0 %v13912_v29  ;;  %v10211_v11 = vrot.slane %v10210_v5, 4  ;;  %v8511_v14 = vrot.slane %v8509_v17, 5  ;;  %v10218_v43 = vshrl.u32 %v10148_v40, 16  ;;  %v10221_v12 = vshll.u32 %v10148_v40, 16 }
 0x30a   : > { %v8506_v60 = vor.u32 %v8505_v0, %v8502_v23  ;;  %v8515_v19 = vrot.slane %v8513_v21, 4  ;;  %v8521_v22 = vrot.slane %v8519_v20, 5  ;;  %v10206_v10 = vsel %vm16079_vm5, %v10201_v37, %v10205_v58  ;;  %v10157_v20 = vld [vmem:[#allocation2 + $0x54] sm:$0xf] }
 0x30b   : > { %v10216_v42 = vsel %vm16079_vm5, %v10211_v11, %v10215_v47  ;;  %v10220_v8 = vrot.slane %v10218_v43, 4  ;;  %v10227_v3 = vshll.u32 %v10149_v52, 16  ;;  %v10223_v31 = vrot.slane %v10221_v12, 5  ;;  %v15710_v12 = vld [vmem:[%s19355_s2 + $0x1f0] sm:$0xff]  }
 0x30c   : > { %v13977_v33 = vcombine.low %v10206_v10, %v10216_v42  ;;  %v8507_v38 = vrot.slane %v8506_v60, 4  ;;  %v8516_v16 = vor.u32 %v8515_v19, %v8511_v14  ;;  %v10231_v49 = vshrl.u32 %v10149_v52, 16  ;;  %v18093_v54 = vpop.f32.mrf.mxu0 }
 0x30d   : > { %v10229_v63 = vrot.slane %v10227_v3, 5  ;;  %v10237_v15 = vshll.u32 %v10150_v2, 16  ;;  %v10242_v62 = vshrl.u32 %v10151_v18, 16  ;;  %v10224_v50 = vor.u32 %v10223_v31, %v10220_v8  ;;  %v10158_v2 = vld [vmem:[#allocation2 + $0x58] sm:$0xf]  ;;  %v15697_v31 = vld [vmem:[#allocation2 + $0x24] sm:$0xff]  }
 0x30e   : > { %15327 = vmatprep.mubr.bf16.mxu0 %v13977_v33  ;;  %v8512_v28 = vsel %vm16079_vm5, %v8507_v38, %v8511_v14  ;;  %v8517_v41 = vrot.slane %v8516_v16, 4  ;;  %v10245_v7 = vshll.u32 %v10151_v18, 16  ;;  %v10233_v45 = vrot.slane %v10231_v49, 4  ;;  %v18097_v40 = vpop.f32.mrf.mxu0  ;;  %v10159_v8 = vld [vmem:[#allocation2 + $0x5c] sm:$0x1] }
 0x30f   : > { %v10239_v35 = vrot.slane %v10237_v15, 5  ;;  %v10244_v39 = vrot.slane %v10242_v62, 4  ;;  %v10251_v44 = vshll.u32 %v10152_v51, 16  ;;  %v10225_v24 = vrot.slane %v10224_v50, 4  ;;  %19592 = vst [vmem:[#allocation28_spill] sm:$0xff] %v18097_v40 }
 0x310   : > { %v8522_v13 = vsel %vm16079_vm5, %v8517_v41, %v8521_v22  ;;  %v10247_v30 = vrot.slane %v10245_v7, 5  ;;  %v10255_v55 = vshrl.u32 %v10152_v51, 16  ;;  %v10234_v57 = vor.u32 %v10233_v45, %v10229_v63  ;;  %v18101_v5 = vpop.f32.mrf.mxu0  ;;  %v10160_v15 = vld [vmem:[#allocation2 + $0x64] sm:$0xf]  ;;  %v10161_v7 = vld [vmem:[#allocation2 + $0x68] sm:$0xf] }
 0x311   : > { %v13856_v59 = vcombine.low %v8512_v28, %v8522_v13  ;;  %v10253_v34 = vrot.slane %v10251_v44, 5  ;;  %v10261_v53 = vshll.u32 %v10153_v32, 16  ;;  %v10230_v46 = vsel %vm16079_vm5, %v10225_v24, %v10229_v63  ;;  %v15701_v32 = vld [vmem:[%s19355_s2 + $0x1b0] sm:$0xff]   ;;  %v15755_v45 = vld [vmem:[%s19355_s2 + $0x1f8] sm:$0xff]  }
 0x312   : > { %v10248_v58 = vor.u32 %v10247_v30, %v10244_v39  ;;  %v10257_v25 = vrot.slane %v10255_v55, 4  ;;  %v10266_v47 = vshrl.u32 %v10154_v61, 16  ;;  %v10235_v6 = vrot.slane %v10234_v57, 4  ;;  %v18110_v18 = vpop.f32.mrf.mxu0  ;;  %v15699_v39 = vld [vmem:[#allocation2 + $0x34] sm:$0xff]   ;;  %v15714_v30 = vld [vmem:[%s19355_s2 + $0x1e8] sm:$0xff]  }
 0x313   : > { %15212 = vmatmul.mubr.bf16.gmra.mxu1 %v13856_v59  ;;  %v10263_v56 = vrot.slane %v10261_v53, 5  ;;  %v10269_v29 = vshll.u32 %v10154_v61, 16  ;;  %v10275_v36 = vshll.u32 %v10155_v26, 16  ;;  %v10279_v21 = vshrl.u32 %v10155_v26, 16  ;;  %19593 = vst [vmem:[#allocation19_spill] sm:$0xff] %v18110_v18 }
 0x314   : > { %15279 = vmatprep.mubr.bf16.mxu1 %v15696_v9  ;;  %v10249_v17 = vrot.slane %v10248_v58, 4  ;;  %v10258_v23 = vor.u32 %v10257_v25, %v10253_v34  ;;  %v10268_v0 = vrot.slane %v10266_v47, 4  ;;  %v10240_v52 = vsel %vm16079_vm5, %v10235_v6, %v10239_v35  ;;  %v10162_v57 = vld [vmem:[#allocation2 + $0x6c] sm:$0x1]  ;;  %v10163_v47 = vld [vmem:[#allocation2 + $0x74] sm:$0xf] }
 0x315   : > { %v10271_v37 = vrot.slane %v10269_v29, 5  ;;  %v10277_v11 = vrot.slane %v10275_v36, 5  ;;  %v10285_v14 = vshll.u32 %v10156_v4, 16  ;;  %v13978_v43 = vcombine.low %v10230_v46, %v10240_v52 }
 0x316   : > { %v10254_v60 = vsel %vm16079_vm5, %v10249_v17, %v10253_v34  ;;  %v10259_v19 = vrot.slane %v10258_v23, 4  ;;  %v10281_v22 = vrot.slane %v10279_v21, 4  ;;  %v10290_v3 = vshrl.u32 %v10157_v20, 16  ;;  %v18112_v38 = vpop.f32.mrf.mxu1  ;;  %v10164_v23 = vld [vmem:[#allocation2 + $0x78] sm:$0xf] }
 0x317   : > { %v10272_v10 = vor.u32 %v10271_v37, %v10268_v0  ;;  %v10287_v42 = vrot.slane %v10285_v14, 5  ;;  %v10293_v33 = vshll.u32 %v10157_v20, 16  ;;  %15328 = vmatmul.mubr.bf16.vlgmr.msra.gmra.mxu0 %v13978_v43  ;;  %v10299_v63 = vshll.u32 %v10158_v2, 16  ;;  %v15704_v0 = vld [vmem:[%s19355_s2 + $0x1a8] sm:$0xff]   ;;  %v15715_v37 = vld [vmem:[%s19355_s2 + $0x1e0] sm:$0xff]  }
 0x318   : > { %v10264_v16 = vsel %vm16079_vm5, %v10259_v19, %v10263_v56  ;;  %v10282_v51 = vor.u32 %v10281_v22, %v10277_v11  ;;  %v10303_v49 = vshrl.u32 %v10158_v2, 16  ;;  %v10292_v41 = vrot.slane %v10290_v3, 4  ;;  %15408 = vmatpush3.bf16.msra.mxu0 %v15755_v45  ;;  %v18122_v35 = vpop.f32.mrf.mxu1  ;;  %v10165_v43 = vld [vmem:[#allocation2 + $0x7c] sm:$0x1] }
 0x319   : > { %v13979_v62 = vcombine.low %v10254_v60, %v10264_v16  ;;  %v10273_v28 = vrot.slane %v10272_v10, 4  ;;  %v10295_v50 = vrot.slane %v10293_v33, 5  ;;  %19594 = vst [vmem:[#allocation32_spill] sm:$0xff] %v18122_v35  ;;  %v10301_v61 = vrot.slane %v10299_v63, 5  ;;  %15409 = vmatprep.subr.bf16.mxu0 %v15710_v12  ;;  %v18127_v55 = vpop.f32.mrf.mxu0  ;;  %v15700_v10 = vld [vmem:[#allocation2 + $0x44] sm:$0xff]   ;;  %v15719_v45 = vld [vmem:[%s19355_s2 + $0x1d8] sm:$0xff]  }
 0x31a   : > { %v10283_v44 = vrot.slane %v10282_v51, 4  ;;  %v10305_v13 = vrot.slane %v10303_v49, 4  ;;  %v10309_v24 = vshll.u32 %v10159_v8, 16  ;;  %v10314_v34 = vshrl.u32 %v10160_v15, 16  ;;  %v18131_v9 = vpop.f32.mrf.mxu1  ;;  %v10166_v33 = vld [vmem:[#allocation2 + $0x84] sm:$0xf] }
 0x31b   : > { %15331 = vmatprep.mubr.bf16.mxu0 %v13979_v62  ;;  %15280 = vmatmul.mubr.bf16.vlgmr.msra.gmra.mxu1 %v15697_v31  ;;  %v10278_v26 = vsel %vm16079_vm5, %v10273_v28, %v10277_v11  ;;  %v10296_v59 = vor.u32 %v10295_v50, %v10292_v41  ;;  %v10317_v53 = vshll.u32 %v10160_v15, 16  ;;  %v10323_v4 = vshll.u32 %v10161_v7, 16  ;;  %v18136_v6 = vpop.f32.mrf.mxu0  ;;  %v10167_v15 = vld [vmem:[#allocation2 + $0x88] sm:$0xf]  ;;  %v15707_v62 = vld [vmem:[%s19355_s2 + $0x1a0] sm:$0xff]   ;;  %v15702_v28 = vld [vmem:[#allocation2 + $0x54] sm:$0xff]  }
 0x31c   : > { %15283 = vmatprep.mubr.bf16.mxu1 %v15699_v39  ;;  %v10288_v46 = vsel %vm16079_vm5, %v10283_v44, %v10287_v42  ;;  %15360 = vmatpush3.bf16.msra.mxu1 %v18020_v1  ;;  %v10306_v58 = vor.u32 %v10305_v13, %v10301_v61  ;;  %v10311_v25 = vrot.slane %v10309_v24, 5  ;;  %v10316_v36 = vrot.slane %v10314_v34, 4  ;;  %v18150_v22 = vpop.f32.mrf.mxu1  ;;  %v10972_v35 = vld [vmem:[#allocation2 + $0x50] sm:$0x8] }
 0x31d   : > { %v13980_v56 = vcombine.low %v10278_v26, %v10288_v46  ;;  %v10297_v29 = vrot.slane %v10296_v59, 4  ;;  %15361 = vmatprep.subr.bf16.mxu1 %v15701_v32  ;;  %v10319_v17 = vrot.slane %v10317_v53, 5  ;;  %15410 = vmatpush3.bf16.msra.mxu0 %v15710_v12  ;;  %v18141_v20 = vrot.slane %v10323_v4, 5  ;;  %v18146_v11 = vpop.f32.mrf.mxu0  ;;  %19595 = vst [vmem:[#allocation35_spill] sm:$0xff] %v18150_v22  ;;  %v10169_v53 = vld [vmem:[#allocation2 + $0x94] sm:$0xf] }
 0x31e   : > { %v10307_v21 = vrot.slane %v10306_v58, 4  ;;  %v10327_v1 = vshrl.u32 %v10161_v7, 16  ;;  %v10333_v52 = vshll.u32 %v10162_v57, 16  ;;  %15411 = vmatprep.subr.bf16.mxu0 %v15714_v30  ;;  %v10338_v60 = vshrl.u32 %v10163_v47, 16 }
 0x31f   : > { %v10302_v14 = vsel %vm16079_vm5, %v10297_v29, %v10301_v61  ;;  %v10320_v2 = vor.u32 %v10319_v17, %v10316_v36  ;;  %v10341_v19 = vshll.u32 %v10163_v47, 16  ;;  %15332 = vmatmul.mubr.bf16.gmra.mxu0 %v13980_v56  ;;  %v10347_v3 = vshll.u32 %v10164_v23, 16  ;;  %v18154_v16 = vpop.f32.mrf.mxu0  ;;  %v10168_v61 = vld [vmem:[#allocation2 + $0x8c] sm:$0x1]  ;;  %v15712_v56 = vld [vmem:[%s19355_s2 + $0x198] sm:$0xff]  }
 0x320   : > { %v10312_v12 = vsel %vm16079_vm5, %v10307_v21, %v10311_v25  ;;  %v10329_v42 = vrot.slane %v10327_v1, 4  ;;  %v10335_v8 = vrot.slane %v10333_v52, 5  ;;  %15362 = vmatpush3.bf16.msra.mxu1 %v15701_v32  ;;  %19596 = vst [vmem:[#allocation15_spill] sm:$0xff] %v18154_v16  ;;  %v10340_v63 = vrot.slane %v10338_v60, 4  ;;  %v10170_v21 = vld [vmem:[#allocation2 + $0x98] sm:$0xf] }
 0x321   : > { %v13981_v31 = vcombine.low %v10302_v14, %v10312_v12  ;;  %v10321_v51 = vrot.slane %v10320_v2, 4  ;;  %v10343_v49 = vrot.slane %v10341_v19, 5  ;;  %15363 = vmatprep.subr.bf16.mxu1 %v15704_v0  ;;  %15412 = vmatpush3.bf16.msra.mxu0 %v15714_v30  ;;  %v18160_v50 = vrot.slane %v10347_v3, 5  ;;  %v10171_v2 = vld [vmem:[#allocation2 + $0x9c] sm:$0x1]  ;;  %v15703_v12 = vld [vmem:[#allocation2 + $0x64] sm:$0xff]  }
 0x322   : > { %v10330_v41 = vor.u32 %v10329_v42, %v18141_v20  ;;  %v10351_v32 = vshrl.u32 %v10164_v23, 16  ;;  %v10357_v7 = vshll.u32 %v10165_v43, 16  ;;  %15413 = vmatprep.subr.bf16.mxu0 %v15715_v37  ;;  %v10362_v13 = vshrl.u32 %v10166_v33, 16  ;;  %v18168_v30 = vpop.f32.mrf.mxu1  ;;  %v18170_v46 = vpop.f32.mrf.mxu0  ;;  %v15720_v43 = vld [vmem:[%s19355_s2 + $0x1d0] sm:$0xff]  }
 0x323   : > { %15335 = vmatprep.mubr.bf16.mxu0 %v13981_v31  ;;  %15284 = vmatmul.mubr.bf16.gmra.mxu1 %v15700_v10  ;;  %v10326_v39 = vsel %vm16079_vm5, %v10321_v51, %v18141_v20  ;;  %v10344_v44 = vor.u32 %v10343_v49, %v10340_v63  ;;  %v10365_v24 = vshll.u32 %v10166_v33, 16  ;;  %v10371_v34 = vshll.u32 %v10167_v15, 16  ;;  %v10172_v49 = vld [vmem:[#allocation2 + $0xa4] sm:$0xf] }
 0x324   : > { %15287 = vmatprep.mubr.bf16.mxu1 %v15702_v28  ;;  %v10331_v26 = vrot.slane %v10330_v41, 4  ;;  %v10353_v59 = vrot.slane %v10351_v32, 4  ;;  %v10359_v57 = vrot.slane %v10357_v7, 5  ;;  %15364 = vmatpush3.bf16.msra.mxu1 %v15704_v0  ;;  %v10364_v25 = vrot.slane %v10362_v13, 4  ;;  %v18175_v29 = vpop.f32.mrf.mxu1  ;;  %v18180_v20 = vpop.f32.mrf.mxu0 }
 0x325   : > { %v10345_v58 = vrot.slane %v10344_v44, 4  ;;  %v10367_v4 = vrot.slane %v10365_v24, 5  ;;  %v10375_v47 = vshrl.u32 %v10167_v15, 16  ;;  %15365 = vmatprep.subr.bf16.mxu1 %v15707_v62  ;;  %15414 = vmatpush3.bf16.msra.mxu0 %v15715_v37  ;;  %v10373_v23 = vrot.slane %v10371_v34, 5  ;;  %v15717_v15 = vld [vmem:[%s19355_s2 + $0x190] sm:$0xff]  }
 0x326   : > { %v10336_v36 = vsel %vm16079_vm5, %v10331_v26, %v10335_v8  ;;  %v10354_v17 = vor.u32 %v10353_v59, %v18160_v50  ;;  %v10381_v0 = vshll.u32 %v10168_v61, 16  ;;  %15415 = vmatprep.subr.bf16.mxu0 %v15719_v45  ;;  %v18188_v60 = vpop.f32.mrf.mxu1  ;;  %v10386_v42 = vshrl.u32 %v10169_v53, 16  ;;  %v18190_v3 = vpop.f32.mrf.mxu0  ;;  %v15724_v26 = vld [vmem:[%s19355_s2 + $0x1c8] sm:$0xff]  }
 0x327   : > { %v13982_v1 = vcombine.low %v10326_v39, %v10336_v36  ;;  %v10350_v52 = vsel %vm16079_vm5, %v10345_v58, %v18160_v50  ;;  %v10368_v14 = vor.u32 %v10367_v4, %v10364_v25  ;;  %v10377_v37 = vrot.slane %v10375_v47, 4  ;;  %v15705_v50 = vld [vmem:[#allocation2 + $0x74] sm:$0xff]   ;;  %v10173_v39 = vld [vmem:[#allocation2 + $0xa8] sm:$0xf]  ;;  %v10174_v58 = vld [vmem:[#allocation2 + $0xac] sm:$0x1] }
 0x328   : > { %v10355_v19 = vrot.slane %v10354_v17, 4  ;;  %v10383_v10 = vrot.slane %v10381_v0, 5  ;;  %v10389_v8 = vshll.u32 %v10169_v53, 16  ;;  %15366 = vmatpush3.bf16.msra.mxu1 %v15707_v62  ;;  %v10395_v51 = vshll.u32 %v10170_v21, 16  ;;  %v18195_v28 = vpop.f32.mrf.mxu1  ;;  %v18204_v59 = vpop.f32.mrf.mxu0  ;;  %v15722_v0 = vld [vmem:[%s19355_s2 + $0x188] sm:$0xff]  }
 0x329   : > { %15336 = vmatmul.mubr.bf16.gmra.mxu0 %v13982_v1  ;;  %v10369_v33 = vrot.slane %v10368_v14, 4  ;;  %v10378_v31 = vor.u32 %v10377_v37, %v10373_v23  ;;  %v10399_v63 = vshrl.u32 %v10170_v21, 16  ;;  %15367 = vmatprep.subr.bf16.mxu1 %v15712_v56  ;;  %19597 = vst [vmem:[#allocation20_spill] sm:$0xff] %v18195_v28  ;;  %v10388_v62 = vrot.slane %v10386_v42, 4  ;;  %19598 = vst [vmem:[#allocation45_spill] sm:$0xff] %v18204_v59  ;;  %v15726_v42 = vld [vmem:[%s19355_s2 + $0x1c0] sm:$0xff]  }
 0x32a   : > { %v10360_v41 = vsel %vm16079_vm5, %v10355_v19, %v10359_v57  ;;  %v10391_v32 = vrot.slane %v10389_v8, 5  ;;  %v10405_v7 = vshll.u32 %v10171_v2, 16  ;;  %15416 = vmatpush3.bf16.msra.mxu0 %v15719_v45  ;;  %v10397_v24 = vrot.slane %v10395_v51, 5  ;;  %v10189_v28 = vld [vmem:[#allocation2 + $0xfc] sm:$0x1] }
 0x32b   : > { %v13983_v44 = vcombine.low %v10350_v52, %v10360_v41  ;;  %15288 = vmatmul.mubr.bf16.gmra.mxu1 %v15703_v12  ;;  %v10374_v61 = vsel %vm16079_vm5, %v10369_v33, %v10373_v23  ;;  %v10379_v13 = vrot.slane %v10378_v31, 4  ;;  %15417 = vmatprep.subr.bf16.mxu0 %v15720_v43  ;;  %v10401_v34 = vrot.slane %v10399_v63, 4  ;;  %v10175_v23 = vld [vmem:[#allocation2 + $0xb4] sm:$0xf]  ;;  %v15706_v41 = vld [vmem:[#allocation2 + $0x84] sm:$0xff]  }
 0x32c   : > { %15291 = vmatprep.mubr.bf16.mxu1 %v15705_v50  ;;  %v10392_v57 = vor.u32 %v10391_v32, %v10388_v62  ;;  %v10407_v53 = vrot.slane %v10405_v7, 5  ;;  %v10410_v45 = vshrl.u32 %v10172_v49, 16  ;;  %15368 = vmatpush3.bf16.msra.mxu1 %v15712_v56  ;;  %v18206_v25 = vpop.f32.mrf.mxu1  ;;  %v10413_v47 = vshll.u32 %v10172_v49, 16  ;;  %v10176_v56 = vld [vmem:[#allocation2 + $0xb8] sm:$0xf] }
 0x32d   : > { %15339 = vmatprep.mubr.bf16.mxu0 %v13983_v44  ;;  %v10384_v4 = vsel %vm16079_vm5, %v10379_v13, %v10383_v10  ;;  %v10419_v36 = vshll.u32 %v10173_v39, 16  ;;  %v10423_v17 = vshrl.u32 %v10173_v39, 16  ;;  %15369 = vmatprep.subr.bf16.mxu1 %v15717_v15  ;;  %v10402_v52 = vor.u32 %v10401_v34, %v10397_v24  ;;  %v10177_v7 = vld [vmem:[#allocation2 + $0xbc] sm:$0x1]  ;;  %v15728_v44 = vld [vmem:[%s19355_s2 + $0x180] sm:$0xff]  }
 0x32e   : > { %v13984_v21 = vcombine.low %v10374_v61, %v10384_v4  ;;  %v10393_v1 = vrot.slane %v10392_v57, 4  ;;  %v10412_v14 = vrot.slane %v10410_v45, 4  ;;  %15418 = vmatpush3.bf16.msra.mxu0 %v15720_v43  ;;  %v18213_v37 = vpop.f32.mrf.mxu1  ;;  %v10415_v2 = vrot.slane %v10413_v47, 5  ;;  %v18218_v8 = vpop.f32.mrf.mxu0  ;;  %v10178_v43 = vld [vmem:[#allocation2 + $0xc4] sm:$0xf] }
 0x32f   : > { %v10421_v19 = vrot.slane %v10419_v36, 5  ;;  %v10425_v12 = vrot.slane %v10423_v17, 4  ;;  %v10429_v10 = vshll.u32 %v10174_v58, 16  ;;  %15419 = vmatprep.subr.bf16.mxu0 %v15724_v26  ;;  %v10403_v31 = vrot.slane %v10402_v52, 4  ;;  %v10179_v58 = vld [vmem:[#allocation2 + $0xc8] sm:$0xf] }
 0x330   : > { %v10398_v33 = vsel %vm16079_vm5, %v10393_v1, %v10397_v24  ;;  %v10434_v51 = vshrl.u32 %v10175_v23, 16  ;;  %v10437_v63 = vshll.u32 %v10175_v23, 16  ;;  %15370 = vmatpush3.bf16.msra.mxu1 %v15717_v15  ;;  %v18222_v49 = vpop.f32.mrf.mxu1  ;;  %v10416_v50 = vor.u32 %v10415_v2, %v10412_v14  ;;  %v18227_v61 = vpop.f32.mrf.mxu0  ;;  %v15708_v15 = vld [vmem:[#allocation2 + $0x94] sm:$0xff]   ;;  %v10180_v52 = vld [vmem:[#allocation2 + $0xcc] sm:$0x1] }
 0x331   : > { %15340 = vmatmul.mubr.bf16.gmra.mxu0 %v13984_v21  ;;  %v10426_v62 = vor.u32 %v10425_v12, %v10421_v19  ;;  %v10431_v32 = vrot.slane %v10429_v10, 5  ;;  %v10443_v39 = vshll.u32 %v10176_v56, 16  ;;  %15371 = vmatprep.subr.bf16.mxu1 %v15722_v0  ;;  %v10408_v13 = vsel %vm16079_vm5, %v10403_v31, %v10407_v53  ;;  %v10181_v10 = vld [vmem:[#allocation2 + $0xd4] sm:$0xf] }
 0x332   : > { %v10436_v24 = vrot.slane %v10434_v51, 4  ;;  %v10439_v57 = vrot.slane %v10437_v63, 5  ;;  %v10447_v34 = vshrl.u32 %v10176_v56, 16  ;;  %15420 = vmatpush3.bf16.msra.mxu0 %v15724_v26  ;;  %v13985_v45 = vcombine.low %v10398_v33, %v10408_v13  ;;  %v18231_v17 = vpop.f32.mrf.mxu0  ;;  %v18233_v14 = vpop.f32.mrf.mxu1  ;;  %v18242_v33 = vld [vmem:[%s19355_s2 + $0x238] sm:$0xff]  }
 0x333   : > { %15292 = vmatmul.mubr.bf16.gmra.mxu1 %v15706_v41  ;;  %v10417_v4 = vrot.slane %v10416_v50, 4  ;;  %v10427_v47 = vrot.slane %v10426_v62, 4  ;;  %v10445_v36 = vrot.slane %v10443_v39, 5  ;;  %15421 = vmatprep.subr.bf16.mxu0 %v15726_v42  ;;  %v10453_v1 = vshll.u32 %v10177_v7, 16  ;;  %19599 = vst [vmem:[#allocation37_spill] sm:$0xff] %v18233_v14 }
 0x334   : > { %15295 = vmatprep.mubr.bf16.mxu1 %v15708_v15  ;;  %v10440_v23 = vor.u32 %v10439_v57, %v10436_v24  ;;  %v10449_v21 = vrot.slane %v10447_v34, 4  ;;  %v10458_v53 = vshrl.u32 %v10178_v43, 16  ;;  %15372 = vmatpush3.bf16.msra.mxu1 %v15722_v0  ;;  %v10461_v2 = vshll.u32 %v10178_v43, 16  ;;  %v18244_v31 = vpop.f32.mrf.mxu0  ;;  %v10182_v50 = vld [vmem:[#allocation2 + $0xd8] sm:$0xf]  ;;  %v15711_v34 = vld [vmem:[#allocation2 + $0xa4] sm:$0xff]  }
 0x335   : > { %15343 = vmatprep.mubr.bf16.mxu0 %v13985_v45  ;;  %v10422_v26 = vsel %vm16079_vm5, %v10417_v4, %v10421_v19  ;;  %v10432_v56 = vsel %vm16079_vm5, %v10427_v47, %v10431_v32  ;;  %v10467_v12 = vshll.u32 %v10179_v58, 16  ;;  %15373 = vmatprep.subr.bf16.mxu1 %v15728_v44  ;;  %19600 = vst [vmem:[#allocation47_spill] sm:$0xff] %v18244_v31  ;;  %v10455_v41 = vrot.slane %v10453_v1, 5  ;;  %v10184_v24 = vld [vmem:[#allocation2 + $0xe4] sm:$0xf] }
 0x336   : > { %v13986_v0 = vcombine.low %v10422_v26, %v10432_v56  ;;  %v10441_v51 = vrot.slane %v10440_v23, 4  ;;  %v10450_v63 = vor.u32 %v10449_v21, %v10445_v36  ;;  %15422 = vmatpush3.bf16.msra.mxu0 %v15726_v42  ;;  %v10460_v19 = vrot.slane %v10458_v53, 4  ;;  %v10183_v47 = vld [vmem:[#allocation2 + $0xdc] sm:$0x1]  ;;  %v15713_v21 = vld [vmem:[#allocation2 + $0xb4] sm:$0xff]  }
 0x337   : > { %v10463_v62 = vrot.slane %v10461_v2, 5  ;;  %v10469_v32 = vrot.slane %v10467_v12, 5  ;;  %v10471_v43 = vshrl.u32 %v10179_v58, 16  ;;  %v10477_v13 = vshll.u32 %v10180_v52, 16  ;;  %v18248_v57 = vpop.f32.mrf.mxu1  ;;  %v10965_v14 = vld [vmem:[#allocation2 + $0x28] sm:$0xf] }
 0x338   : > { %v10446_v7 = vsel %vm16079_vm5, %v10441_v51, %v10445_v36  ;;  %v10451_v39 = vrot.slane %v10450_v63, 4  ;;  %v10482_v15 = vshrl.u32 %v10181_v10, 16  ;;  %15374 = vmatpush3.bf16.msra.mxu1 %v15728_v44  ;;  %v10485_v42 = vshll.u32 %v10181_v10, 16  ;;  %v18251_v58 = vpop.f32.mrf.mxu0  ;;  %v10185_v10 = vld [vmem:[#allocation2 + $0xe8] sm:$0xf] }
 0x339   : > { %15344 = vmatmul.mubr.bf16.gmra.mxu0 %v13986_v0  ;;  %v10464_v45 = vor.u32 %v10463_v62, %v10460_v19  ;;  %v10473_v4 = vrot.slane %v10471_v43, 4  ;;  %v10491_v23 = vshll.u32 %v10182_v50, 16  ;;  %15455 = vmatprep.subr.bf16.mxu1 %v18242_v33  ;;  %v10479_v1 = vrot.slane %v10477_v13, 5  ;;  %v18255_v53 = vpop.f32.mrf.mxu1 }
 0x33a   : > { %v10456_v36 = vsel %vm16079_vm5, %v10451_v39, %v10455_v41  ;;  %v10484_v52 = vrot.slane %v10482_v15, 4  ;;  %v10495_v44 = vshrl.u32 %v10182_v50, 16  ;;  %v10487_v12 = vrot.slane %v10485_v42, 5  ;;  %v18257_v0 = vpop.f32.mrf.mxu0  ;;  %v10186_v39 = vld [vmem:[#allocation2 + $0xec] sm:$0x1] }
 0x33b   : > { %v13987_v26 = vcombine.low %v10446_v7, %v10456_v36  ;;  %15296 = vmatmul.mubr.bf16.gmra.mxu1 %v15711_v34  ;;  %v10465_v56 = vrot.slane %v10464_v45, 4  ;;  %v10474_v2 = vor.u32 %v10473_v4, %v10469_v32  ;;  %v10493_v51 = vrot.slane %v10491_v23, 5  ;;  %v18259_v41 = vpop.f32.mrf.mxu1  ;;  %v10187_v23 = vld [vmem:[#allocation2 + $0xf4] sm:$0xf] }
 0x33c   : > { %15299 = vmatprep.mubr.bf16.mxu1 %v15713_v21  ;;  %v10497_v63 = vrot.slane %v10495_v44, 4  ;;  %v10501_v19 = vshll.u32 %v10183_v47, 16  ;;  %v10506_v62 = vshrl.u32 %v10184_v24, 16  ;;  %v10488_v7 = vor.u32 %v10487_v12, %v10484_v52  ;;  %v18263_v15 = vpop.f32.mrf.mxu0 }
 0x33d   : > { %15347 = vmatprep.mubr.bf16.mxu0 %v13987_v26  ;;  %v10470_v50 = vsel %vm16079_vm5, %v10465_v56, %v10469_v32  ;;  %v10475_v43 = vrot.slane %v10474_v2, 4  ;;  %v10509_v13 = vshll.u32 %v10184_v24, 16  ;;  %v10515_v42 = vshll.u32 %v10185_v10, 16  ;;  %v10188_v26 = vld [vmem:[#allocation2 + $0xf8] sm:$0xf]  ;;  %v18267_v16 = vpop.f32.mrf.mxu1 }
 0x33e   : > { %v10498_v34 = vor.u32 %v10497_v63, %v10493_v51  ;;  %v10503_v45 = vrot.slane %v10501_v19, 5  ;;  %v10508_v4 = vrot.slane %v10506_v62, 4  ;;  %v10489_v36 = vrot.slane %v10488_v7, 4  ;;  %19601 = vst [vmem:[#allocation49_spill] sm:$0xff] %v18267_v16  ;;  %v18269_v2 = vpop.f32.mrf.mxu0  ;;  %v15716_v63 = vld [vmem:[#allocation2 + $0xc4] sm:$0xff]  }
 0x33f   : > { %v10480_v47 = vsel %vm16079_vm5, %v10475_v43, %v10479_v1  ;;  %v10511_v21 = vrot.slane %v10509_v13, 5  ;;  %v10519_v44 = vshrl.u32 %v10185_v10, 16  ;;  %v10517_v56 = vrot.slane %v10515_v42, 5  ;;  %19602 = vst [vmem:[#allocation52_spill] sm:$0xff] %v18269_v2  ;;  %v15718_v43 = vld [vmem:[#allocation2 + $0xd4] sm:$0xff]  }
 0x340   : > { %v13988_v32 = vcombine.low %v10470_v50, %v10480_v47  ;;  %v10499_v52 = vrot.slane %v10498_v34, 4  ;;  %v10525_v24 = vshll.u32 %v10186_v39, 16  ;;  %v10494_v12 = vsel %vm16079_vm5, %v10489_v36, %v10493_v51  ;;  %v10190_v34 = vld [vmem:[#allocation2 + $0x104] sm:$0xf]  ;;  %v10191_v51 = vld [vmem:[#allocation2 + $0x108] sm:$0xf] }
 0x341   : > { %v10512_v19 = vor.u32 %v10511_v21, %v10508_v4  ;;  %v10521_v62 = vrot.slane %v10519_v44, 4  ;;  %v10530_v1 = vshrl.u32 %v10187_v23, 16  ;;  %v10533_v50 = vshll.u32 %v10187_v23, 16 }
 0x342   : > { %15348 = vmatmul.mubr.bf16.gmra.mxu0 %v13988_v32  ;;  %v10504_v10 = vsel %vm16079_vm5, %v10499_v52, %v10503_v45  ;;  %v10527_v7 = vrot.slane %v10525_v24, 5  ;;  %v10539_v13 = vshll.u32 %v10188_v26, 16  ;;  %v18275_v36 = vpop.f32.mrf.mxu1  ;;  %v10543_v44 = vshrl.u32 %v10188_v26, 16  ;;  %v18277_v22 = vpop.f32.mrf.mxu0  ;;  %v10192_v52 = vld [vmem:[#allocation2 + $0x10c] sm:$0x1] }
 0x343   : > { %v13989_v39 = vcombine.low %v10494_v12, %v10504_v10  ;;  %15300 = vmatmul.mubr.bf16.gmra.mxu1 %v15716_v63  ;;  %v10513_v42 = vrot.slane %v10512_v19, 4  ;;  %v10522_v47 = vor.u32 %v10521_v62, %v10517_v56  ;;  %v10532_v18 = vrot.slane %v10530_v1, 4 }
 0x344   : > { %15303 = vmatprep.mubr.bf16.mxu1 %v15718_v43  ;;  %v10535_v4 = vrot.slane %v10533_v50, 5  ;;  %v10541_v21 = vrot.slane %v10539_v13, 5  ;;  %v10549_v32 = vshll.u32 %v10189_v28, 16  ;;  %v10554_v24 = vshrl.u32 %v10190_v34, 16  ;;  %v18281_v63 = vpop.f32.mrf.mxu1  ;;  %v10963_v43 = vld [vmem:[#allocation2 + $0x20] sm:$0x8]  ;;  %v18283_v50 = vpop.f32.mrf.mxu0 }
 0x345   : > { %15351 = vmatprep.mubr.bf16.mxu0 %v13989_v39  ;;  %v10518_v45 = vsel %vm16079_vm5, %v10513_v42, %v10517_v56  ;;  %v10523_v23 = vrot.slane %v10522_v47, 4  ;;  %v10557_v12 = vshll.u32 %v10190_v34, 16  ;;  %v10545_v62 = vrot.slane %v10543_v44, 4  ;;  %v10964_v56 = vld [vmem:[#allocation2 + $0x24] sm:$0xf] }
 0x346   : > { %v10536_v19 = vor.u32 %v10535_v4, %v10532_v18  ;;  %v10551_v1 = vrot.slane %v10549_v32, 5  ;;  %v10563_v10 = vshll.u32 %v10191_v51, 16  ;;  %v10556_v26 = vrot.slane %v10554_v24, 4  ;;  %v18287_v42 = vpop.f32.mrf.mxu1  ;;  %v18289_v18 = vpop.f32.mrf.mxu0  ;;  %v15721_v4 = vld [vmem:[#allocation2 + $0xe4] sm:$0xff]  }
 0x347   : > { %v10528_v28 = vsel %vm16079_vm5, %v10523_v23, %v10527_v7  ;;  %v10559_v13 = vrot.slane %v10557_v12, 5  ;;  %v10567_v39 = vshrl.u32 %v10191_v51, 16  ;;  %v10546_v31 = vor.u32 %v10545_v62, %v10541_v21  ;;  %v15723_v23 = vld [vmem:[#allocation2 + $0xf4] sm:$0xff]   ;;  %v10966_v12 = vld [vmem:[#allocation2 + $0x30] sm:$0x8] }
 0x348   : > { %v13990_v47 = vcombine.low %v10518_v45, %v10528_v28  ;;  %v10537_v34 = vrot.slane %v10536_v19, 4  ;;  %v10565_v16 = vrot.slane %v10563_v10, 5  ;;  %v10573_v59 = vshll.u32 %v10192_v52, 16  ;;  %v18291_v40 = vpop.f32.mrf.mxu1  ;;  %v18295_v19 = vpop.f32.mrf.mxu0 }
 0x349   : > { %v10560_v44 = vor.u32 %v10559_v13, %v10556_v26  ;;  %v10569_v32 = vrot.slane %v10567_v39, 4  ;;  %v11012_v2 = vshrl.u32 %v10963_v43, 16  ;;  %19603 = vst [vmem:[#allocation42_spill] sm:$0xff] %v18291_v40  ;;  %v10547_v51 = vrot.slane %v10546_v31, 4  ;;  %19604 = vst [vmem:[#allocation43_spill] sm:$0xff] %v18295_v19  ;;  %v15725_v19 = vld [vmem:[#allocation2 + $0x24] sm:$0xff]  }
 0x34a   : > { %15352 = vmatmul.mubr.bf16.gmra.mxu0 %v13990_v47  ;;  %v10542_v7 = vsel %vm16079_vm5, %v10537_v34, %v10541_v21  ;;  %v11017_v45 = vshrl.u32 %v10964_v56, 16  ;;  %v11020_v24 = vshll.u32 %v10964_v56, 16  ;;  %v10575_v28 = vrot.slane %v10573_v59, 5  ;;  %v10967_v26 = vld [vmem:[#allocation2 + $0x34] sm:$0xf]  ;;  %v15727_v40 = vld [vmem:[#allocation2 + $0x104] sm:$0xff]  }
 0x34b   : > { %15304 = vmatmul.mubr.bf16.gmra.mxu1 %v15721_v4  ;;  %v10561_v62 = vrot.slane %v10560_v44, 4  ;;  %v10570_v10 = vor.u32 %v10569_v32, %v10565_v16  ;;  %v14001_v52 = vrot.slane %v11012_v2, 11  ;;  %v10552_v43 = vsel %vm16079_vm5, %v10547_v51, %v10551_v1  ;;  %v10968_v31 = vld [vmem:[#allocation2 + $0x38] sm:$0xf]  ;;  %v10969_v2 = vld [vmem:[#allocation2 + $0x40] sm:$0x8] }
 0x34c   : > { %15307 = vmatprep.mubr.bf16.mxu1 %v15723_v23  ;;  %v11019_v13 = vrot.slane %v11017_v45, 7  ;;  %v11026_v39 = vshrl.u32 %v10965_v14, 16  ;;  %v11029_v21 = vshll.u32 %v10965_v14, 16  ;;  %v18299_v47 = vpop.f32.mrf.mxu1  ;;  %v13991_v56 = vcombine.low %v10542_v7, %v10552_v43  ;;  %v10970_v23 = vld [vmem:[#allocation2 + $0x44] sm:$0xf]  ;;  %v18307_v45 = vpop.f32.mrf.mxu0 }
 0x34d   : > { %v10566_v34 = vsel %vm16079_vm5, %v10561_v62, %v10565_v16  ;;  %v10571_v4 = vrot.slane %v10570_v10, 4  ;;  %v18305_v59 = vadd.f32 %v18093_v54, %v18112_v38  ;;  %v11034_v51 = vshrl.u32 %v10966_v12, 16  ;;  %v10971_v43 = vld [vmem:[#allocation2 + $0x48] sm:$0xf] }
 0x34e   : > { %v11022_v44 = vor.u32 %v11020_v24, %v11019_v13  ;;  %v11024_v32 = vrot.slane %v11019_v13, 4  ;;  %v11028_v1 = vrot.slane %v11026_v39, 7  ;;  %v18309_v14 = vpop.f32.mrf.mxu1  ;;  %15355 = vmatprep.mubr.bf16.mxu0 %v13991_v56  ;;  %v11039_v16 = vshrl.u32 %v10967_v26, 16  ;;  %v18315_v12 = vpop.f32.mrf.mxu0 }
 0x34f   : > { %19605 = vst [vmem:[#allocation44_spill] sm:$0xff] %v18305_v59  ;;  %v10576_v7 = vsel %vm16079_vm5, %v10571_v4, %v10575_v28  ;;  %v11042_v62 = vshll.u32 %v10967_v26, 16  ;;  %v11048_v10 = vshrl.u32 %v10968_v31, 16  ;;  %v14002_v13 = vrot.slane %v11034_v51, 11  ;;  %19606 = vst [vmem:[#allocation46_spill] sm:$0xff] %v18315_v12 }
 0x350   : > { %v13992_v54 = vcombine.low %v10566_v34, %v10576_v7  ;;  %v11023_v38 = vsel %vm15873_vm2, %v14001_v52, %v11022_v44  ;;  %v11031_v24 = vor.u32 %v11029_v21, %v11028_v1  ;;  %v18317_v39 = vpop.f32.mrf.mxu1  ;;  %v11041_v56 = vrot.slane %v11039_v16, 7  ;;  %v18321_v52 = vpop.f32.mrf.mxu0  ;;  %v10973_v12 = vld [vmem:[#allocation2 + $0x54] sm:$0xf] }
 0x351   : > { %v11050_v59 = vrot.slane %v11048_v10, 7  ;;  %v11051_v48 = vshll.u32 %v10968_v31, 16  ;;  %v11056_v28 = vshrl.u32 %v10969_v2, 16  ;;  %v11061_v34 = vshrl.u32 %v10970_v23, 16 }
 0x352   : > { %15356 = vmatmul.mubr.bf16.gmra.mxu0 %v13992_v54  ;;  %v11032_v26 = vsel %vm15873_vm2, %v11024_v32, %v11031_v24  ;;  %v11064_v4 = vshll.u32 %v10970_v23, 16  ;;  %v11070_v7 = vshrl.u32 %v10971_v43, 16  ;;  %v11044_v44 = vor.u32 %v11042_v62, %v11041_v56  ;;  %v18323_v16 = vpop.f32.mrf.mxu1  ;;  %v18331_v23 = vpop.f32.mrf.mxu0 }
 0x353   : > { %15423 = vmatprep.mubr.bf16.mxu0 %v15725_v19  ;;  %15308 = vmatmul.mubr.bf16.gmra.mxu1 %v15727_v40  ;;  %v14033_v21 = vcombine.low %v11023_v38, %v11032_v26  ;;  %v11046_v1 = vrot.slane %v11041_v56, 4  ;;  %v11053_v51 = vor.u32 %v11051_v48, %v11050_v59  ;;  %19607 = vst [vmem:[#allocation48_spill] sm:$0xff] %v18323_v16  ;;  %v14003_v31 = vrot.slane %v11056_v28, 11  ;;  %v10974_v40 = vld [vmem:[#allocation2 + $0x58] sm:$0xf] }
 0x354   : > { %v11063_v2 = vrot.slane %v11061_v34, 7  ;;  %v11072_v10 = vrot.slane %v11070_v7, 7  ;;  %v11073_v54 = vshll.u32 %v10971_v43, 16  ;;  %v18329_v19 = vadd.f32 %v18101_v5, %v18131_v9  ;;  %19608 = vst [vmem:[#allocation60_spill] sm:$0xff] %v18331_v23  ;;  %v10975_v28 = vld [vmem:[#allocation2 + $0x60] sm:$0x8] }
 0x355   : > { %15375 = vmatprep.mubr.bf16.mxu1 %v14033_v21  ;;  %v11054_v32 = vsel %vm15873_vm2, %v11046_v1, %v11053_v51  ;;  %v11045_v38 = vsel %vm15873_vm2, %v14002_v13, %v11044_v44  ;;  %v18337_v43 = vadd.f32 %v18127_v55, %v18168_v30  ;;  %v11078_v24 = vshrl.u32 %v10972_v35, 16  ;;  %v10976_v26 = vld [vmem:[#allocation2 + $0x64] sm:$0xf]  ;;  %v15729_v5 = vld [vmem:[#allocation2 + $0x34] sm:$0xff]   ;;  %v10977_v13 = vld [vmem:[#allocation2 + $0x68] sm:$0xf] }
 0x356   : > { %v11066_v48 = vor.u32 %v11064_v4, %v11063_v2  ;;  %v11068_v59 = vrot.slane %v11063_v2, 4  ;;  %v11075_v62 = vor.u32 %v11073_v54, %v11072_v10  ;;  %v11083_v56 = vshrl.u32 %v10973_v12, 16  ;;  %v18339_v34 = vpop.f32.mrf.mxu1  ;;  %v15730_v44 = vld [vmem:[#allocation2 + $0x44] sm:$0xff]   ;;  %v15734_v51 = vld [vmem:[%s19355_s2 + $0x230] sm:$0xff]  }
 0x357   : > { %v14034_v9 = vcombine.low %v11045_v38, %v11054_v32  ;;  %v11092_v21 = vshrl.u32 %v10974_v40, 16  ;;  %v14004_v55 = vrot.slane %v11078_v24, 11  ;;  %v11086_v35 = vshll.u32 %v10973_v12, 16 }
 0x358   : > { %v11067_v4 = vsel %vm15873_vm2, %v14003_v31, %v11066_v48  ;;  %v11076_v7 = vsel %vm15873_vm2, %v11068_v59, %v11075_v62  ;;  %v11085_v30 = vrot.slane %v11083_v56, 7  ;;  %v18348_v2 = vpop.f32.mrf.mxu0  ;;  %v18350_v10 = vpop.f32.mrf.mxu1  ;;  %v11095_v54 = vshll.u32 %v10974_v40, 16 }
 0x359   : > { %v14035_v1 = vcombine.low %v11067_v4, %v11076_v7  ;;  %v11094_v31 = vrot.slane %v11092_v21, 7  ;;  %v11100_v32 = vshrl.u32 %v10975_v28, 16  ;;  %v11105_v48 = vshrl.u32 %v10976_v26, 16  ;;  %v10978_v28 = vld [vmem:[#allocation2 + $0x70] sm:$0x8] }
 0x35a   : > { %15424 = vmatmul.mubr.bf16.vlgmr.msra.gmra.mxu0 %v15729_v5  ;;  %v11088_v59 = vor.u32 %v11086_v35, %v11085_v30  ;;  %v11090_v62 = vrot.slane %v11085_v30, 4  ;;  %v11108_v38 = vshll.u32 %v10976_v26, 16  ;;  %v11114_v24 = vshrl.u32 %v10977_v13, 16  ;;  %v18352_v12 = vpop.f32.mrf.mxu0  ;;  %v18354_v56 = vpop.f32.mrf.mxu1  ;;  %v10980_v30 = vld [vmem:[#allocation2 + $0x78] sm:$0xf] }
 0x35b   : > { %15427 = vmatprep.mubr.bf16.mxu0 %v15730_v44  ;;  %15376 = vmatmul.mubr.bf16.vlgmr.msra.gmra.mxu1 %v14034_v9  ;;  %v11097_v4 = vor.u32 %v11095_v54, %v11094_v31  ;;  %v14005_v7 = vrot.slane %v11100_v32, 11  ;;  %v11107_v5 = vrot.slane %v11105_v48, 7  ;;  %v18359_v40 = vadd.f32 %v18136_v6, %v18175_v29  ;;  %v10979_v9 = vld [vmem:[#allocation2 + $0x74] sm:$0xf] }
 0x35c   : > { %15379 = vmatprep.mubr.bf16.mxu1 %v14035_v1  ;;  %15456 = vmatpush3.bf16.msra.mxu1 %v18242_v33  ;;  %v11116_v21 = vrot.slane %v11114_v24, 7  ;;  %v11117_v26 = vshll.u32 %v10977_v13, 16  ;;  %v18363_v44 = vadd.f32 %v18146_v11, %v18188_v60  ;;  %v15737_v33 = vld [vmem:[%s19355_s2 + $0x228] sm:$0xff]   ;;  %v18368_v1 = vpop.f32.mrf.mxu0  ;;  %v18370_v35 = vpop.f32.mrf.mxu1  ;;  %v11089_v6 = vsel %vm15873_vm2, %v14004_v55, %v11088_v59  ;;  %v10981_v60 = vld [vmem:[#allocation2 + $0x80] sm:$0x8] }
 0x35d   : > { %15457 = vmatprep.subr.bf16.mxu1 %v15734_v51  ;;  %19609 = vst [vmem:[#allocation39_spill] sm:$0xff] %v18370_v35  ;;  %v11098_v29 = vsel %vm15873_vm2, %v11090_v62, %v11097_v4  ;;  %v11110_v13 = vor.u32 %v11108_v38, %v11107_v5  ;;  %v18378_v11 = vadd.f32 %v18170_v46, %v18206_v25  ;;  %v11112_v31 = vrot.slane %v11107_v5, 4  ;;  %v10982_v24 = vld [vmem:[#allocation2 + $0x84] sm:$0xf]  ;;  %v15732_v35 = vld [vmem:[#allocation2 + $0x54] sm:$0xff]  }
 0x35e   : > { %v11119_v54 = vor.u32 %v11117_v26, %v11116_v21  ;;  %v11122_v32 = vshrl.u32 %v10978_v28, 16  ;;  %v11127_v48 = vshrl.u32 %v10979_v9, 16  ;;  %v18380_v23 = vpop.f32.mrf.mxu0  ;;  %v14036_v16 = vcombine.low %v11089_v6, %v11098_v29  ;;  %v10983_v38 = vld [vmem:[#allocation2 + $0x88] sm:$0xf]  ;;  %v15740_v21 = vld [vmem:[%s19355_s2 + $0x220] sm:$0xff]  }
 0x35f   : > { %19610 = vst [vmem:[#allocation51_spill] sm:$0xff] %v18378_v11  ;;  %19611 = vst [vmem:[#allocation53_spill] sm:$0xff] %v18380_v23  ;;  %v11111_v55 = vsel %vm15873_vm2, %v14005_v7, %v11110_v13  ;;  %v11130_v59 = vshll.u32 %v10979_v9, 16  ;;  %v11136_v62 = vshrl.u32 %v10980_v30, 16  ;;  %v15733_v4 = vld [vmem:[#allocation2 + $0x64] sm:$0xff]   ;;  %v11139_v5 = vshll.u32 %v10980_v30, 16 }
 0x360   : > { %15458 = vmatpush3.bf16.msra.mxu1 %v15734_v51  ;;  %v11120_v46 = vsel %vm15873_vm2, %v11112_v31, %v11119_v54  ;;  %v11129_v25 = vrot.slane %v11127_v48, 7  ;;  %v11144_v28 = vshrl.u32 %v10981_v60, 16  ;;  %v14006_v51 = vrot.slane %v11122_v32, 11  ;;  %v10984_v32 = vld [vmem:[#allocation2 + $0x90] sm:$0x8] }
 0x361   : > { %15459 = vmatprep.subr.bf16.mxu1 %v15737_v33  ;;  %v14037_v7 = vcombine.low %v11111_v55, %v11120_v46  ;;  %v11138_v9 = vrot.slane %v11136_v62, 7  ;;  %v11149_v6 = vshrl.u32 %v10982_v24, 16  ;;  %v18391_v29 = vpop.f32.mrf.mxu0  ;;  %v11152_v30 = vshll.u32 %v10982_v24, 16  ;;  %v10985_v55 = vld [vmem:[#allocation2 + $0x94] sm:$0xf] }
 0x362   : > { %v18389_v26 = vpop.f32.mrf.mxu1  ;;  %15428 = vmatmul.mubr.bf16.gmra.mxu0 %v15732_v35  ;;  %19612 = vst [vmem:[#allocation55_spill] sm:$0xff] %v18391_v29  ;;  %v11132_v13 = vor.u32 %v11130_v59, %v11129_v25  ;;  %v11134_v31 = vrot.slane %v11129_v25, 4  ;;  %v11158_v54 = vshrl.u32 %v10983_v38, 16  ;;  %v14007_v23 = vrot.slane %v11144_v28, 11 }
 0x363   : > { %15431 = vmatprep.mubr.bf16.mxu0 %v15733_v4  ;;  %15380 = vmatmul.mubr.bf16.gmra.mxu1 %v14036_v16  ;;  %v11141_v48 = vor.u32 %v11139_v5, %v11138_v9  ;;  %v11151_v11 = vrot.slane %v11149_v6, 7  ;;  %v18397_v35 = vadd.f32 %v18180_v20, %v18213_v37  ;;  %v18399_v62 = vpop.f32.mrf.mxu0  ;;  %v11161_v59 = vshll.u32 %v10983_v38, 16  ;;  %v10986_v4 = vld [vmem:[#allocation2 + $0x98] sm:$0xf]  ;;  %v10988_v6 = vld [vmem:[#allocation2 + $0xa4] sm:$0xf] }
 0x364   : > { %v18393_v60 = vpop.f32.mrf.mxu1  ;;  %15383 = vmatprep.mubr.bf16.mxu1 %v14037_v7  ;;  %15460 = vmatpush3.bf16.msra.mxu1 %v15737_v33  ;;  %19613 = vst [vmem:[#allocation54_spill] sm:$0xff] %v18399_v62  ;;  %v11160_v16 = vrot.slane %v11158_v54, 7  ;;  %v18403_v24 = vadd.f32 %v18190_v3, %v18222_v49  ;;  %v15743_v33 = vld [vmem:[%s19355_s2 + $0x218] sm:$0xff]   ;;  %v11133_v20 = vsel %vm15873_vm2, %v14006_v51, %v11132_v13  ;;  %v10987_v3 = vld [vmem:[#allocation2 + $0xa0] sm:$0x8]  ;;  %v11166_v7 = vshrl.u32 %v10984_v32, 16 }
 0x365   : > { %15461 = vmatprep.subr.bf16.mxu1 %v15740_v21  ;;  %v11142_v37 = vsel %vm15873_vm2, %v11134_v31, %v11141_v48  ;;  %v11154_v25 = vor.u32 %v11152_v30, %v11151_v11  ;;  %v18416_v38 = vadd.f32 %v18218_v8, %v18248_v57  ;;  %v18418_v49 = vpop.f32.mrf.mxu0  ;;  %v11156_v5 = vrot.slane %v11151_v11, 4  ;;  %v15735_v54 = vld [vmem:[#allocation2 + $0x74] sm:$0xff]   ;;  %v10989_v30 = vld [vmem:[#allocation2 + $0xa8] sm:$0xf] }
 0x366   : > { %v18408_v46 = vpop.f32.mrf.mxu1  ;;  %19614 = vst [vmem:[#allocation57_spill] sm:$0xff] %v18418_v49  ;;  %v11163_v28 = vor.u32 %v11161_v59, %v11160_v16  ;;  %v11171_v9 = vshrl.u32 %v10985_v55, 16  ;;  %v14038_v62 = vcombine.low %v11133_v20, %v11142_v37  ;;  %v11174_v13 = vshll.u32 %v10985_v55, 16  ;;  %v15736_v8 = vld [vmem:[#allocation2 + $0x84] sm:$0xff]   ;;  %v15746_v59 = vld [vmem:[%s19355_s2 + $0x210] sm:$0xff]  }
 0x367   : > { %v11155_v51 = vsel %vm15873_vm2, %v14007_v23, %v11154_v25  ;;  %v11180_v31 = vshrl.u32 %v10986_v4, 16  ;;  %v11183_v16 = vshll.u32 %v10986_v4, 16  ;;  %v11188_v32 = vshrl.u32 %v10987_v3, 16 }
 0x368   : > { %15462 = vmatpush3.bf16.msra.mxu1 %v15740_v21  ;;  %v18422_v48 = vpop.f32.mrf.mxu1  ;;  %v11164_v57 = vsel %vm15873_vm2, %v11156_v5, %v11163_v28  ;;  %v11173_v11 = vrot.slane %v11171_v9, 7  ;;  %v14008_v55 = vrot.slane %v11166_v7, 11  ;;  %v11193_v37 = vshrl.u32 %v10988_v6, 16  ;;  %v18429_v21 = vpop.f32.mrf.mxu0  ;;  %v10991_v7 = vld [vmem:[#allocation2 + $0xb4] sm:$0xf] }
 0x369   : > { %15463 = vmatprep.subr.bf16.mxu1 %v15743_v33  ;;  %v14039_v23 = vcombine.low %v11155_v51, %v11164_v57  ;;  %v11182_v20 = vrot.slane %v11180_v31, 7  ;;  %19615 = vst [vmem:[#allocation56_spill] sm:$0xff] %v18429_v21  ;;  %v11196_v5 = vshll.u32 %v10988_v6, 16  ;;  %v11202_v28 = vshrl.u32 %v10989_v30, 16  ;;  %v10992_v6 = vld [vmem:[#allocation2 + $0xb8] sm:$0xf] }
 0x36a   : > { %15432 = vmatmul.mubr.bf16.gmra.mxu0 %v15735_v54  ;;  %v11176_v25 = vor.u32 %v11174_v13, %v11173_v11  ;;  %v11178_v49 = vrot.slane %v11173_v11, 4  ;;  %v14009_v3 = vrot.slane %v11188_v32, 11  ;;  %v11195_v9 = vrot.slane %v11193_v37, 7  ;;  %v10990_v54 = vld [vmem:[#allocation2 + $0xb0] sm:$0x8]  ;;  %v15749_v13 = vld [vmem:[%s19355_s2 + $0x208] sm:$0xff]  }
 0x36b   : > { %15435 = vmatprep.mubr.bf16.mxu0 %v15736_v8  ;;  %15384 = vmatmul.mubr.bf16.gmra.mxu1 %v14038_v62  ;;  %v11185_v4 = vor.u32 %v11183_v16, %v11182_v20  ;;  %v18433_v29 = vadd.f32 %v18227_v61, %v18255_v53  ;;  %v11204_v31 = vrot.slane %v11202_v28, 7  ;;  %v11205_v8 = vshll.u32 %v10989_v30, 16  ;;  %v10993_v57 = vld [vmem:[#allocation2 + $0xc0] sm:$0x8]  ;;  %v10994_v20 = vld [vmem:[#allocation2 + $0xc4] sm:$0xf] }
 0x36c   : > { %15387 = vmatprep.mubr.bf16.mxu1 %v14039_v23  ;;  %15464 = vmatpush3.bf16.msra.mxu1 %v15743_v33  ;;  %v18435_v51 = vpop.f32.mrf.mxu1  ;;  %v18439_v62 = vadd.f32 %v18231_v17, %v18259_v41  ;;  %v11177_v61 = vsel %vm15873_vm2, %v14008_v55, %v11176_v25  ;;  %v11198_v33 = vor.u32 %v11196_v5, %v11195_v9  ;;  %v11200_v11 = vrot.slane %v11195_v9, 4  ;;  %v15738_v37 = vld [vmem:[#allocation2 + $0x94] sm:$0xff]   ;;  %v10995_v28 = vld [vmem:[#allocation2 + $0xc8] sm:$0xf] }
 0x36d   : > { %15465 = vmatprep.subr.bf16.mxu1 %v15746_v59  ;;  %v11186_v53 = vsel %vm15873_vm2, %v11178_v49, %v11185_v4  ;;  %v18450_v30 = vadd.f32 %v18251_v58, %v18275_v36  ;;  %v11207_v16 = vor.u32 %v11205_v8, %v11204_v31  ;;  %v11210_v32 = vshrl.u32 %v10990_v54, 16  ;;  %v15739_v36 = vld [vmem:[#allocation2 + $0xa4] sm:$0xff]  }
 0x36e   : > { %v18452_v17 = vpop.f32.mrf.mxu0  ;;  %v18454_v41 = vpop.f32.mrf.mxu1  ;;  %v11215_v23 = vshrl.u32 %v10991_v7, 16  ;;  %v14040_v55 = vcombine.low %v11177_v61, %v11186_v53  ;;  %v11199_v49 = vsel %vm15873_vm2, %v14009_v3, %v11198_v33  ;;  %v11218_v25 = vshll.u32 %v10991_v7, 16  ;;  %v15750_v8 = vld [vmem:[%s19355_s2 + $0x200] sm:$0xff]  }
 0x36f   : > { %19616 = vst [vmem:[#allocation59_spill] sm:$0xff] %v18452_v17  ;;  %v11224_v5 = vshrl.u32 %v10992_v6, 16  ;;  %v11208_v4 = vsel %vm15873_vm2, %v11200_v11, %v11207_v16  ;;  %v11227_v31 = vshll.u32 %v10992_v6, 16  ;;  %v11232_v54 = vshrl.u32 %v10993_v57, 16  ;;  %v10996_v17 = vld [vmem:[#allocation2 + $0xd0] sm:$0x8] }
 0x370   : > { %15466 = vmatpush3.bf16.msra.mxu1 %v15746_v59  ;;  %v18458_v58 = vpop.f32.mrf.mxu0  ;;  %v11217_v9 = vrot.slane %v11215_v23, 7  ;;  %v18465_v61 = vpop.f32.mrf.mxu1  ;;  %v14041_v3 = vcombine.low %v11199_v49, %v11208_v4  ;;  %v14010_v7 = vrot.slane %v11210_v32, 11  ;;  %v11237_v53 = vshrl.u32 %v10994_v20, 16 }
 0x371   : > { %19617 = vst [vmem:[#allocation68_spill] sm:$0xff] %v18458_v58  ;;  %15467 = vmatprep.subr.bf16.mxu1 %v15749_v13  ;;  %v11226_v59 = vrot.slane %v11224_v5, 7  ;;  %v11240_v11 = vshll.u32 %v10994_v20, 16  ;;  %v11246_v16 = vshrl.u32 %v10995_v28, 16  ;;  %v14011_v57 = vrot.slane %v11232_v54, 11  ;;  %v15741_v54 = vld [vmem:[#allocation2 + $0xb4] sm:$0xff]  }
 0x372   : > { %15436 = vmatmul.mubr.bf16.gmra.mxu0 %v15738_v37  ;;  %v11220_v33 = vor.u32 %v11218_v25, %v11217_v9  ;;  %v11222_v21 = vrot.slane %v11217_v9, 4  ;;  %v11239_v23 = vrot.slane %v11237_v53, 7  ;;  %v18469_v58 = vadd.f32 %v18257_v0, %v18281_v63  ;;  %v10997_v37 = vld [vmem:[#allocation2 + $0xd4] sm:$0xf]  ;;  %v18471_v32 = vpop.f32.mrf.mxu0  ;;  %v10998_v20 = vld [vmem:[#allocation2 + $0xd8] sm:$0xf]  ;;  %v18477_v25 = vpop.f32.mrf.mxu1 }
 0x373   : > { %15439 = vmatprep.mubr.bf16.mxu0 %v15739_v36  ;;  %15388 = vmatmul.mubr.bf16.gmra.mxu1 %v14040_v55  ;;  %v11229_v6 = vor.u32 %v11227_v31, %v11226_v59  ;;  %19618 = vst [vmem:[#allocation40_spill] sm:$0xff] %v18471_v32  ;;  %v11248_v49 = vrot.slane %v11246_v16, 7  ;;  %v11249_v5 = vshll.u32 %v10995_v28, 16  ;;  %v18475_v55 = vadd.f32 %v18263_v15, %v18287_v42  ;;  %v10999_v28 = vld [vmem:[#allocation2 + $0xe0] sm:$0x8] }
 0x374   : > { %15391 = vmatprep.mubr.bf16.mxu1 %v14041_v3  ;;  %15468 = vmatpush3.bf16.msra.mxu1 %v15749_v13  ;;  %19619 = vst [vmem:[#allocation58_spill] sm:$0xff] %v18477_v25  ;;  %v11221_v36 = vsel %vm15873_vm2, %v14010_v7, %v11220_v33  ;;  %v11242_v63 = vor.u32 %v11240_v11, %v11239_v23  ;;  %v11244_v4 = vrot.slane %v11239_v23, 4  ;;  %v11254_v15 = vshrl.u32 %v10996_v17, 16  ;;  %v11000_v31 = vld [vmem:[#allocation2 + $0xe4] sm:$0xf] }
 0x375   : > { %15469 = vmatprep.subr.bf16.mxu1 %v15750_v8  ;;  %v11230_v0 = vsel %vm15873_vm2, %v11222_v21, %v11229_v6  ;;  %v18485_v13 = vadd.f32 %v18277_v22, %v18299_v47  ;;  %v11251_v9 = vor.u32 %v11249_v5, %v11248_v49  ;;  %v11259_v42 = vshrl.u32 %v10997_v37, 16  ;;  %v11001_v33 = vld [vmem:[#allocation2 + $0xe8] sm:$0xf]  ;;  %v18489_v21 = vpop.f32.mrf.mxu0 }
 0x376   : > { %v14042_v3 = vcombine.low %v11221_v36, %v11230_v0  ;;  %v11243_v59 = vsel %vm15873_vm2, %v14011_v57, %v11242_v63  ;;  %v11262_v7 = vshll.u32 %v10997_v37, 16  ;;  %v11268_v53 = vshrl.u32 %v10998_v20, 16  ;;  %19620 = vst [vmem:[#allocation61_spill] sm:$0xff] %v18489_v21  ;;  %v15742_v11 = vld [vmem:[#allocation2 + $0xc4] sm:$0xff]  }
 0x377   : > { %v11252_v22 = vsel %vm15873_vm2, %v11244_v4, %v11251_v9  ;;  %v11261_v47 = vrot.slane %v11259_v42, 7  ;;  %v11271_v16 = vshll.u32 %v10998_v20, 16  ;;  %v11276_v17 = vshrl.u32 %v10999_v28, 16  ;;  %v11002_v42 = vld [vmem:[#allocation2 + $0xf0] sm:$0x8] }
 0x378   : > { %15470 = vmatpush3.bf16.msra.mxu1 %v15750_v8  ;;  %v18493_v6 = vpop.f32.mrf.mxu1  ;;  %v14043_v23 = vcombine.low %v11243_v59, %v11252_v22  ;;  %v14012_v49 = vrot.slane %v11254_v15, 11  ;;  %v11270_v5 = vrot.slane %v11268_v53, 7  ;;  %v11281_v57 = vshrl.u32 %v11000_v31, 16  ;;  %v11003_v15 = vld [vmem:[#allocation2 + $0xf4] sm:$0xf] }
 0x379   : > { %v11264_v37 = vor.u32 %v11262_v7, %v11261_v47  ;;  %v11266_v8 = vrot.slane %v11261_v47, 4  ;;  %v11284_v36 = vshll.u32 %v11000_v31, 16  ;;  %v11290_v0 = vshrl.u32 %v11001_v33, 16  ;;  %v11004_v7 = vld [vmem:[#allocation2 + $0xf8] sm:$0xf] }
 0x37a   : > { %15440 = vmatmul.mubr.bf16.gmra.mxu0 %v15741_v54  ;;  %v18495_v63 = vpop.f32.mrf.mxu1  ;;  %v11273_v4 = vor.u32 %v11271_v16, %v11270_v5  ;;  %v14013_v9 = vrot.slane %v11276_v17, 11  ;;  %v11283_v20 = vrot.slane %v11281_v57, 7  ;;  %v18499_v28 = vadd.f32 %v18283_v50, %v18309_v14  ;;  %v11005_v14 = vld [vmem:[#allocation2 + $0x100] sm:$0x8]  ;;  %v15744_v5 = vld [vmem:[#allocation2 + $0xd4] sm:$0xff]  }
 0x37b   : > { %15443 = vmatprep.mubr.bf16.mxu0 %v15742_v11  ;;  %15392 = vmatmul.mubr.bf16.gmra.mxu1 %v14042_v3  ;;  %v11292_v59 = vrot.slane %v11290_v0, 7  ;;  %v11293_v3 = vshll.u32 %v11001_v33, 16  ;;  %v18505_v31 = vadd.f32 %v18289_v18, %v18317_v39  ;;  %v11265_v53 = vsel %vm15873_vm2, %v14012_v49, %v11264_v37  ;;  %v11006_v39 = vld [vmem:[#allocation2 + $0x104] sm:$0xf] }
 0x37c   : > { %15395 = vmatprep.mubr.bf16.mxu1 %v14043_v23  ;;  %v18501_v54 = vpop.f32.mrf.mxu0  ;;  %v11274_v11 = vsel %vm15873_vm2, %v11266_v8, %v11273_v4  ;;  %v11286_v22 = vor.u32 %v11284_v36, %v11283_v20  ;;  %v18513_v50 = vadd.f32 %v18307_v45, %v18339_v34  ;;  %v18515_v47 = vpop.f32.mrf.mxu1  ;;  %v11288_v33 = vrot.slane %v11283_v20, 4  ;;  %v11007_v36 = vld [vmem:[#allocation2 + $0x108] sm:$0xf] }
 0x37d   : > { %19621 = vst [vmem:[#allocation63_spill] sm:$0xff] %v18501_v54  ;;  %v11295_v16 = vor.u32 %v11293_v3, %v11292_v59  ;;  %v11298_v17 = vshrl.u32 %v11002_v42, 16  ;;  %v11303_v18 = vshrl.u32 %v11003_v15, 16  ;;  %v14044_v49 = vcombine.low %v11265_v53, %v11274_v11  ;;  %v15745_v45 = vld [vmem:[#allocation2 + $0xe4] sm:$0xff]   ;;  %v12220_v54 = vld [vmem:[#allocation2 + $0x94] sm:$0xf] }
 0x37e   : > { %v18517_v23 = vpop.f32.mrf.mxu0  ;;  %v11287_v57 = vsel %vm15873_vm2, %v14013_v9, %v11286_v22  ;;  %v11306_v37 = vshll.u32 %v11003_v15, 16  ;;  %v11312_v8 = vshrl.u32 %v11004_v7, 16  ;;  %v11320_v20 = vshrl.u32 %v11005_v14, 16  ;;  %v18523_v25 = vpop.f32.mrf.mxu1  ;;  %v19625_v14 = vld [vmem:[#allocation46_spill] sm:$0xff] }
 0x37f   : > { %19622 = vst [vmem:[#allocation41_spill] sm:$0xff] %v18517_v23  ;;  %v11296_v34 = vsel %vm15873_vm2, %v11288_v33, %v11295_v16  ;;  %v14014_v0 = vrot.slane %v11298_v17, 11  ;;  %v11305_v4 = vrot.slane %v11303_v18, 7  ;;  %v11315_v3 = vshll.u32 %v11004_v7, 16  ;;  %19623 = vst [vmem:[#allocation62_spill] sm:$0xff] %v18523_v25 }
 0x380   : > { %v14045_v42 = vcombine.low %v11287_v57, %v11296_v34  ;;  %v11314_v59 = vrot.slane %v11312_v8, 7  ;;  %v11325_v21 = vshrl.u32 %v11006_v39, 16  ;;  %v11328_v53 = vshll.u32 %v11006_v39, 16  ;;  %v18525_v22 = vpop.f32.mrf.mxu0  ;;  %v11008_v7 = vld [vmem:[#allocation2 + $0x110] sm:$0x8] }
 0x381   : > { %v11308_v9 = vor.u32 %v11306_v37, %v11305_v4  ;;  %v11310_v15 = vrot.slane %v11305_v4, 4  ;;  %v11334_v11 = vshrl.u32 %v11007_v36, 16  ;;  %19624 = vst [vmem:[#allocation65_spill] sm:$0xff] %v18525_v22  ;;  %v14015_v16 = vrot.slane %v11320_v20, 11  ;;  %v11010_v8 = vld [vmem:[#allocation2 + $0x118] sm:$0xf] }
 0x382   : > { %15444 = vmatmul.mubr.bf16.gmra.mxu0 %v15744_v5  ;;  %v11317_v33 = vor.u32 %v11315_v3, %v11314_v59  ;;  %v11327_v17 = vrot.slane %v11325_v21, 7  ;;  %v18529_v18 = vadd.f32 %v19625_v14, %v18350_v10  ;;  %v11009_v5 = vld [vmem:[#allocation2 + $0x114] sm:$0xf]  ;;  %v11337_v37 = vshll.u32 %v11007_v36, 16  ;;  %v12199_v4 = vld [vmem:[#allocation2 + $0x24] sm:$0xf] }
 0x383   : > { %15447 = vmatprep.mubr.bf16.mxu0 %v15745_v45  ;;  %15396 = vmatmul.mubr.bf16.gmra.mxu1 %v14044_v49  ;;  %v11309_v57 = vsel %vm15873_vm2, %v14014_v0, %v11308_v9  ;;  %v11336_v49 = vrot.slane %v11334_v11, 7  ;;  %v18535_v39 = vadd.f32 %v18321_v52, %v18354_v56  ;;  %v18541_v10 = vadd.f32 %v18348_v2, %v18389_v26  ;;  %v12200_v3 = vld [vmem:[#allocation2 + $0x28] sm:$0xf]  ;;  %v18545_v52 = vpop.f32.mrf.mxu0  ;;  %v15747_v56 = vld [vmem:[#allocation2 + $0xf4] sm:$0xff]   ;;  %v12201_v14 = vld [vmem:[#allocation2 + $0x2c] sm:$0x1] }
 0x384   : > { %15399 = vmatprep.mubr.bf16.mxu1 %v14045_v42  ;;  %v11318_v45 = vsel %vm15873_vm2, %v11310_v15, %v11317_v33  ;;  %v11330_v21 = vor.u32 %v11328_v53, %v11327_v17  ;;  %v11332_v34 = vrot.slane %v11327_v17, 4  ;;  %v11342_v36 = vshrl.u32 %v11008_v7, 16  ;;  %19626 = vst [vmem:[#allocation64_spill] sm:$0xff] %v18545_v52  ;;  %v15748_v33 = vld [vmem:[#allocation2 + $0x104] sm:$0xff]   ;;  %v12202_v22 = vld [vmem:[#allocation2 + $0x34] sm:$0xf] }
 0x385   : > { %v14046_v0 = vcombine.low %v11309_v57, %v11318_v45  ;;  %v11339_v42 = vor.u32 %v11337_v37, %v11336_v49  ;;  %v11347_v59 = vshrl.u32 %v11009_v5, 16  ;;  %v11350_v15 = vshll.u32 %v11009_v5, 16 }
 0x386   : > { %v18543_v20 = vpop.f32.mrf.mxu1  ;;  %v11331_v9 = vsel %vm15873_vm2, %v14015_v16, %v11330_v21  ;;  %v11356_v53 = vshrl.u32 %v11010_v8, 16  ;;  %v11359_v11 = vshll.u32 %v11010_v8, 16  ;;  %v14016_v26 = vrot.slane %v11342_v36, 11 }
 0x387   : > { %v11340_v2 = vsel %vm15873_vm2, %v11332_v34, %v11339_v42  ;;  %v11349_v17 = vrot.slane %v11347_v59, 7  ;;  %v12248_v57 = vshrl.u32 %v12199_v4, 16  ;;  %v12251_v45 = vshll.u32 %v12199_v4, 16 }
 0x388   : > { %v18551_v7 = vpop.f32.mrf.mxu1  ;;  %v14047_v49 = vcombine.low %v11331_v9, %v11340_v2  ;;  %v11358_v37 = vrot.slane %v11356_v53, 7  ;;  %v12257_v25 = vshll.u32 %v12200_v3, 16  ;;  %v12261_v21 = vshrl.u32 %v12200_v3, 16  ;;  %v12203_v3 = vld [vmem:[#allocation2 + $0x38] sm:$0xf]  ;;  %v19628_v53 = vld [vmem:[#allocation32_spill] sm:$0xff] }
 0x389   : > { %v11352_v16 = vor.u32 %v11350_v15, %v11349_v17  ;;  %v11354_v5 = vrot.slane %v11349_v17, 4  ;;  %v12250_v8 = vrot.slane %v12248_v57, 4  ;;  %v12253_v42 = vrot.slane %v12251_v45, 5  ;;  %v15751_v17 = vld [vmem:[#allocation2 + $0x114] sm:$0xff]   ;;  %v12205_v57 = vld [vmem:[#allocation2 + $0x44] sm:$0xf] }
 0x38a   : > { %15448 = vmatmul.mubr.bf16.gmra.mxu0 %v15747_v56  ;;  %v18553_v52 = vpop.f32.mrf.mxu0  ;;  %v11361_v34 = vor.u32 %v11359_v11, %v11358_v37  ;;  %v12259_v36 = vrot.slane %v12257_v25, 5  ;;  %v12267_v59 = vshll.u32 %v12201_v14, 16  ;;  %v12263_v9 = vrot.slane %v12261_v21, 4  ;;  %v18565_v15 = vpop.f32.mrf.mxu1  ;;  %v19629_v11 = vld [vmem:[#allocation28_spill] sm:$0xff]  ;;  %v12204_v14 = vld [vmem:[#allocation2 + $0x3c] sm:$0x1] }
 0x38b   : > { %15451 = vmatprep.mubr.bf16.mxu0 %v15748_v33  ;;  %15400 = vmatmul.mubr.bf16.gmra.mxu1 %v14046_v0  ;;  %19627 = vst [vmem:[#allocation67_spill] sm:$0xff] %v18553_v52  ;;  %v11353_v56 = vsel %vm15873_vm2, %v14016_v26, %v11352_v16  ;;  %v18559_v4 = vadd.f32 %v18352_v12, %v18393_v60  ;;  %v12275_v16 = vshll.u32 %v12202_v22, 16  ;;  %v12281_v21 = vshll.u32 %v12203_v3, 16 }
 0x38c   : > { %15403 = vmatprep.mubr.bf16.mxu1 %v14047_v49  ;;  %v18563_v0 = vadd.f32 %v18368_v1, %v18408_v46  ;;  %v8027_v25 = vadd.f32 %v19629_v11, %v19628_v53  ;;  %v11362_v33 = vsel %vm15873_vm2, %v11354_v5, %v11361_v34  ;;  %v12254_v2 = vor.u32 %v12253_v42, %v12250_v8  ;;  %v19630_v49 = vld [vmem:[#allocation44_spill] sm:$0xff]  ;;  %v18575_v37 = vpop.f32.mrf.mxu0  ;;  %v12206_v34 = vld [vmem:[#allocation2 + $0x48] sm:$0xf] }
 0x38d   : > { %v12269_v26 = vrot.slane %v12267_v59, 5  ;;  %v14048_v12 = vcombine.low %v11353_v56, %v11362_v33  ;;  %v12264_v60 = vor.u32 %v12263_v9, %v12259_v36  ;;  %v18573_v1 = vadd.f32 %v18435_v51, %v19630_v49  ;;  %19631 = vst [vmem:[#allocation66_spill] sm:$0xff] %v18575_v37  ;;  %v18577_v59 = vpop.f32.mrf.mxu1  ;;  %v12207_v49 = vld [vmem:[#allocation2 + $0x4c] sm:$0x1] }
 0x38e   : > { %v12272_v46 = vshrl.u32 %v12202_v22, 16  ;;  %v12255_v45 = vrot.slane %v12254_v2, 4  ;;  %v12285_v53 = vshrl.u32 %v12203_v3, 16  ;;  %v12291_v8 = vshll.u32 %v12204_v14, 16  ;;  %19632 = vst [vmem:[#allocation69_spill] sm:$0xff] %v18577_v59  ;;  %v18583_v14 = vpop.f32.mrf.mxu0 }
 0x38f   : > { %v12265_v27 = vrot.slane %v12264_v60, 4  ;;  %v12296_v42 = vshrl.u32 %v12205_v57, 16  ;;  %v12277_v51 = vrot.slane %v12275_v16, 5  ;;  %v12283_v11 = vrot.slane %v12281_v21, 5  ;;  %19634 = vst [vmem:[#allocation6_spill] sm:$0xff] %v18583_v14 }
 0x390   : > { %v12274_v5 = vrot.slane %v12272_v46, 4  ;;  %v12260_v9 = vsel %vm16079_vm5, %v12255_v45, %v12259_v36  ;;  %v12287_v33 = vrot.slane %v12285_v53, 4  ;;  %v12293_v3 = vrot.slane %v12291_v8, 5  ;;  %v12208_v16 = vld [vmem:[#allocation2 + $0x54] sm:$0xf] }
 0x391   : > { %v12270_v22 = vsel %vm16079_vm5, %v12265_v27, %v12269_v26  ;;  %v12298_v2 = vrot.slane %v12296_v42, 4  ;;  %v12299_v60 = vshll.u32 %v12205_v57, 16  ;;  %v12305_v23 = vshll.u32 %v12206_v34, 16  ;;  %v12209_v42 = vld [vmem:[#allocation2 + $0x58] sm:$0xf] }
 0x392   : > { %15452 = vmatmul.mubr.bf16.gmra.mxu0 %v15751_v17  ;;  %v14113_v46 = vcombine.low %v12260_v9, %v12270_v22  ;;  %v12278_v37 = vor.u32 %v12277_v51, %v12274_v5  ;;  %v12288_v52 = vor.u32 %v12287_v33, %v12283_v11  ;;  %v12309_v36 = vshrl.u32 %v12206_v34, 16  ;;  %v12210_v34 = vld [vmem:[#allocation2 + $0x5c] sm:$0x1]  ;;  %v18594_v9 = vpop.f32.mrf.mxu0 }
 0x393   : > { %15404 = vmatmul.mubr.bf16.gmra.mxu1 %v14048_v12  ;;  %v12301_v59 = vrot.slane %v12299_v60, 5  ;;  %v12315_v17 = vshll.u32 %v12207_v49, 16  ;;  %v18586_v45 = vadd.f32 %v18454_v41, %v8027_v25  ;;  %v18588_v12 = vpop.f32.mrf.mxu1  ;;  %v12307_v53 = vrot.slane %v12305_v23, 5  ;;  %19635 = vst [vmem:[#allocation7_spill] sm:$0xff] %v18594_v9 }
 0x394   : > { %15471 = vmatprep.mubr.bf16.mxu1 %v14113_v46  ;;  %v12279_v26 = vrot.slane %v12278_v37, 4  ;;  %v12289_v21 = vrot.slane %v12288_v52, 4  ;;  %v18592_v57 = vadd.f32 %v18465_v61, %v18329_v19  ;;  %v12311_v5 = vrot.slane %v12309_v36, 4  ;;  %v12211_v19 = vld [vmem:[#allocation2 + $0x64] sm:$0xf] }
 0x395   : > { %v12302_v27 = vor.u32 %v12301_v59, %v12298_v2  ;;  %v12317_v8 = vrot.slane %v12315_v17, 5  ;;  %v18602_v23 = vadd.f32 %v18493_v6, %v18337_v43  ;;  %v12320_v52 = vshrl.u32 %v12208_v16, 16  ;;  %v18604_v33 = vpop.f32.mrf.mxu1 }
 0x396   : > { %v12284_v41 = vsel %vm16079_vm5, %v12279_v26, %v12283_v11  ;;  %v12294_v25 = vsel %vm16079_vm5, %v12289_v21, %v12293_v3  ;;  %v12312_v59 = vor.u32 %v12311_v5, %v12307_v53  ;;  %v12323_v51 = vshll.u32 %v12208_v16, 16  ;;  %v12212_v11 = vld [vmem:[#allocation2 + $0x68] sm:$0xf]  ;;  %v12213_v16 = vld [vmem:[#allocation2 + $0x6c] sm:$0x1] }
 0x397   : > { %19636 = vst [vmem:[#allocation8_spill] sm:$0xff] %v18602_v23  ;;  %v14114_v61 = vcombine.low %v12284_v41, %v12294_v25  ;;  %v12303_v37 = vrot.slane %v12302_v27, 4  ;;  %v12322_v49 = vrot.slane %v12320_v52, 4  ;;  %v12329_v22 = vshll.u32 %v12209_v42, 16  ;;  %v18612_v25 = vpop.f32.mrf.mxu1 }
 0x398   : > { %v12333_v2 = vshrl.u32 %v12209_v42, 16  ;;  %v12339_v60 = vshll.u32 %v12210_v34, 16  ;;  %v12313_v46 = vrot.slane %v12312_v59, 4  ;;  %v12325_v43 = vrot.slane %v12323_v51, 5 }
 0x399   : > { %v12308_v3 = vsel %vm16079_vm5, %v12303_v37, %v12307_v53  ;;  %v12344_v6 = vshrl.u32 %v12211_v19, 16  ;;  %v12331_v17 = vrot.slane %v12329_v22, 5  ;;  %v12347_v27 = vshll.u32 %v12211_v19, 16 }
 0x39a   : > { %v12335_v26 = vrot.slane %v12333_v2, 4  ;;  %v12341_v21 = vrot.slane %v12339_v60, 5  ;;  %v12318_v5 = vsel %vm16079_vm5, %v12313_v46, %v12317_v8  ;;  %v12326_v42 = vor.u32 %v12325_v43, %v12322_v49  ;;  %v12214_v60 = vld [vmem:[#allocation2 + $0x74] sm:$0xf]  ;;  %v12215_v43 = vld [vmem:[#allocation2 + $0x78] sm:$0xf] }
 0x39b   : > { %15472 = vmatmul.mubr.bf16.vlgmr.msra.gmra.mxu1 %v14114_v61  ;;  %v18608_v36 = vpop.f32.mrf.mxu0  ;;  %v12346_v34 = vrot.slane %v12344_v6, 4  ;;  %v12353_v41 = vshll.u32 %v12212_v11, 16  ;;  %v14115_v52 = vcombine.low %v12308_v3, %v12318_v5  ;;  %v12349_v61 = vrot.slane %v12347_v27, 5  ;;  %v19640_v6 = vld [vmem:[#allocation52_spill] sm:$0xff]  ;;  %v12216_v5 = vld [vmem:[#allocation2 + $0x7c] sm:$0x1] }
 0x39c   : > { %v12336_v53 = vor.u32 %v12335_v26, %v12331_v17  ;;  %v12357_v37 = vshrl.u32 %v12212_v11, 16  ;;  %v12327_v51 = vrot.slane %v12326_v42, 4  ;;  %v12363_v2 = vshll.u32 %v12213_v16, 16  ;;  %v19639_v11 = vld [vmem:[#allocation42_spill] sm:$0xff]  ;;  %v18634_v42 = vpop.f32.mrf.mxu1 }
 0x39d   : > { %v18614_v59 = vpop.f32.mrf.mxu0  ;;  %v12355_v22 = vrot.slane %v12353_v41, 5  ;;  %v18618_v19 = vadd.f32 %v18495_v63, %v18359_v40  ;;  %15475 = vmatprep.mubr.bf16.mxu1 %v14115_v52  ;;  %v12350_v49 = vor.u32 %v12349_v61, %v12346_v34  ;;  %v18622_v3 = vadd.f32 %v18515_v47, %v18363_v44  ;;  %v19641_v40 = vld [vmem:[#allocation51_spill] sm:$0xff]  ;;  %19643 = vst [vmem:[#allocation29_spill] sm:$0xff] %v18634_v42  ;;  %v12217_v52 = vld [vmem:[#allocation2 + $0x84] sm:$0xf] }
 0x39e   : > { %v12337_v8 = vrot.slane %v12336_v53, 4  ;;  %v12359_v46 = vrot.slane %v12357_v37, 4  ;;  %v18626_v26 = vadd.f32 %v19640_v6, %v19639_v11  ;;  %v12332_v16 = vsel %vm16079_vm5, %v12327_v51, %v12331_v17 }
 0x39f   : > { %19637 = vst [vmem:[#allocation9_spill] sm:$0xff] %v18618_v19  ;;  %19638 = vst [vmem:[#allocation4_spill] sm:$0xff] %v18622_v3  ;;  %v12365_v27 = vrot.slane %v12363_v2, 5  ;;  %v18632_v63 = vadd.f32 %v18543_v20, %v19641_v40  ;;  %v12351_v47 = vrot.slane %v12350_v49, 4  ;;  %v12368_v41 = vshrl.u32 %v12214_v60, 16  ;;  %v18638_v53 = vpop.f32.mrf.mxu0 }
 0x3a0   : > { %v12342_v44 = vsel %vm16079_vm5, %v12337_v8, %v12341_v21  ;;  %v12360_v34 = vor.u32 %v12359_v46, %v12355_v22  ;;  %v12371_v37 = vshll.u32 %v12214_v60, 16  ;;  %v12377_v17 = vshll.u32 %v12215_v43, 16  ;;  %v12218_v2 = vld [vmem:[#allocation2 + $0x88] sm:$0xf]  ;;  %v12219_v49 = vld [vmem:[#allocation2 + $0x8c] sm:$0x1] }
 0x3a1   : > { %19642 = vst [vmem:[#allocation50_spill] sm:$0xff] %v18632_v63  ;;  %v14116_v61 = vcombine.low %v12332_v16, %v12342_v44  ;;  %v12381_v51 = vshrl.u32 %v12215_v43, 16  ;;  %v12356_v20 = vsel %vm16079_vm5, %v12351_v47, %v12355_v22  ;;  %v12370_v6 = vrot.slane %v12368_v41, 4  ;;  %v18646_v42 = vpop.f32.mrf.mxu0 }
 0x3a2   : > { %v12361_v11 = vrot.slane %v12360_v34, 4  ;;  %v12387_v40 = vshll.u32 %v12216_v5, 16  ;;  %v12373_v9 = vrot.slane %v12371_v37, 5  ;;  %v12379_v21 = vrot.slane %v12377_v17, 5 }
 0x3a3   : > { %15476 = vmatmul.mubr.bf16.gmra.mxu1 %v14116_v61  ;;  %v12383_v8 = vrot.slane %v12381_v51, 4  ;;  %v12392_v46 = vshrl.u32 %v12217_v52, 16  ;;  %v12395_v43 = vshll.u32 %v12217_v52, 16  ;;  %v12401_v44 = vshll.u32 %v12218_v2, 16 }
 0x3a4   : > { %v12366_v60 = vsel %vm16079_vm5, %v12361_v11, %v12365_v27  ;;  %v12389_v16 = vrot.slane %v12387_v40, 5  ;;  %v12374_v47 = vor.u32 %v12373_v9, %v12370_v6  ;;  %v12405_v17 = vshrl.u32 %v12218_v2, 16  ;;  %v19646_v9 = vld [vmem:[#allocation48_spill] sm:$0xff] }
 0x3a5   : > { %v18642_v14 = vpop.f32.mrf.mxu1  ;;  %v14117_v22 = vcombine.low %v12356_v20, %v12366_v60  ;;  %v12384_v34 = vor.u32 %v12383_v8, %v12379_v21  ;;  %v12394_v5 = vrot.slane %v12392_v46, 4  ;;  %v12397_v61 = vrot.slane %v12395_v43, 5  ;;  %v19647_v20 = vld [vmem:[#allocation43_spill] sm:$0xff] }
 0x3a6   : > { %v12403_v37 = vrot.slane %v12401_v44, 5  ;;  %v12411_v51 = vshll.u32 %v12219_v49, 16  ;;  %v12375_v63 = vrot.slane %v12374_v47, 4  ;;  %v18652_v27 = vadd.f32 %v18551_v7, %v18397_v35  ;;  %v12221_v8 = vld [vmem:[#allocation2 + $0x98] sm:$0xf] }
 0x3a7   : > { %v18648_v41 = vpop.f32.mrf.mxu1  ;;  %15479 = vmatprep.mubr.bf16.mxu1 %v14117_v22  ;;  %v12385_v32 = vrot.slane %v12384_v34, 4  ;;  %v18656_v52 = vadd.f32 %v18565_v15, %v18403_v24  ;;  %v18660_v11 = vadd.f32 %v19647_v20, %v19646_v9  ;;  %v12398_v6 = vor.u32 %v12397_v61, %v12394_v5  ;;  %v12222_v49 = vld [vmem:[#allocation2 + $0x9c] sm:$0x1]  ;;  %v12223_v15 = vld [vmem:[#allocation2 + $0xa4] sm:$0xf] }
 0x3a8   : > { %19644 = vst [vmem:[#allocation38_spill] sm:$0xff] %v18652_v27  ;;  %v12407_v40 = vrot.slane %v12405_v17, 4  ;;  %v12413_v2 = vrot.slane %v12411_v51, 5  ;;  %v12380_v60 = vsel %vm16079_vm5, %v12375_v63, %v12379_v21  ;;  %v18670_v24 = vadd.f32 %v18588_v12, %v18416_v38  ;;  %v12224_v63 = vld [vmem:[#allocation2 + $0xa8] sm:$0xf] }
 0x3a9   : > { %19645 = vst [vmem:[#allocation11_spill] sm:$0xff] %v18656_v52  ;;  %v12390_v35 = vsel %vm16079_vm5, %v12385_v32, %v12389_v16  ;;  %v12416_v7 = vshrl.u32 %v12220_v54, 16  ;;  %v18672_v43 = vpop.f32.mrf.mxu1  ;;  %v12399_v22 = vrot.slane %v12398_v6, 4  ;;  %v12419_v34 = vshll.u32 %v12220_v54, 16  ;;  %v12225_v6 = vld [vmem:[#allocation2 + $0xac] sm:$0x1] }
 0x3aa   : > { %v18662_v46 = vpop.f32.mrf.mxu0  ;;  %19648 = vst [vmem:[#allocation10_spill] sm:$0xff] %v18670_v24  ;;  %v14118_v44 = vcombine.low %v12380_v60, %v12390_v35  ;;  %v12408_v47 = vor.u32 %v12407_v40, %v12403_v37  ;;  %v12425_v61 = vshll.u32 %v12221_v8, 16  ;;  %v12429_v17 = vshrl.u32 %v12221_v8, 16 }
 0x3ab   : > { %v12418_v5 = vrot.slane %v12416_v7, 4  ;;  %v12435_v51 = vshll.u32 %v12222_v49, 16  ;;  %v12404_v32 = vsel %vm16079_vm5, %v12399_v22, %v12403_v37  ;;  %v12421_v38 = vrot.slane %v12419_v34, 5  ;;  %v18678_v54 = vpop.f32.mrf.mxu1 }
 0x3ac   : > { %15480 = vmatmul.mubr.bf16.gmra.mxu1 %v14118_v44  ;;  %v12409_v21 = vrot.slane %v12408_v47, 4  ;;  %v12440_v12 = vshrl.u32 %v12223_v15, 16  ;;  %v18676_v16 = vpop.f32.mrf.mxu0  ;;  %v12427_v9 = vrot.slane %v12425_v61, 5  ;;  %v12431_v20 = vrot.slane %v12429_v17, 4 }
 0x3ad   : > { %v12437_v60 = vrot.slane %v12435_v51, 5  ;;  %v12443_v40 = vshll.u32 %v12223_v15, 16  ;;  %v12422_v49 = vor.u32 %v12421_v38, %v12418_v5  ;;  %v12449_v7 = vshll.u32 %v12224_v63, 16  ;;  %v12226_v15 = vld [vmem:[#allocation2 + $0xb4] sm:$0xf]  ;;  %v19651_v38 = vld [vmem:[#allocation39_spill] sm:$0xff] }
 0x3ae   : > { %v12414_v8 = vsel %vm16079_vm5, %v12409_v21, %v12413_v2  ;;  %v12442_v35 = vrot.slane %v12440_v12, 4  ;;  %v12432_v37 = vor.u32 %v12431_v20, %v12427_v9  ;;  %v12453_v47 = vshrl.u32 %v12224_v63, 16  ;;  %v18686_v17 = vpop.f32.mrf.mxu0  ;;  %v12227_v21 = vld [vmem:[#allocation2 + $0xb8] sm:$0xf]  ;;  %v19652_v12 = vld [vmem:[#allocation60_spill] sm:$0xff] }
 0x3af   : > { %v14119_v44 = vcombine.low %v12404_v32, %v12414_v8  ;;  %v12445_v22 = vrot.slane %v12443_v40, 5  ;;  %v12423_v34 = vrot.slane %v12422_v49, 4  ;;  %v12451_v24 = vrot.slane %v12449_v7, 5  ;;  %v12228_v40 = vld [vmem:[#allocation2 + $0xbc] sm:$0x1] }
 0x3b0   : > { %v12459_v52 = vshll.u32 %v12225_v6, 16  ;;  %v18684_v61 = vadd.f32 %v18604_v33, %v18433_v29  ;;  %v12433_v51 = vrot.slane %v12432_v37, 4  ;;  %v12455_v5 = vrot.slane %v12453_v47, 4  ;;  %v12230_v47 = vld [vmem:[#allocation2 + $0xc8] sm:$0xf] }
 0x3b1   : > { %15483 = vmatprep.mubr.bf16.mxu1 %v14119_v44  ;;  %v12446_v2 = vor.u32 %v12445_v22, %v12442_v35  ;;  %v18690_v32 = vadd.f32 %v18612_v25, %v18439_v62  ;;  %v18694_v20 = vadd.f32 %v19652_v12, %v19651_v38  ;;  %v12428_v29 = vsel %vm16079_vm5, %v12423_v34, %v12427_v9  ;;  %v12229_v35 = vld [vmem:[#allocation2 + $0xc4] sm:$0xf]  ;;  %v18704_v38 = vpop.f32.mrf.mxu0 }
 0x3b2   : > { %19649 = vst [vmem:[#allocation17_spill] sm:$0xff] %v18684_v61  ;;  %v15205_v63 = vpop.f32.mrf.mxu1  ;;  %v12461_v33 = vrot.slane %v12459_v52, 5  ;;  %v18700_v6 = vadd.f32 %v18642_v14, %v18450_v30  ;;  %v12438_v8 = vsel %vm16079_vm5, %v12433_v51, %v12437_v60  ;;  %v12456_v25 = vor.u32 %v12455_v5, %v12451_v24  ;;  %v12231_v5 = vld [vmem:[#allocation2 + $0xcc] sm:$0x1] }
 0x3b3   : > { %19650 = vst [vmem:[#allocation12_spill] sm:$0xff] %v18690_v32  ;;  %v12447_v62 = vrot.slane %v12446_v2, 4  ;;  %v12464_v49 = vshrl.u32 %v12226_v15, 16  ;;  %v14120_v7 = vcombine.low %v12428_v29, %v12438_v8  ;;  %v12467_v44 = vshll.u32 %v12226_v15, 16 }
 0x3b4   : > { %v12473_v37 = vshll.u32 %v12227_v21, 16  ;;  %v12477_v22 = vshrl.u32 %v12227_v21, 16  ;;  %v12457_v30 = vrot.slane %v12456_v25, 4  ;;  %v12483_v9 = vshll.u32 %v12228_v40, 16  ;;  %v18708_v34 = vpop.f32.mrf.mxu1 }
 0x3b5   : > { %v12452_v52 = vsel %vm16079_vm5, %v12447_v62, %v12451_v24  ;;  %v12466_v14 = vrot.slane %v12464_v49, 4  ;;  %15484 = vmatmul.mubr.bf16.gmra.mxu1 %v14120_v7  ;;  %v12469_v60 = vrot.slane %v12467_v44, 5  ;;  %v12488_v12 = vshrl.u32 %v12229_v35, 16 }
 0x3b6   : > { %v12475_v51 = vrot.slane %v12473_v37, 5  ;;  %v12479_v2 = vrot.slane %v12477_v22, 4  ;;  %v12462_v15 = vsel %vm16079_vm5, %v12457_v30, %v12461_v33  ;;  %v12485_v21 = vrot.slane %v12483_v9, 5  ;;  %v12232_v37 = vld [vmem:[#allocation2 + $0xd4] sm:$0xf]  ;;  %v15206_v22 = vpop.f32.mrf.mxu1 }
 0x3b7   : > { %v12491_v29 = vshll.u32 %v12229_v35, 16  ;;  %v12497_v8 = vshll.u32 %v12230_v47, 16  ;;  %v14121_v32 = vcombine.low %v12452_v52, %v12462_v15  ;;  %v12470_v61 = vor.u32 %v12469_v60, %v12466_v14  ;;  %v12233_v9 = vld [vmem:[#allocation2 + $0xd8] sm:$0xf]  ;;  %v12234_v60 = vld [vmem:[#allocation2 + $0xdc] sm:$0x1] }
 0x3b8   : > { %v12480_v24 = vor.u32 %v12479_v2, %v12475_v51  ;;  %v12490_v62 = vrot.slane %v12488_v12, 4  ;;  %v12501_v7 = vshrl.u32 %v12230_v47, 16  ;;  %v12507_v44 = vshll.u32 %v12231_v5, 16 }
 0x3b9   : > { %v12493_v40 = vrot.slane %v12491_v29, 5  ;;  %v12499_v49 = vrot.slane %v12497_v8, 5  ;;  %15487 = vmatprep.mubr.bf16.mxu1 %v14121_v32  ;;  %v12471_v27 = vrot.slane %v12470_v61, 4  ;;  %v18716_v33 = vadd.f32 %v18648_v41, %v18469_v58 }
 0x3ba   : > { %v18712_v25 = vpop.f32.mrf.mxu0  ;;  %v12481_v3 = vrot.slane %v12480_v24, 4  ;;  %v18720_v35 = vadd.f32 %v18672_v43, %v18475_v55  ;;  %v12503_v30 = vrot.slane %v12501_v7, 4  ;;  %v12509_v14 = vrot.slane %v12507_v44, 5  ;;  %v12235_v43 = vld [vmem:[#allocation2 + $0xe4] sm:$0xf] }
 0x3bb   : > { %v12494_v52 = vor.u32 %v12493_v40, %v12490_v62  ;;  %v18724_v47 = vadd.f32 %v18678_v54, %v18626_v26  ;;  %v12476_v61 = vsel %vm16079_vm5, %v12471_v27, %v12475_v51  ;;  %v18733_v55 = vadd.f32 %v15205_v63, %v18485_v13  ;;  %v8769_v54 = vpop.f32.mrf.mxu1  ;;  %v12236_v62 = vld [vmem:[#allocation2 + $0xe8] sm:$0xf]  ;;  %v12237_v44 = vld [vmem:[#allocation2 + $0xec] sm:$0x1] }
 0x3bc   : > { %v18726_v32 = vpop.f32.mrf.mxu0  ;;  %v12486_v58 = vsel %vm16079_vm5, %v12481_v3, %v12485_v21  ;;  %v12512_v41 = vshrl.u32 %v12232_v37, 16  ;;  %v12504_v12 = vor.u32 %v12503_v30, %v12499_v49  ;;  %v12515_v26 = vshll.u32 %v12232_v37, 16 }
 0x3bd   : > { %v14122_v2 = vcombine.low %v12476_v61, %v12486_v58  ;;  %v12495_v5 = vrot.slane %v12494_v52, 4  ;;  %v12521_v29 = vshll.u32 %v12233_v9, 16  ;;  %v12525_v8 = vshrl.u32 %v12233_v9, 16 }
 0x3be   : > { %v12514_v15 = vrot.slane %v12512_v41, 4  ;;  %v12531_v24 = vshll.u32 %v12234_v60, 16  ;;  %v12505_v3 = vrot.slane %v12504_v12, 4  ;;  %v12517_v51 = vrot.slane %v12515_v26, 5  ;;  %v18737_v63 = vpop.f32.mrf.mxu0 }
 0x3bf   : > { %15488 = vmatmul.mubr.bf16.gmra.mxu1 %v14122_v2  ;;  %v12500_v27 = vsel %vm16079_vm5, %v12495_v5, %v12499_v49  ;;  %v12536_v13 = vshrl.u32 %v12235_v43, 16  ;;  %v12523_v21 = vrot.slane %v12521_v29, 5  ;;  %v12527_v40 = vrot.slane %v12525_v8, 4 }
 0x3c0   : > { %v12533_v7 = vrot.slane %v12531_v24, 5  ;;  %v12539_v37 = vshll.u32 %v12235_v43, 16  ;;  %v12510_v52 = vsel %vm16079_vm5, %v12505_v3, %v12509_v14  ;;  %v12518_v30 = vor.u32 %v12517_v51, %v12514_v15  ;;  %v18745_v8 = vpop.f32.mrf.mxu0  ;;  %v12238_v43 = vld [vmem:[#allocation2 + $0xf4] sm:$0xf]  ;;  %v12239_v51 = vld [vmem:[#allocation2 + $0xf8] sm:$0xf] }
 0x3c1   : > { %v12538_v9 = vrot.slane %v12536_v13, 4  ;;  %v12545_v60 = vshll.u32 %v12236_v62, 16  ;;  %v14123_v58 = vcombine.low %v12500_v27, %v12510_v52  ;;  %v12528_v41 = vor.u32 %v12527_v40, %v12523_v21 }
 0x3c2   : > { %v15209_v61 = vpop.f32.mrf.mxu1  ;;  %v12541_v49 = vrot.slane %v12539_v37, 5  ;;  %v12549_v2 = vshrl.u32 %v12236_v62, 16  ;;  %v12519_v5 = vrot.slane %v12518_v30, 4  ;;  %v12555_v26 = vshll.u32 %v12237_v44, 16 }
 0x3c3   : > { %v12547_v12 = vrot.slane %v12545_v60, 5  ;;  %v18743_v29 = vadd.f32 %v18708_v34, %v18499_v28  ;;  %15491 = vmatprep.mubr.bf16.mxu1 %v14123_v58  ;;  %v12529_v14 = vrot.slane %v12528_v41, 4  ;;  %v18748_v27 = vadd.f32 %v15206_v22, %v18505_v31  ;;  %v12240_v34 = vld [vmem:[#allocation2 + $0xfc] sm:$0x1]  ;;  %v12241_v31 = vld [vmem:[#allocation2 + $0x104] sm:$0xf] }
 0x3c4   : > { %v8782_v24 = vpop.f32.mrf.mxu1  ;;  %v12542_v15 = vor.u32 %v12541_v49, %v12538_v9  ;;  %v12551_v3 = vrot.slane %v12549_v2, 4  ;;  %v12524_v62 = vsel %vm16079_vm5, %v12519_v5, %v12523_v21  ;;  %v12557_v13 = vrot.slane %v12555_v26, 5  ;;  %v12242_v41 = vld [vmem:[#allocation2 + $0x108] sm:$0xf]  ;;  %v12243_v26 = vld [vmem:[#allocation2 + $0x10c] sm:$0x1] }
 0x3c5   : > { %v18753_v40 = vadd.f32 %v8769_v54, %v18660_v11  ;;  %v18756_v28 = vadd.f32 %v15209_v61, %v18513_v50  ;;  %v12534_v44 = vsel %vm16079_vm5, %v12529_v14, %v12533_v7  ;;  %v12560_v30 = vshrl.u32 %v12238_v43, 16 }
 0x3c6   : > { %v12543_v37 = vrot.slane %v12542_v15, 4  ;;  %v12552_v52 = vor.u32 %v12551_v3, %v12547_v12  ;;  %v14124_v22 = vcombine.low %v12524_v62, %v12534_v44  ;;  %v12563_v9 = vshll.u32 %v12238_v43, 16  ;;  %v15210_v11 = vpop.f32.mrf.mxu1 }
 0x3c7   : > { %v12569_v60 = vshll.u32 %v12239_v51, 16  ;;  %v12573_v58 = vshrl.u32 %v12239_v51, 16  ;;  %v12562_v61 = vrot.slane %v12560_v30, 4  ;;  %v12579_v49 = vshll.u32 %v12240_v34, 16 }
 0x3c8   : > { %v12548_v50 = vsel %vm16079_vm5, %v12543_v37, %v12547_v12  ;;  %v12553_v54 = vrot.slane %v12552_v52, 4  ;;  %15492 = vmatmul.mubr.bf16.gmra.mxu1 %v14124_v22  ;;  %v12565_v7 = vrot.slane %v12563_v9, 5  ;;  %v12584_v14 = vshrl.u32 %v12241_v31, 16  ;;  %v8785_v52 = vpop.f32.mrf.mxu1 }
 0x3c9   : > { %v18760_v21 = vpop.f32.mrf.mxu0  ;;  %v12571_v2 = vrot.slane %v12569_v60, 5  ;;  %v12575_v5 = vrot.slane %v12573_v58, 4  ;;  %v12581_v15 = vrot.slane %v12579_v49, 5  ;;  %v12587_v3 = vshll.u32 %v12241_v31, 16  ;;  %v12244_v60 = vld [vmem:[#allocation2 + $0x114] sm:$0xf] }
 0x3ca   : > { %v12558_v43 = vsel %vm16079_vm5, %v12553_v54, %v12557_v13  ;;  %v12593_v51 = vshll.u32 %v12242_v41, 16  ;;  %v12566_v19 = vor.u32 %v12565_v7, %v12562_v61  ;;  %v12586_v37 = vrot.slane %v12584_v14, 4  ;;  %v12245_v54 = vld [vmem:[#allocation2 + $0x118] sm:$0xf] }
 0x3cb   : > { %v18766_v62 = vpop.f32.mrf.mxu0  ;;  %v14125_v44 = vcombine.low %v12548_v50, %v12558_v43  ;;  %v12576_v12 = vor.u32 %v12575_v5, %v12571_v2  ;;  %v12589_v34 = vrot.slane %v12587_v3, 5  ;;  %v12597_v22 = vshrl.u32 %v12242_v41, 16  ;;  %v12246_v41 = vld [vmem:[#allocation2 + $0x11c] sm:$0x1] }
 0x3cc   : > { %v12595_v30 = vrot.slane %v12593_v51, 5  ;;  %v12603_v9 = vshll.u32 %v12243_v26, 16  ;;  %v12567_v58 = vrot.slane %v12566_v19, 4  ;;  %v18769_v13 = vadd.f32 %v8782_v24, %v18529_v18 }
 0x3cd   : > { %15495 = vmatprep.mubr.bf16.mxu1 %v14125_v44  ;;  %v12577_v23 = vrot.slane %v12576_v12, 4  ;;  %v18772_v31 = vadd.f32 %v15210_v11, %v18535_v39  ;;  %v12590_v50 = vor.u32 %v12589_v34, %v12586_v37  ;;  %v12599_v61 = vrot.slane %v12597_v22, 4  ;;  %v18774_v7 = vpop.f32.mrf.mxu0 }
 0x3ce   : > { %v12605_v49 = vrot.slane %v12603_v9, 5  ;;  %v18777_v5 = vadd.f32 %v8785_v52, %v18694_v20  ;;  %v12572_v19 = vsel %vm16079_vm5, %v12567_v58, %v12571_v2  ;;  %v12608_v24 = vshrl.u32 %v12244_v60, 16 }
 0x3cf   : > { %v12582_v18 = vsel %vm16079_vm5, %v12577_v23, %v12581_v15  ;;  %v12611_v26 = vshll.u32 %v12244_v60, 16  ;;  %v12591_v11 = vrot.slane %v12590_v50, 4  ;;  %v12600_v14 = vor.u32 %v12599_v61, %v12595_v30  ;;  %v9587_v52 = vpop.f32.mrf.mxu0 }
 0x3d0   : > { %v14126_v39 = vcombine.low %v12572_v19, %v12582_v18  ;;  %v12617_v43 = vshll.u32 %v12245_v54, 16  ;;  %v12610_v51 = vrot.slane %v12608_v24, 4  ;;  %v12621_v12 = vshrl.u32 %v12245_v54, 16  ;;  %v19653_v18 = vld [vmem:[#allocation53_spill] sm:$0xff] }
 0x3d1   : > { %v12613_v44 = vrot.slane %v12611_v26, 5  ;;  %v12627_v37 = vshll.u32 %v12246_v41, 16  ;;  %v12601_v20 = vrot.slane %v12600_v14, 4  ;;  %v12596_v15 = vsel %vm16079_vm5, %v12591_v11, %v12595_v30  ;;  %v19654_v14 = vld [vmem:[#allocation55_spill] sm:$0xff] }
 0x3d2   : > { %15496 = vmatmul.mubr.bf16.gmra.mxu1 %v14126_v39  ;;  %v12619_v2 = vrot.slane %v12617_v43, 5  ;;  %v12623_v9 = vrot.slane %v12621_v12, 4  ;;  %v9633_v43 = vadd.f32 %v19654_v14, %v18573_v1  ;;  %v18816_v56 = vadd.f32 %v18614_v59, %v18716_v33  ;;  %v19667_v14 = vld [vmem:[#allocation69_spill] sm:$0xff] }
 0x3d3   : > { %v15213_v3 = vpop.f32.mrf.mxu1  ;;  %v12614_v22 = vor.u32 %v12613_v44, %v12610_v51  ;;  %v12606_v60 = vsel %vm16079_vm5, %v12601_v20, %v12605_v49  ;;  %v12629_v41 = vrot.slane %v12627_v37, 5  ;;  %v19655_v51 = vld [vmem:[#allocation54_spill] sm:$0xff]  ;;  %v19656_v20 = vld [vmem:[#allocation57_spill] sm:$0xff]  ;;  %v18836_v59 = vadd.f32 %v18676_v16, %v18743_v29 }
 0x3d4   : > { %v8875_v34 = vadd.f32 %v15213_v3, %v18541_v10  ;;  %v14127_v50 = vcombine.low %v12596_v15, %v12606_v60  ;;  %v12624_v61 = vor.u32 %v12623_v9, %v12619_v2  ;;  %v8056_v10 = vadd.f32 %v19653_v18, %v18422_v48  ;;  %v19662_v60 = vld [vmem:[#allocation40_spill] sm:$0xff]  ;;  %v19664_v18 = vld [vmem:[#allocation45_spill] sm:$0xff] }
 0x3d5   : > { %v8798_v23 = vpop.f32.mrf.mxu1  ;;  %v12615_v54 = vrot.slane %v12614_v22, 4  ;;  %v9631_v44 = vadd.f32 %v19655_v51, %v18586_v45  ;;  %v18812_v22 = vadd.f32 %v18608_v36, %v18700_v6  ;;  %v18820_v45 = vadd.f32 %v18638_v53, %v18720_v35  ;;  %v19669_v51 = vld [vmem:[#allocation41_spill] sm:$0xff] }
 0x3d6   : > { %v8873_v58 = vadd.f32 %v8798_v23, %v18559_v4  ;;  %15499 = vmatprep.mubr.bf16.mxu1 %v14127_v50  ;;  %v12625_v39 = vrot.slane %v12624_v61, 4  ;;  %v18824_v9 = vadd.f32 %v18646_v42, %v18724_v47  ;;  %v18840_v53 = vadd.f32 %v18686_v17, %v18748_v27 }
 0x3d7   : > { %v15214_v19 = vpop.f32.mrf.mxu1  ;;  %v18791_v24 = vpop.f32.mrf.mxu0  ;;  %v12620_v30 = vsel %vm16079_vm5, %v12615_v54, %v12619_v2  ;;  %v9634_v2 = vadd.f32 %v19656_v20, %v18592_v57  ;;  %v18828_v57 = vadd.f32 %v18662_v46, %v18733_v55  ;;  %v18844_v42 = vadd.f32 %v18704_v38, %v18753_v40  ;;  %v19658_v40 = vld [vmem:[#allocation59_spill] sm:$0xff] }
 0x3d8   : > { %v8876_v26 = vadd.f32 %v15214_v19, %v18563_v0  ;;  %v12630_v3 = vsel %vm16079_vm5, %v12625_v39, %v12629_v41  ;;  %v18848_v46 = vadd.f32 %v18712_v25, %v18756_v28  ;;  %v18852_v35 = vadd.f32 %v18726_v32, %v18769_v13  ;;  %v19663_v19 = vld [vmem:[#allocation37_spill] sm:$0xff] }
 0x3d9   : > { %v8801_v49 = vpop.f32.mrf.mxu1  ;;  %v18796_v11 = vpop.f32.mrf.mxu0  ;;  %v14128_v0 = vcombine.low %v12620_v30, %v12630_v3  ;;  %v18856_v16 = vadd.f32 %v18737_v63, %v18772_v31  ;;  %v18860_v17 = vadd.f32 %v18745_v8, %v18777_v5  ;;  %v18867_v55 = vadd.f32 %v18760_v21, %v8875_v34  ;;  %v19657_v8 = vld [vmem:[#allocation8_spill] sm:$0xff]  ;;  %v19659_v5 = vld [vmem:[#allocation9_spill] sm:$0xff]  ;;  %v19666_v30 = vld [vmem:[#allocation63_spill] sm:$0xff] }
 0x3da   : > { %v8874_v4 = vadd.f32 %v8801_v49, %v8056_v10  ;;  %v18870_v25 = vadd.f32 %v18766_v62, %v8873_v58  ;;  %v18873_v32 = vadd.f32 %v18774_v7, %v8876_v26  ;;  %v9637_v28 = vadd.f32 %v19658_v40, %v19657_v8  ;;  %v19660_v62 = vld [vmem:[#allocation68_spill] sm:$0xff]  ;;  %v19665_v26 = vld [vmem:[#allocation50_spill] sm:$0xff] }
 0x3db   : > { %v15281_v48 = vpop.f32.mrf.mxu1  ;;  %v18804_v12 = vpop.f32.mrf.mxu0  ;;  %15500 = vmatmul.mubr.bf16.gmra.mxu1 %v14128_v0  ;;  %v9635_v34 = vadd.f32 %v19660_v62, %v19659_v5  ;;  %v8036_v10 = vadd.f32 %v19664_v18, %v19663_v19  ;;  %v9641_v39 = vadd.f32 %v19666_v30, %v19665_v26  ;;  %v19675_v5 = vld [vmem:[#allocation64_spill] sm:$0xff]  ;;  %v19679_v19 = vld [vmem:[#allocation10_spill] sm:$0xff]  ;;  %v19680_v18 = vld [vmem:[#allocation67_spill] sm:$0xff] }
 0x3dc   : > { %v18806_v37 = vadd.f32 %v15281_v48, %v9633_v43  ;;  %v18877_v63 = vadd.f32 %v9587_v52, %v8874_v4  ;;  %v19661_v52 = vld [vmem:[#allocation4_spill] sm:$0xff]  ;;  %v19668_v48 = vld [vmem:[#allocation38_spill] sm:$0xff] }
 0x3dd   : > { %v9922_v1 = vpop.f32.mrf.mxu1  ;;  %v18830_v36 = vpop.f32.mrf.mxu0  ;;  %v9638_v58 = vadd.f32 %v19662_v60, %v19661_v52  ;;  %v8854_v43 = vadd.f32 %v19667_v14, %v8036_v10  ;;  %v19676_v52 = vld [vmem:[#allocation49_spill] sm:$0xff]  ;;  %v19677_v60 = vld [vmem:[#allocation47_spill] sm:$0xff]  ;;  %v9645_v10 = vadd.f32 %v19680_v18, %v19679_v19 }
 0x3de   : > { %v18832_v6 = vadd.f32 %v9922_v1, %v9631_v44  ;;  %v9639_v44 = vadd.f32 %v19669_v51, %v19668_v48  ;;  %v19671_v1 = vld [vmem:[#allocation11_spill] sm:$0xff]  ;;  %v19682_v48 = vld [vmem:[#allocation17_spill] sm:$0xff]  ;;  %v19683_v51 = vld [vmem:[#allocation66_spill] sm:$0xff] }
 0x3df   : > { %v15282_v33 = vpop.f32.mrf.mxu1  ;;  %v18862_v47 = vpop.f32.mrf.mxu0  ;;  %v9640_v62 = vadd.f32 %v19675_v5, %v8854_v43 }
 0x3e0   : > { %v18864_v38 = vadd.f32 %v15282_v33, %v9634_v2  ;;  %v19672_v33 = vld [vmem:[#allocation65_spill] sm:$0xff] }
 0x3e1   : > { %v18875_v29 = vpop.f32.mrf.mxu1  ;;  %v18879_v27 = vpop.f32.mrf.mxu0  ;;  %v9642_v8 = vadd.f32 %v19672_v33, %v19671_v1  ;;  %v19684_v33 = vld [vmem:[#allocation12_spill] sm:$0xff] }
 0x3e3   : > { %v15285_v13 = vpop.f32.mrf.mxu1  ;;  %v18883_v31 = vpop.f32.mrf.mxu0 }
 0x3e4   : > { %v18885_v21 = vadd.f32 %v15285_v13, %v9637_v28 }
 0x3e5   : > { %v9938_v23 = vpop.f32.mrf.mxu1  ;;  %v18889_v7 = vpop.f32.mrf.mxu0 }
 0x3e6   : > { %v18891_v15 = vadd.f32 %v9938_v23, %v9635_v34 }
 0x3e7   : > { %v15286_v50 = vpop.f32.mrf.mxu1 }
 0x3e8   : > { %v18895_v54 = vadd.f32 %v15286_v50, %v9638_v58  ;;  %v8040_v58 = vadd.f32 %v19677_v60, %v19676_v52  ;;  %v19686_v60 = vld [vmem:[#allocation7_spill] sm:$0xff] }
 0x3e9   : > { %v18897_v61 = vpop.f32.mrf.mxu0  ;;  %v18899_v41 = vpop.f32.mrf.mxu1 }
 0x3eb   : > { %v18905_v49 = vpop.f32.mrf.mxu0  ;;  %v15289_v4 = vpop.f32.mrf.mxu1 }
 0x3ec   : > { %v18908_v3 = vadd.f32 %v15289_v4, %v9641_v39  ;;  %v19681_v39 = vld [vmem:[#allocation29_spill] sm:$0xff] }
 0x3ed   : > { %v18912_v0 = vpop.f32.mrf.mxu0  ;;  %v9954_v20 = vpop.f32.mrf.mxu1  ;;  %v8858_v4 = vadd.f32 %v19681_v39, %v8040_v58 }
 0x3ee   : > { %19670 = vst [vmem:[#allocation14_spill] sm:$0xff] %v18912_v0  ;;  %v18914_v2 = vadd.f32 %v9954_v20, %v9639_v44  ;;  %v9643_v44 = vadd.f32 %v19683_v51, %v19682_v48 }
 0x3ef   : > { %v18918_v40 = vpop.f32.mrf.mxu0  ;;  %v15290_v28 = vpop.f32.mrf.mxu1  ;;  %v9644_v19 = vadd.f32 %v19686_v60, %v8858_v4 }
 0x3f0   : > { %19673 = vst [vmem:[#allocation23_spill] sm:$0xff] %v18918_v40  ;;  %v18920_v13 = vadd.f32 %v15290_v28, %v9642_v8  ;;  %v19685_v8 = vld [vmem:[#allocation6_spill] sm:$0xff] }
 0x3f1   : > { %v15341_v34 = vpop.f32.mrf.mxu0  ;;  %v9957_v23 = vpop.f32.mrf.mxu1  ;;  %v9646_v28 = vadd.f32 %v19685_v8, %v19684_v33 }
 0x3f2   : > { %19674 = vst [vmem:[#allocation31_spill] sm:$0xff] %v18920_v13  ;;  %v18925_v50 = vadd.f32 %v9957_v23, %v9640_v62 }
 0x3f3   : > { %v10788_v26 = vpop.f32.mrf.mxu0  ;;  %v15293_v30 = vpop.f32.mrf.mxu1 }
 0x3f4   : > { %19678 = vst [vmem:[#allocation21_spill] sm:$0xff] %v18925_v50  ;;  %v10095_v14 = vadd.f32 %v15293_v30, %v9645_v10 }
 0x3f5   : > { %v15342_v20 = vpop.f32.mrf.mxu0  ;;  %v9970_v43 = vpop.f32.mrf.mxu1 }
 0x3f6   : > { %v10093_v1 = vadd.f32 %v9970_v43, %v9643_v44  ;;  %v18934_v5 = vadd.f32 %v15341_v34, %v10095_v14 }
 0x3f7   : > { %v10791_v62 = vpop.f32.mrf.mxu0  ;;  %v15294_v23 = vpop.f32.mrf.mxu1 }
 0x3f8   : > { %v10096_v52 = vadd.f32 %v15294_v23, %v9646_v28  ;;  %v18937_v18 = vadd.f32 %v10788_v26, %v10093_v1 }
 0x3f9   : > { %v15345_v58 = vpop.f32.mrf.mxu0  ;;  %v9973_v10 = vpop.f32.mrf.mxu1 }
 0x3fa   : > { %v10094_v30 = vadd.f32 %v9973_v10, %v9644_v19  ;;  %v18939_v39 = vadd.f32 %v15342_v20, %v10096_v52 }
 0x3fb   : > { %v10804_v48 = vpop.f32.mrf.mxu0  ;;  %v15297_v51 = vpop.f32.mrf.mxu1 }
 0x3fc   : > { %v10099_v44 = vadd.f32 %v15297_v51, %v18812_v22  ;;  %v18942_v43 = vadd.f32 %v10791_v62, %v10094_v30 }
 0x3fd   : > { %v15346_v34 = vpop.f32.mrf.mxu0  ;;  %v9986_v14 = vpop.f32.mrf.mxu1 }
 0x3fe   : > { %v10097_v33 = vadd.f32 %v9986_v14, %v18816_v56  ;;  %v18945_v8 = vadd.f32 %v15345_v58, %v10099_v44 }
 0x3ff   : > { %v10807_v4 = vpop.f32.mrf.mxu0  ;;  %v15298_v26 = vpop.f32.mrf.mxu1 }
 0x400   : > { %v10100_v1 = vadd.f32 %v15298_v26, %v18820_v45  ;;  %v18948_v28 = vadd.f32 %v10804_v48, %v10097_v33 }
 0x401   : > { %v9989_v20 = vpop.f32.mrf.mxu1 }
 0x402   : > { %v15349_v23 = vpop.f32.mrf.mxu0  ;;  %v10098_v52 = vadd.f32 %v9989_v20, %v18824_v9  ;;  %v18951_v60 = vadd.f32 %v15346_v34, %v10100_v1 }
 0x403   : > { %v15301_v22 = vpop.f32.mrf.mxu1 }
 0x404   : > { %v10820_v62 = vpop.f32.mrf.mxu0  ;;  %v10103_v19 = vadd.f32 %v15301_v22, %v18828_v57  ;;  %v18954_v10 = vadd.f32 %v10807_v4, %v10098_v52 }
 0x405   : > { %v10002_v56 = vpop.f32.mrf.mxu1 }
 0x406   : > { %v15350_v58 = vpop.f32.mrf.mxu0  ;;  %v10101_v30 = vadd.f32 %v10002_v56, %v18836_v59  ;;  %v18957_v51 = vadd.f32 %v15349_v23, %v10103_v19 }
 0x407   : > { %v15302_v45 = vpop.f32.mrf.mxu1 }
 0x408   : > { %v10823_v48 = vpop.f32.mrf.mxu0  ;;  %v10104_v44 = vadd.f32 %v15302_v45, %v18840_v53  ;;  %v18960_v14 = vadd.f32 %v10820_v62, %v10101_v30 }
 0x409   : > { %v10005_v9 = vpop.f32.mrf.mxu1 }
 0x40a   : > { %v15353_v34 = vpop.f32.mrf.mxu0  ;;  %v10102_v33 = vadd.f32 %v10005_v9, %v18844_v42  ;;  %v18963_v26 = vadd.f32 %v15350_v58, %v10104_v44 }
 0x40b   : > { %v15305_v57 = vpop.f32.mrf.mxu1 }
 0x40c   : > { %v10836_v4 = vpop.f32.mrf.mxu0  ;;  %v10107_v1 = vadd.f32 %v15305_v57, %v18848_v46  ;;  %v18966_v20 = vadd.f32 %v10823_v48, %v10102_v33 }
 0x40d   : > { %v10018_v59 = vpop.f32.mrf.mxu1 }
 0x40e   : > { %v15354_v23 = vpop.f32.mrf.mxu0  ;;  %v10105_v52 = vadd.f32 %v10018_v59, %v18852_v35  ;;  %v18969_v22 = vadd.f32 %v15353_v34, %v10107_v1 }
 0x40f   : > { %v15306_v53 = vpop.f32.mrf.mxu1 }
 0x410   : > { %v10839_v62 = vpop.f32.mrf.mxu0  ;;  %v10108_v19 = vadd.f32 %v15306_v53, %v18856_v16  ;;  %v18972_v56 = vadd.f32 %v10836_v4, %v10105_v52 }
 0x411   : > { %v10021_v42 = vpop.f32.mrf.mxu1 }
 0x412   : > { %v15357_v58 = vpop.f32.mrf.mxu0  ;;  %v10106_v30 = vadd.f32 %v10021_v42, %v18860_v17  ;;  %v18975_v45 = vadd.f32 %v15354_v23, %v10108_v19 }
 0x413   : > { %v15309_v46 = vpop.f32.mrf.mxu1 }
 0x414   : > { %v10852_v48 = vpop.f32.mrf.mxu0  ;;  %v10111_v44 = vadd.f32 %v15309_v46, %v18867_v55  ;;  %v18978_v9 = vadd.f32 %v10839_v62, %v10106_v30 }
 0x415   : > { %v10034_v35 = vpop.f32.mrf.mxu1 }
 0x416   : > { %v10109_v34 = vadd.f32 %v10034_v35, %v18870_v25  ;;  %v18981_v33 = vadd.f32 %v15357_v58, %v10111_v44  ;;  %v15358_v16 = vpop.f32.mrf.mxu0 }
 0x417   : > { %v15310_v57 = vpop.f32.mrf.mxu1 }
 0x418   : > { %v10112_v4 = vadd.f32 %v15310_v57, %v18873_v32  ;;  %v18984_v1 = vadd.f32 %v10852_v48, %v10109_v34  ;;  %v10855_v52 = vpop.f32.mrf.mxu0 }
 0x419   : > { %v10037_v17 = vpop.f32.mrf.mxu1 }
 0x41a   : > { %v10110_v59 = vadd.f32 %v10037_v17, %v18877_v63  ;;  %v18987_v23 = vadd.f32 %v15358_v16, %v10112_v4  ;;  %v19003_v58 = vpop.f32.mrf.mxu0 }
 0x41b   : > { %v18989_v55 = vpop.f32.mrf.mxu1 }
 0x41c   : > { %v18991_v53 = vadd.f32 %v10855_v52, %v10110_v59  ;;  %v19009_v46 = vpop.f32.mrf.mxu0 }
 0x41d   : > { %v18993_v62 = vpop.f32.mrf.mxu1 }
 0x41e   : > { %v19015_v35 = vpop.f32.mrf.mxu0 }
 0x41f   : > { %v18995_v25 = vpop.f32.mrf.mxu1 }
 0x420   : > { %v19021_v57 = vpop.f32.mrf.mxu0 }
 0x421   : > { %v18997_v19 = vpop.f32.mrf.mxu1 }
 0x422   : > { %v19026_v52 = vpop.f32.mrf.mxu0 }
 0x423   : > { %v18999_v42 = vpop.f32.mrf.mxu1 }
 0x425   : > { %v19001_v32 = vpop.f32.mrf.mxu1 }
 0x427   : > { %v19005_v63 = vpop.f32.mrf.mxu1 }
 0x429   : > { %v19007_v30 = vpop.f32.mrf.mxu1 }
 0x42b   : > { %v19011_v48 = vpop.f32.mrf.mxu1 }
 0x42d   : > { %v19013_v44 = vpop.f32.mrf.mxu1 }
 0x42e   : > { %19687 = vst [vmem:[#allocation27_spill] sm:$0xff] %v19013_v44 }
 0x42f   : > { %v19017_v34 = vpop.f32.mrf.mxu1 }
 0x430   : > { %19688 = vst [vmem:[#allocation25_spill] sm:$0xff] %v19017_v34  ;;  %v19034_v34 = vpop.f32.mrf.mxu0 }
 0x431   : > { %v19019_v16 = vpop.f32.mrf.mxu1 }
 0x432   : > { %19689 = vst [vmem:[#allocation30_spill] sm:$0xff] %v19019_v16 }
 0x433   : > { %v15389_v4 = vpop.f32.mrf.mxu1 }
 0x434   : > { %v19024_v17 = vadd.f32 %v15389_v4, %v18934_v5 }
 0x435   : > { %v11574_v59 = vpop.f32.mrf.mxu1 }
 0x436   : > { %19690 = vst [vmem:[#allocation13_spill] sm:$0xff] %v19024_v17  ;;  %v19029_v40 = vadd.f32 %v11574_v59, %v18937_v18  ;;  %v19042_v17 = vpop.f32.mrf.mxu0 }
 0x437   : > { %v15390_v50 = vpop.f32.mrf.mxu1 }
 0x438   : > { %v19032_v0 = vadd.f32 %v15390_v50, %v18939_v39 }
 0x439   : > { %v11577_v13 = vpop.f32.mrf.mxu1 }
 0x43a   : > { %19691 = vst [vmem:[#allocation22_spill] sm:$0xff] %v19032_v0  ;;  %v19037_v16 = vadd.f32 %v11577_v13, %v18942_v43  ;;  %v19050_v0 = vpop.f32.mrf.mxu0 }
 0x43b   : > { %v15393_v44 = vpop.f32.mrf.mxu1 }
 0x43c   : > { %v19040_v5 = vadd.f32 %v15393_v44, %v18945_v8 }
 0x43d   : > { %v11590_v4 = vpop.f32.mrf.mxu1 }
 0x43e   : > { %19692 = vst [vmem:[#allocation36_spill] sm:$0xff] %v19040_v5  ;;  %v19045_v18 = vadd.f32 %v11590_v4, %v18948_v28  ;;  %v19058_v5 = vpop.f32.mrf.mxu0 }
 0x43f   : > { %v15394_v59 = vpop.f32.mrf.mxu1 }
 0x440   : > { %19693 = vst [vmem:[#allocation24_spill] sm:$0xff] %v19045_v18  ;;  %v19048_v50 = vadd.f32 %v15394_v59, %v18951_v60 }
 0x441   : > { %v11593_v39 = vpop.f32.mrf.mxu1 }
 0x442   : > { %19694 = vst [vmem:[#allocation34_spill] sm:$0xff] %v19048_v50  ;;  %v19053_v13 = vadd.f32 %v11593_v39, %v18954_v10  ;;  %v19066_v50 = vpop.f32.mrf.mxu0 }
 0x443   : > { %v15397_v43 = vpop.f32.mrf.mxu1 }
 0x444   : > { %19695 = vst [vmem:[#allocation16_spill] sm:$0xff] %v19053_v13  ;;  %v19056_v8 = vadd.f32 %v15397_v43, %v18957_v51  ;;  %v19701_v13 = vld [vmem:[#allocation19_spill] sm:$0xff] }
 0x445   : > { %v11606_v44 = vpop.f32.mrf.mxu1 }
 0x446   : > { %19696 = vst [vmem:[#allocation33_spill] sm:$0xff] %v19056_v8  ;;  %v19061_v28 = vadd.f32 %v11606_v44, %v18960_v14  ;;  %v19700_v8 = vld [vmem:[#allocation35_spill] sm:$0xff]  ;;  %v19076_v14 = vpop.f32.mrf.mxu0 }
 0x447   : > { %v15398_v4 = vpop.f32.mrf.mxu1  ;;  %v8028_v18 = vadd.f32 %v19701_v13, %v19700_v8  ;;  %v10901_v8 = vadd.f32 %v18791_v24, %v18806_v37 }
 0x448   : > { %19697 = vst [vmem:[#allocation18_spill] sm:$0xff] %v19061_v28  ;;  %v19064_v60 = vadd.f32 %v15398_v4, %v18963_v26  ;;  %v19702_v4 = vld [vmem:[#allocation58_spill] sm:$0xff] }
 0x449   : > { %v11609_v59 = vpop.f32.mrf.mxu1 }
 0x44a   : > { %19698 = vst [vmem:[#allocation26_spill] sm:$0xff] %v19064_v60  ;;  %v19069_v10 = vadd.f32 %v11609_v59, %v18966_v20  ;;  %v8846_v60 = vadd.f32 %v19702_v4, %v8028_v18  ;;  %v19085_v59 = vpop.f32.mrf.mxu0 }
 0x44b   : > { %v15401_v39 = vpop.f32.mrf.mxu1 }
 0x44c   : > { %v19072_v51 = vadd.f32 %v15401_v39, %v18969_v22  ;;  %v19100_v4 = vpop.f32.mrf.mxu0 }
 0x44d   : > { %v11622_v43 = vpop.f32.mrf.mxu1 }
 0x44e   : > { %19699 = vst [vmem:[#allocation46_spill] sm:$0xff] %v19072_v51  ;;  %v19079_v44 = vadd.f32 %v11622_v43, %v18972_v56  ;;  %v19703_v51 = vld [vmem:[#allocation56_spill] sm:$0xff] }
 0x44f   : > { %v15402_v26 = vpop.f32.mrf.mxu1  ;;  %v9632_v13 = vadd.f32 %v19703_v51, %v8846_v60  ;;  %v19704_v60 = vld [vmem:[#allocation20_spill] sm:$0xff]  ;;  %v19705_v51 = vld [vmem:[#allocation15_spill] sm:$0xff] }
 0x450   : > { %v19083_v28 = vadd.f32 %v15402_v26, %v18975_v45  ;;  %v11687_v45 = vadd.f32 %v18989_v55, %v10901_v8  ;;  %v10899_v26 = vadd.f32 %v18796_v11, %v18832_v6  ;;  %v19706_v55 = vld [vmem:[#allocation62_spill] sm:$0xff] }
 0x451   : > { %v11625_v20 = vpop.f32.mrf.mxu1  ;;  %v10082_v18 = vadd.f32 %v18875_v29, %v9632_v13  ;;  %v19116_v13 = vpop.f32.mrf.mxu0 }
 0x452   : > { %v19088_v22 = vadd.f32 %v11625_v20, %v18978_v9  ;;  %v8032_v20 = vadd.f32 %v19705_v51, %v19704_v60  ;;  %v11685_v37 = vadd.f32 %v18993_v62, %v10899_v26  ;;  %v12137_v62 = vadd.f32 %v19003_v58, %v11687_v45  ;;  %v19135_v58 = vld [vmem:[%s19359_s6] ss:$0 sm:$0xff] }
 0x453   : > { %v15405_v39 = vpop.f32.mrf.mxu1  ;;  %v19137_v26 = vpop.f32.mrf.mxu0 }
 0x454   : > { %v19094_v56 = vadd.f32 %v15405_v39, %v18981_v33  ;;  %v10902_v33 = vadd.f32 %v18804_v12, %v18864_v38  ;;  %v8850_v39 = vadd.f32 %v19706_v55, %v8032_v20  ;;  %v19125_v12 = vld [vmem:[%s19358_s5] ss:$0 sm:$0xff] }
 0x455   : > { %v11638_v43 = vpop.f32.mrf.mxu1 }
 0x456   : > { %v19103_v9 = vadd.f32 %v11638_v43, %v18984_v1  ;;  %v11688_v6 = vadd.f32 %v18995_v25, %v10902_v33  ;;  %v10900_v1 = vadd.f32 %v18830_v36, %v10082_v18  ;;  %v12135_v25 = vadd.f32 %v19009_v46, %v11685_v37  ;;  %v19707_v36 = vld [vmem:[#allocation61_spill] sm:$0xff] }
 0x457   : > { %v15406_v24 = vpop.f32.mrf.mxu1  ;;  %v9636_v18 = vadd.f32 %v19707_v36, %v8850_v39 }
 0x458   : > { %v19111_v29 = vadd.f32 %v15406_v24, %v18987_v23  ;;  %v11686_v38 = vadd.f32 %v18997_v19, %v10900_v1  ;;  %v12138_v46 = vadd.f32 %v19015_v35, %v11688_v6 }
 0x459   : > { %v11641_v11 = vpop.f32.mrf.mxu1  ;;  %v10086_v51 = vadd.f32 %v18899_v41, %v9636_v18  ;;  %v10906_v41 = vadd.f32 %v18883_v31, %v18895_v54  ;;  %v13130_v54 = vld [vmem:[%s15861_s9 + $0x18] sm:$0xff] }
 0x45a   : > { %v19119_v8 = vadd.f32 %v11641_v11, %v18991_v53  ;;  %v10905_v53 = vadd.f32 %v18862_v47, %v18885_v21  ;;  %v10903_v47 = vadd.f32 %v18879_v27, %v18891_v15  ;;  %v13129_v21 = vld [vmem:[%s15861_s9 + $0x10] sm:$0xff]  ;;  %v12136_v39 = vadd.f32 %v19021_v57, %v11686_v38  ;;  %v13127_v27 = vld [vmem:[%s15861_s9] sm:$0xff] }
 0x45b   : > { %v15473_v43 = vpop.f32.mrf.mxu1  ;;  %v10904_v31 = vadd.f32 %v18889_v7, %v10086_v51 }
 0x45c   : > { %v12955_v23 = vadd.f32 %v15473_v43, %v12137_v62  ;;  %v11691_v20 = vadd.f32 %v18999_v42, %v10905_v53  ;;  %v11689_v11 = vadd.f32 %v19001_v32, %v10903_v47  ;;  %v19160_v42 = vpop.f32.mrf.mxu0  ;;  %v11692_v62 = vadd.f32 %v19005_v63, %v10906_v41 }
 0x45d   : > { %v12794_v45 = vpop.f32.mrf.mxu1  ;;  %v11690_v53 = vadd.f32 %v19007_v30, %v10904_v31  ;;  %v10907_v47 = vadd.f32 %v18905_v49, %v18914_v2  ;;  %v13131_v49 = vld [vmem:[%s15861_s9 + $0x20] sm:$0xff]  ;;  %v19712_v31 = vld [vmem:[#allocation21_spill] sm:$0xff] }
 0x45e   : > { %v13058_v19 = vmul.f32 %v19125_v12, %v12955_v23  ;;  %v12953_v60 = vadd.f32 %v12794_v45, %v12135_v25  ;;  %v12141_v1 = vadd.f32 %v19026_v52, %v11691_v20  ;;  %v13128_v25 = vld [vmem:[%s15861_s9 + $0x8] sm:$0xff]  ;;  %v12139_v18 = vadd.f32 %v19034_v34, %v11689_v11  ;;  %v19174_v7 = vpop.f32.mrf.mxu0  ;;  %v19710_v11 = vld [vmem:[#allocation14_spill] sm:$0xff] }
 0x45f   : > { %v15474_v24 = vpop.f32.mrf.mxu1  ;;  %v12142_v30 = vadd.f32 %v19042_v17, %v11692_v62  ;;  %v19708_v17 = vld [vmem:[#allocation27_spill] sm:$0xff] }
 0x460   : > { %v13097_v37 = vadd.f32 %v19135_v58, %v13058_v19  ;;  %v13056_v33 = vmul.f32 %v19125_v12, %v12953_v60  ;;  %v12956_v55 = vadd.f32 %v15474_v24, %v12138_v46  ;;  %v10909_v19 = vadd.f32 %v18897_v61, %v18908_v3 }
 0x461   : > { %v12797_v15 = vpop.f32.mrf.mxu1 }
 0x462   : > { %v13161_v35 = vadd.f32 %v13129_v21, %v13097_v37  ;;  %v13095_v57 = vadd.f32 %v19135_v58, %v13056_v33  ;;  %v13059_v32 = vmul.f32 %v19125_v12, %v12956_v55  ;;  %v12954_v6 = vadd.f32 %v12797_v15, %v12136_v39  ;;  %v13133_v21 = vld [vmem:[%s15861_s9 + $0x30] sm:$0xff]  ;;  %v19187_v37 = vpop.f32.mrf.mxu0 }
 0x463   : > { %v15477_v36 = vpop.f32.mrf.mxu1  ;;  %v11695_v20 = vadd.f32 %v19011_v48, %v10909_v19  ;;  %v12140_v55 = vadd.f32 %v19050_v0, %v11690_v53  ;;  %v11693_v39 = vadd.f32 %v19708_v17, %v10907_v47  ;;  %v19709_v48 = vld [vmem:[#allocation31_spill] sm:$0xff]  ;;  %v13137_v47 = vld [vmem:[%s15861_s9 + $0x50] sm:$0xff] }
 0x464   : > { %13193 = vst [vmem:[%s19157_s27 + $0x10] sm:$0xff] %v13161_v35  ;;  %v13159_v43 = vadd.f32 %v13127_v27, %v13095_v57  ;;  %v13098_v38 = vadd.f32 %v19135_v58, %v13059_v32  ;;  %v13057_v23 = vmul.f32 %v19125_v12, %v12954_v6  ;;  %v12959_v45 = vadd.f32 %v15477_v36, %v12141_v1  ;;  %v19711_v32 = vld [vmem:[#allocation25_spill] sm:$0xff]  ;;  %v13134_v1 = vld [vmem:[%s15861_s9 + $0x38] sm:$0xff] }
 0x465   : > { %v12810_v60 = vpop.f32.mrf.mxu1  ;;  %v10910_v41 = vadd.f32 %v19710_v11, %v19709_v48  ;;  %v12145_v62 = vadd.f32 %v19058_v5, %v11695_v20 }
 0x466   : > { %13191 = vst [vmem:[%s19157_s27] sm:$0xff] %v13159_v43  ;;  %v13162_v52 = vadd.f32 %v13130_v54, %v13098_v38  ;;  %v13096_v63 = vadd.f32 %v19135_v58, %v13057_v23  ;;  %v13062_v34 = vmul.f32 %v19125_v12, %v12959_v45  ;;  %v12957_v51 = vadd.f32 %v12810_v60, %v12139_v18  ;;  %v19713_v54 = vld [vmem:[#allocation23_spill] sm:$0xff]  ;;  %v19204_v43 = vpop.f32.mrf.mxu0  ;;  %v19714_v18 = vld [vmem:[#allocation30_spill] sm:$0xff] }
 0x467   : > { %v15478_v24 = vpop.f32.mrf.mxu1  ;;  %v11696_v6 = vadd.f32 %v19711_v32, %v10910_v41  ;;  %v10908_v0 = vadd.f32 %v19713_v54, %v19712_v31  ;;  %v12143_v45 = vadd.f32 %v19066_v50, %v11693_v39  ;;  %v13138_v41 = vld [vmem:[%s15861_s9 + $0x58] sm:$0xff]  ;;  %v12147_v54 = vadd.f32 %v19116_v13, %v19029_v40 }
 0x468   : > { %13194 = vst [vmem:[%s19157_s27 + $0x18] sm:$0xff] %v13162_v52  ;;  %v13160_v46 = vadd.f32 %v13128_v25, %v13096_v63  ;;  %v13101_v61 = vadd.f32 %v19135_v58, %v13062_v34  ;;  %v13060_v3 = vmul.f32 %v19125_v12, %v12957_v51  ;;  %v12960_v33 = vadd.f32 %v15478_v24, %v12142_v30  ;;  %v13132_v52 = vld [vmem:[%s15861_s9 + $0x28] sm:$0xff]  ;;  %v19216_v30 = vpop.f32.mrf.mxu0 }
 0x469   : > { %v12813_v2 = vpop.f32.mrf.mxu1  ;;  %v11694_v53 = vadd.f32 %v19714_v18, %v10908_v0  ;;  %v12146_v51 = vadd.f32 %v19076_v14, %v11696_v6 }
 0x46a   : > { %13192 = vst [vmem:[%s19157_s27 + $0x8] sm:$0xff] %v13160_v46  ;;  %v13165_v27 = vadd.f32 %v13133_v21, %v13101_v61  ;;  %v13099_v15 = vadd.f32 %v19135_v58, %v13060_v3  ;;  %v13063_v35 = vmul.f32 %v19125_v12, %v12960_v33  ;;  %v12958_v57 = vadd.f32 %v12813_v2, %v12140_v55  ;;  %v13135_v33 = vld [vmem:[%s15861_s9 + $0x40] sm:$0xff]  ;;  %v19227_v11 = vpop.f32.mrf.mxu0 }
 0x46b   : > { %v12144_v3 = vadd.f32 %v19085_v59, %v11694_v53 }
 0x46c   : > { %13197 = vst [vmem:[%s19157_s27 + $0x30] sm:$0xff] %v13165_v27  ;;  %v13163_v38 = vadd.f32 %v13131_v49, %v13099_v15  ;;  %v13102_v23 = vadd.f32 %v19135_v58, %v13063_v35  ;;  %v13061_v25 = vmul.f32 %v19125_v12, %v12958_v57  ;;  %v15481_v36 = vpop.f32.mrf.mxu1  ;;  %v19715_v27 = vld [vmem:[#allocation13_spill] sm:$0xff]  ;;  %v19240_v0 = vpop.f32.mrf.mxu0 }
 0x46d   : > { %v12963_v63 = vadd.f32 %v15481_v36, %v12145_v62  ;;  %v12149_v15 = vadd.f32 %v19100_v4, %v19715_v27  ;;  %v13136_v35 = vld [vmem:[%s15861_s9 + $0x48] sm:$0xff]  ;;  %v13141_v36 = vld [vmem:[%s15861_s9 + $0x70] sm:$0xff] }
 0x46e   : > { %13195 = vst [vmem:[%s19157_s27 + $0x20] sm:$0xff] %v13163_v38  ;;  %v13166_v5 = vadd.f32 %v13134_v1, %v13102_v23  ;;  %v13100_v19 = vadd.f32 %v19135_v58, %v13061_v25  ;;  %v12826_v60 = vpop.f32.mrf.mxu1  ;;  %v19716_v23 = vld [vmem:[#allocation22_spill] sm:$0xff] }
 0x46f   : > { %v13066_v46 = vmul.f32 %v19125_v12, %v12963_v63  ;;  %v12961_v34 = vadd.f32 %v12826_v60, %v12143_v45  ;;  %v12150_v25 = vadd.f32 %v19137_v26, %v19716_v23  ;;  %v15446_v63 = vpop.f32.mrf.mxu0  ;;  %v13139_v45 = vld [vmem:[%s15861_s9 + $0x60] sm:$0xff] }
 0x470   : > { %13198 = vst [vmem:[%s19157_s27 + $0x38] sm:$0xff] %v13166_v5  ;;  %v13164_v20 = vadd.f32 %v13132_v52, %v13100_v19  ;;  %v15482_v50 = vpop.f32.mrf.mxu1  ;;  %v12148_v52 = vadd.f32 %v19160_v42, %v19037_v16 }
 0x471   : > { %v13105_v21 = vadd.f32 %v19135_v58, %v13066_v46  ;;  %v13064_v24 = vmul.f32 %v19125_v12, %v12961_v34  ;;  %v12964_v61 = vadd.f32 %v15482_v50, %v12146_v51  ;;  %v13142_v34 = vld [vmem:[%s15861_s9 + $0x78] sm:$0xff]  ;;  %v19717_v51 = vld [vmem:[#allocation36_spill] sm:$0xff] }
 0x472   : > { %13196 = vst [vmem:[%s19157_s27 + $0x28] sm:$0xff] %v13164_v20  ;;  %v12829_v14 = vpop.f32.mrf.mxu1  ;;  %v12153_v20 = vadd.f32 %v19174_v7, %v19717_v51 }
 0x473   : > { %v13169_v55 = vadd.f32 %v13137_v47, %v13105_v21  ;;  %v13103_v17 = vadd.f32 %v19135_v58, %v13064_v24  ;;  %v13067_v39 = vmul.f32 %v19125_v12, %v12964_v61  ;;  %v12962_v48 = vadd.f32 %v12829_v14, %v12144_v3  ;;  %v12059_v21 = vpop.f32.mrf.mxu0  ;;  %v13140_v24 = vld [vmem:[%s15861_s9 + $0x68] sm:$0xff]  ;;  %v19718_v3 = vld [vmem:[#allocation24_spill] sm:$0xff] }
 0x475   : > { %13201 = vst [vmem:[%s19157_s27 + $0x50] sm:$0xff] %v13169_v55  ;;  %v13167_v49 = vadd.f32 %v13135_v33, %v13103_v17  ;;  %v13106_v2 = vadd.f32 %v19135_v58, %v13067_v39  ;;  %v13065_v59 = vmul.f32 %v19125_v12, %v12962_v48  ;;  %v15485_v57 = vpop.f32.mrf.mxu1  ;;  %v12151_v33 = vadd.f32 %v19187_v37, %v19718_v3  ;;  %v19719_v48 = vld [vmem:[#allocation34_spill] sm:$0xff]  ;;  %v15449_v37 = vpop.f32.mrf.mxu0 }
 0x476   : > { %v12967_v31 = vadd.f32 %v15485_v57, %v12149_v15  ;;  %v19720_v57 = vld [vmem:[#allocation16_spill] sm:$0xff] }
 0x477   : > { %13199 = vst [vmem:[%s19157_s27 + $0x40] sm:$0xff] %v13167_v49  ;;  %v13170_v32 = vadd.f32 %v13138_v41, %v13106_v2  ;;  %v13104_v6 = vadd.f32 %v19135_v58, %v13065_v59  ;;  %v12842_v1 = vpop.f32.mrf.mxu1  ;;  %v12154_v41 = vadd.f32 %v19204_v43, %v19719_v48  ;;  %v13145_v2 = vld [vmem:[%s15861_s9 + $0x90] sm:$0xff] }
 0x478   : > { %v13070_v38 = vmul.f32 %v19125_v12, %v12967_v31  ;;  %v12965_v4 = vadd.f32 %v12842_v1, %v12147_v54 }
 0x479   : > { %13202 = vst [vmem:[%s19157_s27 + $0x58] sm:$0xff] %v13170_v32  ;;  %v13168_v62 = vadd.f32 %v13136_v35, %v13104_v6  ;;  %v15486_v18 = vpop.f32.mrf.mxu1  ;;  %v12152_v32 = vadd.f32 %v19216_v30, %v19720_v57  ;;  %v13143_v6 = vld [vmem:[%s15861_s9 + $0x80] sm:$0xff]  ;;  %v19721_v30 = vld [vmem:[#allocation33_spill] sm:$0xff] }
 0x47a   : > { %v13109_v53 = vadd.f32 %v19135_v58, %v13070_v38  ;;  %v13068_v40 = vmul.f32 %v19125_v12, %v12965_v4  ;;  %v12968_v13 = vadd.f32 %v15486_v18, %v12150_v25  ;;  %v13146_v38 = vld [vmem:[%s15861_s9 + $0x98] sm:$0xff]  ;;  %v12072_v4 = vpop.f32.mrf.mxu0  ;;  %v12157_v18 = vadd.f32 %v19227_v11, %v19721_v30  ;;  %v19723_v11 = vld [vmem:[#allocation26_spill] sm:$0xff] }
 0x47b   : > { %13200 = vst [vmem:[%s19157_s27 + $0x48] sm:$0xff] %v13168_v62  ;;  %v12845_v5 = vpop.f32.mrf.mxu1 }
 0x47c   : > { %v13173_v19 = vadd.f32 %v13141_v36, %v13109_v53  ;;  %v13107_v26 = vadd.f32 %v19135_v58, %v13068_v40  ;;  %v13071_v60 = vmul.f32 %v19125_v12, %v12968_v13  ;;  %v12966_v46 = vadd.f32 %v12845_v5, %v12148_v52  ;;  %v13144_v53 = vld [vmem:[%s15861_s9 + $0x88] sm:$0xff]  ;;  %v19722_v5 = vld [vmem:[#allocation18_spill] sm:$0xff] }
 0x47e   : > { %13205 = vst [vmem:[%s19157_s27 + $0x70] sm:$0xff] %v13173_v19  ;;  %v13171_v47 = vadd.f32 %v13139_v45, %v13107_v26  ;;  %v13110_v16 = vadd.f32 %v19135_v58, %v13071_v60  ;;  %v13069_v42 = vmul.f32 %v19125_v12, %v12966_v46  ;;  %v12155_v19 = vadd.f32 %v19240_v0, %v19722_v5  ;;  %v15450_v60 = vpop.f32.mrf.mxu0 }
 0x47f   : > { %v15489_v50 = vpop.f32.mrf.mxu1  ;;  %v12156_v0 = vadd.f32 %v12059_v21, %v19069_v10 }
 0x480   : > { %v12971_v61 = vadd.f32 %v15489_v50, %v12153_v20  ;;  %13203 = vst [vmem:[%s19157_s27 + $0x60] sm:$0xff] %v13171_v47  ;;  %v13174_v14 = vadd.f32 %v13142_v34, %v13110_v16  ;;  %v13108_v7 = vadd.f32 %v19135_v58, %v13069_v42  ;;  %v12158_v20 = vadd.f32 %v15446_v63, %v19723_v11  ;;  %v13149_v47 = vld [vmem:[%s15861_s9 + $0xb0] sm:$0xff] }
 0x481   : > { %v12858_v55 = vpop.f32.mrf.mxu1 }
 0x482   : > { %v13074_v17 = vmul.f32 %v19125_v12, %v12971_v61  ;;  %v12969_v39 = vadd.f32 %v12858_v55, %v12151_v33  ;;  %13206 = vst [vmem:[%s19157_s27 + $0x78] sm:$0xff] %v13174_v14  ;;  %v13172_v49 = vadd.f32 %v13140_v24, %v13108_v7  ;;  %v13147_v61 = vld [vmem:[%s15861_s9 + $0xa0] sm:$0xff]  ;;  %v12075_v33 = vpop.f32.mrf.mxu0 }
 0x483   : > { %v15490_v59 = vpop.f32.mrf.mxu1 }
 0x484   : > { %v13113_v27 = vadd.f32 %v19135_v58, %v13074_v17  ;;  %v13072_v15 = vmul.f32 %v19125_v12, %v12969_v39  ;;  %v12972_v35 = vadd.f32 %v15490_v59, %v12154_v41  ;;  %13204 = vst [vmem:[%s19157_s27 + $0x68] sm:$0xff] %v13172_v49  ;;  %v13150_v17 = vld [vmem:[%s15861_s9 + $0xb8] sm:$0xff]  ;;  %v19724_v39 = vld [vmem:[#allocation46_spill] sm:$0xff]  ;;  %v15453_v41 = vpop.f32.mrf.mxu0  ;;  %v13148_v59 = vld [vmem:[%s15861_s9 + $0xa8] sm:$0xff] }
 0x485   : > { %v12861_v43 = vpop.f32.mrf.mxu1  ;;  %v12161_v48 = vadd.f32 %v15449_v37, %v19724_v39 }
 0x486   : > { %v13177_v31 = vadd.f32 %v13145_v2, %v13113_v27  ;;  %v13111_v54 = vadd.f32 %v19135_v58, %v13072_v15  ;;  %v13075_v1 = vmul.f32 %v19125_v12, %v12972_v35  ;;  %v12970_v62 = vadd.f32 %v12861_v43, %v12152_v32 }
 0x487   : > { %v12159_v15 = vadd.f32 %v12072_v4, %v19079_v44  ;;  %v12162_v43 = vadd.f32 %v15450_v60, %v19083_v28 }
 0x488   : > { %13209 = vst [vmem:[%s19157_s27 + $0x90] sm:$0xff] %v13177_v31  ;;  %v13175_v23 = vadd.f32 %v13143_v6, %v13111_v54  ;;  %v13114_v25 = vadd.f32 %v19135_v58, %v13075_v1  ;;  %v13073_v36 = vmul.f32 %v19125_v12, %v12970_v62  ;;  %v15493_v40 = vpop.f32.mrf.mxu1  ;;  %v12088_v31 = vpop.f32.mrf.mxu0  ;;  %v13153_v1 = vld [vmem:[%s15861_s9 + $0xd0] sm:$0xff] }
 0x489   : > { %v12975_v45 = vadd.f32 %v15493_v40, %v12157_v18  ;;  %v12163_v60 = vadd.f32 %v12088_v31, %v19103_v9 }
 0x48a   : > { %13207 = vst [vmem:[%s19157_s27 + $0x80] sm:$0xff] %v13175_v23  ;;  %v13178_v13 = vadd.f32 %v13146_v38, %v13114_v25  ;;  %v13112_v52 = vadd.f32 %v19135_v58, %v13073_v36  ;;  %v12874_v26 = vpop.f32.mrf.mxu1  ;;  %v12160_v23 = vadd.f32 %v12075_v33, %v19088_v22  ;;  %v13151_v25 = vld [vmem:[%s15861_s9 + $0xc0] sm:$0xff]  ;;  %v15454_v40 = vpop.f32.mrf.mxu0 }
 0x48b   : > { %v13078_v34 = vmul.f32 %v19125_v12, %v12975_v45  ;;  %v12973_v51 = vadd.f32 %v12874_v26, %v12155_v19  ;;  %v13152_v19 = vld [vmem:[%s15861_s9 + $0xc8] sm:$0xff] }
 0x48c   : > { %13210 = vst [vmem:[%s19157_s27 + $0x98] sm:$0xff] %v13178_v13  ;;  %v13176_v46 = vadd.f32 %v13144_v53, %v13112_v52  ;;  %v15494_v16 = vpop.f32.mrf.mxu1  ;;  %v13154_v13 = vld [vmem:[%s15861_s9 + $0xd8] sm:$0xff]  ;;  %v12165_v52 = vadd.f32 %v15453_v41, %v19094_v56  ;;  %v12091_v11 = vpop.f32.mrf.mxu0  ;;  %v13156_v41 = vld [vmem:[%s15861_s9 + $0xe8] sm:$0xff] }
 0x48d   : > { %v13117_v42 = vadd.f32 %v19135_v58, %v13078_v34  ;;  %v13076_v50 = vmul.f32 %v19125_v12, %v12973_v51  ;;  %v12976_v24 = vadd.f32 %v15494_v16, %v12158_v20  ;;  %v12166_v20 = vadd.f32 %v15454_v40, %v19111_v29  ;;  %v13155_v29 = vld [vmem:[%s15861_s9 + $0xe0] sm:$0xff] }
 0x48e   : > { %13208 = vst [vmem:[%s19157_s27 + $0x88] sm:$0xff] %v13176_v46  ;;  %v12877_v3 = vpop.f32.mrf.mxu1  ;;  %v12164_v9 = vadd.f32 %v12091_v11, %v19119_v8 }
 0x48f   : > { %v13181_v14 = vadd.f32 %v13149_v47, %v13117_v42  ;;  %v13115_v7 = vadd.f32 %v19135_v58, %v13076_v50  ;;  %v13079_v63 = vmul.f32 %v19125_v12, %v12976_v24  ;;  %v12974_v55 = vadd.f32 %v12877_v3, %v12156_v0  ;;  %v13157_v50 = vld [vmem:[%s15861_s9 + $0xf0] sm:$0xff] }
 0x491   : > { %13213 = vst [vmem:[%s19157_s27 + $0xb0] sm:$0xff] %v13181_v14  ;;  %v13179_v49 = vadd.f32 %v13147_v61, %v13115_v7  ;;  %v13118_v10 = vadd.f32 %v19135_v58, %v13079_v63  ;;  %v13077_v21 = vmul.f32 %v19125_v12, %v12974_v55 }
 0x492   : > { %v15497_v2 = vpop.f32.mrf.mxu1 }
 0x493   : > { %v12979_v27 = vadd.f32 %v15497_v2, %v12161_v48  ;;  %13211 = vst [vmem:[%s19157_s27 + $0xa0] sm:$0xff] %v13179_v49  ;;  %v13182_v35 = vadd.f32 %v13150_v17, %v13118_v10  ;;  %v13116_v37 = vadd.f32 %v19135_v58, %v13077_v21  ;;  %v13158_v17 = vld [vmem:[%s15861_s9 + $0xf8] sm:$0xff] }
 0x494   : > { %v12890_v57 = vpop.f32.mrf.mxu1 }
 0x495   : > { %v13082_v32 = vmul.f32 %v19125_v12, %v12979_v27  ;;  %v12977_v6 = vadd.f32 %v12890_v57, %v12159_v15  ;;  %13214 = vst [vmem:[%s19157_s27 + $0xb8] sm:$0xff] %v13182_v35  ;;  %v13180_v54 = vadd.f32 %v13148_v59, %v13116_v37 }
 0x496   : > { %v15498_v62 = vpop.f32.mrf.mxu1 }
 0x497   : > { %v13121_v44 = vadd.f32 %v19135_v58, %v13082_v32  ;;  %v13080_v38 = vmul.f32 %v19125_v12, %v12977_v6  ;;  %v12980_v4 = vadd.f32 %v15498_v62, %v12162_v43  ;;  %13212 = vst [vmem:[%s19157_s27 + $0xa8] sm:$0xff] %v13180_v54 }
 0x498   : > { %v12893_v36 = vpop.f32.mrf.mxu1 }
 0x499   : > { %v13185_v28 = vadd.f32 %v13153_v1, %v13121_v44  ;;  %v13119_v30 = vadd.f32 %v19135_v58, %v13080_v38  ;;  %v13083_v18 = vmul.f32 %v19125_v12, %v12980_v4  ;;  %v12978_v53 = vadd.f32 %v12893_v36, %v12160_v23 }
 0x49b   : > { %13217 = vst [vmem:[%s19157_s27 + $0xd0] sm:$0xff] %v13185_v28  ;;  %v13183_v45 = vadd.f32 %v13151_v25, %v13119_v30  ;;  %v13122_v5 = vadd.f32 %v19135_v58, %v13083_v18  ;;  %v13081_v22 = vmul.f32 %v19125_v12, %v12978_v53  ;;  %v15501_v26 = vpop.f32.mrf.mxu1 }
 0x49c   : > { %v12983_v51 = vadd.f32 %v15501_v26, %v12165_v52 }
 0x49d   : > { %13215 = vst [vmem:[%s19157_s27 + $0xc0] sm:$0xff] %v13183_v45  ;;  %v13186_v46 = vadd.f32 %v13154_v13, %v13122_v5  ;;  %v13120_v34 = vadd.f32 %v19135_v58, %v13081_v22  ;;  %v12906_v56 = vpop.f32.mrf.mxu1 }
 0x49e   : > { %v13086_v16 = vmul.f32 %v19125_v12, %v12983_v51  ;;  %v12981_v42 = vadd.f32 %v12906_v56, %v12163_v60 }
 0x49f   : > { %13218 = vst [vmem:[%s19157_s27 + $0xd8] sm:$0xff] %v13186_v46  ;;  %v13184_v47 = vadd.f32 %v13152_v19, %v13120_v34  ;;  %v15502_v24 = vpop.f32.mrf.mxu1 }
 0x4a0   : > { %v13125_v0 = vadd.f32 %v19135_v58, %v13086_v16  ;;  %v13084_v61 = vmul.f32 %v19125_v12, %v12981_v42  ;;  %v12984_v3 = vadd.f32 %v15502_v24, %v12166_v20 }
 0x4a1   : > { %13216 = vst [vmem:[%s19157_s27 + $0xc8] sm:$0xff] %v13184_v47  ;;  %v12909_v33 = vpop.f32.mrf.mxu1 }
 0x4a2   : > { %v13189_v14 = vadd.f32 %v13157_v50, %v13125_v0  ;;  %v13123_v7 = vadd.f32 %v19135_v58, %v13084_v61  ;;  %v13087_v63 = vmul.f32 %v19125_v12, %v12984_v3  ;;  %v12982_v55 = vadd.f32 %v12909_v33, %v12164_v9 }
 0x4a4   : > { %13221 = vst [vmem:[%s19157_s27 + $0xf0] sm:$0xff] %v13189_v14  ;;  %v13187_v8 = vadd.f32 %v13155_v29, %v13123_v7  ;;  %v13126_v39 = vadd.f32 %v19135_v58, %v13087_v63  ;;  %v13085_v48 = vmul.f32 %v19125_v12, %v12982_v55 }
 0x4a6   : > { %13219 = vst [vmem:[%s19157_s27 + $0xe0] sm:$0xff] %v13187_v8  ;;  %v13190_v49 = vadd.f32 %v13158_v17, %v13126_v39  ;;  %v13124_v10 = vadd.f32 %v19135_v58, %v13085_v48 }
 0x4a8   : > { %13222 = vst [vmem:[%s19157_s27 + $0xf8] sm:$0xff] %v13190_v49  ;;  %v13188_v21 = vadd.f32 %v13156_v41, %v13124_v10 }
 0x4aa   : > { %13220 = vst [vmem:[%s19157_s27 + $0xe8] sm:$0xff] %v13188_v21 }
 0x4ab PF: > { %s17_s24 = sadd.s32 1, %s15762_s24  }
 0x4ac   : > { %p14_p4 = scmp.ge.s32.totalorder %s17_s24, 4  }
 0x4ae   :  { %16 = sbr.rel (!%p14_p4) target bundleno = 1 (0x1), region = 97 }

</bundles_post_ra>
